<compile_context>
chip_gen: v7x
topology: tpu7x:2x2x1
jax: 0.10.0
libtpu: 0.0.40
codegen_flags: <defaults>
</compile_context>

<pallas_src>
import jax
import jax.numpy as jnp
import numpy as np
from jax.experimental import pallas as pl
from jax.experimental.pallas import tpu as pltpu


def _round_up(n, m):
    return ((n + m - 1) // m) * m


def _pick_unroll(T, max_unroll):
    """Largest divisor of T not exceeding max_unroll (keeps blocks exact)."""
    for u in range(min(T, max_unroll), 0, -1):
        if T % u == 0:
            return u
    return 1


# ----------------------------------------------------------------------------
# Pallas kernels
# ----------------------------------------------------------------------------
def _lstm_cell(gx, h, c, whh, Hp):
    """One LSTM cell update.  gx already holds x @ W_ih^T + b (f32).

    The recurrent matmul runs on the MXU in the weights' storage dtype (bf16
    by default) with f32 accumulation; gate nonlinearities and the c/h update
    stay in f32 (mandatory on v5e: no bf16 VPU).
    """
    gates = gx + jnp.dot(h.astype(whh.dtype), whh,
                         preferred_element_type=jnp.float32)
    i = jax.nn.sigmoid(gates[:, 0 * Hp:1 * Hp])   # lane-aligned slices
    f = jax.nn.sigmoid(gates[:, 1 * Hp:2 * Hp])
    g = jnp.tanh(gates[:, 2 * Hp:3 * Hp])
    o = jax.nn.sigmoid(gates[:, 3 * Hp:4 * Hp])
    c_new = f * c + i * g
    h_new = o * jnp.tanh(c_new)
    return h_new, c_new


def _bidir_lstm_seq_kernel(gxf_ref, gxb_ref, whhf_ref, whhb_ref,
                           outf_ref, outb_ref, h_scr, c_scr):
    """Fused fwd+bwd LSTM recurrence, U time steps per grid iteration.

    gxf_ref : (U, B, 4Hp)  precomputed x@W_ih^T + b, forward,  times [jU, (j+1)U)
    gxb_ref : (U, B, 4Hp)  same for backward, times [T-(j+1)U, T-jU) (reversed block)
    whh*_ref: (Hp, 4Hp)    recurrent weights (transposed, gate-major, padded)
    outf_ref: (U, B, Hp)   forward hidden for this time block
    outb_ref: (U, B, Hp)   backward hidden for the mirrored time block
    h_scr/c_scr : (2, B, Hp)  carries across blocks; [0]=fwd, [1]=bwd
    """
    j = pl.program_id(0)
    U = gxf_ref.shape[0]
    Hp = h_scr.shape[-1]

    @pl.when(j == 0)
    def _():
        h_scr[...] = jnp.zeros_like(h_scr)
        c_scr[...] = jnp.zeros_like(c_scr)

    whhf = whhf_ref[...]
    whhb = whhb_ref[...]
    hf, cf = h_scr[0], c_scr[0]
    hb, cb = h_scr[1], c_scr[1]

    # Fully unrolled (static indices) -- carries stay in vregs within the block.
    for u in range(U):
        hf, cf = _lstm_cell(gxf_ref[u], hf, cf, whhf, Hp)           # fwd time jU+u
        hb, cb = _lstm_cell(gxb_ref[U - 1 - u], hb, cb, whhb, Hp)   # bwd time T-1-(jU+u)
        outf_ref[u] = hf.astype(outf_ref.dtype)
        outb_ref[U - 1 - u] = hb.astype(outb_ref.dtype)

    h_scr[0] = hf
    c_scr[0] = cf
    h_scr[1] = hb
    c_scr[1] = cb


def _bidir_lstm_top_fc_kernel(gxf_ref, gxb_ref, whhf_ref, whhb_ref,
                              wtop_ref, wbot_ref, bfc_ref,
                              y_ref, h_scr, c_scr, hb_scr):
    """Top LSTM layer with fused FC+ReLU epilogue.

    Only h_fwd(T-1) (end of last block) and h_bwd(T-1) (first bwd sub-step,
    produced at grid step 0 and stashed in hb_scr) feed the FC; the full
    (T,B,Hp) sequences are never written to HBM.
    Output y_ref: (B, Cp) = relu([h_f | h_b] @ W_fc^T + b), written once at
    the last grid step (constant-index output block).
    """
    j = pl.program_id(0)
    last = pl.num_programs(0) - 1
    U = gxf_ref.shape[0]
    Hp = h_scr.shape[-1]

    @pl.when(j == 0)
    def _():
        h_scr[...] = jnp.zeros_like(h_scr)
        c_scr[...] = jnp.zeros_like(c_scr)

    whhf = whhf_ref[...]
    whhb = whhb_ref[...]
    hf, cf = h_scr[0], c_scr[0]
    hb, cb = h_scr[1], c_scr[1]

    for u in range(U):
        hf, cf = _lstm_cell(gxf_ref[u], hf, cf, whhf, Hp)
        hb, cb = _lstm_cell(gxb_ref[U - 1 - u], hb, cb, whhb, Hp)
        if u == 0:
            # Backward hidden at time index T-1 (PyTorch h1[-1] bwd half) is
            # produced at the very first bwd sub-step of grid step 0.
            @pl.when(j == 0)
            def _(hb=hb):
                hb_scr[...] = hb

    h_scr[0] = hf
    c_scr[0] = cf
    h_scr[1] = hb
    c_scr[1] = cb

    @pl.when(j == last)
    def _():
        # hf here is the forward hidden at time T-1.
        y = (jnp.dot(hf, wtop_ref[...], preferred_element_type=jnp.float32)
             + jnp.dot(hb_scr[...], wbot_ref[...], preferred_element_type=jnp.float32)
             + bfc_ref[...])
        y_ref[...] = jnp.maximum(y, 0.0).astype(y_ref.dtype)


# ----------------------------------------------------------------------------
# Wrappers
# ----------------------------------------------------------------------------
def bidir_lstm_layer(gx_f, gx_b, whh_f_t, whh_b_t, max_unroll=4):
    """gx_*: (T, B, 4Hp) precomputed input gates (bias folded in), f32.
       whh_*_t: (Hp, 4Hp).  Returns (out_f, out_b), each (T, B, Hp)."""
    T, B, G = gx_f.shape
    Hp = G // 4
    U = _pick_unroll(T, max_unroll)
    NJ = T // U
    out_f, out_b = pl.pallas_call(
        _bidir_lstm_seq_kernel,
        out_shape=(jax.ShapeDtypeStruct((T, B, Hp), jnp.float32),
                   jax.ShapeDtypeStruct((T, B, Hp), jnp.float32)),
        grid=(NJ,),
        in_specs=[
            pl.BlockSpec((U, B, G), lambda j: (j, 0, 0)),            # fwd gates block
            pl.BlockSpec((U, B, G), lambda j: (NJ - 1 - j, 0, 0)),   # bwd gates (time-reversed blocks)
            # NOTE: constant index_map -> weights stay VMEM-resident across the
            # grid.  (pipeline_mode=pl.Buffered(1) would halve their VMEM
            # footprint further; left out to stay compile-safe everywhere.)
            pl.BlockSpec((Hp, G), lambda j: (0, 0)),                 # W_hh fwd
            pl.BlockSpec((Hp, G), lambda j: (0, 0)),                 # W_hh bwd
        ],
        out_specs=(
            pl.BlockSpec((U, B, Hp), lambda j: (j, 0, 0)),           # fwd outputs
            pl.BlockSpec((U, B, Hp), lambda j: (NJ - 1 - j, 0, 0)),  # bwd outputs
        ),
        scratch_shapes=[
            pltpu.VMEM((2, B, Hp), jnp.float32),   # h carry (fwd, bwd)
            pltpu.VMEM((2, B, Hp), jnp.float32),   # c carry (fwd, bwd)
        ],
        compiler_params=pltpu.CompilerParams(
            dimension_semantics=("arbitrary",),
            vmem_limit_bytes=32 * 1024 * 1024),
    )(gx_f, gx_b, whh_f_t, whh_b_t)
    return out_f, out_b


def bidir_lstm_top_fc(gx_f, gx_b, whh_f_t, whh_b_t, w_top, w_bot, b_fc,
                      max_unroll=4):
    """Top layer recurrence + fused FC/ReLU.  Returns (B, Cp)."""
    T, B, G = gx_f.shape
    Hp = G // 4
    Cp = w_top.shape[1]
    U = _pick_unroll(T, max_unroll)
    NJ = T // U
    return pl.pallas_call(
        _bidir_lstm_top_fc_kernel,
        out_shape=jax.ShapeDtypeStruct((B, Cp), jnp.float32),
        grid=(NJ,),
        in_specs=[
            pl.BlockSpec((U, B, G), lambda j: (j, 0, 0)),            # fwd gates
            pl.BlockSpec((U, B, G), lambda j: (NJ - 1 - j, 0, 0)),   # bwd gates
            pl.BlockSpec((Hp, G), lambda j: (0, 0)),                 # W_hh fwd
            pl.BlockSpec((Hp, G), lambda j: (0, 0)),                 # W_hh bwd
            pl.BlockSpec((Hp, Cp), lambda j: (0, 0)),                # W_fc fwd half
            pl.BlockSpec((Hp, Cp), lambda j: (0, 0)),                # W_fc bwd half
            pl.BlockSpec((1, Cp), lambda j: (0, 0)),                 # b_fc
        ],
        out_specs=pl.BlockSpec((B, Cp), lambda j: (0, 0)),           # y, written at last step
        scratch_shapes=[
            pltpu.VMEM((2, B, Hp), jnp.float32),   # h carry (fwd, bwd)
            pltpu.VMEM((2, B, Hp), jnp.float32),   # c carry (fwd, bwd)
            pltpu.VMEM((B, Hp), jnp.float32),      # h_bwd(T-1) stash from grid step 0
        ],
        compiler_params=pltpu.CompilerParams(
            dimension_semantics=("arbitrary",),
            vmem_limit_bytes=32 * 1024 * 1024),
    )(gx_f, gx_b, whh_f_t, whh_b_t, w_top, w_bot, b_fc)


def net_forward(x, params, max_unroll=4):
    """x: (T, B, inp_dims) float32.  Returns (B, classes)."""
    Hp = params["Hp"]
    layers = params["lstm"]
    w_top, w_bot, b_fc = params["fc"]
    out_f = out_b = None
    y = None
    for li, layer in enumerate(layers):
        wf, wb = layer["fwd"], layer["bwd"]
        if out_f is None:
            # Layer 0: hoisted input projection as one big batched matmul (XLA).
            gx_f = jnp.einsum("tbd,dg->tbg", x, wf["wih_t"]) + wf["b"]
            gx_b = jnp.einsum("tbd,dg->tbg", x, wb["wih_t"]) + wb["b"]
        else:
            # Layers >= 1: consume (out_f, out_b) directly through a split W_ih
            # (== concat([out_f, out_b]) @ W_ih^T, without the concat).
            gx_f = (jnp.einsum("tbh,hg->tbg", out_f, wf["wih_t"][:Hp])
                    + jnp.einsum("tbh,hg->tbg", out_b, wf["wih_t"][Hp:]) + wf["b"])
            gx_b = (jnp.einsum("tbh,hg->tbg", out_f, wb["wih_t"][:Hp])
                    + jnp.einsum("tbh,hg->tbg", out_b, wb["wih_t"][Hp:]) + wb["b"])
        if li < len(layers) - 1:
            out_f, out_b = bidir_lstm_layer(gx_f, gx_b, wf["whh_t"], wb["whh_t"],
                                            max_unroll=max_unroll)
        else:
            # Top layer: full sequences never hit HBM; FC+ReLU fused as epilogue.
            y = bidir_lstm_top_fc(gx_f, gx_b, wf["whh_t"], wb["whh_t"],
                                  w_top, w_bot, b_fc, max_unroll=max_unroll)
    return y[:, :params["classes"]]


# ----------------------------------------------------------------------------
# Parameters: raw (PyTorch layout) + padded/transposed kernel layout
# ----------------------------------------------------------------------------
def init_raw_params(key, inp_dims, hidden, num_layers, classes):
    """PyTorch-style uniform(-1/sqrt(H), 1/sqrt(H)) init, PyTorch weight layout."""
    k = 1.0 / float(np.sqrt(hidden))
    lstm = []
    for layer_idx in range(num_layers):
        d_in = inp_dims if layer_idx == 0 else 2 * hidden
        layer = {}
        for direction in ("fwd", "bwd"):
            key, k1, k2, k3, k4 = jax.random.split(key, 5)
            layer[direction] = dict(
                w_ih=jax.random.uniform(k1, (4 * hidden, d_in), jnp.float32, -k, k),
                w_hh=jax.random.uniform(k2, (4 * hidden, hidden), jnp.float32, -k, k),
                b_ih=jax.random.uniform(k3, (4 * hidden,), jnp.float32, -k, k),
                b_hh=jax.random.uniform(k4, (4 * hidden,), jnp.float32, -k, k),
            )
        lstm.append(layer)
    kf = 1.0 / float(np.sqrt(2 * hidden))
    key, k1, k2 = jax.random.split(key, 3)
    fc = dict(w=jax.random.uniform(k1, (classes, 2 * hidden), jnp.float32, -kf, kf),
              b=jax.random.uniform(k2, (classes,), jnp.float32, -kf, kf))
    return dict(lstm=lstm, fc=fc, hidden=hidden, classes=classes)


def prepare_kernel_params(raw, lane=128, whh_dtype=jnp.bfloat16):
    """Zero-pad hidden/class dims to multiples of `lane`, transpose for MXU.

    whh_dtype: storage dtype of the recurrent weights (bf16 by default; the
    matmul accumulates in f32).  Zeros are exact in bf16, so the padding
    argument is unaffected.
    """
    H = raw["hidden"]
    classes = raw["classes"]
    Hp = _round_up(H, lane)
    Cp = _round_up(classes, lane)

    def pad_gate_rows(w):               # (4H, K) -> (4Hp, K), gate-major padding
        K = w.shape[1]
        w4 = w.reshape(4, H, K)
        return jnp.pad(w4, ((0, 0), (0, Hp - H), (0, 0))).reshape(4 * Hp, K)

    def pad_dir_cols(w):                # (R, 2H) -> (R, 2Hp): [fwd H|bwd H] -> [fwd Hp|bwd Hp]
        R = w.shape[0]
        w2 = w.reshape(R, 2, H)
        return jnp.pad(w2, ((0, 0), (0, 0), (0, Hp - H))).reshape(R, 2 * Hp)

    def pad_hid_cols(w):                # (R, H) -> (R, Hp)
        return jnp.pad(w, ((0, 0), (0, Hp - H)))

    lstm = []
    for layer_idx, layer in enumerate(raw["lstm"]):
        out_layer = {}
        for direction in ("fwd", "bwd"):
            p = layer[direction]
            w_ih = pad_gate_rows(p["w_ih"])                       # (4Hp, d_in)
            if layer_idx > 0:
                w_ih = pad_dir_cols(w_ih)                         # (4Hp, 2Hp)
            w_hh = pad_hid_cols(pad_gate_rows(p["w_hh"]))         # (4Hp, Hp)
            b = pad_gate_rows((p["b_ih"] + p["b_hh"])[:, None])[:, 0]   # (4Hp,)
            out_layer[direction] = dict(
                wih_t=w_ih.T,                                  # (d_in or 2Hp, 4Hp) f32
                whh_t=w_hh.T.astype(whh_dtype),                # (Hp, 4Hp)
                b=b.reshape(1, 4 * Hp),
            )
        lstm.append(out_layer)

    w_fc = pad_dir_cols(raw["fc"]["w"])                           # (classes, 2Hp)
    w_fc = jnp.pad(w_fc, ((0, Cp - classes), (0, 0)))             # (Cp, 2Hp)
    b_fc = jnp.pad(raw["fc"]["b"], (0, Cp - classes)).reshape(1, Cp)
    w_fc_t = w_fc.T                                               # (2Hp, Cp)
    fc = (w_fc_t[:Hp], w_fc_t[Hp:], b_fc)                         # fwd half, bwd half

    return dict(lstm=lstm, fc=fc, Hp=Hp, Cp=Cp, classes=classes)


# ----------------------------------------------------------------------------
# Pure-JAX reference (unpadded, f32, PyTorch semantics) for correctness check
# ----------------------------------------------------------------------------
def _ref_lstm_dir(x, p, H):
    B = x.shape[1]
    w_ih, w_hh = p["w_ih"], p["w_hh"]
    b = p["b_ih"] + p["b_hh"]
    h0 = jnp.zeros((B, H), jnp.float32)
    c0 = jnp.zeros((B, H), jnp.float32)

    def step(carry, x_t):
        h, c = carry
        gates = x_t @ w_ih.T + h @ w_hh.T + b
        i = jax.nn.sigmoid(gates[:, :H])
        f = jax.nn.sigmoid(gates[:, H:2 * H])
        g = jnp.tanh(gates[:, 2 * H:3 * H])
        o = jax.nn.sigmoid(gates[:, 3 * H:])
        c = f * c + i * g
        h = o * jnp.tanh(c)
        return (h, c), h

    _, hs = jax.lax.scan(step, (h0, c0), x)
    return hs


def net_forward_ref(x, raw):
    H = raw["hidden"]
    h = x
    for layer in raw["lstm"]:
        f = _ref_lstm_dir(h, layer["fwd"], H)
        b = jnp.flip(_ref_lstm_dir(jnp.flip(h, 0), layer["bwd"], H), 0)
        h = jnp.concatenate([f, b], axis=-1)
    h2 = h[-1]
    return jnp.maximum(h2 @ raw["fc"]["w"].T + raw["fc"]["b"], 0.0)


# ----------------------------------------------------------------------------
if __name__ == "__main__":
    # Small shapes consistent with the module's forward semantics.
    T, B = 8, 8              # seq_len, batch
    inp_dims = 16
    rnn_size = 32            # hidden size (scaled down from 320; padded to 128 lanes)
    num_layers = 4
    classes = 10

    key = jax.random.PRNGKey(0)
    key, kx, kp = jax.random.split(key, 3)
    x = jax.random.normal(kx, (T, B, inp_dims), jnp.float32)

    raw = init_raw_params(kp, inp_dims, rnn_size, num_layers, classes)
    ref = jax.block_until_ready(net_forward_ref(x, raw))

    # 1) Exact-f32 configuration: validates the unrolled/fused kernel structure
    #    against the strict tolerance used previously.
    params_f32 = prepare_kernel_params(raw, whh_dtype=jnp.float32)
    out_f32 = jax.block_until_ready(jax.jit(lambda v: net_forward(v, params_f32))(x))
    assert out_f32.shape == (B, classes), out_f32.shape
    np.testing.assert_allclose(np.asarray(out_f32), np.asarray(ref),
                               rtol=5e-3, atol=5e-3)

    # 2) Performance configuration: bf16 recurrent weights, f32 accumulation.
    #    Slightly looser tolerance accounts for bf16 quantization of W_hh only.
    params = prepare_kernel_params(raw, whh_dtype=jnp.bfloat16)
    out = jax.block_until_ready(jax.jit(lambda v: net_forward(v, params))(x))
    assert out.shape == (B, classes), out.shape
    np.testing.assert_allclose(np.asarray(out), np.asarray(ref),
                               rtol=1e-2, atol=1e-2)

    print("KERNEL_OK")
</pallas_src>

<mosaic_0001>
module attributes {stable_mosaic.version = 11 : i64} {
  func.func @_bidir_lstm_seq_kernel(%arg0: i32, %arg1: memref<4x8x512xf32, #tpu.memory_space<vmem>>, %arg2: memref<4x8x512xf32, #tpu.memory_space<vmem>>, %arg3: memref<128x512xf32, #tpu.memory_space<vmem>>, %arg4: memref<128x512xf32, #tpu.memory_space<vmem>>, %arg5: memref<4x8x128xf32, #tpu.memory_space<vmem>>, %arg6: memref<4x8x128xf32, #tpu.memory_space<vmem>>, %arg7: memref<2x8x128xf32, #tpu.memory_space<vmem>>, %arg8: memref<2x8x128xf32, #tpu.memory_space<vmem>>) attributes {dimension_semantics = [#tpu.dimension_semantics<arbitrary>], iteration_bounds = array<i64: 2>, scalar_prefetch = 0 : i64, scratch_operands = 2 : i64, tpu.core_type = #tpu.core_type<tc>, window_params = [{transform_indices = @transform_0, window_bounds = array<i64: 4, 8, 512>}, {transform_indices = @transform_1, window_bounds = array<i64: 4, 8, 512>}, {pipeline_mode = #tpu.pipeline_mode<synchronous>, transform_indices = @transform_2, window_bounds = array<i64: 128, 512>}, {pipeline_mode = #tpu.pipeline_mode<synchronous>, transform_indices = @transform_3, window_bounds = array<i64: 128, 512>}, {transform_indices = @transform_4, window_bounds = array<i64: 4, 8, 128>}, {transform_indices = @transform_5, window_bounds = array<i64: 4, 8, 128>}]} {
    %c0_i32 = arith.constant 0 : i32
    %0 = arith.cmpi eq, %arg0, %c0_i32 : i32
    %1 = arith.extui %0 : i1 to i32
    %c0_i32_0 = arith.constant 0 : i32
    %2 = arith.cmpi ne, %1, %c0_i32_0 : i32
    scf.if %2 {
      %cst_104 = arith.constant 0.000000e+00 : f32
      %281 = vector.broadcast %cst_104 : f32 to vector<2x8x128xf32>
      %c0_105 = arith.constant 0 : index
      %c0_106 = arith.constant 0 : index
      %c0_107 = arith.constant 0 : index
      %282 = vector.load %arg7[%c0_105, %c0_106, %c0_107] : memref<2x8x128xf32, #tpu.memory_space<vmem>>, vector<2x8x128xf32>
      tpu.vector_store %arg7[%c0_105, %c0_106, %c0_107], %281 {strides = array<i32>} : memref<2x8x128xf32, #tpu.memory_space<vmem>>, vector<2x8x128xf32>,
      %cst_108 = arith.constant 0.000000e+00 : f32
      %283 = vector.broadcast %cst_108 : f32 to vector<2x8x128xf32>
      %c0_109 = arith.constant 0 : index
      %c0_110 = arith.constant 0 : index
      %c0_111 = arith.constant 0 : index
      %284 = vector.load %arg8[%c0_109, %c0_110, %c0_111] : memref<2x8x128xf32, #tpu.memory_space<vmem>>, vector<2x8x128xf32>
      tpu.vector_store %arg8[%c0_109, %c0_110, %c0_111], %283 {strides = array<i32>} : memref<2x8x128xf32, #tpu.memory_space<vmem>>, vector<2x8x128xf32>,
    } else {
    }
    %c0 = arith.constant 0 : index
    %c0_1 = arith.constant 0 : index
    %3 = vector.load %arg3[%c0, %c0_1] : memref<128x512xf32, #tpu.memory_space<vmem>>, vector<128x512xf32>
    %c0_2 = arith.constant 0 : index
    %c0_3 = arith.constant 0 : index
    %4 = vector.load %arg4[%c0_2, %c0_3] : memref<128x512xf32, #tpu.memory_space<vmem>>, vector<128x512xf32>
    %c0_4 = arith.constant 0 : index
    %c0_5 = arith.constant 0 : index
    %c0_6 = arith.constant 0 : index
    %5 = vector.load %arg7[%c0_4, %c0_5, %c0_6] : memref<2x8x128xf32, #tpu.memory_space<vmem>>, vector<1x8x128xf32>
    %6 = vector.shape_cast %5 : vector<1x8x128xf32> to vector<8x128xf32>
    %c0_7 = arith.constant 0 : index
    %c0_8 = arith.constant 0 : index
    %c0_9 = arith.constant 0 : index
    %7 = vector.load %arg8[%c0_7, %c0_8, %c0_9] : memref<2x8x128xf32, #tpu.memory_space<vmem>>, vector<1x8x128xf32>
    %8 = vector.shape_cast %7 : vector<1x8x128xf32> to vector<8x128xf32>
    %c1 = arith.constant 1 : index
    %c0_10 = arith.constant 0 : index
    %c0_11 = arith.constant 0 : index
    %9 = vector.load %arg7[%c1, %c0_10, %c0_11] : memref<2x8x128xf32, #tpu.memory_space<vmem>>, vector<1x8x128xf32>
    %10 = vector.shape_cast %9 : vector<1x8x128xf32> to vector<8x128xf32>
    %c1_12 = arith.constant 1 : index
    %c0_13 = arith.constant 0 : index
    %c0_14 = arith.constant 0 : index
    %11 = vector.load %arg8[%c1_12, %c0_13, %c0_14] : memref<2x8x128xf32, #tpu.memory_space<vmem>>, vector<1x8x128xf32>
    %12 = vector.shape_cast %11 : vector<1x8x128xf32> to vector<8x128xf32>
    %c0_15 = arith.constant 0 : index
    %c0_16 = arith.constant 0 : index
    %c0_17 = arith.constant 0 : index
    %13 = vector.load %arg1[%c0_15, %c0_16, %c0_17] : memref<4x8x512xf32, #tpu.memory_space<vmem>>, vector<1x8x512xf32>
    %14 = vector.shape_cast %13 : vector<1x8x512xf32> to vector<8x512xf32>
    %cst = arith.constant dense<0.000000e+00> : vector<8x512xf32>
    %15 = tpu.matmul %6, %3, %cst {dimension_numbers = #tpu.dot_dimension_numbers<[1], [0], [0], [1], [0, 0, 1, 1], [], []>} : vector<8x128xf32>, vector<128x512xf32>, vector<8x512xf32> -> vector<8x512xf32>
    %16 = arith.addf %14, %15 : vector<8x512xf32>
    %17 = vector.extract_strided_slice %16 {offsets = [0, 0], sizes = [8, 128], strides = [1, 1]} : vector<8x512xf32> to vector<8x128xf32>
    %18 = arith.negf %17 : vector<8x128xf32>
    %19 = math.exp %18 : vector<8x128xf32>
    %cst_18 = arith.constant 1.000000e+00 : f32
    %20 = vector.broadcast %cst_18 : f32 to vector<8x128xf32>
    %21 = arith.addf %20, %19 : vector<8x128xf32>
    %22 = arith.divf %20, %21 : vector<8x128xf32>
    %23 = vector.extract_strided_slice %16 {offsets = [0, 128], sizes = [8, 128], strides = [1, 1]} : vector<8x512xf32> to vector<8x128xf32>
    %24 = arith.negf %23 : vector<8x128xf32>
    %25 = math.exp %24 : vector<8x128xf32>
    %cst_19 = arith.constant 1.000000e+00 : f32
    %26 = vector.broadcast %cst_19 : f32 to vector<8x128xf32>
    %27 = arith.addf %26, %25 : vector<8x128xf32>
    %28 = arith.divf %26, %27 : vector<8x128xf32>
    %29 = vector.extract_strided_slice %16 {offsets = [0, 256], sizes = [8, 128], strides = [1, 1]} : vector<8x512xf32> to vector<8x128xf32>
    %30 = math.tanh %29 : vector<8x128xf32>
    %31 = vector.extract_strided_slice %16 {offsets = [0, 384], sizes = [8, 128], strides = [1, 1]} : vector<8x512xf32> to vector<8x128xf32>
    %32 = arith.negf %31 : vector<8x128xf32>
    %33 = math.exp %32 : vector<8x128xf32>
    %cst_20 = arith.constant 1.000000e+00 : f32
    %34 = vector.broadcast %cst_20 : f32 to vector<8x128xf32>
    %35 = arith.addf %34, %33 : vector<8x128xf32>
    %36 = arith.divf %34, %35 : vector<8x128xf32>
    %37 = arith.mulf %28, %8 : vector<8x128xf32>
    %38 = arith.mulf %22, %30 : vector<8x128xf32>
    %39 = arith.addf %37, %38 : vector<8x128xf32>
    %40 = math.tanh %39 : vector<8x128xf32>
    %41 = arith.mulf %36, %40 : vector<8x128xf32>
    %c3 = arith.constant 3 : index
    %c0_21 = arith.constant 0 : index
    %c0_22 = arith.constant 0 : index
    %42 = vector.load %arg2[%c3, %c0_21, %c0_22] : memref<4x8x512xf32, #tpu.memory_space<vmem>>, vector<1x8x512xf32>
    %43 = vector.shape_cast %42 : vector<1x8x512xf32> to vector<8x512xf32>
    %cst_23 = arith.constant dense<0.000000e+00> : vector<8x512xf32>
    %44 = tpu.matmul %10, %4, %cst_23 {dimension_numbers = #tpu.dot_dimension_numbers<[1], [0], [0], [1], [0, 0, 1, 1], [], []>} : vector<8x128xf32>, vector<128x512xf32>, vector<8x512xf32> -> vector<8x512xf32>
    %45 = arith.addf %43, %44 : vector<8x512xf32>
    %46 = vector.extract_strided_slice %45 {offsets = [0, 0], sizes = [8, 128], strides = [1, 1]} : vector<8x512xf32> to vector<8x128xf32>
    %47 = arith.negf %46 : vector<8x128xf32>
    %48 = math.exp %47 : vector<8x128xf32>
    %cst_24 = arith.constant 1.000000e+00 : f32
    %49 = vector.broadcast %cst_24 : f32 to vector<8x128xf32>
    %50 = arith.addf %49, %48 : vector<8x128xf32>
    %51 = arith.divf %49, %50 : vector<8x128xf32>
    %52 = vector.extract_strided_slice %45 {offsets = [0, 128], sizes = [8, 128], strides = [1, 1]} : vector<8x512xf32> to vector<8x128xf32>
    %53 = arith.negf %52 : vector<8x128xf32>
    %54 = math.exp %53 : vector<8x128xf32>
    %cst_25 = arith.constant 1.000000e+00 : f32
    %55 = vector.broadcast %cst_25 : f32 to vector<8x128xf32>
    %56 = arith.addf %55, %54 : vector<8x128xf32>
    %57 = arith.divf %55, %56 : vector<8x128xf32>
    %58 = vector.extract_strided_slice %45 {offsets = [0, 256], sizes = [8, 128], strides = [1, 1]} : vector<8x512xf32> to vector<8x128xf32>
    %59 = math.tanh %58 : vector<8x128xf32>
    %60 = vector.extract_strided_slice %45 {offsets = [0, 384], sizes = [8, 128], strides = [1, 1]} : vector<8x512xf32> to vector<8x128xf32>
    %61 = arith.negf %60 : vector<8x128xf32>
    %62 = math.exp %61 : vector<8x128xf32>
    %cst_26 = arith.constant 1.000000e+00 : f32
    %63 = vector.broadcast %cst_26 : f32 to vector<8x128xf32>
    %64 = arith.addf %63, %62 : vector<8x128xf32>
    %65 = arith.divf %63, %64 : vector<8x128xf32>
    %66 = arith.mulf %57, %12 : vector<8x128xf32>
    %67 = arith.mulf %51, %59 : vector<8x128xf32>
    %68 = arith.addf %66, %67 : vector<8x128xf32>
    %69 = math.tanh %68 : vector<8x128xf32>
    %70 = arith.mulf %65, %69 : vector<8x128xf32>
    %c0_27 = arith.constant 0 : index
    %c0_28 = arith.constant 0 : index
    %c0_29 = arith.constant 0 : index
    %71 = vector.load %arg5[%c0_27, %c0_28, %c0_29] : memref<4x8x128xf32, #tpu.memory_space<vmem>>, vector<1x8x128xf32>
    %72 = vector.shape_cast %71 : vector<1x8x128xf32> to vector<8x128xf32>
    %73 = vector.shape_cast %41 : vector<8x128xf32> to vector<1x8x128xf32>
    tpu.vector_store %arg5[%c0_27, %c0_28, %c0_29], %73 {strides = array<i32>} : memref<4x8x128xf32, #tpu.memory_space<vmem>>, vector<1x8x128xf32>,
    %c3_30 = arith.constant 3 : index
    %c0_31 = arith.constant 0 : index
    %c0_32 = arith.constant 0 : index
    %74 = vector.load %arg6[%c3_30, %c0_31, %c0_32] : memref<4x8x128xf32, #tpu.memory_space<vmem>>, vector<1x8x128xf32>
    %75 = vector.shape_cast %74 : vector<1x8x128xf32> to vector<8x128xf32>
    %76 = vector.shape_cast %70 : vector<8x128xf32> to vector<1x8x128xf32>
    tpu.vector_store %arg6[%c3_30, %c0_31, %c0_32], %76 {strides = array<i32>} : memref<4x8x128xf32, #tpu.memory_space<vmem>>, vector<1x8x128xf32>,
    %c1_33 = arith.constant 1 : index
    %c0_34 = arith.constant 0 : index
    %c0_35 = arith.constant 0 : index
    %77 = vector.load %arg1[%c1_33, %c0_34, %c0_35] : memref<4x8x512xf32, #tpu.memory_space<vmem>>, vector<1x8x512xf32>
    %78 = vector.shape_cast %77 : vector<1x8x512xf32> to vector<8x512xf32>
    %cst_36 = arith.constant dense<0.000000e+00> : vector<8x512xf32>
    %79 = tpu.matmul %41, %3, %cst_36 {dimension_numbers = #tpu.dot_dimension_numbers<[1], [0], [0], [1], [0, 0, 1, 1], [], []>} : vector<8x128xf32>, vector<128x512xf32>, vector<8x512xf32> -> vector<8x512xf32>
    %80 = arith.addf %78, %79 : vector<8x512xf32>
    %81 = vector.extract_strided_slice %80 {offsets = [0, 0], sizes = [8, 128], strides = [1, 1]} : vector<8x512xf32> to vector<8x128xf32>
    %82 = arith.negf %81 : vector<8x128xf32>
    %83 = math.exp %82 : vector<8x128xf32>
    %cst_37 = arith.constant 1.000000e+00 : f32
    %84 = vector.broadcast %cst_37 : f32 to vector<8x128xf32>
    %85 = arith.addf %84, %83 : vector<8x128xf32>
    %86 = arith.divf %84, %85 : vector<8x128xf32>
    %87 = vector.extract_strided_slice %80 {offsets = [0, 128], sizes = [8, 128], strides = [1, 1]} : vector<8x512xf32> to vector<8x128xf32>
    %88 = arith.negf %87 : vector<8x128xf32>
    %89 = math.exp %88 : vector<8x128xf32>
    %cst_38 = arith.constant 1.000000e+00 : f32
    %90 = vector.broadcast %cst_38 : f32 to vector<8x128xf32>
    %91 = arith.addf %90, %89 : vector<8x128xf32>
    %92 = arith.divf %90, %91 : vector<8x128xf32>
    %93 = vector.extract_strided_slice %80 {offsets = [0, 256], sizes = [8, 128], strides = [1, 1]} : vector<8x512xf32> to vector<8x128xf32>
    %94 = math.tanh %93 : vector<8x128xf32>
    %95 = vector.extract_strided_slice %80 {offsets = [0, 384], sizes = [8, 128], strides = [1, 1]} : vector<8x512xf32> to vector<8x128xf32>
    %96 = arith.negf %95 : vector<8x128xf32>
    %97 = math.exp %96 : vector<8x128xf32>
    %cst_39 = arith.constant 1.000000e+00 : f32
    %98 = vector.broadcast %cst_39 : f32 to vector<8x128xf32>
    %99 = arith.addf %98, %97 : vector<8x128xf32>
    %100 = arith.divf %98, %99 : vector<8x128xf32>
    %101 = arith.mulf %92, %39 : vector<8x128xf32>
    %102 = arith.mulf %86, %94 : vector<8x128xf32>
    %103 = arith.addf %101, %102 : vector<8x128xf32>
    %104 = math.tanh %103 : vector<8x128xf32>
    %105 = arith.mulf %100, %104 : vector<8x128xf32>
    %c2 = arith.constant 2 : index
    %c0_40 = arith.constant 0 : index
    %c0_41 = arith.constant 0 : index
    %106 = vector.load %arg2[%c2, %c0_40, %c0_41] : memref<4x8x512xf32, #tpu.memory_space<vmem>>, vector<1x8x512xf32>
    %107 = vector.shape_cast %106 : vector<1x8x512xf32> to vector<8x512xf32>
    %cst_42 = arith.constant dense<0.000000e+00> : vector<8x512xf32>
    %108 = tpu.matmul %70, %4, %cst_42 {dimension_numbers = #tpu.dot_dimension_numbers<[1], [0], [0], [1], [0, 0, 1, 1], [], []>} : vector<8x128xf32>, vector<128x512xf32>, vector<8x512xf32> -> vector<8x512xf32>
    %109 = arith.addf %107, %108 : vector<8x512xf32>
    %110 = vector.extract_strided_slice %109 {offsets = [0, 0], sizes = [8, 128], strides = [1, 1]} : vector<8x512xf32> to vector<8x128xf32>
    %111 = arith.negf %110 : vector<8x128xf32>
    %112 = math.exp %111 : vector<8x128xf32>
    %cst_43 = arith.constant 1.000000e+00 : f32
    %113 = vector.broadcast %cst_43 : f32 to vector<8x128xf32>
    %114 = arith.addf %113, %112 : vector<8x128xf32>
    %115 = arith.divf %113, %114 : vector<8x128xf32>
    %116 = vector.extract_strided_slice %109 {offsets = [0, 128], sizes = [8, 128], strides = [1, 1]} : vector<8x512xf32> to vector<8x128xf32>
    %117 = arith.negf %116 : vector<8x128xf32>
    %118 = math.exp %117 : vector<8x128xf32>
    %cst_44 = arith.constant 1.000000e+00 : f32
    %119 = vector.broadcast %cst_44 : f32 to vector<8x128xf32>
    %120 = arith.addf %119, %118 : vector<8x128xf32>
    %121 = arith.divf %119, %120 : vector<8x128xf32>
    %122 = vector.extract_strided_slice %109 {offsets = [0, 256], sizes = [8, 128], strides = [1, 1]} : vector<8x512xf32> to vector<8x128xf32>
    %123 = math.tanh %122 : vector<8x128xf32>
    %124 = vector.extract_strided_slice %109 {offsets = [0, 384], sizes = [8, 128], strides = [1, 1]} : vector<8x512xf32> to vector<8x128xf32>
    %125 = arith.negf %124 : vector<8x128xf32>
    %126 = math.exp %125 : vector<8x128xf32>
    %cst_45 = arith.constant 1.000000e+00 : f32
    %127 = vector.broadcast %cst_45 : f32 to vector<8x128xf32>
    %128 = arith.addf %127, %126 : vector<8x128xf32>
    %129 = arith.divf %127, %128 : vector<8x128xf32>
    %130 = arith.mulf %121, %68 : vector<8x128xf32>
    %131 = arith.mulf %115, %123 : vector<8x128xf32>
    %132 = arith.addf %130, %131 : vector<8x128xf32>
    %133 = math.tanh %132 : vector<8x128xf32>
    %134 = arith.mulf %129, %133 : vector<8x128xf32>
    %c1_46 = arith.constant 1 : index
    %c0_47 = arith.constant 0 : index
    %c0_48 = arith.constant 0 : index
    %135 = vector.load %arg5[%c1_46, %c0_47, %c0_48] : memref<4x8x128xf32, #tpu.memory_space<vmem>>, vector<1x8x128xf32>
    %136 = vector.shape_cast %135 : vector<1x8x128xf32> to vector<8x128xf32>
    %137 = vector.shape_cast %105 : vector<8x128xf32> to vector<1x8x128xf32>
    tpu.vector_store %arg5[%c1_46, %c0_47, %c0_48], %137 {strides = array<i32>} : memref<4x8x128xf32, #tpu.memory_space<vmem>>, vector<1x8x128xf32>,
    %c2_49 = arith.constant 2 : index
    %c0_50 = arith.constant 0 : index
    %c0_51 = arith.constant 0 : index
    %138 = vector.load %arg6[%c2_49, %c0_50, %c0_51] : memref<4x8x128xf32, #tpu.memory_space<vmem>>, vector<1x8x128xf32>
    %139 = vector.shape_cast %138 : vector<1x8x128xf32> to vector<8x128xf32>
    %140 = vector.shape_cast %134 : vector<8x128xf32> to vector<1x8x128xf32>
    tpu.vector_store %arg6[%c2_49, %c0_50, %c0_51], %140 {strides = array<i32>} : memref<4x8x128xf32, #tpu.memory_space<vmem>>, vector<1x8x128xf32>,
    %c2_52 = arith.constant 2 : index
    %c0_53 = arith.constant 0 : index
    %c0_54 = arith.constant 0 : index
    %141 = vector.load %arg1[%c2_52, %c0_53, %c0_54] : memref<4x8x512xf32, #tpu.memory_space<vmem>>, vector<1x8x512xf32>
    %142 = vector.shape_cast %141 : vector<1x8x512xf32> to vector<8x512xf32>
    %cst_55 = arith.constant dense<0.000000e+00> : vector<8x512xf32>
    %143 = tpu.matmul %105, %3, %cst_55 {dimension_numbers = #tpu.dot_dimension_numbers<[1], [0], [0], [1], [0, 0, 1, 1], [], []>} : vector<8x128xf32>, vector<128x512xf32>, vector<8x512xf32> -> vector<8x512xf32>
    %144 = arith.addf %142, %143 : vector<8x512xf32>
    %145 = vector.extract_strided_slice %144 {offsets = [0, 0], sizes = [8, 128], strides = [1, 1]} : vector<8x512xf32> to vector<8x128xf32>
    %146 = arith.negf %145 : vector<8x128xf32>
    %147 = math.exp %146 : vector<8x128xf32>
    %cst_56 = arith.constant 1.000000e+00 : f32
    %148 = vector.broadcast %cst_56 : f32 to vector<8x128xf32>
    %149 = arith.addf %148, %147 : vector<8x128xf32>
    %150 = arith.divf %148, %149 : vector<8x128xf32>
    %151 = vector.extract_strided_slice %144 {offsets = [0, 128], sizes = [8, 128], strides = [1, 1]} : vector<8x512xf32> to vector<8x128xf32>
    %152 = arith.negf %151 : vector<8x128xf32>
    %153 = math.exp %152 : vector<8x128xf32>
    %cst_57 = arith.constant 1.000000e+00 : f32
    %154 = vector.broadcast %cst_57 : f32 to vector<8x128xf32>
    %155 = arith.addf %154, %153 : vector<8x128xf32>
    %156 = arith.divf %154, %155 : vector<8x128xf32>
    %157 = vector.extract_strided_slice %144 {offsets = [0, 256], sizes = [8, 128], strides = [1, 1]} : vector<8x512xf32> to vector<8x128xf32>
    %158 = math.tanh %157 : vector<8x128xf32>
    %159 = vector.extract_strided_slice %144 {offsets = [0, 384], sizes = [8, 128], strides = [1, 1]} : vector<8x512xf32> to vector<8x128xf32>
    %160 = arith.negf %159 : vector<8x128xf32>
    %161 = math.exp %160 : vector<8x128xf32>
    %cst_58 = arith.constant 1.000000e+00 : f32
    %162 = vector.broadcast %cst_58 : f32 to vector<8x128xf32>
    %163 = arith.addf %162, %161 : vector<8x128xf32>
    %164 = arith.divf %162, %163 : vector<8x128xf32>
    %165 = arith.mulf %156, %103 : vector<8x128xf32>
    %166 = arith.mulf %150, %158 : vector<8x128xf32>
    %167 = arith.addf %165, %166 : vector<8x128xf32>
    %168 = math.tanh %167 : vector<8x128xf32>
    %169 = arith.mulf %164, %168 : vector<8x128xf32>
    %c1_59 = arith.constant 1 : index
    %c0_60 = arith.constant 0 : index
    %c0_61 = arith.constant 0 : index
    %170 = vector.load %arg2[%c1_59, %c0_60, %c0_61] : memref<4x8x512xf32, #tpu.memory_space<vmem>>, vector<1x8x512xf32>
    %171 = vector.shape_cast %170 : vector<1x8x512xf32> to vector<8x512xf32>
    %cst_62 = arith.constant dense<0.000000e+00> : vector<8x512xf32>
    %172 = tpu.matmul %134, %4, %cst_62 {dimension_numbers = #tpu.dot_dimension_numbers<[1], [0], [0], [1], [0, 0, 1, 1], [], []>} : vector<8x128xf32>, vector<128x512xf32>, vector<8x512xf32> -> vector<8x512xf32>
    %173 = arith.addf %171, %172 : vector<8x512xf32>
    %174 = vector.extract_strided_slice %173 {offsets = [0, 0], sizes = [8, 128], strides = [1, 1]} : vector<8x512xf32> to vector<8x128xf32>
    %175 = arith.negf %174 : vector<8x128xf32>
    %176 = math.exp %175 : vector<8x128xf32>
    %cst_63 = arith.constant 1.000000e+00 : f32
    %177 = vector.broadcast %cst_63 : f32 to vector<8x128xf32>
    %178 = arith.addf %177, %176 : vector<8x128xf32>
    %179 = arith.divf %177, %178 : vector<8x128xf32>
    %180 = vector.extract_strided_slice %173 {offsets = [0, 128], sizes = [8, 128], strides = [1, 1]} : vector<8x512xf32> to vector<8x128xf32>
    %181 = arith.negf %180 : vector<8x128xf32>
    %182 = math.exp %181 : vector<8x128xf32>
    %cst_64 = arith.constant 1.000000e+00 : f32
    %183 = vector.broadcast %cst_64 : f32 to vector<8x128xf32>
    %184 = arith.addf %183, %182 : vector<8x128xf32>
    %185 = arith.divf %183, %184 : vector<8x128xf32>
    %186 = vector.extract_strided_slice %173 {offsets = [0, 256], sizes = [8, 128], strides = [1, 1]} : vector<8x512xf32> to vector<8x128xf32>
    %187 = math.tanh %186 : vector<8x128xf32>
    %188 = vector.extract_strided_slice %173 {offsets = [0, 384], sizes = [8, 128], strides = [1, 1]} : vector<8x512xf32> to vector<8x128xf32>
    %189 = arith.negf %188 : vector<8x128xf32>
    %190 = math.exp %189 : vector<8x128xf32>
    %cst_65 = arith.constant 1.000000e+00 : f32
    %191 = vector.broadcast %cst_65 : f32 to vector<8x128xf32>
    %192 = arith.addf %191, %190 : vector<8x128xf32>
    %193 = arith.divf %191, %192 : vector<8x128xf32>
    %194 = arith.mulf %185, %132 : vector<8x128xf32>
    %195 = arith.mulf %179, %187 : vector<8x128xf32>
    %196 = arith.addf %194, %195 : vector<8x128xf32>
    %197 = math.tanh %196 : vector<8x128xf32>
    %198 = arith.mulf %193, %197 : vector<8x128xf32>
    %c2_66 = arith.constant 2 : index
    %c0_67 = arith.constant 0 : index
    %c0_68 = arith.constant 0 : index
    %199 = vector.load %arg5[%c2_66, %c0_67, %c0_68] : memref<4x8x128xf32, #tpu.memory_space<vmem>>, vector<1x8x128xf32>
    %200 = vector.shape_cast %199 : vector<1x8x128xf32> to vector<8x128xf32>
    %201 = vector.shape_cast %169 : vector<8x128xf32> to vector<1x8x128xf32>
    tpu.vector_store %arg5[%c2_66, %c0_67, %c0_68], %201 {strides = array<i32>} : memref<4x8x128xf32, #tpu.memory_space<vmem>>, vector<1x8x128xf32>,
    %c1_69 = arith.constant 1 : index
    %c0_70 = arith.constant 0 : index
    %c0_71 = arith.constant 0 : index
    %202 = vector.load %arg6[%c1_69, %c0_70, %c0_71] : memref<4x8x128xf32, #tpu.memory_space<vmem>>, vector<1x8x128xf32>
    %203 = vector.shape_cast %202 : vector<1x8x128xf32> to vector<8x128xf32>
    %204 = vector.shape_cast %198 : vector<8x128xf32> to vector<1x8x128xf32>
    tpu.vector_store %arg6[%c1_69, %c0_70, %c0_71], %204 {strides = array<i32>} : memref<4x8x128xf32, #tpu.memory_space<vmem>>, vector<1x8x128xf32>,
    %c3_72 = arith.constant 3 : index
    %c0_73 = arith.constant 0 : index
    %c0_74 = arith.constant 0 : index
    %205 = vector.load %arg1[%c3_72, %c0_73, %c0_74] : memref<4x8x512xf32, #tpu.memory_space<vmem>>, vector<1x8x512xf32>
    %206 = vector.shape_cast %205 : vector<1x8x512xf32> to vector<8x512xf32>
    %cst_75 = arith.constant dense<0.000000e+00> : vector<8x512xf32>
    %207 = tpu.matmul %169, %3, %cst_75 {dimension_numbers = #tpu.dot_dimension_numbers<[1], [0], [0], [1], [0, 0, 1, 1], [], []>} : vector<8x128xf32>, vector<128x512xf32>, vector<8x512xf32> -> vector<8x512xf32>
    %208 = arith.addf %206, %207 : vector<8x512xf32>
    %209 = vector.extract_strided_slice %208 {offsets = [0, 0], sizes = [8, 128], strides = [1, 1]} : vector<8x512xf32> to vector<8x128xf32>
    %210 = arith.negf %209 : vector<8x128xf32>
    %211 = math.exp %210 : vector<8x128xf32>
    %cst_76 = arith.constant 1.000000e+00 : f32
    %212 = vector.broadcast %cst_76 : f32 to vector<8x128xf32>
    %213 = arith.addf %212, %211 : vector<8x128xf32>
    %214 = arith.divf %212, %213 : vector<8x128xf32>
    %215 = vector.extract_strided_slice %208 {offsets = [0, 128], sizes = [8, 128], strides = [1, 1]} : vector<8x512xf32> to vector<8x128xf32>
    %216 = arith.negf %215 : vector<8x128xf32>
    %217 = math.exp %216 : vector<8x128xf32>
    %cst_77 = arith.constant 1.000000e+00 : f32
    %218 = vector.broadcast %cst_77 : f32 to vector<8x128xf32>
    %219 = arith.addf %218, %217 : vector<8x128xf32>
    %220 = arith.divf %218, %219 : vector<8x128xf32>
    %221 = vector.extract_strided_slice %208 {offsets = [0, 256], sizes = [8, 128], strides = [1, 1]} : vector<8x512xf32> to vector<8x128xf32>
    %222 = math.tanh %221 : vector<8x128xf32>
    %223 = vector.extract_strided_slice %208 {offsets = [0, 384], sizes = [8, 128], strides = [1, 1]} : vector<8x512xf32> to vector<8x128xf32>
    %224 = arith.negf %223 : vector<8x128xf32>
    %225 = math.exp %224 : vector<8x128xf32>
    %cst_78 = arith.constant 1.000000e+00 : f32
    %226 = vector.broadcast %cst_78 : f32 to vector<8x128xf32>
    %227 = arith.addf %226, %225 : vector<8x128xf32>
    %228 = arith.divf %226, %227 : vector<8x128xf32>
    %229 = arith.mulf %220, %167 : vector<8x128xf32>
    %230 = arith.mulf %214, %222 : vector<8x128xf32>
    %231 = arith.addf %229, %230 : vector<8x128xf32>
    %232 = math.tanh %231 : vector<8x128xf32>
    %233 = arith.mulf %228, %232 : vector<8x128xf32>
    %c0_79 = arith.constant 0 : index
    %c0_80 = arith.constant 0 : index
    %c0_81 = arith.constant 0 : index
    %234 = vector.load %arg2[%c0_79, %c0_80, %c0_81] : memref<4x8x512xf32, #tpu.memory_space<vmem>>, vector<1x8x512xf32>
    %235 = vector.shape_cast %234 : vector<1x8x512xf32> to vector<8x512xf32>
    %cst_82 = arith.constant dense<0.000000e+00> : vector<8x512xf32>
    %236 = tpu.matmul %198, %4, %cst_82 {dimension_numbers = #tpu.dot_dimension_numbers<[1], [0], [0], [1], [0, 0, 1, 1], [], []>} : vector<8x128xf32>, vector<128x512xf32>, vector<8x512xf32> -> vector<8x512xf32>
    %237 = arith.addf %235, %236 : vector<8x512xf32>
    %238 = vector.extract_strided_slice %237 {offsets = [0, 0], sizes = [8, 128], strides = [1, 1]} : vector<8x512xf32> to vector<8x128xf32>
    %239 = arith.negf %238 : vector<8x128xf32>
    %240 = math.exp %239 : vector<8x128xf32>
    %cst_83 = arith.constant 1.000000e+00 : f32
    %241 = vector.broadcast %cst_83 : f32 to vector<8x128xf32>
    %242 = arith.addf %241, %240 : vector<8x128xf32>
    %243 = arith.divf %241, %242 : vector<8x128xf32>
    %244 = vector.extract_strided_slice %237 {offsets = [0, 128], sizes = [8, 128], strides = [1, 1]} : vector<8x512xf32> to vector<8x128xf32>
    %245 = arith.negf %244 : vector<8x128xf32>
    %246 = math.exp %245 : vector<8x128xf32>
    %cst_84 = arith.constant 1.000000e+00 : f32
    %247 = vector.broadcast %cst_84 : f32 to vector<8x128xf32>
    %248 = arith.addf %247, %246 : vector<8x128xf32>
    %249 = arith.divf %247, %248 : vector<8x128xf32>
    %250 = vector.extract_strided_slice %237 {offsets = [0, 256], sizes = [8, 128], strides = [1, 1]} : vector<8x512xf32> to vector<8x128xf32>
    %251 = math.tanh %250 : vector<8x128xf32>
    %252 = vector.extract_strided_slice %237 {offsets = [0, 384], sizes = [8, 128], strides = [1, 1]} : vector<8x512xf32> to vector<8x128xf32>
    %253 = arith.negf %252 : vector<8x128xf32>
    %254 = math.exp %253 : vector<8x128xf32>
    %cst_85 = arith.constant 1.000000e+00 : f32
    %255 = vector.broadcast %cst_85 : f32 to vector<8x128xf32>
    %256 = arith.addf %255, %254 : vector<8x128xf32>
    %257 = arith.divf %255, %256 : vector<8x128xf32>
    %258 = arith.mulf %249, %196 : vector<8x128xf32>
    %259 = arith.mulf %243, %251 : vector<8x128xf32>
    %260 = arith.addf %258, %259 : vector<8x128xf32>
    %261 = math.tanh %260 : vector<8x128xf32>
    %262 = arith.mulf %257, %261 : vector<8x128xf32>
    %c3_86 = arith.constant 3 : index
    %c0_87 = arith.constant 0 : index
    %c0_88 = arith.constant 0 : index
    %263 = vector.load %arg5[%c3_86, %c0_87, %c0_88] : memref<4x8x128xf32, #tpu.memory_space<vmem>>, vector<1x8x128xf32>
    %264 = vector.shape_cast %263 : vector<1x8x128xf32> to vector<8x128xf32>
    %265 = vector.shape_cast %233 : vector<8x128xf32> to vector<1x8x128xf32>
    tpu.vector_store %arg5[%c3_86, %c0_87, %c0_88], %265 {strides = array<i32>} : memref<4x8x128xf32, #tpu.memory_space<vmem>>, vector<1x8x128xf32>,
    %c0_89 = arith.constant 0 : index
    %c0_90 = arith.constant 0 : index
    %c0_91 = arith.constant 0 : index
    %266 = vector.load %arg6[%c0_89, %c0_90, %c0_91] : memref<4x8x128xf32, #tpu.memory_space<vmem>>, vector<1x8x128xf32>
    %267 = vector.shape_cast %266 : vector<1x8x128xf32> to vector<8x128xf32>
    %268 = vector.shape_cast %262 : vector<8x128xf32> to vector<1x8x128xf32>
    tpu.vector_store %arg6[%c0_89, %c0_90, %c0_91], %268 {strides = array<i32>} : memref<4x8x128xf32, #tpu.memory_space<vmem>>, vector<1x8x128xf32>,
    %c0_92 = arith.constant 0 : index
    %c0_93 = arith.constant 0 : index
    %c0_94 = arith.constant 0 : index
    %269 = vector.load %arg7[%c0_92, %c0_93, %c0_94] : memref<2x8x128xf32, #tpu.memory_space<vmem>>, vector<1x8x128xf32>
    %270 = vector.shape_cast %269 : vector<1x8x128xf32> to vector<8x128xf32>
    %271 = vector.shape_cast %233 : vector<8x128xf32> to vector<1x8x128xf32>
    tpu.vector_store %arg7[%c0_92, %c0_93, %c0_94], %271 {strides = array<i32>} : memref<2x8x128xf32, #tpu.memory_space<vmem>>, vector<1x8x128xf32>,
    %c0_95 = arith.constant 0 : index
    %c0_96 = arith.constant 0 : index
    %c0_97 = arith.constant 0 : index
    %272 = vector.load %arg8[%c0_95, %c0_96, %c0_97] : memref<2x8x128xf32, #tpu.memory_space<vmem>>, vector<1x8x128xf32>
    %273 = vector.shape_cast %272 : vector<1x8x128xf32> to vector<8x128xf32>
    %274 = vector.shape_cast %231 : vector<8x128xf32> to vector<1x8x128xf32>
    tpu.vector_store %arg8[%c0_95, %c0_96, %c0_97], %274 {strides = array<i32>} : memref<2x8x128xf32, #tpu.memory_space<vmem>>, vector<1x8x128xf32>,
    %c1_98 = arith.constant 1 : index
    %c0_99 = arith.constant 0 : index
    %c0_100 = arith.constant 0 : index
    %275 = vector.load %arg7[%c1_98, %c0_99, %c0_100] : memref<2x8x128xf32, #tpu.memory_space<vmem>>, vector<1x8x128xf32>
    %276 = vector.shape_cast %275 : vector<1x8x128xf32> to vector<8x128xf32>
    %277 = vector.shape_cast %262 : vector<8x128xf32> to vector<1x8x128xf32>
    tpu.vector_store %arg7[%c1_98, %c0_99, %c0_100], %277 {strides = array<i32>} : memref<2x8x128xf32, #tpu.memory_space<vmem>>, vector<1x8x128xf32>,
    %c1_101 = arith.constant 1 : index
    %c0_102 = arith.constant 0 : index
    %c0_103 = arith.constant 0 : index
    %278 = vector.load %arg8[%c1_101, %c0_102, %c0_103] : memref<2x8x128xf32, #tpu.memory_space<vmem>>, vector<1x8x128xf32>
    %279 = vector.shape_cast %278 : vector<1x8x128xf32> to vector<8x128xf32>
    %280 = vector.shape_cast %260 : vector<8x128xf32> to vector<1x8x128xf32>
    tpu.vector_store %arg8[%c1_101, %c0_102, %c0_103], %280 {strides = array<i32>} : memref<2x8x128xf32, #tpu.memory_space<vmem>>, vector<1x8x128xf32>,
    return
  }
  func.func @transform_0(%arg0: i32) -> (i32, i32, i32) {
    %c0_i32 = arith.constant 0 : i32
    %c0_i32_0 = arith.constant 0 : i32
    %c0_i32_1 = arith.constant 0 : i32
    return %arg0, %c0_i32, %c0_i32_0 : i32, i32, i32
  }
  func.func @transform_1(%arg0: i32) -> (i32, i32, i32) {
    %c1_i32 = arith.constant 1 : i32
    %0 = arith.subi %c1_i32, %arg0 : i32
    %c0_i32 = arith.constant 0 : i32
    %c0_i32_0 = arith.constant 0 : i32
    %c0_i32_1 = arith.constant 0 : i32
    return %0, %c0_i32, %c0_i32_0 : i32, i32, i32
  }
  func.func @transform_2(%arg0: i32) -> (i32, i32) {
    %c0_i32 = arith.constant 0 : i32
    %c0_i32_0 = arith.constant 0 : i32
    %c0_i32_1 = arith.constant 0 : i32
    return %c0_i32, %c0_i32_0 : i32, i32
  }
  func.func @transform_3(%arg0: i32) -> (i32, i32) {
    %c0_i32 = arith.constant 0 : i32
    %c0_i32_0 = arith.constant 0 : i32
    %c0_i32_1 = arith.constant 0 : i32
    return %c0_i32, %c0_i32_0 : i32, i32
  }
  func.func @transform_4(%arg0: i32) -> (i32, i32, i32) {
    %c0_i32 = arith.constant 0 : i32
    %c0_i32_0 = arith.constant 0 : i32
    %c0_i32_1 = arith.constant 0 : i32
    return %arg0, %c0_i32, %c0_i32_0 : i32, i32, i32
  }
  func.func @transform_5(%arg0: i32) -> (i32, i32, i32) {
    %c1_i32 = arith.constant 1 : i32
    %0 = arith.subi %c1_i32, %arg0 : i32
    %c0_i32 = arith.constant 0 : i32
    %c0_i32_0 = arith.constant 0 : i32
    %c0_i32_1 = arith.constant 0 : i32
    return %0, %c0_i32, %c0_i32_0 : i32, i32, i32
  }
}

module attributes {stable_mosaic.version = 11 : i64} {
  func.func @_bidir_lstm_seq_kernel(%arg0: i32, %arg1: memref<4x8x512xf32, #tpu.memory_space<vmem>>, %arg2: memref<4x8x512xf32, #tpu.memory_space<vmem>>, %arg3: memref<128x512xf32, #tpu.memory_space<vmem>>, %arg4: memref<128x512xf32, #tpu.memory_space<vmem>>, %arg5: memref<4x8x128xf32, #tpu.memory_space<vmem>>, %arg6: memref<4x8x128xf32, #tpu.memory_space<vmem>>, %arg7: memref<2x8x128xf32, #tpu.memory_space<vmem>>, %arg8: memref<2x8x128xf32, #tpu.memory_space<vmem>>) attributes {dimension_semantics = [#tpu.dimension_semantics<arbitrary>], iteration_bounds = array<i64: 2>, scalar_prefetch = 0 : i64, scratch_operands = 2 : i64, tpu.core_type = #tpu.core_type<tc>, window_params = [{transform_indices = @transform_0, window_bounds = array<i64: 4, 8, 512>}, {transform_indices = @transform_1, window_bounds = array<i64: 4, 8, 512>}, {pipeline_mode = #tpu.pipeline_mode<synchronous>, transform_indices = @transform_2, window_bounds = array<i64: 128, 512>}, {pipeline_mode = #tpu.pipeline_mode<synchronous>, transform_indices = @transform_3, window_bounds = array<i64: 128, 512>}, {transform_indices = @transform_4, window_bounds = array<i64: 4, 8, 128>}, {transform_indices = @transform_5, window_bounds = array<i64: 4, 8, 128>}]} {
    %c0_i32 = arith.constant 0 : i32
    %0 = arith.cmpi eq, %arg0, %c0_i32 : i32
    %1 = arith.extui %0 : i1 to i32
    %c0_i32_0 = arith.constant 0 : i32
    %2 = arith.cmpi ne, %1, %c0_i32_0 : i32
    scf.if %2 {
      %cst_104 = arith.constant 0.000000e+00 : f32
      %281 = vector.broadcast %cst_104 : f32 to vector<2x8x128xf32>
      %c0_105 = arith.constant 0 : index
      %c0_106 = arith.constant 0 : index
      %c0_107 = arith.constant 0 : index
      %282 = vector.load %arg7[%c0_105, %c0_106, %c0_107] : memref<2x8x128xf32, #tpu.memory_space<vmem>>, vector<2x8x128xf32>
      tpu.vector_store %arg7[%c0_105, %c0_106, %c0_107], %281 {strides = array<i32>} : memref<2x8x128xf32, #tpu.memory_space<vmem>>, vector<2x8x128xf32>,
      %cst_108 = arith.constant 0.000000e+00 : f32
      %283 = vector.broadcast %cst_108 : f32 to vector<2x8x128xf32>
      %c0_109 = arith.constant 0 : index
      %c0_110 = arith.constant 0 : index
      %c0_111 = arith.constant 0 : index
      %284 = vector.load %arg8[%c0_109, %c0_110, %c0_111] : memref<2x8x128xf32, #tpu.memory_space<vmem>>, vector<2x8x128xf32>
      tpu.vector_store %arg8[%c0_109, %c0_110, %c0_111], %283 {strides = array<i32>} : memref<2x8x128xf32, #tpu.memory_space<vmem>>, vector<2x8x128xf32>,
    } else {
    }
    %c0 = arith.constant 0 : index
    %c0_1 = arith.constant 0 : index
    %3 = vector.load %arg3[%c0, %c0_1] : memref<128x512xf32, #tpu.memory_space<vmem>>, vector<128x512xf32>
    %c0_2 = arith.constant 0 : index
    %c0_3 = arith.constant 0 : index
    %4 = vector.load %arg4[%c0_2, %c0_3] : memref<128x512xf32, #tpu.memory_space<vmem>>, vector<128x512xf32>
    %c0_4 = arith.constant 0 : index
    %c0_5 = arith.constant 0 : index
    %c0_6 = arith.constant 0 : index
    %5 = vector.load %arg7[%c0_4, %c0_5, %c0_6] : memref<2x8x128xf32, #tpu.memory_space<vmem>>, vector<1x8x128xf32>
    %6 = vector.shape_cast %5 : vector<1x8x128xf32> to vector<8x128xf32>
    %c0_7 = arith.constant 0 : index
    %c0_8 = arith.constant 0 : index
    %c0_9 = arith.constant 0 : index
    %7 = vector.load %arg8[%c0_7, %c0_8, %c0_9] : memref<2x8x128xf32, #tpu.memory_space<vmem>>, vector<1x8x128xf32>
    %8 = vector.shape_cast %7 : vector<1x8x128xf32> to vector<8x128xf32>
    %c1 = arith.constant 1 : index
    %c0_10 = arith.constant 0 : index
    %c0_11 = arith.constant 0 : index
    %9 = vector.load %arg7[%c1, %c0_10, %c0_11] : memref<2x8x128xf32, #tpu.memory_space<vmem>>, vector<1x8x128xf32>
    %10 = vector.shape_cast %9 : vector<1x8x128xf32> to vector<8x128xf32>
    %c1_12 = arith.constant 1 : index
    %c0_13 = arith.constant 0 : index
    %c0_14 = arith.constant 0 : index
    %11 = vector.load %arg8[%c1_12, %c0_13, %c0_14] : memref<2x8x128xf32, #tpu.memory_space<vmem>>, vector<1x8x128xf32>
    %12 = vector.shape_cast %11 : vector<1x8x128xf32> to vector<8x128xf32>
    %c0_15 = arith.constant 0 : index
    %c0_16 = arith.constant 0 : index
    %c0_17 = arith.constant 0 : index
    %13 = vector.load %arg1[%c0_15, %c0_16, %c0_17] : memref<4x8x512xf32, #tpu.memory_space<vmem>>, vector<1x8x512xf32>
    %14 = vector.shape_cast %13 : vector<1x8x512xf32> to vector<8x512xf32>
    %cst = arith.constant dense<0.000000e+00> : vector<8x512xf32>
    %15 = tpu.matmul %6, %3, %cst {dimension_numbers = #tpu.dot_dimension_numbers<[1], [0], [0], [1], [0, 0, 1, 1], [], []>} : vector<8x128xf32>, vector<128x512xf32>, vector<8x512xf32> -> vector<8x512xf32>
    %16 = arith.addf %14, %15 : vector<8x512xf32>
    %17 = vector.extract_strided_slice %16 {offsets = [0, 0], sizes = [8, 128], strides = [1, 1]} : vector<8x512xf32> to vector<8x128xf32>
    %18 = arith.negf %17 : vector<8x128xf32>
    %19 = math.exp %18 : vector<8x128xf32>
    %cst_18 = arith.constant 1.000000e+00 : f32
    %20 = vector.broadcast %cst_18 : f32 to vector<8x128xf32>
    %21 = arith.addf %20, %19 : vector<8x128xf32>
    %22 = arith.divf %20, %21 : vector<8x128xf32>
    %23 = vector.extract_strided_slice %16 {offsets = [0, 128], sizes = [8, 128], strides = [1, 1]} : vector<8x512xf32> to vector<8x128xf32>
    %24 = arith.negf %23 : vector<8x128xf32>
    %25 = math.exp %24 : vector<8x128xf32>
    %cst_19 = arith.constant 1.000000e+00 : f32
    %26 = vector.broadcast %cst_19 : f32 to vector<8x128xf32>
    %27 = arith.addf %26, %25 : vector<8x128xf32>
    %28 = arith.divf %26, %27 : vector<8x128xf32>
    %29 = vector.extract_strided_slice %16 {offsets = [0, 256], sizes = [8, 128], strides = [1, 1]} : vector<8x512xf32> to vector<8x128xf32>
    %30 = math.tanh %29 : vector<8x128xf32>
    %31 = vector.extract_strided_slice %16 {offsets = [0, 384], sizes = [8, 128], strides = [1, 1]} : vector<8x512xf32> to vector<8x128xf32>
    %32 = arith.negf %31 : vector<8x128xf32>
    %33 = math.exp %32 : vector<8x128xf32>
    %cst_20 = arith.constant 1.000000e+00 : f32
    %34 = vector.broadcast %cst_20 : f32 to vector<8x128xf32>
    %35 = arith.addf %34, %33 : vector<8x128xf32>
    %36 = arith.divf %34, %35 : vector<8x128xf32>
    %37 = arith.mulf %28, %8 : vector<8x128xf32>
    %38 = arith.mulf %22, %30 : vector<8x128xf32>
    %39 = arith.addf %37, %38 : vector<8x128xf32>
    %40 = math.tanh %39 : vector<8x128xf32>
    %41 = arith.mulf %36, %40 : vector<8x128xf32>
    %c3 = arith.constant 3 : index
    %c0_21 = arith.constant 0 : index
    %c0_22 = arith.constant 0 : index
    %42 = vector.load %arg2[%c3, %c0_21, %c0_22] : memref<4x8x512xf32, #tpu.memory_space<vmem>>, vector<1x8x512xf32>
    %43 = vector.shape_cast %42 : vector<1x8x512xf32> to vector<8x512xf32>
    %cst_23 = arith.constant dense<0.000000e+00> : vector<8x512xf32>
    %44 = tpu.matmul %10, %4, %cst_23 {dimension_numbers = #tpu.dot_dimension_numbers<[1], [0], [0], [1], [0, 0, 1, 1], [], []>} : vector<8x128xf32>, vector<128x512xf32>, vector<8x512xf32> -> vector<8x512xf32>
    %45 = arith.addf %43, %44 : vector<8x512xf32>
    %46 = vector.extract_strided_slice %45 {offsets = [0, 0], sizes = [8, 128], strides = [1, 1]} : vector<8x512xf32> to vector<8x128xf32>
    %47 = arith.negf %46 : vector<8x128xf32>
    %48 = math.exp %47 : vector<8x128xf32>
    %cst_24 = arith.constant 1.000000e+00 : f32
    %49 = vector.broadcast %cst_24 : f32 to vector<8x128xf32>
    %50 = arith.addf %49, %48 : vector<8x128xf32>
    %51 = arith.divf %49, %50 : vector<8x128xf32>
    %52 = vector.extract_strided_slice %45 {offsets = [0, 128], sizes = [8, 128], strides = [1, 1]} : vector<8x512xf32> to vector<8x128xf32>
    %53 = arith.negf %52 : vector<8x128xf32>
    %54 = math.exp %53 : vector<8x128xf32>
    %cst_25 = arith.constant 1.000000e+00 : f32
    %55 = vector.broadcast %cst_25 : f32 to vector<8x128xf32>
    %56 = arith.addf %55, %54 : vector<8x128xf32>
    %57 = arith.divf %55, %56 : vector<8x128xf32>
    %58 = vector.extract_strided_slice %45 {offsets = [0, 256], sizes = [8, 128], strides = [1, 1]} : vector<8x512xf32> to vector<8x128xf32>
    %59 = math.tanh %58 : vector<8x128xf32>
    %60 = vector.extract_strided_slice %45 {offsets = [0, 384], sizes = [8, 128], strides = [1, 1]} : vector<8x512xf32> to vector<8x128xf32>
    %61 = arith.negf %60 : vector<8x128xf32>
    %62 = math.exp %61 : vector<8x128xf32>
    %cst_26 = arith.constant 1.000000e+00 : f32
    %63 = vector.broadcast %cst_26 : f32 to vector<8x128xf32>
    %64 = arith.addf %63, %62 : vector<8x128xf32>
    %65 = arith.divf %63, %64 : vector<8x128xf32>
    %66 = arith.mulf %57, %12 : vector<8x128xf32>
    %67 = arith.mulf %51, %59 : vector<8x128xf32>
    %68 = arith.addf %66, %67 : vector<8x128xf32>
    %69 = math.tanh %68 : vector<8x128xf32>
    %70 = arith.mulf %65, %69 : vector<8x128xf32>
    %c0_27 = arith.constant 0 : index
    %c0_28 = arith.constant 0 : index
    %c0_29 = arith.constant 0 : index
    %71 = vector.load %arg5[%c0_27, %c0_28, %c0_29] : memref<4x8x128xf32, #tpu.memory_space<vmem>>, vector<1x8x128xf32>
    %72 = vector.shape_cast %71 : vector<1x8x128xf32> to vector<8x128xf32>
    %73 = vector.shape_cast %41 : vector<8x128xf32> to vector<1x8x128xf32>
    tpu.vector_store %arg5[%c0_27, %c0_28, %c0_29], %73 {strides = array<i32>} : memref<4x8x128xf32, #tpu.memory_space<vmem>>, vector<1x8x128xf32>,
    %c3_30 = arith.constant 3 : index
    %c0_31 = arith.constant 0 : index
    %c0_32 = arith.constant 0 : index
    %74 = vector.load %arg6[%c3_30, %c0_31, %c0_32] : memref<4x8x128xf32, #tpu.memory_space<vmem>>, vector<1x8x128xf32>
    %75 = vector.shape_cast %74 : vector<1x8x128xf32> to vector<8x128xf32>
    %76 = vector.shape_cast %70 : vector<8x128xf32> to vector<1x8x128xf32>
    tpu.vector_store %arg6[%c3_30, %c0_31, %c0_32], %76 {strides = array<i32>} : memref<4x8x128xf32, #tpu.memory_space<vmem>>, vector<1x8x128xf32>,
    %c1_33 = arith.constant 1 : index
    %c0_34 = arith.constant 0 : index
    %c0_35 = arith.constant 0 : index
    %77 = vector.load %arg1[%c1_33, %c0_34, %c0_35] : memref<4x8x512xf32, #tpu.memory_space<vmem>>, vector<1x8x512xf32>
    %78 = vector.shape_cast %77 : vector<1x8x512xf32> to vector<8x512xf32>
    %cst_36 = arith.constant dense<0.000000e+00> : vector<8x512xf32>
    %79 = tpu.matmul %41, %3, %cst_36 {dimension_numbers = #tpu.dot_dimension_numbers<[1], [0], [0], [1], [0, 0, 1, 1], [], []>} : vector<8x128xf32>, vector<128x512xf32>, vector<8x512xf32> -> vector<8x512xf32>
    %80 = arith.addf %78, %79 : vector<8x512xf32>
    %81 = vector.extract_strided_slice %80 {offsets = [0, 0], sizes = [8, 128], strides = [1, 1]} : vector<8x512xf32> to vector<8x128xf32>
    %82 = arith.negf %81 : vector<8x128xf32>
    %83 = math.exp %82 : vector<8x128xf32>
    %cst_37 = arith.constant 1.000000e+00 : f32
    %84 = vector.broadcast %cst_37 : f32 to vector<8x128xf32>
    %85 = arith.addf %84, %83 : vector<8x128xf32>
    %86 = arith.divf %84, %85 : vector<8x128xf32>
    %87 = vector.extract_strided_slice %80 {offsets = [0, 128], sizes = [8, 128], strides = [1, 1]} : vector<8x512xf32> to vector<8x128xf32>
    %88 = arith.negf %87 : vector<8x128xf32>
    %89 = math.exp %88 : vector<8x128xf32>
    %cst_38 = arith.constant 1.000000e+00 : f32
    %90 = vector.broadcast %cst_38 : f32 to vector<8x128xf32>
    %91 = arith.addf %90, %89 : vector<8x128xf32>
    %92 = arith.divf %90, %91 : vector<8x128xf32>
    %93 = vector.extract_strided_slice %80 {offsets = [0, 256], sizes = [8, 128], strides = [1, 1]} : vector<8x512xf32> to vector<8x128xf32>
    %94 = math.tanh %93 : vector<8x128xf32>
    %95 = vector.extract_strided_slice %80 {offsets = [0, 384], sizes = [8, 128], strides = [1, 1]} : vector<8x512xf32> to vector<8x128xf32>
    %96 = arith.negf %95 : vector<8x128xf32>
    %97 = math.exp %96 : vector<8x128xf32>
    %cst_39 = arith.constant 1.000000e+00 : f32
    %98 = vector.broadcast %cst_39 : f32 to vector<8x128xf32>
    %99 = arith.addf %98, %97 : vector<8x128xf32>
    %100 = arith.divf %98, %99 : vector<8x128xf32>
    %101 = arith.mulf %92, %39 : vector<8x128xf32>
    %102 = arith.mulf %86, %94 : vector<8x128xf32>
    %103 = arith.addf %101, %102 : vector<8x128xf32>
    %104 = math.tanh %103 : vector<8x128xf32>
    %105 = arith.mulf %100, %104 : vector<8x128xf32>
    %c2 = arith.constant 2 : index
    %c0_40 = arith.constant 0 : index
    %c0_41 = arith.constant 0 : index
    %106 = vector.load %arg2[%c2, %c0_40, %c0_41] : memref<4x8x512xf32, #tpu.memory_space<vmem>>, vector<1x8x512xf32>
    %107 = vector.shape_cast %106 : vector<1x8x512xf32> to vector<8x512xf32>
    %cst_42 = arith.constant dense<0.000000e+00> : vector<8x512xf32>
    %108 = tpu.matmul %70, %4, %cst_42 {dimension_numbers = #tpu.dot_dimension_numbers<[1], [0], [0], [1], [0, 0, 1, 1], [], []>} : vector<8x128xf32>, vector<128x512xf32>, vector<8x512xf32> -> vector<8x512xf32>
    %109 = arith.addf %107, %108 : vector<8x512xf32>
    %110 = vector.extract_strided_slice %109 {offsets = [0, 0], sizes = [8, 128], strides = [1, 1]} : vector<8x512xf32> to vector<8x128xf32>
    %111 = arith.negf %110 : vector<8x128xf32>
    %112 = math.exp %111 : vector<8x128xf32>
    %cst_43 = arith.constant 1.000000e+00 : f32
    %113 = vector.broadcast %cst_43 : f32 to vector<8x128xf32>
    %114 = arith.addf %113, %112 : vector<8x128xf32>
    %115 = arith.divf %113, %114 : vector<8x128xf32>
    %116 = vector.extract_strided_slice %109 {offsets = [0, 128], sizes = [8, 128], strides = [1, 1]} : vector<8x512xf32> to vector<8x128xf32>
    %117 = arith.negf %116 : vector<8x128xf32>
    %118 = math.exp %117 : vector<8x128xf32>
    %cst_44 = arith.constant 1.000000e+00 : f32
    %119 = vector.broadcast %cst_44 : f32 to vector<8x128xf32>
    %120 = arith.addf %119, %118 : vector<8x128xf32>
    %121 = arith.divf %119, %120 : vector<8x128xf32>
    %122 = vector.extract_strided_slice %109 {offsets = [0, 256], sizes = [8, 128], strides = [1, 1]} : vector<8x512xf32> to vector<8x128xf32>
    %123 = math.tanh %122 : vector<8x128xf32>
    %124 = vector.extract_strided_slice %109 {offsets = [0, 384], sizes = [8, 128], strides = [1, 1]} : vector<8x512xf32> to vector<8x128xf32>
    %125 = arith.negf %124 : vector<8x128xf32>
    %126 = math.exp %125 : vector<8x128xf32>
    %cst_45 = arith.constant 1.000000e+00 : f32
    %127 = vector.broadcast %cst_45 : f32 to vector<8x128xf32>
    %128 = arith.addf %127, %126 : vector<8x128xf32>
    %129 = arith.divf %127, %128 : vector<8x128xf32>
    %130 = arith.mulf %121, %68 : vector<8x128xf32>
    %131 = arith.mulf %115, %123 : vector<8x128xf32>
    %132 = arith.addf %130, %131 : vector<8x128xf32>
    %133 = math.tanh %132 : vector<8x128xf32>
    %134 = arith.mulf %129, %133 : vector<8x128xf32>
    %c1_46 = arith.constant 1 : index
    %c0_47 = arith.constant 0 : index
    %c0_48 = arith.constant 0 : index
    %135 = vector.load %arg5[%c1_46, %c0_47, %c0_48] : memref<4x8x128xf32, #tpu.memory_space<vmem>>, vector<1x8x128xf32>
    %136 = vector.shape_cast %135 : vector<1x8x128xf32> to vector<8x128xf32>
    %137 = vector.shape_cast %105 : vector<8x128xf32> to vector<1x8x128xf32>
    tpu.vector_store %arg5[%c1_46, %c0_47, %c0_48], %137 {strides = array<i32>} : memref<4x8x128xf32, #tpu.memory_space<vmem>>, vector<1x8x128xf32>,
    %c2_49 = arith.constant 2 : index
    %c0_50 = arith.constant 0 : index
    %c0_51 = arith.constant 0 : index
    %138 = vector.load %arg6[%c2_49, %c0_50, %c0_51] : memref<4x8x128xf32, #tpu.memory_space<vmem>>, vector<1x8x128xf32>
    %139 = vector.shape_cast %138 : vector<1x8x128xf32> to vector<8x128xf32>
    %140 = vector.shape_cast %134 : vector<8x128xf32> to vector<1x8x128xf32>
    tpu.vector_store %arg6[%c2_49, %c0_50, %c0_51], %140 {strides = array<i32>} : memref<4x8x128xf32, #tpu.memory_space<vmem>>, vector<1x8x128xf32>,
    %c2_52 = arith.constant 2 : index
    %c0_53 = arith.constant 0 : index
    %c0_54 = arith.constant 0 : index
    %141 = vector.load %arg1[%c2_52, %c0_53, %c0_54] : memref<4x8x512xf32, #tpu.memory_space<vmem>>, vector<1x8x512xf32>
    %142 = vector.shape_cast %141 : vector<1x8x512xf32> to vector<8x512xf32>
    %cst_55 = arith.constant dense<0.000000e+00> : vector<8x512xf32>
    %143 = tpu.matmul %105, %3, %cst_55 {dimension_numbers = #tpu.dot_dimension_numbers<[1], [0], [0], [1], [0, 0, 1, 1], [], []>} : vector<8x128xf32>, vector<128x512xf32>, vector<8x512xf32> -> vector<8x512xf32>
    %144 = arith.addf %142, %143 : vector<8x512xf32>
    %145 = vector.extract_strided_slice %144 {offsets = [0, 0], sizes = [8, 128], strides = [1, 1]} : vector<8x512xf32> to vector<8x128xf32>
    %146 = arith.negf %145 : vector<8x128xf32>
    %147 = math.exp %146 : vector<8x128xf32>
    %cst_56 = arith.constant 1.000000e+00 : f32
    %148 = vector.broadcast %cst_56 : f32 to vector<8x128xf32>
    %149 = arith.addf %148, %147 : vector<8x128xf32>
    %150 = arith.divf %148, %149 : vector<8x128xf32>
    %151 = vector.extract_strided_slice %144 {offsets = [0, 128], sizes = [8, 128], strides = [1, 1]} : vector<8x512xf32> to vector<8x128xf32>
    %152 = arith.negf %151 : vector<8x128xf32>
    %153 = math.exp %152 : vector<8x128xf32>
    %cst_57 = arith.constant 1.000000e+00 : f32
    %154 = vector.broadcast %cst_57 : f32 to vector<8x128xf32>
    %155 = arith.addf %154, %153 : vector<8x128xf32>
    %156 = arith.divf %154, %155 : vector<8x128xf32>
    %157 = vector.extract_strided_slice %144 {offsets = [0, 256], sizes = [8, 128], strides = [1, 1]} : vector<8x512xf32> to vector<8x128xf32>
    %158 = math.tanh %157 : vector<8x128xf32>
    %159 = vector.extract_strided_slice %144 {offsets = [0, 384], sizes = [8, 128], strides = [1, 1]} : vector<8x512xf32> to vector<8x128xf32>
    %160 = arith.negf %159 : vector<8x128xf32>
    %161 = math.exp %160 : vector<8x128xf32>
    %cst_58 = arith.constant 1.000000e+00 : f32
    %162 = vector.broadcast %cst_58 : f32 to vector<8x128xf32>
    %163 = arith.addf %162, %161 : vector<8x128xf32>
    %164 = arith.divf %162, %163 : vector<8x128xf32>
    %165 = arith.mulf %156, %103 : vector<8x128xf32>
    %166 = arith.mulf %150, %158 : vector<8x128xf32>
    %167 = arith.addf %165, %166 : vector<8x128xf32>
    %168 = math.tanh %167 : vector<8x128xf32>
    %169 = arith.mulf %164, %168 : vector<8x128xf32>
    %c1_59 = arith.constant 1 : index
    %c0_60 = arith.constant 0 : index
    %c0_61 = arith.constant 0 : index
    %170 = vector.load %arg2[%c1_59, %c0_60, %c0_61] : memref<4x8x512xf32, #tpu.memory_space<vmem>>, vector<1x8x512xf32>
    %171 = vector.shape_cast %170 : vector<1x8x512xf32> to vector<8x512xf32>
    %cst_62 = arith.constant dense<0.000000e+00> : vector<8x512xf32>
    %172 = tpu.matmul %134, %4, %cst_62 {dimension_numbers = #tpu.dot_dimension_numbers<[1], [0], [0], [1], [0, 0, 1, 1], [], []>} : vector<8x128xf32>, vector<128x512xf32>, vector<8x512xf32> -> vector<8x512xf32>
    %173 = arith.addf %171, %172 : vector<8x512xf32>
    %174 = vector.extract_strided_slice %173 {offsets = [0, 0], sizes = [8, 128], strides = [1, 1]} : vector<8x512xf32> to vector<8x128xf32>
    %175 = arith.negf %174 : vector<8x128xf32>
    %176 = math.exp %175 : vector<8x128xf32>
    %cst_63 = arith.constant 1.000000e+00 : f32
    %177 = vector.broadcast %cst_63 : f32 to vector<8x128xf32>
    %178 = arith.addf %177, %176 : vector<8x128xf32>
    %179 = arith.divf %177, %178 : vector<8x128xf32>
    %180 = vector.extract_strided_slice %173 {offsets = [0, 128], sizes = [8, 128], strides = [1, 1]} : vector<8x512xf32> to vector<8x128xf32>
    %181 = arith.negf %180 : vector<8x128xf32>
    %182 = math.exp %181 : vector<8x128xf32>
    %cst_64 = arith.constant 1.000000e+00 : f32
    %183 = vector.broadcast %cst_64 : f32 to vector<8x128xf32>
    %184 = arith.addf %183, %182 : vector<8x128xf32>
    %185 = arith.divf %183, %184 : vector<8x128xf32>
    %186 = vector.extract_strided_slice %173 {offsets = [0, 256], sizes = [8, 128], strides = [1, 1]} : vector<8x512xf32> to vector<8x128xf32>
    %187 = math.tanh %186 : vector<8x128xf32>
    %188 = vector.extract_strided_slice %173 {offsets = [0, 384], sizes = [8, 128], strides = [1, 1]} : vector<8x512xf32> to vector<8x128xf32>
    %189 = arith.negf %188 : vector<8x128xf32>
    %190 = math.exp %189 : vector<8x128xf32>
    %cst_65 = arith.constant 1.000000e+00 : f32
    %191 = vector.broadcast %cst_65 : f32 to vector<8x128xf32>
    %192 = arith.addf %191, %190 : vector<8x128xf32>
    %193 = arith.divf %191, %192 : vector<8x128xf32>
    %194 = arith.mulf %185, %132 : vector<8x128xf32>
    %195 = arith.mulf %179, %187 : vector<8x128xf32>
    %196 = arith.addf %194, %195 : vector<8x128xf32>
    %197 = math.tanh %196 : vector<8x128xf32>
    %198 = arith.mulf %193, %197 : vector<8x128xf32>
    %c2_66 = arith.constant 2 : index
    %c0_67 = arith.constant 0 : index
    %c0_68 = arith.constant 0 : index
    %199 = vector.load %arg5[%c2_66, %c0_67, %c0_68] : memref<4x8x128xf32, #tpu.memory_space<vmem>>, vector<1x8x128xf32>
    %200 = vector.shape_cast %199 : vector<1x8x128xf32> to vector<8x128xf32>
    %201 = vector.shape_cast %169 : vector<8x128xf32> to vector<1x8x128xf32>
    tpu.vector_store %arg5[%c2_66, %c0_67, %c0_68], %201 {strides = array<i32>} : memref<4x8x128xf32, #tpu.memory_space<vmem>>, vector<1x8x128xf32>,
    %c1_69 = arith.constant 1 : index
    %c0_70 = arith.constant 0 : index
    %c0_71 = arith.constant 0 : index
    %202 = vector.load %arg6[%c1_69, %c0_70, %c0_71] : memref<4x8x128xf32, #tpu.memory_space<vmem>>, vector<1x8x128xf32>
    %203 = vector.shape_cast %202 : vector<1x8x128xf32> to vector<8x128xf32>
    %204 = vector.shape_cast %198 : vector<8x128xf32> to vector<1x8x128xf32>
    tpu.vector_store %arg6[%c1_69, %c0_70, %c0_71], %204 {strides = array<i32>} : memref<4x8x128xf32, #tpu.memory_space<vmem>>, vector<1x8x128xf32>,
    %c3_72 = arith.constant 3 : index
    %c0_73 = arith.constant 0 : index
    %c0_74 = arith.constant 0 : index
    %205 = vector.load %arg1[%c3_72, %c0_73, %c0_74] : memref<4x8x512xf32, #tpu.memory_space<vmem>>, vector<1x8x512xf32>
    %206 = vector.shape_cast %205 : vector<1x8x512xf32> to vector<8x512xf32>
    %cst_75 = arith.constant dense<0.000000e+00> : vector<8x512xf32>
    %207 = tpu.matmul %169, %3, %cst_75 {dimension_numbers = #tpu.dot_dimension_numbers<[1], [0], [0], [1], [0, 0, 1, 1], [], []>} : vector<8x128xf32>, vector<128x512xf32>, vector<8x512xf32> -> vector<8x512xf32>
    %208 = arith.addf %206, %207 : vector<8x512xf32>
    %209 = vector.extract_strided_slice %208 {offsets = [0, 0], sizes = [8, 128], strides = [1, 1]} : vector<8x512xf32> to vector<8x128xf32>
    %210 = arith.negf %209 : vector<8x128xf32>
    %211 = math.exp %210 : vector<8x128xf32>
    %cst_76 = arith.constant 1.000000e+00 : f32
    %212 = vector.broadcast %cst_76 : f32 to vector<8x128xf32>
    %213 = arith.addf %212, %211 : vector<8x128xf32>
    %214 = arith.divf %212, %213 : vector<8x128xf32>
    %215 = vector.extract_strided_slice %208 {offsets = [0, 128], sizes = [8, 128], strides = [1, 1]} : vector<8x512xf32> to vector<8x128xf32>
    %216 = arith.negf %215 : vector<8x128xf32>
    %217 = math.exp %216 : vector<8x128xf32>
    %cst_77 = arith.constant 1.000000e+00 : f32
    %218 = vector.broadcast %cst_77 : f32 to vector<8x128xf32>
    %219 = arith.addf %218, %217 : vector<8x128xf32>
    %220 = arith.divf %218, %219 : vector<8x128xf32>
    %221 = vector.extract_strided_slice %208 {offsets = [0, 256], sizes = [8, 128], strides = [1, 1]} : vector<8x512xf32> to vector<8x128xf32>
    %222 = math.tanh %221 : vector<8x128xf32>
    %223 = vector.extract_strided_slice %208 {offsets = [0, 384], sizes = [8, 128], strides = [1, 1]} : vector<8x512xf32> to vector<8x128xf32>
    %224 = arith.negf %223 : vector<8x128xf32>
    %225 = math.exp %224 : vector<8x128xf32>
    %cst_78 = arith.constant 1.000000e+00 : f32
    %226 = vector.broadcast %cst_78 : f32 to vector<8x128xf32>
    %227 = arith.addf %226, %225 : vector<8x128xf32>
    %228 = arith.divf %226, %227 : vector<8x128xf32>
    %229 = arith.mulf %220, %167 : vector<8x128xf32>
    %230 = arith.mulf %214, %222 : vector<8x128xf32>
    %231 = arith.addf %229, %230 : vector<8x128xf32>
    %232 = math.tanh %231 : vector<8x128xf32>
    %233 = arith.mulf %228, %232 : vector<8x128xf32>
    %c0_79 = arith.constant 0 : index
    %c0_80 = arith.constant 0 : index
    %c0_81 = arith.constant 0 : index
    %234 = vector.load %arg2[%c0_79, %c0_80, %c0_81] : memref<4x8x512xf32, #tpu.memory_space<vmem>>, vector<1x8x512xf32>
    %235 = vector.shape_cast %234 : vector<1x8x512xf32> to vector<8x512xf32>
    %cst_82 = arith.constant dense<0.000000e+00> : vector<8x512xf32>
    %236 = tpu.matmul %198, %4, %cst_82 {dimension_numbers = #tpu.dot_dimension_numbers<[1], [0], [0], [1], [0, 0, 1, 1], [], []>} : vector<8x128xf32>, vector<128x512xf32>, vector<8x512xf32> -> vector<8x512xf32>
    %237 = arith.addf %235, %236 : vector<8x512xf32>
    %238 = vector.extract_strided_slice %237 {offsets = [0, 0], sizes = [8, 128], strides = [1, 1]} : vector<8x512xf32> to vector<8x128xf32>
    %239 = arith.negf %238 : vector<8x128xf32>
    %240 = math.exp %239 : vector<8x128xf32>
    %cst_83 = arith.constant 1.000000e+00 : f32
    %241 = vector.broadcast %cst_83 : f32 to vector<8x128xf32>
    %242 = arith.addf %241, %240 : vector<8x128xf32>
    %243 = arith.divf %241, %242 : vector<8x128xf32>
    %244 = vector.extract_strided_slice %237 {offsets = [0, 128], sizes = [8, 128], strides = [1, 1]} : vector<8x512xf32> to vector<8x128xf32>
    %245 = arith.negf %244 : vector<8x128xf32>
    %246 = math.exp %245 : vector<8x128xf32>
    %cst_84 = arith.constant 1.000000e+00 : f32
    %247 = vector.broadcast %cst_84 : f32 to vector<8x128xf32>
    %248 = arith.addf %247, %246 : vector<8x128xf32>
    %249 = arith.divf %247, %248 : vector<8x128xf32>
    %250 = vector.extract_strided_slice %237 {offsets = [0, 256], sizes = [8, 128], strides = [1, 1]} : vector<8x512xf32> to vector<8x128xf32>
    %251 = math.tanh %250 : vector<8x128xf32>
    %252 = vector.extract_strided_slice %237 {offsets = [0, 384], sizes = [8, 128], strides = [1, 1]} : vector<8x512xf32> to vector<8x128xf32>
    %253 = arith.negf %252 : vector<8x128xf32>
    %254 = math.exp %253 : vector<8x128xf32>
    %cst_85 = arith.constant 1.000000e+00 : f32
    %255 = vector.broadcast %cst_85 : f32 to vector<8x128xf32>
    %256 = arith.addf %255, %254 : vector<8x128xf32>
    %257 = arith.divf %255, %256 : vector<8x128xf32>
    %258 = arith.mulf %249, %196 : vector<8x128xf32>
    %259 = arith.mulf %243, %251 : vector<8x128xf32>
    %260 = arith.addf %258, %259 : vector<8x128xf32>
    %261 = math.tanh %260 : vector<8x128xf32>
    %262 = arith.mulf %257, %261 : vector<8x128xf32>
    %c3_86 = arith.constant 3 : index
    %c0_87 = arith.constant 0 : index
    %c0_88 = arith.constant 0 : index
    %263 = vector.load %arg5[%c3_86, %c0_87, %c0_88] : memref<4x8x128xf32, #tpu.memory_space<vmem>>, vector<1x8x128xf32>
    %264 = vector.shape_cast %263 : vector<1x8x128xf32> to vector<8x128xf32>
    %265 = vector.shape_cast %233 : vector<8x128xf32> to vector<1x8x128xf32>
    tpu.vector_store %arg5[%c3_86, %c0_87, %c0_88], %265 {strides = array<i32>} : memref<4x8x128xf32, #tpu.memory_space<vmem>>, vector<1x8x128xf32>,
    %c0_89 = arith.constant 0 : index
    %c0_90 = arith.constant 0 : index
    %c0_91 = arith.constant 0 : index
    %266 = vector.load %arg6[%c0_89, %c0_90, %c0_91] : memref<4x8x128xf32, #tpu.memory_space<vmem>>, vector<1x8x128xf32>
    %267 = vector.shape_cast %266 : vector<1x8x128xf32> to vector<8x128xf32>
    %268 = vector.shape_cast %262 : vector<8x128xf32> to vector<1x8x128xf32>
    tpu.vector_store %arg6[%c0_89, %c0_90, %c0_91], %268 {strides = array<i32>} : memref<4x8x128xf32, #tpu.memory_space<vmem>>, vector<1x8x128xf32>,
    %c0_92 = arith.constant 0 : index
    %c0_93 = arith.constant 0 : index
    %c0_94 = arith.constant 0 : index
    %269 = vector.load %arg7[%c0_92, %c0_93, %c0_94] : memref<2x8x128xf32, #tpu.memory_space<vmem>>, vector<1x8x128xf32>
    %270 = vector.shape_cast %269 : vector<1x8x128xf32> to vector<8x128xf32>
    %271 = vector.shape_cast %233 : vector<8x128xf32> to vector<1x8x128xf32>
    tpu.vector_store %arg7[%c0_92, %c0_93, %c0_94], %271 {strides = array<i32>} : memref<2x8x128xf32, #tpu.memory_space<vmem>>, vector<1x8x128xf32>,
    %c0_95 = arith.constant 0 : index
    %c0_96 = arith.constant 0 : index
    %c0_97 = arith.constant 0 : index
    %272 = vector.load %arg8[%c0_95, %c0_96, %c0_97] : memref<2x8x128xf32, #tpu.memory_space<vmem>>, vector<1x8x128xf32>
    %273 = vector.shape_cast %272 : vector<1x8x128xf32> to vector<8x128xf32>
    %274 = vector.shape_cast %231 : vector<8x128xf32> to vector<1x8x128xf32>
    tpu.vector_store %arg8[%c0_95, %c0_96, %c0_97], %274 {strides = array<i32>} : memref<2x8x128xf32, #tpu.memory_space<vmem>>, vector<1x8x128xf32>,
    %c1_98 = arith.constant 1 : index
    %c0_99 = arith.constant 0 : index
    %c0_100 = arith.constant 0 : index
    %275 = vector.load %arg7[%c1_98, %c0_99, %c0_100] : memref<2x8x128xf32, #tpu.memory_space<vmem>>, vector<1x8x128xf32>
    %276 = vector.shape_cast %275 : vector<1x8x128xf32> to vector<8x128xf32>
    %277 = vector.shape_cast %262 : vector<8x128xf32> to vector<1x8x128xf32>
    tpu.vector_store %arg7[%c1_98, %c0_99, %c0_100], %277 {strides = array<i32>} : memref<2x8x128xf32, #tpu.memory_space<vmem>>, vector<1x8x128xf32>,
    %c1_101 = arith.constant 1 : index
    %c0_102 = arith.constant 0 : index
    %c0_103 = arith.constant 0 : index
    %278 = vector.load %arg8[%c1_101, %c0_102, %c0_103] : memref<2x8x128xf32, #tpu.memory_space<vmem>>, vector<1x8x128xf32>
    %279 = vector.shape_cast %278 : vector<1x8x128xf32> to vector<8x128xf32>
    %280 = vector.shape_cast %260 : vector<8x128xf32> to vector<1x8x128xf32>
    tpu.vector_store %arg8[%c1_101, %c0_102, %c0_103], %280 {strides = array<i32>} : memref<2x8x128xf32, #tpu.memory_space<vmem>>, vector<1x8x128xf32>,
    return
  }
  func.func @transform_0(%arg0: i32) -> (i32, i32, i32) {
    %c0_i32 = arith.constant 0 : i32
    %c0_i32_0 = arith.constant 0 : i32
    %c0_i32_1 = arith.constant 0 : i32
    return %arg0, %c0_i32, %c0_i32_0 : i32, i32, i32
  }
  func.func @transform_1(%arg0: i32) -> (i32, i32, i32) {
    %c1_i32 = arith.constant 1 : i32
    %0 = arith.subi %c1_i32, %arg0 : i32
    %c0_i32 = arith.constant 0 : i32
    %c0_i32_0 = arith.constant 0 : i32
    %c0_i32_1 = arith.constant 0 : i32
    return %0, %c0_i32, %c0_i32_0 : i32, i32, i32
  }
  func.func @transform_2(%arg0: i32) -> (i32, i32) {
    %c0_i32 = arith.constant 0 : i32
    %c0_i32_0 = arith.constant 0 : i32
    %c0_i32_1 = arith.constant 0 : i32
    return %c0_i32, %c0_i32_0 : i32, i32
  }
  func.func @transform_3(%arg0: i32) -> (i32, i32) {
    %c0_i32 = arith.constant 0 : i32
    %c0_i32_0 = arith.constant 0 : i32
    %c0_i32_1 = arith.constant 0 : i32
    return %c0_i32, %c0_i32_0 : i32, i32
  }
  func.func @transform_4(%arg0: i32) -> (i32, i32, i32) {
    %c0_i32 = arith.constant 0 : i32
    %c0_i32_0 = arith.constant 0 : i32
    %c0_i32_1 = arith.constant 0 : i32
    return %arg0, %c0_i32, %c0_i32_0 : i32, i32, i32
  }
  func.func @transform_5(%arg0: i32) -> (i32, i32, i32) {
    %c1_i32 = arith.constant 1 : i32
    %0 = arith.subi %c1_i32, %arg0 : i32
    %c0_i32 = arith.constant 0 : i32
    %c0_i32_0 = arith.constant 0 : i32
    %c0_i32_1 = arith.constant 0 : i32
    return %0, %c0_i32, %c0_i32_0 : i32, i32, i32
  }
}

module attributes {stable_mosaic.version = 11 : i64} {
  func.func @_bidir_lstm_top_fc_kernel(%arg0: i32, %arg1: memref<4x8x512xf32, #tpu.memory_space<vmem>>, %arg2: memref<4x8x512xf32, #tpu.memory_space<vmem>>, %arg3: memref<128x512xf32, #tpu.memory_space<vmem>>, %arg4: memref<128x512xf32, #tpu.memory_space<vmem>>, %arg5: memref<128x128xf32, #tpu.memory_space<vmem>>, %arg6: memref<128x128xf32, #tpu.memory_space<vmem>>, %arg7: memref<1x128xf32, #tpu.memory_space<vmem>>, %arg8: memref<8x128xf32, #tpu.memory_space<vmem>>, %arg9: memref<2x8x128xf32, #tpu.memory_space<vmem>>, %arg10: memref<2x8x128xf32, #tpu.memory_space<vmem>>, %arg11: memref<8x128xf32, #tpu.memory_space<vmem>>) attributes {dimension_semantics = [#tpu.dimension_semantics<arbitrary>], iteration_bounds = array<i64: 2>, scalar_prefetch = 0 : i64, scratch_operands = 3 : i64, tpu.core_type = #tpu.core_type<tc>, window_params = [{transform_indices = @transform_0, window_bounds = array<i64: 4, 8, 512>}, {transform_indices = @transform_1, window_bounds = array<i64: 4, 8, 512>}, {pipeline_mode = #tpu.pipeline_mode<synchronous>, transform_indices = @transform_2, window_bounds = array<i64: 128, 512>}, {pipeline_mode = #tpu.pipeline_mode<synchronous>, transform_indices = @transform_3, window_bounds = array<i64: 128, 512>}, {pipeline_mode = #tpu.pipeline_mode<synchronous>, transform_indices = @transform_4, window_bounds = array<i64: 128, 128>}, {pipeline_mode = #tpu.pipeline_mode<synchronous>, transform_indices = @transform_5, window_bounds = array<i64: 128, 128>}, {pipeline_mode = #tpu.pipeline_mode<synchronous>, transform_indices = @transform_6, window_bounds = array<i64: 1, 128>}, {pipeline_mode = #tpu.pipeline_mode<synchronous>, transform_indices = @transform_7, window_bounds = array<i64: 8, 128>}]} {
    %c0_i32 = arith.constant 0 : i32
    %0 = arith.cmpi eq, %arg0, %c0_i32 : i32
    %1 = arith.extui %0 : i1 to i32
    %c0_i32_0 = arith.constant 0 : i32
    %2 = arith.cmpi ne, %1, %c0_i32_0 : i32
    scf.if %2 {
      %cst_83 = arith.constant 0.000000e+00 : f32
      %263 = vector.broadcast %cst_83 : f32 to vector<2x8x128xf32>
      %c0_84 = arith.constant 0 : index
      %c0_85 = arith.constant 0 : index
      %c0_86 = arith.constant 0 : index
      %264 = vector.load %arg9[%c0_84, %c0_85, %c0_86] : memref<2x8x128xf32, #tpu.memory_space<vmem>>, vector<2x8x128xf32>
      tpu.vector_store %arg9[%c0_84, %c0_85, %c0_86], %263 {strides = array<i32>} : memref<2x8x128xf32, #tpu.memory_space<vmem>>, vector<2x8x128xf32>,
      %cst_87 = arith.constant 0.000000e+00 : f32
      %265 = vector.broadcast %cst_87 : f32 to vector<2x8x128xf32>
      %c0_88 = arith.constant 0 : index
      %c0_89 = arith.constant 0 : index
      %c0_90 = arith.constant 0 : index
      %266 = vector.load %arg10[%c0_88, %c0_89, %c0_90] : memref<2x8x128xf32, #tpu.memory_space<vmem>>, vector<2x8x128xf32>
      tpu.vector_store %arg10[%c0_88, %c0_89, %c0_90], %265 {strides = array<i32>} : memref<2x8x128xf32, #tpu.memory_space<vmem>>, vector<2x8x128xf32>,
    } else {
    }
    %c0 = arith.constant 0 : index
    %c0_1 = arith.constant 0 : index
    %3 = vector.load %arg3[%c0, %c0_1] : memref<128x512xf32, #tpu.memory_space<vmem>>, vector<128x512xf32>
    %c0_2 = arith.constant 0 : index
    %c0_3 = arith.constant 0 : index
    %4 = vector.load %arg4[%c0_2, %c0_3] : memref<128x512xf32, #tpu.memory_space<vmem>>, vector<128x512xf32>
    %c0_4 = arith.constant 0 : index
    %c0_5 = arith.constant 0 : index
    %c0_6 = arith.constant 0 : index
    %5 = vector.load %arg9[%c0_4, %c0_5, %c0_6] : memref<2x8x128xf32, #tpu.memory_space<vmem>>, vector<1x8x128xf32>
    %6 = vector.shape_cast %5 : vector<1x8x128xf32> to vector<8x128xf32>
    %c0_7 = arith.constant 0 : index
    %c0_8 = arith.constant 0 : index
    %c0_9 = arith.constant 0 : index
    %7 = vector.load %arg10[%c0_7, %c0_8, %c0_9] : memref<2x8x128xf32, #tpu.memory_space<vmem>>, vector<1x8x128xf32>
    %8 = vector.shape_cast %7 : vector<1x8x128xf32> to vector<8x128xf32>
    %c1 = arith.constant 1 : index
    %c0_10 = arith.constant 0 : index
    %c0_11 = arith.constant 0 : index
    %9 = vector.load %arg9[%c1, %c0_10, %c0_11] : memref<2x8x128xf32, #tpu.memory_space<vmem>>, vector<1x8x128xf32>
    %10 = vector.shape_cast %9 : vector<1x8x128xf32> to vector<8x128xf32>
    %c1_12 = arith.constant 1 : index
    %c0_13 = arith.constant 0 : index
    %c0_14 = arith.constant 0 : index
    %11 = vector.load %arg10[%c1_12, %c0_13, %c0_14] : memref<2x8x128xf32, #tpu.memory_space<vmem>>, vector<1x8x128xf32>
    %12 = vector.shape_cast %11 : vector<1x8x128xf32> to vector<8x128xf32>
    %c0_15 = arith.constant 0 : index
    %c0_16 = arith.constant 0 : index
    %c0_17 = arith.constant 0 : index
    %13 = vector.load %arg1[%c0_15, %c0_16, %c0_17] : memref<4x8x512xf32, #tpu.memory_space<vmem>>, vector<1x8x512xf32>
    %14 = vector.shape_cast %13 : vector<1x8x512xf32> to vector<8x512xf32>
    %cst = arith.constant dense<0.000000e+00> : vector<8x512xf32>
    %15 = tpu.matmul %6, %3, %cst {dimension_numbers = #tpu.dot_dimension_numbers<[1], [0], [0], [1], [0, 0, 1, 1], [], []>} : vector<8x128xf32>, vector<128x512xf32>, vector<8x512xf32> -> vector<8x512xf32>
    %16 = arith.addf %14, %15 : vector<8x512xf32>
    %17 = vector.extract_strided_slice %16 {offsets = [0, 0], sizes = [8, 128], strides = [1, 1]} : vector<8x512xf32> to vector<8x128xf32>
    %18 = arith.negf %17 : vector<8x128xf32>
    %19 = math.exp %18 : vector<8x128xf32>
    %cst_18 = arith.constant 1.000000e+00 : f32
    %20 = vector.broadcast %cst_18 : f32 to vector<8x128xf32>
    %21 = arith.addf %20, %19 : vector<8x128xf32>
    %22 = arith.divf %20, %21 : vector<8x128xf32>
    %23 = vector.extract_strided_slice %16 {offsets = [0, 128], sizes = [8, 128], strides = [1, 1]} : vector<8x512xf32> to vector<8x128xf32>
    %24 = arith.negf %23 : vector<8x128xf32>
    %25 = math.exp %24 : vector<8x128xf32>
    %cst_19 = arith.constant 1.000000e+00 : f32
    %26 = vector.broadcast %cst_19 : f32 to vector<8x128xf32>
    %27 = arith.addf %26, %25 : vector<8x128xf32>
    %28 = arith.divf %26, %27 : vector<8x128xf32>
    %29 = vector.extract_strided_slice %16 {offsets = [0, 256], sizes = [8, 128], strides = [1, 1]} : vector<8x512xf32> to vector<8x128xf32>
    %30 = math.tanh %29 : vector<8x128xf32>
    %31 = vector.extract_strided_slice %16 {offsets = [0, 384], sizes = [8, 128], strides = [1, 1]} : vector<8x512xf32> to vector<8x128xf32>
    %32 = arith.negf %31 : vector<8x128xf32>
    %33 = math.exp %32 : vector<8x128xf32>
    %cst_20 = arith.constant 1.000000e+00 : f32
    %34 = vector.broadcast %cst_20 : f32 to vector<8x128xf32>
    %35 = arith.addf %34, %33 : vector<8x128xf32>
    %36 = arith.divf %34, %35 : vector<8x128xf32>
    %37 = arith.mulf %28, %8 : vector<8x128xf32>
    %38 = arith.mulf %22, %30 : vector<8x128xf32>
    %39 = arith.addf %37, %38 : vector<8x128xf32>
    %40 = math.tanh %39 : vector<8x128xf32>
    %41 = arith.mulf %36, %40 : vector<8x128xf32>
    %c3 = arith.constant 3 : index
    %c0_21 = arith.constant 0 : index
    %c0_22 = arith.constant 0 : index
    %42 = vector.load %arg2[%c3, %c0_21, %c0_22] : memref<4x8x512xf32, #tpu.memory_space<vmem>>, vector<1x8x512xf32>
    %43 = vector.shape_cast %42 : vector<1x8x512xf32> to vector<8x512xf32>
    %cst_23 = arith.constant dense<0.000000e+00> : vector<8x512xf32>
    %44 = tpu.matmul %10, %4, %cst_23 {dimension_numbers = #tpu.dot_dimension_numbers<[1], [0], [0], [1], [0, 0, 1, 1], [], []>} : vector<8x128xf32>, vector<128x512xf32>, vector<8x512xf32> -> vector<8x512xf32>
    %45 = arith.addf %43, %44 : vector<8x512xf32>
    %46 = vector.extract_strided_slice %45 {offsets = [0, 0], sizes = [8, 128], strides = [1, 1]} : vector<8x512xf32> to vector<8x128xf32>
    %47 = arith.negf %46 : vector<8x128xf32>
    %48 = math.exp %47 : vector<8x128xf32>
    %cst_24 = arith.constant 1.000000e+00 : f32
    %49 = vector.broadcast %cst_24 : f32 to vector<8x128xf32>
    %50 = arith.addf %49, %48 : vector<8x128xf32>
    %51 = arith.divf %49, %50 : vector<8x128xf32>
    %52 = vector.extract_strided_slice %45 {offsets = [0, 128], sizes = [8, 128], strides = [1, 1]} : vector<8x512xf32> to vector<8x128xf32>
    %53 = arith.negf %52 : vector<8x128xf32>
    %54 = math.exp %53 : vector<8x128xf32>
    %cst_25 = arith.constant 1.000000e+00 : f32
    %55 = vector.broadcast %cst_25 : f32 to vector<8x128xf32>
    %56 = arith.addf %55, %54 : vector<8x128xf32>
    %57 = arith.divf %55, %56 : vector<8x128xf32>
    %58 = vector.extract_strided_slice %45 {offsets = [0, 256], sizes = [8, 128], strides = [1, 1]} : vector<8x512xf32> to vector<8x128xf32>
    %59 = math.tanh %58 : vector<8x128xf32>
    %60 = vector.extract_strided_slice %45 {offsets = [0, 384], sizes = [8, 128], strides = [1, 1]} : vector<8x512xf32> to vector<8x128xf32>
    %61 = arith.negf %60 : vector<8x128xf32>
    %62 = math.exp %61 : vector<8x128xf32>
    %cst_26 = arith.constant 1.000000e+00 : f32
    %63 = vector.broadcast %cst_26 : f32 to vector<8x128xf32>
    %64 = arith.addf %63, %62 : vector<8x128xf32>
    %65 = arith.divf %63, %64 : vector<8x128xf32>
    %66 = arith.mulf %57, %12 : vector<8x128xf32>
    %67 = arith.mulf %51, %59 : vector<8x128xf32>
    %68 = arith.addf %66, %67 : vector<8x128xf32>
    %69 = math.tanh %68 : vector<8x128xf32>
    %70 = arith.mulf %65, %69 : vector<8x128xf32>
    %c0_i32_27 = arith.constant 0 : i32
    %71 = arith.cmpi eq, %arg0, %c0_i32_27 : i32
    %72 = arith.extui %71 : i1 to i32
    %c0_i32_28 = arith.constant 0 : i32
    %73 = arith.cmpi ne, %72, %c0_i32_28 : i32
    scf.if %73 {
      %c0_83 = arith.constant 0 : index
      %c0_84 = arith.constant 0 : index
      %263 = vector.load %arg11[%c0_83, %c0_84] : memref<8x128xf32, #tpu.memory_space<vmem>>, vector<8x128xf32>
      tpu.vector_store %arg11[%c0_83, %c0_84], %70 {strides = array<i32>} : memref<8x128xf32, #tpu.memory_space<vmem>>, vector<8x128xf32>,
    } else {
    }
    %c1_29 = arith.constant 1 : index
    %c0_30 = arith.constant 0 : index
    %c0_31 = arith.constant 0 : index
    %74 = vector.load %arg1[%c1_29, %c0_30, %c0_31] : memref<4x8x512xf32, #tpu.memory_space<vmem>>, vector<1x8x512xf32>
    %75 = vector.shape_cast %74 : vector<1x8x512xf32> to vector<8x512xf32>
    %cst_32 = arith.constant dense<0.000000e+00> : vector<8x512xf32>
    %76 = tpu.matmul %41, %3, %cst_32 {dimension_numbers = #tpu.dot_dimension_numbers<[1], [0], [0], [1], [0, 0, 1, 1], [], []>} : vector<8x128xf32>, vector<128x512xf32>, vector<8x512xf32> -> vector<8x512xf32>
    %77 = arith.addf %75, %76 : vector<8x512xf32>
    %78 = vector.extract_strided_slice %77 {offsets = [0, 0], sizes = [8, 128], strides = [1, 1]} : vector<8x512xf32> to vector<8x128xf32>
    %79 = arith.negf %78 : vector<8x128xf32>
    %80 = math.exp %79 : vector<8x128xf32>
    %cst_33 = arith.constant 1.000000e+00 : f32
    %81 = vector.broadcast %cst_33 : f32 to vector<8x128xf32>
    %82 = arith.addf %81, %80 : vector<8x128xf32>
    %83 = arith.divf %81, %82 : vector<8x128xf32>
    %84 = vector.extract_strided_slice %77 {offsets = [0, 128], sizes = [8, 128], strides = [1, 1]} : vector<8x512xf32> to vector<8x128xf32>
    %85 = arith.negf %84 : vector<8x128xf32>
    %86 = math.exp %85 : vector<8x128xf32>
    %cst_34 = arith.constant 1.000000e+00 : f32
    %87 = vector.broadcast %cst_34 : f32 to vector<8x128xf32>
    %88 = arith.addf %87, %86 : vector<8x128xf32>
    %89 = arith.divf %87, %88 : vector<8x128xf32>
    %90 = vector.extract_strided_slice %77 {offsets = [0, 256], sizes = [8, 128], strides = [1, 1]} : vector<8x512xf32> to vector<8x128xf32>
    %91 = math.tanh %90 : vector<8x128xf32>
    %92 = vector.extract_strided_slice %77 {offsets = [0, 384], sizes = [8, 128], strides = [1, 1]} : vector<8x512xf32> to vector<8x128xf32>
    %93 = arith.negf %92 : vector<8x128xf32>
    %94 = math.exp %93 : vector<8x128xf32>
    %cst_35 = arith.constant 1.000000e+00 : f32
    %95 = vector.broadcast %cst_35 : f32 to vector<8x128xf32>
    %96 = arith.addf %95, %94 : vector<8x128xf32>
    %97 = arith.divf %95, %96 : vector<8x128xf32>
    %98 = arith.mulf %89, %39 : vector<8x128xf32>
    %99 = arith.mulf %83, %91 : vector<8x128xf32>
    %100 = arith.addf %98, %99 : vector<8x128xf32>
    %101 = math.tanh %100 : vector<8x128xf32>
    %102 = arith.mulf %97, %101 : vector<8x128xf32>
    %c2 = arith.constant 2 : index
    %c0_36 = arith.constant 0 : index
    %c0_37 = arith.constant 0 : index
    %103 = vector.load %arg2[%c2, %c0_36, %c0_37] : memref<4x8x512xf32, #tpu.memory_space<vmem>>, vector<1x8x512xf32>
    %104 = vector.shape_cast %103 : vector<1x8x512xf32> to vector<8x512xf32>
    %cst_38 = arith.constant dense<0.000000e+00> : vector<8x512xf32>
    %105 = tpu.matmul %70, %4, %cst_38 {dimension_numbers = #tpu.dot_dimension_numbers<[1], [0], [0], [1], [0, 0, 1, 1], [], []>} : vector<8x128xf32>, vector<128x512xf32>, vector<8x512xf32> -> vector<8x512xf32>
    %106 = arith.addf %104, %105 : vector<8x512xf32>
    %107 = vector.extract_strided_slice %106 {offsets = [0, 0], sizes = [8, 128], strides = [1, 1]} : vector<8x512xf32> to vector<8x128xf32>
    %108 = arith.negf %107 : vector<8x128xf32>
    %109 = math.exp %108 : vector<8x128xf32>
    %cst_39 = arith.constant 1.000000e+00 : f32
    %110 = vector.broadcast %cst_39 : f32 to vector<8x128xf32>
    %111 = arith.addf %110, %109 : vector<8x128xf32>
    %112 = arith.divf %110, %111 : vector<8x128xf32>
    %113 = vector.extract_strided_slice %106 {offsets = [0, 128], sizes = [8, 128], strides = [1, 1]} : vector<8x512xf32> to vector<8x128xf32>
    %114 = arith.negf %113 : vector<8x128xf32>
    %115 = math.exp %114 : vector<8x128xf32>
    %cst_40 = arith.constant 1.000000e+00 : f32
    %116 = vector.broadcast %cst_40 : f32 to vector<8x128xf32>
    %117 = arith.addf %116, %115 : vector<8x128xf32>
    %118 = arith.divf %116, %117 : vector<8x128xf32>
    %119 = vector.extract_strided_slice %106 {offsets = [0, 256], sizes = [8, 128], strides = [1, 1]} : vector<8x512xf32> to vector<8x128xf32>
    %120 = math.tanh %119 : vector<8x128xf32>
    %121 = vector.extract_strided_slice %106 {offsets = [0, 384], sizes = [8, 128], strides = [1, 1]} : vector<8x512xf32> to vector<8x128xf32>
    %122 = arith.negf %121 : vector<8x128xf32>
    %123 = math.exp %122 : vector<8x128xf32>
    %cst_41 = arith.constant 1.000000e+00 : f32
    %124 = vector.broadcast %cst_41 : f32 to vector<8x128xf32>
    %125 = arith.addf %124, %123 : vector<8x128xf32>
    %126 = arith.divf %124, %125 : vector<8x128xf32>
    %127 = arith.mulf %118, %68 : vector<8x128xf32>
    %128 = arith.mulf %112, %120 : vector<8x128xf32>
    %129 = arith.addf %127, %128 : vector<8x128xf32>
    %130 = math.tanh %129 : vector<8x128xf32>
    %131 = arith.mulf %126, %130 : vector<8x128xf32>
    %c2_42 = arith.constant 2 : index
    %c0_43 = arith.constant 0 : index
    %c0_44 = arith.constant 0 : index
    %132 = vector.load %arg1[%c2_42, %c0_43, %c0_44] : memref<4x8x512xf32, #tpu.memory_space<vmem>>, vector<1x8x512xf32>
    %133 = vector.shape_cast %132 : vector<1x8x512xf32> to vector<8x512xf32>
    %cst_45 = arith.constant dense<0.000000e+00> : vector<8x512xf32>
    %134 = tpu.matmul %102, %3, %cst_45 {dimension_numbers = #tpu.dot_dimension_numbers<[1], [0], [0], [1], [0, 0, 1, 1], [], []>} : vector<8x128xf32>, vector<128x512xf32>, vector<8x512xf32> -> vector<8x512xf32>
    %135 = arith.addf %133, %134 : vector<8x512xf32>
    %136 = vector.extract_strided_slice %135 {offsets = [0, 0], sizes = [8, 128], strides = [1, 1]} : vector<8x512xf32> to vector<8x128xf32>
    %137 = arith.negf %136 : vector<8x128xf32>
    %138 = math.exp %137 : vector<8x128xf32>
    %cst_46 = arith.constant 1.000000e+00 : f32
    %139 = vector.broadcast %cst_46 : f32 to vector<8x128xf32>
    %140 = arith.addf %139, %138 : vector<8x128xf32>
    %141 = arith.divf %139, %140 : vector<8x128xf32>
    %142 = vector.extract_strided_slice %135 {offsets = [0, 128], sizes = [8, 128], strides = [1, 1]} : vector<8x512xf32> to vector<8x128xf32>
    %143 = arith.negf %142 : vector<8x128xf32>
    %144 = math.exp %143 : vector<8x128xf32>
    %cst_47 = arith.constant 1.000000e+00 : f32
    %145 = vector.broadcast %cst_47 : f32 to vector<8x128xf32>
    %146 = arith.addf %145, %144 : vector<8x128xf32>
    %147 = arith.divf %145, %146 : vector<8x128xf32>
    %148 = vector.extract_strided_slice %135 {offsets = [0, 256], sizes = [8, 128], strides = [1, 1]} : vector<8x512xf32> to vector<8x128xf32>
    %149 = math.tanh %148 : vector<8x128xf32>
    %150 = vector.extract_strided_slice %135 {offsets = [0, 384], sizes = [8, 128], strides = [1, 1]} : vector<8x512xf32> to vector<8x128xf32>
    %151 = arith.negf %150 : vector<8x128xf32>
    %152 = math.exp %151 : vector<8x128xf32>
    %cst_48 = arith.constant 1.000000e+00 : f32
    %153 = vector.broadcast %cst_48 : f32 to vector<8x128xf32>
    %154 = arith.addf %153, %152 : vector<8x128xf32>
    %155 = arith.divf %153, %154 : vector<8x128xf32>
    %156 = arith.mulf %147, %100 : vector<8x128xf32>
    %157 = arith.mulf %141, %149 : vector<8x128xf32>
    %158 = arith.addf %156, %157 : vector<8x128xf32>
    %159 = math.tanh %158 : vector<8x128xf32>
    %160 = arith.mulf %155, %159 : vector<8x128xf32>
    %c1_49 = arith.constant 1 : index
    %c0_50 = arith.constant 0 : index
    %c0_51 = arith.constant 0 : index
    %161 = vector.load %arg2[%c1_49, %c0_50, %c0_51] : memref<4x8x512xf32, #tpu.memory_space<vmem>>, vector<1x8x512xf32>
    %162 = vector.shape_cast %161 : vector<1x8x512xf32> to vector<8x512xf32>
    %cst_52 = arith.constant dense<0.000000e+00> : vector<8x512xf32>
    %163 = tpu.matmul %131, %4, %cst_52 {dimension_numbers = #tpu.dot_dimension_numbers<[1], [0], [0], [1], [0, 0, 1, 1], [], []>} : vector<8x128xf32>, vector<128x512xf32>, vector<8x512xf32> -> vector<8x512xf32>
    %164 = arith.addf %162, %163 : vector<8x512xf32>
    %165 = vector.extract_strided_slice %164 {offsets = [0, 0], sizes = [8, 128], strides = [1, 1]} : vector<8x512xf32> to vector<8x128xf32>
    %166 = arith.negf %165 : vector<8x128xf32>
    %167 = math.exp %166 : vector<8x128xf32>
    %cst_53 = arith.constant 1.000000e+00 : f32
    %168 = vector.broadcast %cst_53 : f32 to vector<8x128xf32>
    %169 = arith.addf %168, %167 : vector<8x128xf32>
    %170 = arith.divf %168, %169 : vector<8x128xf32>
    %171 = vector.extract_strided_slice %164 {offsets = [0, 128], sizes = [8, 128], strides = [1, 1]} : vector<8x512xf32> to vector<8x128xf32>
    %172 = arith.negf %171 : vector<8x128xf32>
    %173 = math.exp %172 : vector<8x128xf32>
    %cst_54 = arith.constant 1.000000e+00 : f32
    %174 = vector.broadcast %cst_54 : f32 to vector<8x128xf32>
    %175 = arith.addf %174, %173 : vector<8x128xf32>
    %176 = arith.divf %174, %175 : vector<8x128xf32>
    %177 = vector.extract_strided_slice %164 {offsets = [0, 256], sizes = [8, 128], strides = [1, 1]} : vector<8x512xf32> to vector<8x128xf32>
    %178 = math.tanh %177 : vector<8x128xf32>
    %179 = vector.extract_strided_slice %164 {offsets = [0, 384], sizes = [8, 128], strides = [1, 1]} : vector<8x512xf32> to vector<8x128xf32>
    %180 = arith.negf %179 : vector<8x128xf32>
    %181 = math.exp %180 : vector<8x128xf32>
    %cst_55 = arith.constant 1.000000e+00 : f32
    %182 = vector.broadcast %cst_55 : f32 to vector<8x128xf32>
    %183 = arith.addf %182, %181 : vector<8x128xf32>
    %184 = arith.divf %182, %183 : vector<8x128xf32>
    %185 = arith.mulf %176, %129 : vector<8x128xf32>
    %186 = arith.mulf %170, %178 : vector<8x128xf32>
    %187 = arith.addf %185, %186 : vector<8x128xf32>
    %188 = math.tanh %187 : vector<8x128xf32>
    %189 = arith.mulf %184, %188 : vector<8x128xf32>
    %c3_56 = arith.constant 3 : index
    %c0_57 = arith.constant 0 : index
    %c0_58 = arith.constant 0 : index
    %190 = vector.load %arg1[%c3_56, %c0_57, %c0_58] : memref<4x8x512xf32, #tpu.memory_space<vmem>>, vector<1x8x512xf32>
    %191 = vector.shape_cast %190 : vector<1x8x512xf32> to vector<8x512xf32>
    %cst_59 = arith.constant dense<0.000000e+00> : vector<8x512xf32>
    %192 = tpu.matmul %160, %3, %cst_59 {dimension_numbers = #tpu.dot_dimension_numbers<[1], [0], [0], [1], [0, 0, 1, 1], [], []>} : vector<8x128xf32>, vector<128x512xf32>, vector<8x512xf32> -> vector<8x512xf32>
    %193 = arith.addf %191, %192 : vector<8x512xf32>
    %194 = vector.extract_strided_slice %193 {offsets = [0, 0], sizes = [8, 128], strides = [1, 1]} : vector<8x512xf32> to vector<8x128xf32>
    %195 = arith.negf %194 : vector<8x128xf32>
    %196 = math.exp %195 : vector<8x128xf32>
    %cst_60 = arith.constant 1.000000e+00 : f32
    %197 = vector.broadcast %cst_60 : f32 to vector<8x128xf32>
    %198 = arith.addf %197, %196 : vector<8x128xf32>
    %199 = arith.divf %197, %198 : vector<8x128xf32>
    %200 = vector.extract_strided_slice %193 {offsets = [0, 128], sizes = [8, 128], strides = [1, 1]} : vector<8x512xf32> to vector<8x128xf32>
    %201 = arith.negf %200 : vector<8x128xf32>
    %202 = math.exp %201 : vector<8x128xf32>
    %cst_61 = arith.constant 1.000000e+00 : f32
    %203 = vector.broadcast %cst_61 : f32 to vector<8x128xf32>
    %204 = arith.addf %203, %202 : vector<8x128xf32>
    %205 = arith.divf %203, %204 : vector<8x128xf32>
    %206 = vector.extract_strided_slice %193 {offsets = [0, 256], sizes = [8, 128], strides = [1, 1]} : vector<8x512xf32> to vector<8x128xf32>
    %207 = math.tanh %206 : vector<8x128xf32>
    %208 = vector.extract_strided_slice %193 {offsets = [0, 384], sizes = [8, 128], strides = [1, 1]} : vector<8x512xf32> to vector<8x128xf32>
    %209 = arith.negf %208 : vector<8x128xf32>
    %210 = math.exp %209 : vector<8x128xf32>
    %cst_62 = arith.constant 1.000000e+00 : f32
    %211 = vector.broadcast %cst_62 : f32 to vector<8x128xf32>
    %212 = arith.addf %211, %210 : vector<8x128xf32>
    %213 = arith.divf %211, %212 : vector<8x128xf32>
    %214 = arith.mulf %205, %158 : vector<8x128xf32>
    %215 = arith.mulf %199, %207 : vector<8x128xf32>
    %216 = arith.addf %214, %215 : vector<8x128xf32>
    %217 = math.tanh %216 : vector<8x128xf32>
    %218 = arith.mulf %213, %217 : vector<8x128xf32>
    %c0_63 = arith.constant 0 : index
    %c0_64 = arith.constant 0 : index
    %c0_65 = arith.constant 0 : index
    %219 = vector.load %arg2[%c0_63, %c0_64, %c0_65] : memref<4x8x512xf32, #tpu.memory_space<vmem>>, vector<1x8x512xf32>
    %220 = vector.shape_cast %219 : vector<1x8x512xf32> to vector<8x512xf32>
    %cst_66 = arith.constant dense<0.000000e+00> : vector<8x512xf32>
    %221 = tpu.matmul %189, %4, %cst_66 {dimension_numbers = #tpu.dot_dimension_numbers<[1], [0], [0], [1], [0, 0, 1, 1], [], []>} : vector<8x128xf32>, vector<128x512xf32>, vector<8x512xf32> -> vector<8x512xf32>
    %222 = arith.addf %220, %221 : vector<8x512xf32>
    %223 = vector.extract_strided_slice %222 {offsets = [0, 0], sizes = [8, 128], strides = [1, 1]} : vector<8x512xf32> to vector<8x128xf32>
    %224 = arith.negf %223 : vector<8x128xf32>
    %225 = math.exp %224 : vector<8x128xf32>
    %cst_67 = arith.constant 1.000000e+00 : f32
    %226 = vector.broadcast %cst_67 : f32 to vector<8x128xf32>
    %227 = arith.addf %226, %225 : vector<8x128xf32>
    %228 = arith.divf %226, %227 : vector<8x128xf32>
    %229 = vector.extract_strided_slice %222 {offsets = [0, 128], sizes = [8, 128], strides = [1, 1]} : vector<8x512xf32> to vector<8x128xf32>
    %230 = arith.negf %229 : vector<8x128xf32>
    %231 = math.exp %230 : vector<8x128xf32>
    %cst_68 = arith.constant 1.000000e+00 : f32
    %232 = vector.broadcast %cst_68 : f32 to vector<8x128xf32>
    %233 = arith.addf %232, %231 : vector<8x128xf32>
    %234 = arith.divf %232, %233 : vector<8x128xf32>
    %235 = vector.extract_strided_slice %222 {offsets = [0, 256], sizes = [8, 128], strides = [1, 1]} : vector<8x512xf32> to vector<8x128xf32>
    %236 = math.tanh %235 : vector<8x128xf32>
    %237 = vector.extract_strided_slice %222 {offsets = [0, 384], sizes = [8, 128], strides = [1, 1]} : vector<8x512xf32> to vector<8x128xf32>
    %238 = arith.negf %237 : vector<8x128xf32>
    %239 = math.exp %238 : vector<8x128xf32>
    %cst_69 = arith.constant 1.000000e+00 : f32
    %240 = vector.broadcast %cst_69 : f32 to vector<8x128xf32>
    %241 = arith.addf %240, %239 : vector<8x128xf32>
    %242 = arith.divf %240, %241 : vector<8x128xf32>
    %243 = arith.mulf %234, %187 : vector<8x128xf32>
    %244 = arith.mulf %228, %236 : vector<8x128xf32>
    %245 = arith.addf %243, %244 : vector<8x128xf32>
    %246 = math.tanh %245 : vector<8x128xf32>
    %247 = arith.mulf %242, %246 : vector<8x128xf32>
    %c0_70 = arith.constant 0 : index
    %c0_71 = arith.constant 0 : index
    %c0_72 = arith.constant 0 : index
    %248 = vector.load %arg9[%c0_70, %c0_71, %c0_72] : memref<2x8x128xf32, #tpu.memory_space<vmem>>, vector<1x8x128xf32>
    %249 = vector.shape_cast %248 : vector<1x8x128xf32> to vector<8x128xf32>
    %250 = vector.shape_cast %218 : vector<8x128xf32> to vector<1x8x128xf32>
    tpu.vector_store %arg9[%c0_70, %c0_71, %c0_72], %250 {strides = array<i32>} : memref<2x8x128xf32, #tpu.memory_space<vmem>>, vector<1x8x128xf32>,
    %c0_73 = arith.constant 0 : index
    %c0_74 = arith.constant 0 : index
    %c0_75 = arith.constant 0 : index
    %251 = vector.load %arg10[%c0_73, %c0_74, %c0_75] : memref<2x8x128xf32, #tpu.memory_space<vmem>>, vector<1x8x128xf32>
    %252 = vector.shape_cast %251 : vector<1x8x128xf32> to vector<8x128xf32>
    %253 = vector.shape_cast %216 : vector<8x128xf32> to vector<1x8x128xf32>
    tpu.vector_store %arg10[%c0_73, %c0_74, %c0_75], %253 {strides = array<i32>} : memref<2x8x128xf32, #tpu.memory_space<vmem>>, vector<1x8x128xf32>,
    %c1_76 = arith.constant 1 : index
    %c0_77 = arith.constant 0 : index
    %c0_78 = arith.constant 0 : index
    %254 = vector.load %arg9[%c1_76, %c0_77, %c0_78] : memref<2x8x128xf32, #tpu.memory_space<vmem>>, vector<1x8x128xf32>
    %255 = vector.shape_cast %254 : vector<1x8x128xf32> to vector<8x128xf32>
    %256 = vector.shape_cast %247 : vector<8x128xf32> to vector<1x8x128xf32>
    tpu.vector_store %arg9[%c1_76, %c0_77, %c0_78], %256 {strides = array<i32>} : memref<2x8x128xf32, #tpu.memory_space<vmem>>, vector<1x8x128xf32>,
    %c1_79 = arith.constant 1 : index
    %c0_80 = arith.constant 0 : index
    %c0_81 = arith.constant 0 : index
    %257 = vector.load %arg10[%c1_79, %c0_80, %c0_81] : memref<2x8x128xf32, #tpu.memory_space<vmem>>, vector<1x8x128xf32>
    %258 = vector.shape_cast %257 : vector<1x8x128xf32> to vector<8x128xf32>
    %259 = vector.shape_cast %245 : vector<8x128xf32> to vector<1x8x128xf32>
    tpu.vector_store %arg10[%c1_79, %c0_80, %c0_81], %259 {strides = array<i32>} : memref<2x8x128xf32, #tpu.memory_space<vmem>>, vector<1x8x128xf32>,
    %c1_i32 = arith.constant 1 : i32
    %260 = arith.cmpi eq, %arg0, %c1_i32 : i32
    %261 = arith.extui %260 : i1 to i32
    %c0_i32_82 = arith.constant 0 : i32
    %262 = arith.cmpi ne, %261, %c0_i32_82 : i32
    scf.if %262 {
      %c0_83 = arith.constant 0 : index
      %c0_84 = arith.constant 0 : index
      %263 = vector.load %arg5[%c0_83, %c0_84] : memref<128x128xf32, #tpu.memory_space<vmem>>, vector<128x128xf32>
      %cst_85 = arith.constant dense<0.000000e+00> : vector<8x128xf32>
      %264 = tpu.matmul %218, %263, %cst_85 {dimension_numbers = #tpu.dot_dimension_numbers<[1], [0], [0], [1], [0, 0, 1, 1], [], []>} : vector<8x128xf32>, vector<128x128xf32>, vector<8x128xf32> -> vector<8x128xf32>
      %c0_86 = arith.constant 0 : index
      %c0_87 = arith.constant 0 : index
      %265 = vector.load %arg11[%c0_86, %c0_87] : memref<8x128xf32, #tpu.memory_space<vmem>>, vector<8x128xf32>
      %c0_88 = arith.constant 0 : index
      %c0_89 = arith.constant 0 : index
      %266 = vector.load %arg6[%c0_88, %c0_89] : memref<128x128xf32, #tpu.memory_space<vmem>>, vector<128x128xf32>
      %cst_90 = arith.constant dense<0.000000e+00> : vector<8x128xf32>
      %267 = tpu.matmul %265, %266, %cst_90 {dimension_numbers = #tpu.dot_dimension_numbers<[1], [0], [0], [1], [0, 0, 1, 1], [], []>} : vector<8x128xf32>, vector<128x128xf32>, vector<8x128xf32> -> vector<8x128xf32>
      %268 = arith.addf %264, %267 : vector<8x128xf32>
      %c0_91 = arith.constant 0 : index
      %c0_92 = arith.constant 0 : index
      %269 = vector.load %arg7[%c0_91, %c0_92] : memref<1x128xf32, #tpu.memory_space<vmem>>, vector<1x128xf32>
      %270 = vector.broadcast %269 : vector<1x128xf32> to vector<8x128xf32>
      %271 = arith.addf %268, %270 : vector<8x128xf32>
      %cst_93 = arith.constant 0.000000e+00 : f32
      %272 = vector.broadcast %cst_93 : f32 to vector<8x128xf32>
      %273 = arith.maximumf %271, %272 : vector<8x128xf32>
      %c0_94 = arith.constant 0 : index
      %c0_95 = arith.constant 0 : index
      %274 = vector.load %arg8[%c0_94, %c0_95] : memref<8x128xf32, #tpu.memory_space<vmem>>, vector<8x128xf32>
      tpu.vector_store %arg8[%c0_94, %c0_95], %273 {strides = array<i32>} : memref<8x128xf32, #tpu.memory_space<vmem>>, vector<8x128xf32>,
    } else {
    }
    return
  }
  func.func @transform_0(%arg0: i32) -> (i32, i32, i32) {
    %c0_i32 = arith.constant 0 : i32
    %c0_i32_0 = arith.constant 0 : i32
    %c0_i32_1 = arith.constant 0 : i32
    return %arg0, %c0_i32, %c0_i32_0 : i32, i32, i32
  }
  func.func @transform_1(%arg0: i32) -> (i32, i32, i32) {
    %c1_i32 = arith.constant 1 : i32
    %0 = arith.subi %c1_i32, %arg0 : i32
    %c0_i32 = arith.constant 0 : i32
    %c0_i32_0 = arith.constant 0 : i32
    %c0_i32_1 = arith.constant 0 : i32
    return %0, %c0_i32, %c0_i32_0 : i32, i32, i32
  }
  func.func @transform_2(%arg0: i32) -> (i32, i32) {
    %c0_i32 = arith.constant 0 : i32
    %c0_i32_0 = arith.constant 0 : i32
    %c0_i32_1 = arith.constant 0 : i32
    return %c0_i32, %c0_i32_0 : i32, i32
  }
  func.func @transform_3(%arg0: i32) -> (i32, i32) {
    %c0_i32 = arith.constant 0 : i32
    %c0_i32_0 = arith.constant 0 : i32
    %c0_i32_1 = arith.constant 0 : i32
    return %c0_i32, %c0_i32_0 : i32, i32
  }
  func.func @transform_4(%arg0: i32) -> (i32, i32) {
    %c0_i32 = arith.constant 0 : i32
    %c0_i32_0 = arith.constant 0 : i32
    %c0_i32_1 = arith.constant 0 : i32
    return %c0_i32, %c0_i32_0 : i32, i32
  }
  func.func @transform_5(%arg0: i32) -> (i32, i32) {
    %c0_i32 = arith.constant 0 : i32
    %c0_i32_0 = arith.constant 0 : i32
    %c0_i32_1 = arith.constant 0 : i32
    return %c0_i32, %c0_i32_0 : i32, i32
  }
  func.func @transform_6(%arg0: i32) -> (i32, i32) {
    %c0_i32 = arith.constant 0 : i32
    %c0_i32_0 = arith.constant 0 : i32
    %c0_i32_1 = arith.constant 0 : i32
    return %c0_i32, %c0_i32_0 : i32, i32
  }
  func.func @transform_7(%arg0: i32) -> (i32, i32) {
    %c0_i32 = arith.constant 0 : i32
    %c0_i32_0 = arith.constant 0 : i32
    %c0_i32_1 = arith.constant 0 : i32
    return %c0_i32, %c0_i32_0 : i32, i32
  }
}

</mosaic_0001>

<bundles_post_ra>
// kernel: _lambda_.4
= control target key start
LH: loop header
LB: loop body
LE: loop exit
PB: predicated region body
PF: predicated region fallthrough
CT: control target
= control target key end

     0   :  { %11 = vsyncpa [#allocation5], 0  ;;  %s2786_s18 = smov 0   ;;  %s3515_s0 = inlined_call_operand.vmem [shape: f32[8,8,512], index: 0, kind: input, shape index: {}]   ;;  %s3516_s1 = inlined_call_operand.vmem [shape: f32[8,8,512], index: 1, kind: input, shape index: {}]   ;;  %s3517_s2 = inlined_call_operand.hbm [shape: f32[128,512], index: 2, kind: input, shape index: {}]   ;;  %s3518_s3 = inlined_call_operand.vmem [shape: f32[128,512], index: 3, kind: input, shape index: {}]   ;;  %s3519_s4 = inlined_call_operand.vmem [shape: f32[8,8,128], index: 4, kind: output, shape index: {0}]   ;;  %s3520_s5 = inlined_call_operand.vmem [shape: f32[8,8,128], index: 5, kind: output, shape index: {1}]  }
   0x1 LB: > { %s2792_s19 = sadd.s32 4294967295, %s2749_s18   ;;  %p1974_p0 = scmp.ge.s32.totalorder %s2749_s18, 1  ;;  %s2749_s18 = sphi %s2786_s18, %s17_s18  }
   0x2   : > { %p172_p1 = scmp.lt.s32.totalorder %s2749_s18, 3  ;;  %s2751_s20 = smov [#allocation4]  }
   0x3   : > { %s184_s21 = sshll.u32 %s2751_s20, 4  ;;  %p3521_p4 = scmp.eq.s32.totalorder %s2792_s19, 0  ;;  %s185_s21 = int_to_ptr.vmem [resolvable:$true] %s184_s21 }
   0x4   : > { %p2797_p3 = pnand %p1974_p0, %p172_p1  ;;  %s2711_s26 = scalar_lea.hbm %s3517_s2, 8192 }
   0x5   : > { %p2712_p7 = scmp.ne.s32.totalorder %s3517_s2, %s2711_s26  ;;  %p2718_p11 = scmp.lt.u32.totalorder %s2711_s26, %s3517_s2 }
   0x6   : > { %s3574_s22 = scalar_select %p2797_p3, 1, 0 }
   0x7   : > { %p2564_p5 = pneg %p2797_p3 }
   0x9   : > { %p2806_p6 = pnand %p3521_p4, %p2564_p5 }
   0xb   : > { %p2713_p8 = pneg %p2806_p6 }
   0xd   : > { %p2714_p9 = pnand %p2713_p8, %p2712_p7 }
   0xf   : > { %p2715_p10 = pneg %p2714_p9 }
  0x11   : > { %p2720_p12 = pnand %p2718_p11, %p2715_p10 }
  0x13   : > { %2723 = shalt.err (!%p2720_p12)
}
  0x14   : > { %s2724_s6 = scalar_lea.vmem %s185_s21, 8192  ;;  %p2732_p5 = scmp.lt.s32.totalorder %s185_s21, %s185_s21 }
  0x15   : > { %p2725_p13 = scmp.ne.s32.totalorder %s185_s21, %s2724_s6  ;;  %p2733_p2 = scmp.lt.s32.totalorder %s2724_s6, %s2724_s6 }
  0x17   : > { %p2727_p0 = pnand %p2725_p13, %p2713_p8  ;;  %p2734_p4 = por %p2733_p2, %p2732_p5 }
  0x19   : > { %p2728_p1 = pneg %p2727_p0 }
  0x1b   : > { %p2735_p3 = pnand %p2734_p4, %p2728_p1 }
  0x1d   : > { %2738 = shalt.err (!%p2735_p3)
}
  0x1e   : > { %s2752_s7 = smov 512   ;;  %s2753_s8 = smov 32  }
  0x1f   : > { %2567 = dma.hbm_to_vmem [thread:$0]  (!%p2806_p6), %s3517_s2, 8192, %s185_s21, [#allocation5], %s2752_s7, %s2752_s7, %s2753_s8  }
  0x20   : > { %p3576_p7 = scmp.ne.s32.totalorder %s3574_s22, 0 }
  0x22   : > { %225 = sbr.rel (%p3576_p7) target bundleno = 1160 (0x488), region = 36 }
  0x29   : > { %p3577_p9 = scmp.eq.s32.totalorder %s2792_s19, 0 }
  0x2b   : > { %2744 = dma.done.wait (%p3577_p9), [#allocation5], 8192   ;;  %p3578_p8 = pmov %p3577_p9 }
  0x2c   : > { %s1979_s11 = sshll.u32 %s2792_s19, 2  ;;  %s274_s12 = ssub.s32 1, %s2792_s19 }
  0x2d   : > { %2746 = vsyncadd (%p3578_p8), [#allocation5], 4294959104  ;;  %p268_p2 = scmp.lt.s32.totalorder %s1979_s11, 7  ;;  %s1982_s13 = sshll.u32 %s274_s12, 2 }
  0x2e   : > { %p276_p3 = scmp.lt.s32.totalorder %s1982_s13, 7  ;;  %p3579_p4 = scmp.ne.s32.totalorder %s2792_s19, 0 }
  0x2f   : > { %s3653_s11 = smov (!%p268_p2, %s1979_s11), 7  ;;  %v2754_v0 = vmov (!%p3579_p4), 0.0  }
  0x30   : > { %s3655_s13 = smov (!%p276_p3, %s1982_s13), 7  ;;  %s2046_s14 = sshll.u32 %s3653_s11, 5  ;;  %301 = vst [vmem:[#allocation2] sm:$0xff] (!%p3579_p4), %v2754_v0  ;;  %302 = vst [vmem:[#allocation2 + $0x8] sm:$0xff] (!%p3579_p4), %v2754_v0 }
  0x31   : > { %s1986_s15 = sshll.u32 %s3653_s11, 3  ;;  %s2837_s20 = scalar_lea.vmem %s3515_s0, %s2046_s14  ;;  %303 = vst [vmem:[#allocation3] sm:$0xff] (!%p3579_p4), %v2754_v0  ;;  %304 = vst [vmem:[#allocation3 + $0x8] sm:$0xff] (!%p3579_p4), %v2754_v0 }
  0x32   : > { %s2047_s21 = sshll.u32 %s3655_s13, 5  ;;  %s2847_s27 = scalar_lea.vmem %s3519_s4, %s1986_s15 }
  0x33   : > { %s2842_s24 = scalar_lea.vmem %s3516_s1, %s2047_s21  ;;  %s1988_s28 = sshll.u32 %s3655_s13, 3 }
  0x34   : > { %s2852_s6 = scalar_lea.vmem %s3520_s5, %s1988_s28  ;;  %300 = sbr.rel (%p3579_p4) target bundleno = 59 (0x3b), region = 44 }
  0x3b PF: > { %v306_v1 = vld [vmem:[#allocation4 + $0x8] sm:$0xff]  ;;  %v305_v3 = vld [vmem:[#allocation4] sm:$0xff]  ;;  %v3523_v8 = vmov 0.0   ;;  %v308_v20 = vld [vmem:[#allocation4 + $0x18] sm:$0xff] }
  0x3c   : > { %v310_v2 = vld [vmem:[#allocation4 + $0x28] sm:$0xff]  ;;  %v309_v5 = vld [vmem:[#allocation4 + $0x20] sm:$0xff]  ;;  %507 = vmatprep.mubr.f32.mxu0 %v3523_v8  ;;  %578 = vmatprep.mubr.f32.mxu1 %v3523_v8  ;;  %v312_v21 = vld [vmem:[#allocation4 + $0x38] sm:$0xff] }
  0x3d   : > { %v2856_v4 = vpack.c.bf16 %v310_v2, %v306_v1  ;;  %v314_v6 = vld [vmem:[#allocation4 + $0x48] sm:$0xff]  ;;  %v2860_v9 = vpack.c.bf16 %v309_v5, %v305_v3  ;;  %v313_v11 = vld [vmem:[#allocation4 + $0x40] sm:$0xff]  ;;  %v2871_v23 = vpack.c.bf16 %v312_v21, %v308_v20  ;;  %v307_v24 = vld [vmem:[#allocation4 + $0x10] sm:$0xff] }
  0x3e   : > { %v318_v7 = vld [vmem:[#allocation4 + $0x68] sm:$0xff]  ;;  %v317_v12 = vld [vmem:[#allocation4 + $0x60] sm:$0xff]  ;;  %v311_v25 = vld [vmem:[#allocation4 + $0x30] sm:$0xff] }
  0x3f   : > { %v2862_v10 = vpack.c.bf16 %v318_v7, %v314_v6  ;;  %v322_v13 = vld [vmem:[#allocation4 + $0x88] sm:$0xff]  ;;  %2049 = vmatprep.subr.bf16.mxu0 %v2856_v4  ;;  %v2866_v15 = vpack.c.bf16 %v317_v12, %v313_v11  ;;  %v321_v16 = vld [vmem:[#allocation4 + $0x80] sm:$0xff]  ;;  %v2873_v26 = vpack.c.bf16 %v311_v25, %v307_v24  ;;  %2081 = vmatprep.subr.bf16.mxu1 %v2871_v23  ;;  %v316_v28 = vld [vmem:[#allocation4 + $0x58] sm:$0xff] }
  0x40   : > { %v326_v14 = vld [vmem:[#allocation4 + $0xa8] sm:$0xff]  ;;  %2051 = vmatpush1.bf16.msra.mxu0 %v2860_v9  ;;  %v325_v17 = vld [vmem:[#allocation4 + $0xa0] sm:$0xff]  ;;  %v320_v29 = vld [vmem:[#allocation4 + $0x78] sm:$0xff] }
  0x41   : > { %2053 = vmatprep.subr.bf16.mxu0 %v2862_v10  ;;  %v2869_v18 = vpack.c.bf16 %v326_v14, %v322_v13  ;;  %v330_v19 = vld [vmem:[#allocation4 + $0xc8] sm:$0xff]  ;;  %v2876_v27 = vpack.c.bf16 %v325_v17, %v321_v16  ;;  %v315_v30 = vld [vmem:[#allocation4 + $0x50] sm:$0xff]  ;;  %v329_v32 = vld [vmem:[#allocation4 + $0xc0] sm:$0xff]  ;;  %2083 = vmatpush1.bf16.msra.mxu1 %v2873_v26  ;;  %v2883_v34 = vpack.c.bf16 %v320_v29, %v316_v28 }
  0x42   : > { %v334_v22 = vld [vmem:[#allocation4 + $0xe8] sm:$0xff]  ;;  %v333_v33 = vld [vmem:[#allocation4 + $0xe0] sm:$0xff]  ;;  %v319_v35 = vld [vmem:[#allocation4 + $0x70] sm:$0xff] }
  0x43   : > { %v2880_v31 = vpack.c.bf16 %v334_v22, %v330_v19  ;;  %v338_v36 = vld [vmem:[#allocation4 + $0x108] sm:$0xff]  ;;  %v2885_v38 = vpack.c.bf16 %v319_v35, %v315_v30  ;;  %v324_v39 = vld [vmem:[#allocation4 + $0x98] sm:$0xff]  ;;  %2085 = vmatprep.subr.bf16.mxu1 %v2883_v34  ;;  %v323_v41 = vld [vmem:[#allocation4 + $0x90] sm:$0xff]  ;;  %v2889_v43 = vpack.c.bf16 %v333_v33, %v329_v32 }
  0x44   : > { %2055 = vmatpush1.bf16.msra.mxu0 %v2866_v15  ;;  %v342_v37 = vld [vmem:[#allocation4 + $0x128] sm:$0xff]  ;;  %v328_v40 = vld [vmem:[#allocation4 + $0xb8] sm:$0xff]  ;;  %v327_v42 = vld [vmem:[#allocation4 + $0xb0] sm:$0xff] }
  0x45   : > { %2057 = vmatprep.subr.bf16.mxu0 %v2869_v18  ;;  %3580 = vst [vmem:[#allocation7_spill] sm:$0xff] %v2880_v31  ;;  %3581 = vst [vmem:[#allocation8_spill] sm:$0xff] %v2889_v43  ;;  %v337_v44 = vld [vmem:[#allocation4 + $0x100] sm:$0xff]  ;;  %v2891_v46 = vpack.c.bf16 %v328_v40, %v324_v39  ;;  %v2894_v47 = vpack.c.bf16 %v342_v37, %v338_v36  ;;  %2087 = vmatpush1.bf16.msra.mxu1 %v2885_v38  ;;  %v346_v48 = vld [vmem:[#allocation4 + $0x148] sm:$0xff] }
  0x46   : > { %v341_v45 = vld [vmem:[#allocation4 + $0x120] sm:$0xff]  ;;  %v2897_v49 = vpack.c.bf16 %v327_v42, %v323_v41  ;;  %v332_v50 = vld [vmem:[#allocation4 + $0xd8] sm:$0xff]  ;;  %v350_v52 = vld [vmem:[#allocation4 + $0x168] sm:$0xff] }
  0x47   : > { %3582 = vst [vmem:[#allocation9_spill] sm:$0xff] %v2894_v47  ;;  %v336_v51 = vld [vmem:[#allocation4 + $0xf8] sm:$0xff]  ;;  %2089 = vmatprep.subr.bf16.mxu1 %v2891_v46  ;;  %v331_v54 = vld [vmem:[#allocation4 + $0xd0] sm:$0xff]  ;;  %v2903_v56 = vpack.c.bf16 %v341_v45, %v337_v44  ;;  %v2906_v59 = vpack.c.bf16 %v350_v52, %v346_v48  ;;  %v345_v60 = vld [vmem:[#allocation4 + $0x140] sm:$0xff] }
  0x48   : > { %2059 = vmatpush1.bf16.msra.mxu0 %v2876_v27  ;;  %v2900_v53 = vpack.c.bf16 %v336_v51, %v332_v50  ;;  %v335_v55 = vld [vmem:[#allocation4 + $0xf0] sm:$0xff]  ;;  %v340_v57 = vld [vmem:[#allocation4 + $0x118] sm:$0xff]  ;;  %v349_v61 = vld [vmem:[#allocation4 + $0x160] sm:$0xff] }
  0x49   : > { %2061 = vmatprep.subr.bf16.mxu0 %v2880_v31  ;;  %3584 = vst [vmem:[#allocation11_spill] sm:$0xff] %v2903_v56  ;;  %v344_v58 = vld [vmem:[#allocation4 + $0x138] sm:$0xff]  ;;  %3585 = vst [vmem:[#allocation12_spill] sm:$0xff] %v2906_v59  ;;  %2091 = vmatpush1.bf16.msra.mxu1 %v2897_v49  ;;  %v354_v62 = vld [vmem:[#allocation4 + $0x188] sm:$0xff]  ;;  %v2909_v63 = vpack.c.bf16 %v335_v55, %v331_v54  ;;  %v2915_v7 = vpack.c.bf16 %v349_v61, %v345_v60 }
  0x4a   : > { %3583 = vst [vmem:[#allocation10_spill] sm:$0xff] %v2900_v53  ;;  %v358_v0 = vld [vmem:[#allocation4 + $0x1a8] sm:$0xff]  ;;  %2093 = vmatprep.subr.bf16.mxu1 %v2900_v53  ;;  %v2912_v1 = vpack.c.bf16 %v344_v58, %v340_v57  ;;  %v339_v2 = vld [vmem:[#allocation4 + $0x110] sm:$0xff]  ;;  %v348_v5 = vld [vmem:[#allocation4 + $0x158] sm:$0xff] }
  0x4b   : > { %3586 = vst [vmem:[#allocation13_spill] sm:$0xff] %v2909_v63  ;;  %v343_v3 = vld [vmem:[#allocation4 + $0x130] sm:$0xff]  ;;  %v352_v6 = vld [vmem:[#allocation4 + $0x178] sm:$0xff]  ;;  %3588 = vst [vmem:[#allocation15_spill] sm:$0xff] %v2915_v7  ;;  %v2918_v11 = vpack.c.bf16 %v358_v0, %v354_v62 }
  0x4c   : > { %2063 = vmatpush1.bf16.msra.mxu0 %v2889_v43  ;;  %3587 = vst [vmem:[#allocation14_spill] sm:$0xff] %v2912_v1  ;;  %v353_v12 = vld [vmem:[#allocation4 + $0x180] sm:$0xff]  ;;  %v362_v14 = vld [vmem:[#allocation4 + $0x1c8] sm:$0xff]  ;;  %v2921_v16 = vpack.c.bf16 %v343_v3, %v339_v2  ;;  %v2924_v19 = vpack.c.bf16 %v352_v6, %v348_v5  ;;  %v347_v20 = vld [vmem:[#allocation4 + $0x150] sm:$0xff] }
  0x4d   : > { %2065 = vmatprep.subr.bf16.mxu0 %v2894_v47  ;;  %3589 = vst [vmem:[#allocation16_spill] sm:$0xff] %v2918_v11  ;;  %v357_v13 = vld [vmem:[#allocation4 + $0x1a0] sm:$0xff]  ;;  %2095 = vmatpush1.bf16.msra.mxu1 %v2909_v63  ;;  %v366_v17 = vld [vmem:[#allocation4 + $0x1e8] sm:$0xff]  ;;  %v351_v21 = vld [vmem:[#allocation4 + $0x170] sm:$0xff] }
  0x4e   : > { %3590 = vst [vmem:[#allocation17_spill] sm:$0xff] %v2921_v16  ;;  %2097 = vmatprep.subr.bf16.mxu1 %v2912_v1  ;;  %3591 = vst [vmem:[#allocation18_spill] sm:$0xff] %v2924_v19  ;;  %v356_v22 = vld [vmem:[#allocation4 + $0x198] sm:$0xff]  ;;  %v2927_v25 = vpack.c.bf16 %v357_v13, %v353_v12  ;;  %v2930_v28 = vpack.c.bf16 %v366_v17, %v362_v14  ;;  %v361_v29 = vld [vmem:[#allocation4 + $0x1c0] sm:$0xff]  ;;  %v2936_v33 = vpack.c.bf16 %v351_v21, %v347_v20 }
  0x4f   : > { %v360_v24 = vld [vmem:[#allocation4 + $0x1b8] sm:$0xff]  ;;  %v365_v30 = vld [vmem:[#allocation4 + $0x1e0] sm:$0xff]  ;;  %v370_v32 = vld [vmem:[%s3518_s3 + $0x8] sm:$0xff] }
  0x50   : > { %2067 = vmatpush1.bf16.msra.mxu0 %v2903_v56  ;;  %3592 = vst [vmem:[#allocation19_spill] sm:$0xff] %v2927_v25  ;;  %3593 = vst [vmem:[#allocation20_spill] sm:$0xff] %v2930_v28  ;;  %v374_v35 = vld [vmem:[%s3518_s3 + $0x28] sm:$0xff]  ;;  %v2942_v36 = vpack.c.bf16 %v360_v24, %v356_v22  ;;  %v355_v37 = vld [vmem:[#allocation4 + $0x190] sm:$0xff]  ;;  %v2945_v42 = vpack.c.bf16 %v365_v30, %v361_v29 }
  0x51   : > { %2069 = vmatprep.subr.bf16.mxu0 %v2906_v59  ;;  %2099 = vmatpush1.bf16.msra.mxu1 %v2921_v16  ;;  %3594 = vst [vmem:[#allocation21_spill] sm:$0xff] %v2936_v33  ;;  %v359_v39 = vld [vmem:[#allocation4 + $0x1b0] sm:$0xff]  ;;  %v364_v40 = vld [vmem:[#allocation4 + $0x1d8] sm:$0xff]  ;;  %v2948_v44 = vpack.c.bf16 %v374_v35, %v370_v32  ;;  %v369_v45 = vld [vmem:[%s3518_s3] sm:$0xff] }
  0x52   : > { %2101 = vmatprep.subr.bf16.mxu1 %v2924_v19  ;;  %3595 = vst [vmem:[#allocation22_spill] sm:$0xff] %v2942_v36  ;;  %v368_v41 = vld [vmem:[#allocation4 + $0x1f8] sm:$0xff]  ;;  %3596 = vst [vmem:[#allocation23_spill] sm:$0xff] %v2945_v42  ;;  %v373_v48 = vld [vmem:[%s3518_s3 + $0x20] sm:$0xff]  ;;  %v2960_v51 = vpack.c.bf16 %v359_v39, %v355_v37 }
  0x53   : > { %3597 = vst [vmem:[#allocation24_spill] sm:$0xff] %v2948_v44  ;;  %v378_v50 = vld [vmem:[%s3518_s3 + $0x48] sm:$0xff]  ;;  %v2966_v54 = vpack.c.bf16 %v368_v41, %v364_v40  ;;  %v363_v55 = vld [vmem:[#allocation4 + $0x1d0] sm:$0xff]  ;;  %v372_v58 = vld [vmem:[%s3518_s3 + $0x18] sm:$0xff]  ;;  %v2975_v62 = vpack.c.bf16 %v373_v48, %v369_v45 }
  0x54   : > { %2071 = vmatpush1.bf16.msra.mxu0 %v2915_v7  ;;  %3598 = vst [vmem:[#allocation25_spill] sm:$0xff] %v2960_v51  ;;  %v382_v52 = vld [vmem:[%s3518_s3 + $0x68] sm:$0xff]  ;;  %v367_v57 = vld [vmem:[#allocation4 + $0x1f0] sm:$0xff]  ;;  %v376_v60 = vld [vmem:[%s3518_s3 + $0x38] sm:$0xff] }
  0x55   : > { %2073 = vmatprep.subr.bf16.mxu0 %v2918_v11  ;;  %2103 = vmatpush1.bf16.msra.mxu1 %v2936_v33  ;;  %3599 = vst [vmem:[#allocation26_spill] sm:$0xff] %v2966_v54  ;;  %v433_v61 = vld [vmem:[#allocation2] sm:$0xff]  ;;  %v2978_v0 = vpack.c.bf16 %v382_v52, %v378_v50  ;;  %v386_v5 = vld [vmem:[%s3518_s3 + $0x88] sm:$0xff]  ;;  %v2990_v6 = vpack.c.bf16 %v367_v57, %v363_v55  ;;  %v371_v14 = vld [vmem:[%s3518_s3 + $0x10] sm:$0xff] }
  0x56   : > { %2105 = vmatprep.subr.bf16.mxu1 %v2942_v36  ;;  %v377_v2 = vld [vmem:[%s3518_s3 + $0x40] sm:$0xff]  ;;  %v390_v12 = vld [vmem:[%s3518_s3 + $0xa8] sm:$0xff]  ;;  %v2996_v13 = vpack.c.bf16 %v376_v60, %v372_v58  ;;  %v375_v17 = vld [vmem:[%s3518_s3 + $0x30] sm:$0xff] }
  0x57   : > { %v381_v3 = vld [vmem:[%s3518_s3 + $0x60] sm:$0xff]  ;;  %3600 = vst [vmem:[#allocation27_spill] sm:$0xff] %v2990_v6  ;;  %v380_v20 = vld [vmem:[%s3518_s3 + $0x58] sm:$0xff]  ;;  %v3015_v24 = vpack.c.bf16 %v390_v12, %v386_v5  ;;  %v394_v32 = vld [vmem:[%s3518_s3 + $0xc8] sm:$0xff]  ;;  %v3027_v35 = vpack.c.bf16 %v375_v17, %v371_v14 }
  0x58   : > { %2075 = vmatpush1.bf16.msra.mxu0 %v2927_v25  ;;  %3601 = vst [vmem:[#allocation28_spill] sm:$0xff] %v2996_v13  ;;  %v384_v21 = vld [vmem:[%s3518_s3 + $0x78] sm:$0xff]  ;;  %v3011_v22 = vpack.c.bf16 %v381_v3, %v377_v2  ;;  %v385_v29 = vld [vmem:[%s3518_s3 + $0x80] sm:$0xff]  ;;  %v398_v37 = vld [vmem:[%s3518_s3 + $0xe8] sm:$0xff] }
  0x59   : > { %2077 = vmatprep.subr.bf16.mxu0 %v2930_v28  ;;  %2107 = vmatpush1.bf16.msra.mxu1 %v2960_v51  ;;  %v389_v30 = vld [vmem:[%s3518_s3 + $0xa0] sm:$0xff]  ;;  %v3033_v39 = vpack.c.bf16 %v384_v21, %v380_v20  ;;  %v379_v40 = vld [vmem:[%s3518_s3 + $0x50] sm:$0xff]  ;;  %v388_v45 = vld [vmem:[%s3518_s3 + $0x98] sm:$0xff]  ;;  %v3051_v52 = vpack.c.bf16 %v398_v37, %v394_v32 }
  0x5a   : > { %2109 = vmatprep.subr.bf16.mxu1 %v2966_v54  ;;  %v383_v41 = vld [vmem:[%s3518_s3 + $0x70] sm:$0xff]  ;;  %v392_v48 = vld [vmem:[%s3518_s3 + $0xb8] sm:$0xff]  ;;  %v3048_v50 = vpack.c.bf16 %v389_v30, %v385_v29  ;;  %v393_v55 = vld [vmem:[%s3518_s3 + $0xc0] sm:$0xff] }
  0x5b   : > { %v397_v57 = vld [vmem:[%s3518_s3 + $0xe0] sm:$0xff]  ;;  %v402_v58 = vld [vmem:[%s3518_s3 + $0x108] sm:$0xff]  ;;  %v3063_v60 = vpack.c.bf16 %v383_v41, %v379_v40  ;;  %v3069_v2 = vpack.c.bf16 %v392_v48, %v388_v45  ;;  %v387_v3 = vld [vmem:[%s3518_s3 + $0x90] sm:$0xff] }
  0x5c   : > { %2079 = vmatpush1.bf16.msra.mxu0 %v2945_v42  ;;  %v391_v5 = vld [vmem:[%s3518_s3 + $0xb0] sm:$0xff]  ;;  %v396_v12 = vld [vmem:[%s3518_s3 + $0xd8] sm:$0xff]  ;;  %v3085_v17 = vpack.c.bf16 %v397_v57, %v393_v55  ;;  %v401_v21 = vld [vmem:[%s3518_s3 + $0x100] sm:$0xff] }
  0x5d   : > { %2113 = vmatprep.subr.bf16.mxu0 %v2948_v44  ;;  %2111 = vmatpush1.bf16.msra.mxu1 %v2990_v6  ;;  %v400_v14 = vld [vmem:[%s3518_s3 + $0xf8] sm:$0xff]  ;;  %v405_v29 = vld [vmem:[%s3518_s3 + $0x120] sm:$0xff]  ;;  %v410_v30 = vld [vmem:[%s3518_s3 + $0x148] sm:$0xff]  ;;  %v3100_v32 = vpack.c.bf16 %v391_v5, %v387_v3 }
  0x5e   : > { %2145 = vmatprep.subr.bf16.mxu1 %v2996_v13  ;;  %v414_v37 = vld [vmem:[%s3518_s3 + $0x168] sm:$0xff]  ;;  %v3106_v40 = vpack.c.bf16 %v400_v14, %v396_v12  ;;  %v395_v41 = vld [vmem:[%s3518_s3 + $0xd0] sm:$0xff]  ;;  %v404_v48 = vld [vmem:[%s3518_s3 + $0x118] sm:$0xff]  ;;  %v3121_v57 = vpack.c.bf16 %v405_v29, %v401_v21 }
  0x5f   : > { %508 = vmatmul.mubr.f32.vlgmr.msra.gmra.mrb[0].mxu0 %v433_v61  ;;  %v399_v45 = vld [vmem:[%s3518_s3 + $0xf0] sm:$0xff]  ;;  %v408_v55 = vld [vmem:[%s3518_s3 + $0x138] sm:$0xff]  ;;  %v413_v3 = vld [vmem:[%s3518_s3 + $0x160] sm:$0xff] }
  0x60   : > { %2115 = vmatpush1.bf16.msra.mxu0 %v2975_v62  ;;  %682 = vmatprep.mubr.f32.mxu0 %v3523_v8  ;;  %3603 = vst [vmem:[#allocation30_spill] sm:$0xff] %v3121_v57  ;;  %v418_v5 = vld [vmem:[%s3518_s3 + $0x188] sm:$0xff]  ;;  %v3136_v12 = vpack.c.bf16 %v399_v45, %v395_v41  ;;  %v3142_v21 = vpack.c.bf16 %v408_v55, %v404_v48  ;;  %v403_v29 = vld [vmem:[%s3518_s3 + $0x110] sm:$0xff]  ;;  %v416_v41 = vld [vmem:[%s3518_s3 + $0x178] sm:$0xff] }
  0x61   : > { %2117 = vmatprep.subr.bf16.mxu0 %v2978_v0  ;;  %579 = vmatmul.mubr.f32.vlgmr.msra.gmra.mrb[0].mxu1 %v433_v61  ;;  %v406_v61 = vld [vmem:[%s3518_s3 + $0x128] sm:$0xff]  ;;  %v417_v55 = vld [vmem:[%s3518_s3 + $0x180] sm:$0xff] }
  0x62   : > { %2147 = vmatpush1.bf16.msra.mxu1 %v3027_v35  ;;  %753 = vmatprep.mubr.f32.mxu1 %v3523_v8  ;;  %v3088_v20 = vpack.c.bf16 %v406_v61, %v402_v58  ;;  %v3124_v58 = vpack.c.bf16 %v414_v37, %v410_v30  ;;  %v409_v61 = vld [vmem:[%s3518_s3 + $0x140] sm:$0xff]  ;;  %3605 = vst [vmem:[#allocation32_spill] sm:$0xff] %v3136_v12  ;;  %v422_v14 = vld [vmem:[%s3518_s3 + $0x1a8] sm:$0xff]  ;;  %3606 = vst [vmem:[#allocation33_spill] sm:$0xff] %v3142_v21 }
  0x63   : > { %2149 = vmatprep.subr.bf16.mxu1 %v3033_v39  ;;  %v407_v30 = vld [vmem:[%s3518_s3 + $0x130] sm:$0xff]  ;;  %v412_v37 = vld [vmem:[%s3518_s3 + $0x158] sm:$0xff]  ;;  %v3157_v45 = vpack.c.bf16 %v413_v3, %v409_v61  ;;  %v3160_v48 = vpack.c.bf16 %v422_v14, %v418_v5  ;;  %v421_v8 = vld [vmem:[%s3518_s3 + $0x1a0] sm:$0xff] }
  0x64   : > { %2119 = vmatpush1.bf16.msra.mxu0 %v3011_v22  ;;  %3602 = vst [vmem:[#allocation29_spill] sm:$0xff] %v3088_v20  ;;  %3604 = vst [vmem:[#allocation31_spill] sm:$0xff] %v3124_v58  ;;  %v3172_v61 = vpack.c.bf16 %v407_v30, %v403_v29  ;;  %v430_v3 = vld [vmem:[%s3518_s3 + $0x1e8] sm:$0xff]  ;;  %v3178_v5 = vpack.c.bf16 %v416_v41, %v412_v37  ;;  %v411_v14 = vld [vmem:[%s3518_s3 + $0x150] sm:$0xff]  ;;  %v3193_v37 = vpack.c.bf16 %v421_v8, %v417_v55 }
  0x65   : > { %2121 = vmatprep.subr.bf16.mxu0 %v3015_v24  ;;  %3607 = vst [vmem:[#allocation34_spill] sm:$0xff] %v3160_v48  ;;  %v420_v29 = vld [vmem:[%s3518_s3 + $0x198] sm:$0xff]  ;;  %v423_v55 = vld [vmem:[%s3518_s3 + $0x1b0] sm:$0xff] }
  0x66   : > { %2151 = vmatpush1.bf16.msra.mxu1 %v3063_v60  ;;  %v424_v30 = vld [vmem:[%s3518_s3 + $0x1b8] sm:$0xff]  ;;  %3608 = vst [vmem:[#allocation35_spill] sm:$0xff] %v3193_v37 }
  0x67   : > { %2153 = vmatprep.subr.bf16.mxu1 %v3069_v2  ;;  %v3208_v8 = vpack.c.bf16 %v424_v30, %v420_v29 }
  0x68   : > { %2123 = vmatpush1.bf16.msra.mxu0 %v3048_v50 }
  0x69   : > { %2125 = vmatprep.subr.bf16.mxu0 %v3051_v52 }
  0x6a   : > { %2155 = vmatpush1.bf16.msra.mxu1 %v3100_v32 }
  0x6b   : > { %2157 = vmatprep.subr.bf16.mxu1 %v3106_v40 }
  0x6c   : > { %2127 = vmatpush1.bf16.msra.mxu0 %v3085_v17 }
  0x6d   : > { %2129 = vmatprep.subr.bf16.mxu0 %v3088_v20  ;;  %v429_v20 = vld [vmem:[%s3518_s3 + $0x1e0] sm:$0xff] }
  0x6e   : > { %2159 = vmatpush1.bf16.msra.mxu1 %v3136_v12 }
  0x6f   : > { %2161 = vmatprep.subr.bf16.mxu1 %v3142_v21  ;;  %v425_v21 = vld [vmem:[%s3518_s3 + $0x1c0] sm:$0xff] }
  0x70   : > { %2131 = vmatpush1.bf16.msra.mxu0 %v3121_v57  ;;  %v426_v57 = vld [vmem:[%s3518_s3 + $0x1c8] sm:$0xff] }
  0x71   : > { %2133 = vmatprep.subr.bf16.mxu0 %v3124_v58  ;;  %v415_v58 = vld [vmem:[%s3518_s3 + $0x170] sm:$0xff]  ;;  %v3196_v41 = vpack.c.bf16 %v430_v3, %v426_v57  ;;  %v428_v3 = vld [vmem:[%s3518_s3 + $0x1d8] sm:$0xff] }
  0x72   : > { %2163 = vmatpush1.bf16.msra.mxu1 %v3172_v61  ;;  %v3205_v12 = vpack.c.bf16 %v415_v58, %v411_v14  ;;  %v419_v57 = vld [vmem:[%s3518_s3 + $0x190] sm:$0xff]  ;;  %v432_v58 = vld [vmem:[%s3518_s3 + $0x1f8] sm:$0xff]  ;;  %v3223_v14 = vpack.c.bf16 %v429_v20, %v425_v21  ;;  %v436_v20 = vld [vmem:[#allocation2 + $0x8] sm:$0xff] }
  0x73   : > { %2165 = vmatprep.subr.bf16.mxu1 %v3178_v5  ;;  %v3227_v29 = vpack.c.bf16 %v423_v55, %v419_v57  ;;  %v3230_v30 = vpack.c.bf16 %v432_v58, %v428_v3  ;;  %v3609_v57 = vmov 0.0  }
  0x74   : > { %2135 = vmatpush1.bf16.msra.mxu0 %v3157_v45 }
  0x75   : > { %2137 = vmatprep.subr.bf16.mxu0 %v3160_v48  ;;  %v427_v48 = vld [vmem:[%s3518_s3 + $0x1d0] sm:$0xff] }
  0x76   : > { %2167 = vmatpush1.bf16.msra.mxu1 %v3205_v12 }
  0x77   : > { %2169 = vmatprep.subr.bf16.mxu1 %v3208_v8 }
  0x78   : > { %2139 = vmatpush1.bf16.msra.mxu0 %v3193_v37  ;;  %v431_v37 = vld [vmem:[%s3518_s3 + $0x1f0] sm:$0xff] }
  0x79   : > { %2141 = vmatprep.subr.bf16.mxu0 %v3196_v41  ;;  %v3240_v21 = vpack.c.bf16 %v431_v37, %v427_v48  ;;  %v439_v48 = vld [vmem:[%s2837_s20] sm:$0xff]  ;;  %v440_v37 = vld [vmem:[%s2837_s20 + $0x8] sm:$0xff] }
  0x7a   : > { %2171 = vmatpush1.bf16.msra.mxu1 %v3227_v29 }
  0x7b   : > { %2173 = vmatprep.subr.bf16.mxu1 %v3230_v30 }
  0x7c   : > { %2143 = vmatpush1.bf16.msra.mxu0 %v3223_v14 }
  0x7d   : > { %2177 = vmatprep.subr.bf16.mxu0 %v2856_v4 }
  0x7e   : > { %2175 = vmatpush1.bf16.msra.mxu1 %v3240_v21 }
  0x7f   : > { %683 = vmatmul.mubr.f32.vlgmr.msra.gmra.mrb[2].mxu0 %v436_v20  ;;  %2209 = vmatprep.subr.bf16.mxu1 %v2871_v23 }
  0x80   : > { %2179 = vmatpush1.bf16.msra.mxu0 %v2860_v9  ;;  %860 = vmatprep.mubr.f32.mxu0 %v3609_v57 }
  0x81   : > { %2181 = vmatprep.subr.bf16.mxu0 %v2862_v10  ;;  %754 = vmatmul.mubr.f32.vlgmr.msra.gmra.mrb[2].mxu1 %v436_v20 }
  0x82   : > { %2211 = vmatpush1.bf16.msra.mxu1 %v2873_v26  ;;  %931 = vmatprep.mubr.f32.mxu1 %v3609_v57 }
  0x83   : > { %2213 = vmatprep.subr.bf16.mxu1 %v2883_v34 }
  0x84   : > { %2183 = vmatpush1.bf16.msra.mxu0 %v2866_v15 }
  0x85   : > { %2185 = vmatprep.subr.bf16.mxu0 %v2869_v18 }
  0x86   : > { %2215 = vmatpush1.bf16.msra.mxu1 %v2885_v38 }
  0x87   : > { %2217 = vmatprep.subr.bf16.mxu1 %v2891_v46 }
  0x88   : > { %2187 = vmatpush1.bf16.msra.mxu0 %v2876_v27 }
  0x89   : > { %2189 = vmatprep.subr.bf16.mxu0 %v2880_v31 }
  0x8a   : > { %2219 = vmatpush1.bf16.msra.mxu1 %v2897_v49 }
  0x8b   : > { %2221 = vmatprep.subr.bf16.mxu1 %v2900_v53 }
  0x8c   : > { %2191 = vmatpush1.bf16.msra.mxu0 %v2889_v43 }
  0x8d   : > { %2193 = vmatprep.subr.bf16.mxu0 %v2894_v47 }
  0x8e   : > { %2223 = vmatpush1.bf16.msra.mxu1 %v2909_v63 }
  0x8f   : > { %2225 = vmatprep.subr.bf16.mxu1 %v2912_v1 }
  0x90   : > { %2195 = vmatpush1.bf16.msra.mxu0 %v2903_v56 }
  0x91   : > { %2197 = vmatprep.subr.bf16.mxu0 %v2906_v59 }
  0x92   : > { %2227 = vmatpush1.bf16.msra.mxu1 %v2921_v16 }
  0x93   : > { %2229 = vmatprep.subr.bf16.mxu1 %v2924_v19 }
  0x94   : > { %2199 = vmatpush1.bf16.msra.mxu0 %v2915_v7 }
  0x95   : > { %2201 = vmatprep.subr.bf16.mxu0 %v2918_v11 }
  0x96   : > { %2231 = vmatpush1.bf16.msra.mxu1 %v2936_v33 }
  0x97   : > { %2233 = vmatprep.subr.bf16.mxu1 %v2942_v36 }
  0x98   : > { %2203 = vmatpush1.bf16.msra.mxu0 %v2927_v25 }
  0x99   : > { %2205 = vmatprep.subr.bf16.mxu0 %v2930_v28 }
  0x9a   : > { %2235 = vmatpush1.bf16.msra.mxu1 %v2960_v51 }
  0x9b   : > { %2237 = vmatprep.subr.bf16.mxu1 %v2966_v54  ;;  %v441_v54 = vld [vmem:[%s2837_s20 + $0x10] sm:$0xff] }
  0x9c   : > { %2207 = vmatpush1.bf16.msra.mxu0 %v2945_v42  ;;  %v442_v42 = vld [vmem:[%s2837_s20 + $0x18] sm:$0xff] }
  0x9d   : > { %2241 = vmatprep.subr.bf16.mxu0 %v2948_v44 }
  0x9e   : > { %2239 = vmatpush1.bf16.msra.mxu1 %v2990_v6 }
  0x9f   : > { %2273 = vmatprep.subr.bf16.mxu1 %v2996_v13 }
 0x132   : > { %v509_v55 = vpop.f32.mrb[0].mxu0 }
 0x133   : > { %v585_v3 = vadd.f32 %v509_v55, %v439_v48  ;;  %v511_v58 = vpop.f32.mrb[1].mxu0 }
 0x134   : > { %v586_v20 = vadd.f32 %v511_v58, %v440_v37  ;;  %v580_v51 = vpop.f32.mrb[0].mxu1 }
 0x135   : > { %v1990_v28 = vmul.f32 -1.442695, %v585_v3  ;;  %v582_v44 = vpop.f32.mrb[1].mxu1  ;;  %v587_v6 = vadd.f32 %v580_v51, %v441_v54  ;;  %v1993_v51 = vld [vmem:[%s2842_s24 + $0x60] sm:$0xff]  ;;  %v1994_v54 = vld [vmem:[%s2842_s24 + $0x68] sm:$0xff] }
 0x136   : > { %v1991_v25 = vmul.f32 -1.442695, %v586_v20  ;;  %v588_v36 = vadd.f32 %v582_v44, %v442_v42 }
 0x137   : > { %2583 = vpow2.f32 %v1990_v28  ;;  %v434_v28 = vld [vmem:[#allocation3] sm:$0xff] }
 0x138   : > { %2585 = vpow2.f32 %v1991_v25  ;;  %v1992_v11 = vmul.f32 -1.442695, %v588_v36 }
 0x13a   : > { %2587 = vpow2.f32 %v1992_v11 }
 0x13b   : > { %2589 = vtanh.f32 %v587_v6 }
 0x141   : > { %v2584_v33 = vpop.eup %2583 }
 0x142   : > { %v2586_v13 = vpop.eup %2585  ;;  %v592_v7 = vadd.f32 1.0, %v2584_v33 }
 0x143   : > { %v598_v48 = vadd.f32 1.0, %v2586_v13 }
 0x144   : > { %2591 = vrcp.f32 %v592_v7  ;;  %v2588_v37 = vpop.eup %2587 }
 0x145   : > { %2593 = vrcp.f32 %v598_v48  ;;  %v2590_v55 = vpop.eup %2589  ;;  %v605_v25 = vadd.f32 1.0, %v2588_v37  ;;  %v1996_v48 = vld [vmem:[%s2842_s24 + $0x78] sm:$0xff] }
 0x147   : > { %2595 = vrcp.f32 %v605_v25 }
 0x14e   : > { %v2592_v3 = vpop.eup %2591 }
 0x14f   : > { %v2594_v42 = vpop.eup %2593  ;;  %v609_v44 = vmul.f32 %v2592_v3, %v2590_v55  ;;  %v1995_v3 = vld [vmem:[%s2842_s24 + $0x70] sm:$0xff] }
 0x150   : > { %v608_v36 = vmul.f32 %v2594_v42, %v434_v28 }
 0x151   : > { %v2596_v42 = vpop.eup %2595 }
 0x152   : > { %v3286_v11 = vadd.f32 %v609_v44, %v608_v36  ;;  %v684_v33 = vpop.f32.mrb[2].mxu0 }
 0x153   : > { %v760_v6 = vadd.f32 %v1993_v51, %v684_v33  ;;  %v686_v13 = vpop.f32.mrb[3].mxu0 }
 0x154   : > { %2597 = vtanh.f32 %v3286_v11  ;;  %v761_v7 = vadd.f32 %v1994_v54, %v686_v13  ;;  %v755_v37 = vpop.f32.mrb[2].mxu1 }
 0x155   : > { %v1997_v58 = vmul.f32 -1.442695, %v760_v6  ;;  %v757_v55 = vpop.f32.mrb[3].mxu1  ;;  %v762_v25 = vadd.f32 %v1995_v3, %v755_v37  ;;  %v3612_v3 = vld [vmem:[#allocation33_spill] sm:$0xff] }
 0x156   : > { %v1998_v20 = vmul.f32 -1.442695, %v761_v7  ;;  %v763_v28 = vadd.f32 %v1996_v48, %v757_v55  ;;  %v438_v7 = vld [vmem:[#allocation3 + $0x8] sm:$0xff]  ;;  %v3610_v48 = vld [vmem:[#allocation32_spill] sm:$0xff] }
 0x157   : > { %2599 = vpow2.f32 %v1997_v58 }
 0x158   : > { %2601 = vpow2.f32 %v1998_v20  ;;  %v1999_v44 = vmul.f32 -1.442695, %v763_v28  ;;  %v3611_v28 = vld [vmem:[#allocation29_spill] sm:$0xff] }
 0x15a   : > { %2603 = vpow2.f32 %v1999_v44 }
 0x15b   : > { %2605 = vtanh.f32 %v762_v25  ;;  %v3614_v25 = vld [vmem:[#allocation31_spill] sm:$0xff] }
 0x15e   : > { %v2598_v36 = vpop.eup %2597 }
 0x15f   : > { %v612_v19 = vmul.f32 %v2598_v36, %v2596_v42  ;;  %v3613_v36 = vld [vmem:[#allocation30_spill] sm:$0xff] }
 0x161   : > { %v2600_v51 = vpop.eup %2599  ;;  %788 = vst [vmem:[%s2847_s27] sm:$0xff] %v612_v19  ;;  %861 = vmatmul.mubr.f32.vlgmr.msra.gmra.mrb[4].mxu0 %v612_v19  ;;  %932 = vmatmul.mubr.f32.vlgmr.msra.gmra.mrb[4].mxu1 %v612_v19 }
 0x162   : > { %v2602_v54 = vpop.eup %2601  ;;  %v767_v33 = vadd.f32 1.0, %v2600_v51  ;;  %2243 = vmatpush1.bf16.msra.mxu0 %v2975_v62  ;;  %2275 = vmatpush1.bf16.msra.mxu1 %v3027_v35  ;;  %v3615_v51 = vld [vmem:[#allocation34_spill] sm:$0xff] }
 0x163   : > { %v773_v6 = vadd.f32 1.0, %v2602_v54  ;;  %2245 = vmatprep.subr.bf16.mxu0 %v2978_v0  ;;  %2277 = vmatprep.subr.bf16.mxu1 %v3033_v39  ;;  %v3616_v54 = vld [vmem:[#allocation35_spill] sm:$0xff] }
 0x164   : > { %2607 = vrcp.f32 %v767_v33  ;;  %1035 = vmatprep.mubr.f32.mxu0 %v3609_v57  ;;  %1106 = vmatprep.mubr.f32.mxu1 %v3609_v57  ;;  %v2604_v19 = vpop.eup %2603 }
 0x165   : > { %2609 = vrcp.f32 %v773_v6  ;;  %v2606_v13 = vpop.eup %2605  ;;  %v780_v20 = vadd.f32 1.0, %v2604_v19 }
 0x166   : > { %2247 = vmatpush1.bf16.msra.mxu0 %v3011_v22  ;;  %2279 = vmatpush1.bf16.msra.mxu1 %v3063_v60 }
 0x167   : > { %2249 = vmatprep.subr.bf16.mxu0 %v3015_v24  ;;  %2281 = vmatprep.subr.bf16.mxu1 %v3069_v2  ;;  %2611 = vrcp.f32 %v780_v20  ;;  %v3620_v20 = vld [vmem:[#allocation16_spill] sm:$0xff] }
 0x16a   : > { %2251 = vmatpush1.bf16.msra.mxu0 %v3048_v50  ;;  %2283 = vmatpush1.bf16.msra.mxu1 %v3100_v32 }
 0x16b   : > { %2253 = vmatprep.subr.bf16.mxu0 %v3051_v52  ;;  %2285 = vmatprep.subr.bf16.mxu1 %v3106_v40 }
 0x16e   : > { %v2608_v58 = vpop.eup %2607  ;;  %2255 = vmatpush1.bf16.msra.mxu0 %v3085_v17  ;;  %2287 = vmatpush1.bf16.msra.mxu1 %v3610_v48 }
 0x16f   : > { %v2610_v37 = vpop.eup %2609  ;;  %v784_v55 = vmul.f32 %v2608_v58, %v2606_v13  ;;  %2257 = vmatprep.subr.bf16.mxu0 %v3611_v28  ;;  %2289 = vmatprep.subr.bf16.mxu1 %v3612_v3  ;;  %v3617_v13 = vld [vmem:[#allocation18_spill] sm:$0xff]  ;;  %v3619_v58 = vld [vmem:[#allocation21_spill] sm:$0xff] }
 0x170   : > { %v783_v42 = vmul.f32 %v2610_v37, %v438_v7  ;;  %v3618_v7 = vld [vmem:[#allocation15_spill] sm:$0xff]  ;;  %v3621_v37 = vld [vmem:[#allocation22_spill] sm:$0xff] }
 0x171   : > { %v2612_v33 = vpop.eup %2611 }
 0x172   : > { %v3310_v44 = vadd.f32 %v784_v55, %v783_v42  ;;  %2259 = vmatpush1.bf16.msra.mxu0 %v3613_v36  ;;  %2291 = vmatpush1.bf16.msra.mxu1 %v3172_v61  ;;  %v3622_v55 = vld [vmem:[#allocation19_spill] sm:$0xff]  ;;  %v3623_v42 = vld [vmem:[#allocation25_spill] sm:$0xff] }
 0x173   : > { %2261 = vmatprep.subr.bf16.mxu0 %v3614_v25  ;;  %2293 = vmatprep.subr.bf16.mxu1 %v3178_v5 }
 0x174   : > { %2613 = vtanh.f32 %v3310_v44 }
 0x176   : > { %2263 = vmatpush1.bf16.msra.mxu0 %v3157_v45  ;;  %2295 = vmatpush1.bf16.msra.mxu1 %v3205_v12 }
 0x177   : > { %2265 = vmatprep.subr.bf16.mxu0 %v3615_v51  ;;  %2297 = vmatprep.subr.bf16.mxu1 %v3208_v8 }
 0x17a   : > { %2267 = vmatpush1.bf16.msra.mxu0 %v3616_v54  ;;  %2299 = vmatpush1.bf16.msra.mxu1 %v3227_v29 }
 0x17b   : > { %2269 = vmatprep.subr.bf16.mxu0 %v3196_v41  ;;  %2301 = vmatprep.subr.bf16.mxu1 %v3230_v30 }
 0x17e   : > { %v2614_v6 = vpop.eup %2613  ;;  %2271 = vmatpush1.bf16.msra.mxu0 %v3223_v14  ;;  %2303 = vmatpush1.bf16.msra.mxu1 %v3240_v21 }
 0x17f   : > { %v787_v19 = vmul.f32 %v2614_v6, %v2612_v33  ;;  %2305 = vmatprep.subr.bf16.mxu0 %v2856_v4  ;;  %2337 = vmatprep.subr.bf16.mxu1 %v2871_v23  ;;  %v3624_v33 = vld [vmem:[#allocation20_spill] sm:$0xff]  ;;  %v3625_v6 = vld [vmem:[#allocation26_spill] sm:$0xff] }
 0x181   : > { %2000 = vst [vmem:[%s2852_s6 + $0x18] sm:$0xff] %v787_v19  ;;  %1036 = vmatmul.mubr.f32.vlgmr.msra.gmra.mrb[6].mxu0 %v787_v19  ;;  %1107 = vmatmul.mubr.f32.vlgmr.msra.gmra.mrb[6].mxu1 %v787_v19  ;;  %v3626_v19 = vld [vmem:[#allocation23_spill] sm:$0xff] }
 0x182   : > { %2307 = vmatpush1.bf16.msra.mxu0 %v2860_v9  ;;  %2339 = vmatpush1.bf16.msra.mxu1 %v2873_v26 }
 0x183   : > { %2309 = vmatprep.subr.bf16.mxu0 %v2862_v10  ;;  %2341 = vmatprep.subr.bf16.mxu1 %v2883_v34 }
 0x184   : > { %1214 = vmatprep.mubr.f32.mxu0 %v3609_v57  ;;  %1285 = vmatprep.mubr.f32.mxu1 %v3609_v57 }
 0x186   : > { %2311 = vmatpush1.bf16.msra.mxu0 %v2866_v15  ;;  %2343 = vmatpush1.bf16.msra.mxu1 %v2885_v38 }
 0x187   : > { %2313 = vmatprep.subr.bf16.mxu0 %v2869_v18  ;;  %2345 = vmatprep.subr.bf16.mxu1 %v2891_v46 }
 0x18a   : > { %2315 = vmatpush1.bf16.msra.mxu0 %v2876_v27  ;;  %2347 = vmatpush1.bf16.msra.mxu1 %v2897_v49 }
 0x18b   : > { %2317 = vmatprep.subr.bf16.mxu0 %v2880_v31  ;;  %2349 = vmatprep.subr.bf16.mxu1 %v2900_v53 }
 0x18e   : > { %2319 = vmatpush1.bf16.msra.mxu0 %v2889_v43  ;;  %2351 = vmatpush1.bf16.msra.mxu1 %v2909_v63 }
 0x18f   : > { %2321 = vmatprep.subr.bf16.mxu0 %v2894_v47  ;;  %2353 = vmatprep.subr.bf16.mxu1 %v2912_v1  ;;  %v2004_v47 = vld [vmem:[%s2837_s20 + $0x38] sm:$0xff] }
 0x192   : > { %2323 = vmatpush1.bf16.msra.mxu0 %v2903_v56  ;;  %2355 = vmatpush1.bf16.msra.mxu1 %v2921_v16 }
 0x193   : > { %2325 = vmatprep.subr.bf16.mxu0 %v2906_v59  ;;  %2357 = vmatprep.subr.bf16.mxu1 %v3617_v13  ;;  %v3627_v13 = vld [vmem:[#allocation27_spill] sm:$0xff] }
 0x196   : > { %2327 = vmatpush1.bf16.msra.mxu0 %v3618_v7  ;;  %2359 = vmatpush1.bf16.msra.mxu1 %v3619_v58  ;;  %v3628_v7 = vld [vmem:[#allocation24_spill] sm:$0xff] }
 0x197   : > { %2329 = vmatprep.subr.bf16.mxu0 %v3620_v20  ;;  %2361 = vmatprep.subr.bf16.mxu1 %v3621_v37  ;;  %v3629_v58 = vld [vmem:[#allocation28_spill] sm:$0xff]  ;;  %v2001_v20 = vld [vmem:[%s2837_s20 + $0x20] sm:$0xff] }
 0x198   : > { %v2002_v37 = vld [vmem:[%s2837_s20 + $0x28] sm:$0xff] }
 0x19a   : > { %2331 = vmatpush1.bf16.msra.mxu0 %v3622_v55  ;;  %2363 = vmatpush1.bf16.msra.mxu1 %v3623_v42 }
 0x19b   : > { %2333 = vmatprep.subr.bf16.mxu0 %v3624_v33  ;;  %2365 = vmatprep.subr.bf16.mxu1 %v3625_v6 }
 0x19e   : > { %2335 = vmatpush1.bf16.msra.mxu0 %v3626_v19  ;;  %2367 = vmatpush1.bf16.msra.mxu1 %v3627_v13  ;;  %v2003_v13 = vld [vmem:[%s2837_s20 + $0x30] sm:$0xff] }
 0x19f   : > { %2369 = vmatprep.subr.bf16.mxu0 %v3628_v7  ;;  %2401 = vmatprep.subr.bf16.mxu1 %v3629_v58 }
 0x234   : > { %v862_v59 = vpop.f32.mrb[4].mxu0  ;;  %v933_v55 = vpop.f32.mrb[4].mxu1 }
 0x235   : > { %v938_v16 = vadd.f32 %v2001_v20, %v862_v59  ;;  %v864_v42 = vpop.f32.mrb[5].mxu0  ;;  %v935_v56 = vpop.f32.mrb[5].mxu1  ;;  %v940_v7 = vadd.f32 %v2003_v13, %v933_v55  ;;  %v2009_v13 = vld [vmem:[%s2842_s24 + $0x48] sm:$0xff] }
 0x236   : > { %v939_v33 = vadd.f32 %v2002_v37, %v864_v42  ;;  %v941_v19 = vadd.f32 %v2004_v47, %v935_v56  ;;  %v2008_v56 = vld [vmem:[%s2842_s24 + $0x40] sm:$0xff] }
 0x237   : > { %v2005_v1 = vmul.f32 -1.442695, %v938_v16 }
 0x238   : > { %v2006_v6 = vmul.f32 -1.442695, %v939_v33  ;;  %v2007_v63 = vmul.f32 -1.442695, %v941_v19 }
 0x239   : > { %2615 = vpow2.f32 %v2005_v1 }
 0x23a   : > { %2617 = vpow2.f32 %v2006_v6 }
 0x23b   : > { %2619 = vpow2.f32 %v2007_v63 }
 0x23c   : > { %2621 = vtanh.f32 %v940_v7 }
 0x243   : > { %v2616_v43 = vpop.eup %2615 }
 0x244   : > { %v2618_v58 = vpop.eup %2617  ;;  %v945_v53 = vadd.f32 1.0, %v2616_v43 }
 0x245   : > { %v951_v59 = vadd.f32 1.0, %v2618_v58  ;;  %v2620_v20 = vpop.eup %2619 }
 0x246   : > { %2623 = vrcp.f32 %v945_v53  ;;  %v2622_v16 = vpop.eup %2621  ;;  %v958_v33 = vadd.f32 1.0, %v2620_v20  ;;  %v2011_v20 = vld [vmem:[%s2842_s24 + $0x58] sm:$0xff] }
 0x247   : > { %2625 = vrcp.f32 %v951_v59 }
 0x248   : > { %2627 = vrcp.f32 %v958_v33 }
 0x250   : > { %v2624_v37 = vpop.eup %2623 }
 0x251   : > { %v2626_v1 = vpop.eup %2625  ;;  %v962_v42 = vmul.f32 %v2624_v37, %v2622_v16  ;;  %v2010_v16 = vld [vmem:[%s2842_s24 + $0x50] sm:$0xff] }
 0x252   : > { %v961_v47 = vmul.f32 %v2626_v1, %v3286_v11  ;;  %v2628_v37 = vpop.eup %2627 }
 0x254   : > { %v3371_v55 = vadd.f32 %v962_v42, %v961_v47  ;;  %v1037_v43 = vpop.f32.mrb[6].mxu0  ;;  %v1108_v63 = vpop.f32.mrb[6].mxu1 }
 0x255   : > { %v1113_v7 = vadd.f32 %v2008_v56, %v1037_v43  ;;  %v1039_v53 = vpop.f32.mrb[7].mxu0  ;;  %v1110_v58 = vpop.f32.mrb[7].mxu1  ;;  %v1115_v47 = vadd.f32 %v2010_v16, %v1108_v63  ;;  %v3642_v16 = vld [vmem:[#allocation16_spill] sm:$0xff] }
 0x256   : > { %v1114_v6 = vadd.f32 %v2009_v13, %v1039_v53  ;;  %2629 = vtanh.f32 %v3371_v55  ;;  %v1116_v11 = vadd.f32 %v2011_v20, %v1110_v58 }
 0x257   : > { %v2012_v19 = vmul.f32 -1.442695, %v1113_v7 }
 0x258   : > { %v2013_v59 = vmul.f32 -1.442695, %v1114_v6  ;;  %v2014_v42 = vmul.f32 -1.442695, %v1116_v11 }
 0x259   : > { %2631 = vpow2.f32 %v2012_v19 }
 0x25a   : > { %2633 = vpow2.f32 %v2013_v59 }
 0x25b   : > { %2635 = vpow2.f32 %v2014_v42  ;;  %v3645_v42 = vld [vmem:[#allocation25_spill] sm:$0xff] }
 0x25c   : > { %2637 = vtanh.f32 %v1115_v47  ;;  %v3646_v47 = vld [vmem:[#allocation20_spill] sm:$0xff] }
 0x260   : > { %v2630_v1 = vpop.eup %2629 }
 0x261   : > { %v965_v31 = vmul.f32 %v2630_v1, %v2628_v37  ;;  %v3643_v37 = vld [vmem:[#allocation22_spill] sm:$0xff]  ;;  %v3644_v1 = vld [vmem:[#allocation19_spill] sm:$0xff] }
 0x263   : > { %v2632_v33 = vpop.eup %2631  ;;  %2015 = vst [vmem:[%s2847_s27 + $0x8] sm:$0xff] %v965_v31  ;;  %1215 = vmatmul.mubr.f32.vlgmr.msra.gmra.mrb[8].mxu0 %v965_v31  ;;  %1286 = vmatmul.mubr.f32.vlgmr.msra.gmra.mrb[8].mxu1 %v965_v31 }
 0x264   : > { %v2634_v56 = vpop.eup %2633  ;;  %v1120_v13 = vadd.f32 1.0, %v2632_v33  ;;  %2371 = vmatpush1.bf16.msra.mxu0 %v2975_v62  ;;  %2403 = vmatpush1.bf16.msra.mxu1 %v3027_v35  ;;  %v3647_v33 = vld [vmem:[#allocation26_spill] sm:$0xff] }
 0x265   : > { %v1126_v43 = vadd.f32 1.0, %v2634_v56  ;;  %2373 = vmatprep.subr.bf16.mxu0 %v2978_v0  ;;  %2405 = vmatprep.subr.bf16.mxu1 %v3033_v39  ;;  %v2636_v31 = vpop.eup %2635  ;;  %v3648_v56 = vld [vmem:[#allocation23_spill] sm:$0xff] }
 0x266   : > { %2639 = vrcp.f32 %v1120_v13  ;;  %1389 = vmatprep.mubr.f32.mxu0 %v3609_v57  ;;  %1460 = vmatprep.mubr.f32.mxu1 %v3609_v57  ;;  %v2638_v63 = vpop.eup %2637  ;;  %v1133_v6 = vadd.f32 1.0, %v2636_v31  ;;  %v3649_v13 = vld [vmem:[#allocation27_spill] sm:$0xff]  ;;  %v3651_v31 = vld [vmem:[#allocation28_spill] sm:$0xff] }
 0x267   : > { %2641 = vrcp.f32 %v1126_v43  ;;  %v3650_v43 = vld [vmem:[#allocation24_spill] sm:$0xff] }
 0x268   : > { %2375 = vmatpush1.bf16.msra.mxu0 %v3011_v22  ;;  %2407 = vmatpush1.bf16.msra.mxu1 %v3063_v60  ;;  %2643 = vrcp.f32 %v1133_v6 }
 0x269   : > { %2377 = vmatprep.subr.bf16.mxu0 %v3015_v24  ;;  %2409 = vmatprep.subr.bf16.mxu1 %v3069_v2 }
 0x26c   : > { %2379 = vmatpush1.bf16.msra.mxu0 %v3048_v50  ;;  %2411 = vmatpush1.bf16.msra.mxu1 %v3100_v32 }
 0x26d   : > { %2381 = vmatprep.subr.bf16.mxu0 %v3051_v52  ;;  %2413 = vmatprep.subr.bf16.mxu1 %v3106_v40 }
 0x270   : > { %v2640_v7 = vpop.eup %2639  ;;  %2383 = vmatpush1.bf16.msra.mxu0 %v3085_v17  ;;  %2415 = vmatpush1.bf16.msra.mxu1 %v3610_v48 }
 0x271   : > { %v2642_v53 = vpop.eup %2641  ;;  %v1137_v58 = vmul.f32 %v2640_v7, %v2638_v63  ;;  %2385 = vmatprep.subr.bf16.mxu0 %v3611_v28  ;;  %2417 = vmatprep.subr.bf16.mxu1 %v3612_v3  ;;  %v2017_v63 = vld [vmem:[%s2837_s20 + $0x40] sm:$0xff]  ;;  %v2018_v7 = vld [vmem:[%s2837_s20 + $0x48] sm:$0xff] }
 0x272   : > { %v1136_v19 = vmul.f32 %v2642_v53, %v3310_v44  ;;  %v2644_v44 = vpop.eup %2643 }
 0x274   : > { %v3396_v59 = vadd.f32 %v1137_v58, %v1136_v19  ;;  %2387 = vmatpush1.bf16.msra.mxu0 %v3613_v36  ;;  %2419 = vmatpush1.bf16.msra.mxu1 %v3172_v61 }
 0x275   : > { %2389 = vmatprep.subr.bf16.mxu0 %v3614_v25  ;;  %2421 = vmatprep.subr.bf16.mxu1 %v3178_v5 }
 0x276   : > { %2645 = vtanh.f32 %v3396_v59 }
 0x278   : > { %2391 = vmatpush1.bf16.msra.mxu0 %v3157_v45  ;;  %2423 = vmatpush1.bf16.msra.mxu1 %v3205_v12 }
 0x279   : > { %2393 = vmatprep.subr.bf16.mxu0 %v3615_v51  ;;  %2425 = vmatprep.subr.bf16.mxu1 %v3208_v8 }
 0x27c   : > { %2395 = vmatpush1.bf16.msra.mxu0 %v3616_v54  ;;  %2427 = vmatpush1.bf16.msra.mxu1 %v3227_v29 }
 0x27d   : > { %2397 = vmatprep.subr.bf16.mxu0 %v3196_v41  ;;  %2429 = vmatprep.subr.bf16.mxu1 %v3230_v30 }
 0x280   : > { %v2646_v20 = vpop.eup %2645  ;;  %2399 = vmatpush1.bf16.msra.mxu0 %v3223_v14  ;;  %2431 = vmatpush1.bf16.msra.mxu1 %v3240_v21 }
 0x281   : > { %v1140_v11 = vmul.f32 %v2646_v20, %v2644_v44  ;;  %2433 = vmatprep.subr.bf16.mxu0 %v2856_v4  ;;  %2465 = vmatprep.subr.bf16.mxu1 %v2871_v23  ;;  %v3630_v4 = vld [vmem:[#allocation7_spill] sm:$0xff]  ;;  %v3633_v23 = vld [vmem:[#allocation13_spill] sm:$0xff] }
 0x283   : > { %2016 = vst [vmem:[%s2852_s6 + $0x10] sm:$0xff] %v1140_v11  ;;  %1390 = vmatmul.mubr.f32.vlgmr.msra.gmra.mrb[10].mxu0 %v1140_v11  ;;  %1461 = vmatmul.mubr.f32.vlgmr.msra.gmra.mrb[10].mxu1 %v1140_v11 }
 0x284   : > { %2435 = vmatpush1.bf16.msra.mxu0 %v2860_v9  ;;  %2467 = vmatpush1.bf16.msra.mxu1 %v2873_v26  ;;  %v3631_v9 = vld [vmem:[#allocation10_spill] sm:$0xff]  ;;  %v3634_v26 = vld [vmem:[#allocation9_spill] sm:$0xff] }
 0x285   : > { %2437 = vmatprep.subr.bf16.mxu0 %v2862_v10  ;;  %2469 = vmatprep.subr.bf16.mxu1 %v2883_v34  ;;  %v3632_v10 = vld [vmem:[#allocation8_spill] sm:$0xff]  ;;  %v3636_v34 = vld [vmem:[#allocation11_spill] sm:$0xff] }
 0x286   : > { %1568 = vmatprep.mubr.f32.mxu0 %v3609_v57  ;;  %1639 = vmatprep.mubr.f32.mxu1 %v3609_v57 }
 0x288   : > { %2439 = vmatpush1.bf16.msra.mxu0 %v2866_v15  ;;  %2471 = vmatpush1.bf16.msra.mxu1 %v2885_v38  ;;  %v3635_v15 = vld [vmem:[#allocation14_spill] sm:$0xff] }
 0x289   : > { %2441 = vmatprep.subr.bf16.mxu0 %v2869_v18  ;;  %2473 = vmatprep.subr.bf16.mxu1 %v2891_v46  ;;  %v3637_v18 = vld [vmem:[#allocation17_spill] sm:$0xff]  ;;  %v3639_v38 = vld [vmem:[#allocation18_spill] sm:$0xff]  ;;  %v3640_v46 = vld [vmem:[#allocation15_spill] sm:$0xff] }
 0x28c   : > { %2443 = vmatpush1.bf16.msra.mxu0 %v2876_v27  ;;  %2475 = vmatpush1.bf16.msra.mxu1 %v2897_v49  ;;  %v3638_v27 = vld [vmem:[#allocation12_spill] sm:$0xff]  ;;  %v3641_v49 = vld [vmem:[#allocation21_spill] sm:$0xff] }
 0x28d   : > { %2445 = vmatprep.subr.bf16.mxu0 %v3630_v4  ;;  %2477 = vmatprep.subr.bf16.mxu1 %v3631_v9  ;;  %v2020_v9 = vld [vmem:[%s2837_s20 + $0x58] sm:$0xff] }
 0x290   : > { %2447 = vmatpush1.bf16.msra.mxu0 %v3632_v10  ;;  %2479 = vmatpush1.bf16.msra.mxu1 %v3633_v23  ;;  %v2019_v23 = vld [vmem:[%s2837_s20 + $0x50] sm:$0xff] }
 0x291   : > { %2449 = vmatprep.subr.bf16.mxu0 %v3634_v26  ;;  %2481 = vmatprep.subr.bf16.mxu1 %v3635_v15 }
 0x294   : > { %2451 = vmatpush1.bf16.msra.mxu0 %v3636_v34  ;;  %2483 = vmatpush1.bf16.msra.mxu1 %v3637_v18 }
 0x295   : > { %2453 = vmatprep.subr.bf16.mxu0 %v3638_v27  ;;  %2485 = vmatprep.subr.bf16.mxu1 %v3639_v38 }
 0x298   : > { %2455 = vmatpush1.bf16.msra.mxu0 %v3640_v46  ;;  %2487 = vmatpush1.bf16.msra.mxu1 %v3641_v49 }
 0x299   : > { %2457 = vmatprep.subr.bf16.mxu0 %v3642_v16  ;;  %2489 = vmatprep.subr.bf16.mxu1 %v3643_v37 }
 0x29c   : > { %2459 = vmatpush1.bf16.msra.mxu0 %v3644_v1  ;;  %2491 = vmatpush1.bf16.msra.mxu1 %v3645_v42 }
 0x29d   : > { %2461 = vmatprep.subr.bf16.mxu0 %v3646_v47  ;;  %2493 = vmatprep.subr.bf16.mxu1 %v3647_v33  ;;  %v2024_v33 = vld [vmem:[%s2842_s24 + $0x20] sm:$0xff] }
 0x2a0   : > { %2463 = vmatpush1.bf16.msra.mxu0 %v3648_v56  ;;  %2495 = vmatpush1.bf16.msra.mxu1 %v3649_v13  ;;  %v2025_v56 = vld [vmem:[%s2842_s24 + $0x28] sm:$0xff] }
 0x2a1   : > { %2497 = vmatprep.subr.bf16.mxu0 %v3650_v43  ;;  %2529 = vmatprep.subr.bf16.mxu1 %v3651_v31 }
 0x336   : > { %v1216_v53 = vpop.f32.mrb[8].mxu0  ;;  %v1287_v58 = vpop.f32.mrb[8].mxu1 }
 0x337   : > { %v1292_v6 = vadd.f32 %v2017_v63, %v1216_v53  ;;  %v1218_v19 = vpop.f32.mrb[9].mxu0  ;;  %v1289_v44 = vpop.f32.mrb[9].mxu1  ;;  %v1294_v15 = vadd.f32 %v2019_v23, %v1287_v58 }
 0x338   : > { %v1293_v20 = vadd.f32 %v2018_v7, %v1218_v19  ;;  %v1295_v10 = vadd.f32 %v2020_v9, %v1289_v44  ;;  %v2027_v44 = vld [vmem:[%s2842_s24 + $0x38] sm:$0xff] }
 0x339   : > { %v2021_v11 = vmul.f32 -1.442695, %v1292_v6 }
 0x33a   : > { %v2022_v4 = vmul.f32 -1.442695, %v1293_v20  ;;  %v2023_v26 = vmul.f32 -1.442695, %v1295_v10  ;;  %v2026_v20 = vld [vmem:[%s2842_s24 + $0x30] sm:$0xff] }
 0x33b   : > { %2647 = vpow2.f32 %v2021_v11 }
 0x33c   : > { %2649 = vpow2.f32 %v2022_v4 }
 0x33d   : > { %2651 = vpow2.f32 %v2023_v26 }
 0x33e   : > { %2653 = vtanh.f32 %v1294_v15 }
 0x345   : > { %v2648_v34 = vpop.eup %2647 }
 0x346   : > { %v2650_v18 = vpop.eup %2649  ;;  %v1299_v27 = vadd.f32 1.0, %v2648_v34 }
 0x347   : > { %v1305_v38 = vadd.f32 1.0, %v2650_v18  ;;  %v2652_v46 = vpop.eup %2651 }
 0x348   : > { %2655 = vrcp.f32 %v1299_v27  ;;  %v2654_v49 = vpop.eup %2653  ;;  %v1312_v42 = vadd.f32 1.0, %v2652_v46 }
 0x349   : > { %2657 = vrcp.f32 %v1305_v38 }
 0x34a   : > { %2659 = vrcp.f32 %v1312_v42 }
 0x352   : > { %v2656_v16 = vpop.eup %2655 }
 0x353   : > { %v2658_v37 = vpop.eup %2657  ;;  %v1316_v1 = vmul.f32 %v2656_v16, %v2654_v49 }
 0x354   : > { %v1315_v47 = vmul.f32 %v2658_v37, %v3371_v55  ;;  %v2660_v11 = vpop.eup %2659  ;;  %v1674_v37 = vld [vmem:[%s2842_s24] sm:$0xff] }
 0x356   : > { %v3457_v13 = vadd.f32 %v1316_v1, %v1315_v47  ;;  %v1391_v43 = vpop.f32.mrb[10].mxu0  ;;  %v1462_v31 = vpop.f32.mrb[10].mxu1  ;;  %v1675_v1 = vld [vmem:[%s2842_s24 + $0x8] sm:$0xff] }
 0x357   : > { %v1467_v63 = vadd.f32 %v2024_v33, %v1391_v43  ;;  %v1393_v7 = vpop.f32.mrb[11].mxu0  ;;  %v1464_v53 = vpop.f32.mrb[11].mxu1  ;;  %v1469_v10 = vadd.f32 %v2026_v20, %v1462_v31 }
 0x358   : > { %v1468_v58 = vadd.f32 %v2025_v56, %v1393_v7  ;;  %2661 = vtanh.f32 %v3457_v13  ;;  %v1470_v55 = vadd.f32 %v2027_v44, %v1464_v53 }
 0x359   : > { %v2028_v6 = vmul.f32 -1.442695, %v1467_v63 }
 0x35a   : > { %v2029_v19 = vmul.f32 -1.442695, %v1468_v58  ;;  %v2030_v9 = vmul.f32 -1.442695, %v1470_v55  ;;  %v1677_v58 = vld [vmem:[%s2842_s24 + $0x18] sm:$0xff] }
 0x35b   : > { %2663 = vpow2.f32 %v2028_v6  ;;  %v1676_v6 = vld [vmem:[%s2842_s24 + $0x10] sm:$0xff] }
 0x35c   : > { %2665 = vpow2.f32 %v2029_v19 }
 0x35d   : > { %2667 = vpow2.f32 %v2030_v9 }
 0x35e   : > { %2669 = vtanh.f32 %v1469_v10 }
 0x362   : > { %v2662_v4 = vpop.eup %2661 }
 0x363   : > { %v1319_v23 = vmul.f32 %v2662_v4, %v2660_v11 }
 0x365   : > { %v2664_v26 = vpop.eup %2663  ;;  %2031 = vst [vmem:[%s2847_s27 + $0x10] sm:$0xff] %v1319_v23  ;;  %1569 = vmatmul.mubr.f32.vlgmr.msra.gmra.mrb[12].mxu0 %v1319_v23  ;;  %1640 = vmatmul.mubr.f32.vlgmr.msra.gmra.mrb[12].mxu1 %v1319_v23 }
 0x366   : > { %v2666_v15 = vpop.eup %2665  ;;  %v1474_v34 = vadd.f32 1.0, %v2664_v26  ;;  %2499 = vmatpush1.bf16.msra.mxu0 %v2975_v62  ;;  %2531 = vmatpush1.bf16.msra.mxu1 %v3027_v35 }
 0x367   : > { %v1480_v18 = vadd.f32 1.0, %v2666_v15  ;;  %2501 = vmatprep.subr.bf16.mxu0 %v2978_v0  ;;  %2533 = vmatprep.subr.bf16.mxu1 %v3033_v39  ;;  %v2668_v62 = vpop.eup %2667 }
 0x368   : > { %2671 = vrcp.f32 %v1474_v34  ;;  %1742 = vmatprep.mubr.f32.mxu0 %v3609_v57  ;;  %1813 = vmatprep.mubr.f32.mxu1 %v3609_v57  ;;  %v2670_v0 = vpop.eup %2669  ;;  %v2035_v57 = vld [vmem:[%s2837_s20 + $0x70] sm:$0xff] }
 0x369   : > { %2673 = vrcp.f32 %v1480_v18 }
 0x36a   : > { %2503 = vmatpush1.bf16.msra.mxu0 %v3011_v22  ;;  %2535 = vmatpush1.bf16.msra.mxu1 %v3063_v60 }
 0x36b   : > { %2505 = vmatprep.subr.bf16.mxu0 %v3015_v24  ;;  %2537 = vmatprep.subr.bf16.mxu1 %v3069_v2  ;;  %v1487_v24 = vadd.f32 1.0, %v2668_v62 }
 0x36d   : > { %2675 = vrcp.f32 %v1487_v24 }
 0x36e   : > { %2507 = vmatpush1.bf16.msra.mxu0 %v3048_v50  ;;  %2539 = vmatpush1.bf16.msra.mxu1 %v3100_v32  ;;  %v2033_v32 = vld [vmem:[%s2837_s20 + $0x60] sm:$0xff] }
 0x36f   : > { %2509 = vmatprep.subr.bf16.mxu0 %v3051_v52  ;;  %2541 = vmatprep.subr.bf16.mxu1 %v3106_v40  ;;  %v2034_v40 = vld [vmem:[%s2837_s20 + $0x68] sm:$0xff] }
 0x372   : > { %v2672_v35 = vpop.eup %2671  ;;  %2511 = vmatpush1.bf16.msra.mxu0 %v3085_v17  ;;  %2543 = vmatpush1.bf16.msra.mxu1 %v3610_v48 }
 0x373   : > { %v2674_v22 = vpop.eup %2673  ;;  %v1491_v39 = vmul.f32 %v2672_v35, %v2670_v0  ;;  %2513 = vmatprep.subr.bf16.mxu0 %v3611_v28  ;;  %2545 = vmatprep.subr.bf16.mxu1 %v3612_v3 }
 0x374   : > { %v1490_v50 = vmul.f32 %v2674_v22, %v3396_v59 }
 0x376   : > { %v3482_v60 = vadd.f32 %v1491_v39, %v1490_v50  ;;  %2515 = vmatpush1.bf16.msra.mxu0 %v3613_v36  ;;  %2547 = vmatpush1.bf16.msra.mxu1 %v3172_v61 }
 0x377   : > { %2517 = vmatprep.subr.bf16.mxu0 %v3614_v25  ;;  %2549 = vmatprep.subr.bf16.mxu1 %v3178_v5  ;;  %v2676_v52 = vpop.eup %2675 }
 0x378   : > { %2677 = vtanh.f32 %v3482_v60 }
 0x37a   : > { %2519 = vmatpush1.bf16.msra.mxu0 %v3157_v45  ;;  %2551 = vmatpush1.bf16.msra.mxu1 %v3205_v12 }
 0x37b   : > { %2521 = vmatprep.subr.bf16.mxu0 %v3615_v51  ;;  %2553 = vmatprep.subr.bf16.mxu1 %v3208_v8 }
 0x37e   : > { %2523 = vmatpush1.bf16.msra.mxu0 %v3616_v54  ;;  %2555 = vmatpush1.bf16.msra.mxu1 %v3227_v29 }
 0x37f   : > { %2525 = vmatprep.subr.bf16.mxu0 %v3196_v41  ;;  %2557 = vmatprep.subr.bf16.mxu1 %v3230_v30 }
 0x382   : > { %v2678_v2 = vpop.eup %2677  ;;  %2527 = vmatpush1.bf16.msra.mxu0 %v3223_v14  ;;  %2559 = vmatpush1.bf16.msra.mxu1 %v3240_v21  ;;  %v2036_v14 = vld [vmem:[%s2837_s20 + $0x78] sm:$0xff] }
 0x383   : > { %v1494_v17 = vmul.f32 %v2678_v2, %v2676_v52 }
 0x385   : > { %2032 = vst [vmem:[%s2852_s6 + $0x8] sm:$0xff] %v1494_v17  ;;  %1743 = vmatmul.mubr.f32.vlgmr.msra.gmra.mrb[14].mxu0 %v1494_v17  ;;  %1814 = vmatmul.mubr.f32.vlgmr.msra.gmra.mrb[14].mxu1 %v1494_v17 }
 0x438   : > { %v1570_v12 = vpop.f32.mrb[12].mxu0  ;;  %v1641_v45 = vpop.f32.mrb[12].mxu1 }
 0x439   : > { %v1646_v61 = vadd.f32 %v2033_v32, %v1570_v12  ;;  %v1572_v5 = vpop.f32.mrb[13].mxu0  ;;  %v1643_v41 = vpop.f32.mrb[13].mxu1  ;;  %v1648_v28 = vadd.f32 %v2035_v57, %v1641_v45 }
 0x43a   : > { %v1647_v8 = vadd.f32 %v2034_v40, %v1572_v5  ;;  %v1649_v21 = vadd.f32 %v2036_v14, %v1643_v41 }
 0x43b   : > { %v2037_v29 = vmul.f32 -1.442695, %v1646_v61 }
 0x43c   : > { %v2038_v30 = vmul.f32 -1.442695, %v1647_v8  ;;  %v2039_v48 = vmul.f32 -1.442695, %v1649_v21 }
 0x43d   : > { %2679 = vpow2.f32 %v2037_v29 }
 0x43e   : > { %2681 = vpow2.f32 %v2038_v30 }
 0x43f   : > { %2683 = vpow2.f32 %v2039_v48 }
 0x440   : > { %2685 = vtanh.f32 %v1648_v28 }
 0x447   : > { %v2680_v3 = vpop.eup %2679 }
 0x448   : > { %v2682_v36 = vpop.eup %2681  ;;  %v1653_v25 = vadd.f32 1.0, %v2680_v3 }
 0x449   : > { %v1659_v51 = vadd.f32 1.0, %v2682_v36  ;;  %v2684_v54 = vpop.eup %2683 }
 0x44a   : > { %2687 = vrcp.f32 %v1653_v25  ;;  %v2686_v59 = vpop.eup %2685  ;;  %v1666_v49 = vadd.f32 1.0, %v2684_v54 }
 0x44b   : > { %2689 = vrcp.f32 %v1659_v51 }
 0x44c   : > { %2691 = vrcp.f32 %v1666_v49 }
 0x454   : > { %v2688_v27 = vpop.eup %2687 }
 0x455   : > { %v2690_v38 = vpop.eup %2689  ;;  %v1670_v46 = vmul.f32 %v2688_v27, %v2686_v59 }
 0x456   : > { %v1669_v16 = vmul.f32 %v2690_v38, %v3457_v13  ;;  %v2692_v19 = vpop.eup %2691 }
 0x458   : > { %v1671_v42 = vadd.f32 %v1670_v46, %v1669_v16  ;;  %v1744_v47 = vpop.f32.mrb[14].mxu0  ;;  %v1815_v33 = vpop.f32.mrb[14].mxu1 }
 0x459   : > { %v1820_v56 = vadd.f32 %v1744_v47, %v1674_v37  ;;  %v1746_v43 = vpop.f32.mrb[15].mxu0  ;;  %v1817_v31 = vpop.f32.mrb[15].mxu1  ;;  %v1822_v11 = vadd.f32 %v1815_v33, %v1676_v6 }
 0x45a   : > { %2693 = vtanh.f32 %v1671_v42  ;;  %1852 = vst [vmem:[#allocation3] sm:$0xff] %v1671_v42  ;;  %v1821_v63 = vadd.f32 %v1746_v43, %v1675_v1  ;;  %v1823_v13 = vadd.f32 %v1817_v31, %v1677_v58 }
 0x45b   : > { %v2040_v7 = vmul.f32 -1.442695, %v1820_v56 }
 0x45c   : > { %v2041_v53 = vmul.f32 -1.442695, %v1821_v63  ;;  %v2042_v55 = vmul.f32 -1.442695, %v1823_v13 }
 0x45d   : > { %2695 = vpow2.f32 %v2040_v7 }
 0x45e   : > { %2697 = vpow2.f32 %v2041_v53 }
 0x45f   : > { %2699 = vpow2.f32 %v2042_v55 }
 0x460   : > { %2701 = vtanh.f32 %v1822_v11 }
 0x464   : > { %v2694_v44 = vpop.eup %2693 }
 0x465   : > { %v1673_v20 = vmul.f32 %v2694_v44, %v2692_v19 }
 0x467   : > { %v2696_v4 = vpop.eup %2695  ;;  %2043 = vst [vmem:[%s2847_s27 + $0x18] sm:$0xff] %v1673_v20  ;;  %1851 = vst [vmem:[#allocation2] sm:$0xff] %v1673_v20 }
 0x468   : > { %v2698_v9 = vpop.eup %2697  ;;  %v1827_v10 = vadd.f32 1.0, %v2696_v4 }
 0x469   : > { %v1833_v23 = vadd.f32 1.0, %v2698_v9  ;;  %v2700_v26 = vpop.eup %2699 }
 0x46a   : > { %2703 = vrcp.f32 %v1827_v10  ;;  %v2702_v15 = vpop.eup %2701  ;;  %v1840_v0 = vadd.f32 1.0, %v2700_v26 }
 0x46b   : > { %2705 = vrcp.f32 %v1833_v23 }
 0x46c   : > { %2707 = vrcp.f32 %v1840_v0 }
 0x474   : > { %v2704_v34 = vpop.eup %2703 }
 0x475   : > { %v2706_v18 = vpop.eup %2705  ;;  %v1844_v62 = vmul.f32 %v2704_v34, %v2702_v15 }
 0x476   : > { %v1843_v35 = vmul.f32 %v2706_v18, %v3482_v60  ;;  %v2708_v39 = vpop.eup %2707 }
 0x478   : > { %v1845_v22 = vadd.f32 %v1844_v62, %v1843_v35 }
 0x47a   : > { %2709 = vtanh.f32 %v1845_v22  ;;  %1854 = vst [vmem:[#allocation3 + $0x8] sm:$0xff] %v1845_v22 }
 0x484   : > { %v2710_v24 = vpop.eup %2709 }
 0x485   : > { %v1847_v50 = vmul.f32 %v2710_v24, %v2708_v39 }
 0x487   : > { %1850 = vst [vmem:[%s2852_s6] sm:$0xff] %v1847_v50  ;;  %1853 = vst [vmem:[#allocation2 + $0x8] sm:$0xff] %v1847_v50 }
 0x488 PF: > { %s17_s18 = sadd.s32 1, %s2749_s18  }
 0x489   : > { %p14_p6 = scmp.ge.s32.totalorder %s17_s18, 4  }
 0x48b   :  { %16 = sbr.rel (!%p14_p6) target bundleno = 1 (0x1), region = 104 }
 0x492   :  { %1897 = vsyncpa [#allocation5], 1 }
 0x493   :  { %1899 = vsyncpa [#allocation5 + $0x1], 1 }

// kernel: _lambda_.5
= control target key start
LH: loop header
LB: loop body
LE: loop exit
PB: predicated region body
PF: predicated region fallthrough
CT: control target
= control target key end

     0   :  { %s2709_s18 = smov 0   ;;  %s3588_s0 = inlined_call_operand.vmem [shape: f32[8,8,512], index: 0, kind: input, shape index: {}]   ;;  %s3589_s1 = inlined_call_operand.vmem [shape: f32[8,8,512], index: 1, kind: input, shape index: {}]   ;;  %s3590_s2 = inlined_call_operand.vmem [shape: f32[128,512], index: 2, kind: input, shape index: {}]   ;;  %s3591_s3 = inlined_call_operand.vmem [shape: f32[128,512], index: 3, kind: input, shape index: {}]   ;;  %s3592_s4 = inlined_call_operand.vmem [shape: f32[8,8,128], index: 4, kind: output, shape index: {0}]   ;;  %s3593_s5 = inlined_call_operand.vmem [shape: f32[8,8,128], index: 5, kind: output, shape index: {1}]  }
   0x1 LB: > { %s1945_s19 = sadd.s32 4294967295, %s2675_s18   ;;  %p1949_p0 = scmp.ge.s32.totalorder %s2675_s18, 1  ;;  %s2675_s18 = sphi %s2709_s18, %s16_s18  }
   0x2   : > { %p210_p1 = scmp.lt.s32.totalorder %s2675_s18, 3 }
   0x4   : > { %p211_p2 = pnand %p1949_p0, %p210_p1 }
   0x6   : > { %214 = sbr.rel (%p211_p2) target bundleno = 1129 (0x469), region = 36 }
   0xd   : > { %s1950_s20 = sshll.u32 %s1945_s19, 2  ;;  %s259_s21 = ssub.s32 1, %s1945_s19 }
   0xe   : > { %p253_p3 = scmp.lt.s32.totalorder %s1950_s20, 7  ;;  %s1953_s22 = sshll.u32 %s259_s21, 2 }
   0xf   : > { %p261_p4 = scmp.lt.s32.totalorder %s1953_s22, 7  ;;  %p1960_p5 = scmp.ne.s32.totalorder %s1945_s19, 0 }
  0x10   : > { %s3718_s20 = smov (!%p253_p3, %s1950_s20), 7  ;;  %v2677_v0 = vmov (!%p1960_p5), 0.0  }
  0x11   : > { %s3720_s22 = smov (!%p261_p4, %s1953_s22), 7  ;;  %s2017_s23 = sshll.u32 %s3718_s20, 5  ;;  %286 = vst [vmem:[#allocation2] sm:$0xff] (!%p1960_p5), %v2677_v0  ;;  %287 = vst [vmem:[#allocation2 + $0x8] sm:$0xff] (!%p1960_p5), %v2677_v0 }
  0x12   : > { %s1957_s24 = sshll.u32 %s3718_s20, 3  ;;  %s2720_s27 = scalar_lea.vmem %s3588_s0, %s2017_s23  ;;  %288 = vst [vmem:[#allocation3] sm:$0xff] (!%p1960_p5), %v2677_v0  ;;  %289 = vst [vmem:[#allocation3 + $0x8] sm:$0xff] (!%p1960_p5), %v2677_v0 }
  0x13   : > { %s2018_s28 = sshll.u32 %s3720_s22, 5  ;;  %s2730_s9 = scalar_lea.vmem %s3592_s4, %s1957_s24 }
  0x14   : > { %s2725_s6 = scalar_lea.vmem %s3589_s1, %s2018_s28  ;;  %s1959_s10 = sshll.u32 %s3720_s22, 3 }
  0x15   : > { %s2735_s13 = scalar_lea.vmem %s3593_s5, %s1959_s10  ;;  %285 = sbr.rel (%p1960_p5) target bundleno = 28 (0x1c), region = 40 }
  0x1c PF: > { %v291_v1 = vld [vmem:[%s3590_s2 + $0x8] sm:$0xff]  ;;  %v290_v3 = vld [vmem:[%s3590_s2] sm:$0xff]  ;;  %v3594_v8 = vmov 0.0   ;;  %v293_v20 = vld [vmem:[%s3590_s2 + $0x18] sm:$0xff] }
  0x1d   : > { %v295_v2 = vld [vmem:[%s3590_s2 + $0x28] sm:$0xff]  ;;  %v294_v5 = vld [vmem:[%s3590_s2 + $0x20] sm:$0xff]  ;;  %492 = vmatprep.mubr.f32.mxu0 %v3594_v8  ;;  %563 = vmatprep.mubr.f32.mxu1 %v3594_v8  ;;  %v297_v21 = vld [vmem:[%s3590_s2 + $0x38] sm:$0xff] }
  0x1e   : > { %v2746_v4 = vpack.c.bf16 %v295_v2, %v291_v1  ;;  %v299_v6 = vld [vmem:[%s3590_s2 + $0x48] sm:$0xff]  ;;  %v2759_v9 = vpack.c.bf16 %v294_v5, %v290_v3  ;;  %v298_v11 = vld [vmem:[%s3590_s2 + $0x40] sm:$0xff]  ;;  %v2800_v23 = vpack.c.bf16 %v297_v21, %v293_v20  ;;  %v292_v24 = vld [vmem:[%s3590_s2 + $0x10] sm:$0xff] }
  0x1f   : > { %v303_v7 = vld [vmem:[%s3590_s2 + $0x68] sm:$0xff]  ;;  %v302_v12 = vld [vmem:[%s3590_s2 + $0x60] sm:$0xff]  ;;  %v296_v25 = vld [vmem:[%s3590_s2 + $0x30] sm:$0xff] }
  0x20   : > { %v2761_v10 = vpack.c.bf16 %v303_v7, %v299_v6  ;;  %v307_v13 = vld [vmem:[%s3590_s2 + $0x88] sm:$0xff]  ;;  %2020 = vmatprep.subr.bf16.mxu0 %v2746_v4  ;;  %v2777_v15 = vpack.c.bf16 %v302_v12, %v298_v11  ;;  %v306_v16 = vld [vmem:[%s3590_s2 + $0x80] sm:$0xff]  ;;  %v2808_v26 = vpack.c.bf16 %v296_v25, %v292_v24  ;;  %2052 = vmatprep.subr.bf16.mxu1 %v2800_v23  ;;  %v301_v28 = vld [vmem:[%s3590_s2 + $0x58] sm:$0xff] }
  0x21   : > { %v311_v14 = vld [vmem:[%s3590_s2 + $0xa8] sm:$0xff]  ;;  %2022 = vmatpush1.bf16.msra.mxu0 %v2759_v9  ;;  %v310_v17 = vld [vmem:[%s3590_s2 + $0xa0] sm:$0xff]  ;;  %v305_v29 = vld [vmem:[%s3590_s2 + $0x78] sm:$0xff] }
  0x22   : > { %2024 = vmatprep.subr.bf16.mxu0 %v2761_v10  ;;  %v2786_v18 = vpack.c.bf16 %v311_v14, %v307_v13  ;;  %v315_v19 = vld [vmem:[%s3590_s2 + $0xc8] sm:$0xff]  ;;  %v2811_v27 = vpack.c.bf16 %v310_v17, %v306_v16  ;;  %v300_v30 = vld [vmem:[%s3590_s2 + $0x50] sm:$0xff]  ;;  %v314_v32 = vld [vmem:[%s3590_s2 + $0xc0] sm:$0xff]  ;;  %2054 = vmatpush1.bf16.msra.mxu1 %v2808_v26  ;;  %v2833_v34 = vpack.c.bf16 %v305_v29, %v301_v28 }
  0x23   : > { %v319_v22 = vld [vmem:[%s3590_s2 + $0xe8] sm:$0xff]  ;;  %v318_v33 = vld [vmem:[%s3590_s2 + $0xe0] sm:$0xff]  ;;  %v304_v35 = vld [vmem:[%s3590_s2 + $0x70] sm:$0xff] }
  0x24   : > { %v2824_v31 = vpack.c.bf16 %v319_v22, %v315_v19  ;;  %v323_v36 = vld [vmem:[%s3590_s2 + $0x108] sm:$0xff]  ;;  %v2844_v38 = vpack.c.bf16 %v304_v35, %v300_v30  ;;  %v309_v39 = vld [vmem:[%s3590_s2 + $0x98] sm:$0xff]  ;;  %2056 = vmatprep.subr.bf16.mxu1 %v2833_v34  ;;  %v308_v41 = vld [vmem:[%s3590_s2 + $0x90] sm:$0xff]  ;;  %v2860_v43 = vpack.c.bf16 %v318_v33, %v314_v32 }
  0x25   : > { %2026 = vmatpush1.bf16.msra.mxu0 %v2777_v15  ;;  %v327_v37 = vld [vmem:[%s3590_s2 + $0x128] sm:$0xff]  ;;  %v313_v40 = vld [vmem:[%s3590_s2 + $0xb8] sm:$0xff]  ;;  %v312_v42 = vld [vmem:[%s3590_s2 + $0xb0] sm:$0xff] }
  0x26   : > { %2028 = vmatprep.subr.bf16.mxu0 %v2786_v18  ;;  %3645 = vst [vmem:[#allocation4_spill] sm:$0xff] %v2824_v31  ;;  %3646 = vst [vmem:[#allocation5_spill] sm:$0xff] %v2860_v43  ;;  %v322_v44 = vld [vmem:[%s3590_s2 + $0x100] sm:$0xff]  ;;  %v2868_v46 = vpack.c.bf16 %v313_v40, %v309_v39  ;;  %v2871_v47 = vpack.c.bf16 %v327_v37, %v323_v36  ;;  %2058 = vmatpush1.bf16.msra.mxu1 %v2844_v38  ;;  %v331_v48 = vld [vmem:[%s3590_s2 + $0x148] sm:$0xff] }
  0x27   : > { %v326_v45 = vld [vmem:[%s3590_s2 + $0x120] sm:$0xff]  ;;  %v2877_v49 = vpack.c.bf16 %v312_v42, %v308_v41  ;;  %v317_v50 = vld [vmem:[%s3590_s2 + $0xd8] sm:$0xff]  ;;  %v335_v52 = vld [vmem:[%s3590_s2 + $0x168] sm:$0xff] }
  0x28   : > { %3647 = vst [vmem:[#allocation6_spill] sm:$0xff] %v2871_v47  ;;  %v321_v51 = vld [vmem:[%s3590_s2 + $0xf8] sm:$0xff]  ;;  %2060 = vmatprep.subr.bf16.mxu1 %v2868_v46  ;;  %v316_v54 = vld [vmem:[%s3590_s2 + $0xd0] sm:$0xff]  ;;  %v2898_v56 = vpack.c.bf16 %v326_v45, %v322_v44  ;;  %v2907_v59 = vpack.c.bf16 %v335_v52, %v331_v48  ;;  %v330_v60 = vld [vmem:[%s3590_s2 + $0x140] sm:$0xff] }
  0x29   : > { %2030 = vmatpush1.bf16.msra.mxu0 %v2811_v27  ;;  %v2889_v53 = vpack.c.bf16 %v321_v51, %v317_v50  ;;  %v320_v55 = vld [vmem:[%s3590_s2 + $0xf0] sm:$0xff]  ;;  %v325_v57 = vld [vmem:[%s3590_s2 + $0x118] sm:$0xff]  ;;  %v334_v61 = vld [vmem:[%s3590_s2 + $0x160] sm:$0xff] }
  0x2a   : > { %2032 = vmatprep.subr.bf16.mxu0 %v2824_v31  ;;  %3649 = vst [vmem:[#allocation8_spill] sm:$0xff] %v2898_v56  ;;  %v329_v58 = vld [vmem:[%s3590_s2 + $0x138] sm:$0xff]  ;;  %3650 = vst [vmem:[#allocation9_spill] sm:$0xff] %v2907_v59  ;;  %2062 = vmatpush1.bf16.msra.mxu1 %v2877_v49  ;;  %v339_v62 = vld [vmem:[%s3590_s2 + $0x188] sm:$0xff]  ;;  %v2919_v63 = vpack.c.bf16 %v320_v55, %v316_v54  ;;  %v2940_v7 = vpack.c.bf16 %v334_v61, %v330_v60 }
  0x2b   : > { %3648 = vst [vmem:[#allocation7_spill] sm:$0xff] %v2889_v53  ;;  %v343_v0 = vld [vmem:[%s3590_s2 + $0x1a8] sm:$0xff]  ;;  %2064 = vmatprep.subr.bf16.mxu1 %v2889_v53  ;;  %v2925_v1 = vpack.c.bf16 %v329_v58, %v325_v57  ;;  %v324_v2 = vld [vmem:[%s3590_s2 + $0x110] sm:$0xff]  ;;  %v333_v5 = vld [vmem:[%s3590_s2 + $0x158] sm:$0xff] }
  0x2c   : > { %3651 = vst [vmem:[#allocation10_spill] sm:$0xff] %v2919_v63  ;;  %v328_v3 = vld [vmem:[%s3590_s2 + $0x130] sm:$0xff]  ;;  %v337_v6 = vld [vmem:[%s3590_s2 + $0x178] sm:$0xff]  ;;  %3653 = vst [vmem:[#allocation12_spill] sm:$0xff] %v2940_v7  ;;  %v2943_v11 = vpack.c.bf16 %v343_v0, %v339_v62 }
  0x2d   : > { %2034 = vmatpush1.bf16.msra.mxu0 %v2860_v43  ;;  %3652 = vst [vmem:[#allocation11_spill] sm:$0xff] %v2925_v1  ;;  %v338_v12 = vld [vmem:[%s3590_s2 + $0x180] sm:$0xff]  ;;  %v347_v14 = vld [vmem:[%s3590_s2 + $0x1c8] sm:$0xff]  ;;  %v2955_v16 = vpack.c.bf16 %v328_v3, %v324_v2  ;;  %v2961_v19 = vpack.c.bf16 %v337_v6, %v333_v5  ;;  %v332_v20 = vld [vmem:[%s3590_s2 + $0x150] sm:$0xff] }
  0x2e   : > { %2036 = vmatprep.subr.bf16.mxu0 %v2871_v47  ;;  %3654 = vst [vmem:[#allocation13_spill] sm:$0xff] %v2943_v11  ;;  %v342_v13 = vld [vmem:[%s3590_s2 + $0x1a0] sm:$0xff]  ;;  %2066 = vmatpush1.bf16.msra.mxu1 %v2919_v63  ;;  %v351_v17 = vld [vmem:[%s3590_s2 + $0x1e8] sm:$0xff]  ;;  %v336_v21 = vld [vmem:[%s3590_s2 + $0x170] sm:$0xff] }
  0x2f   : > { %3655 = vst [vmem:[#allocation14_spill] sm:$0xff] %v2955_v16  ;;  %2068 = vmatprep.subr.bf16.mxu1 %v2925_v1  ;;  %3656 = vst [vmem:[#allocation15_spill] sm:$0xff] %v2961_v19  ;;  %v341_v22 = vld [vmem:[%s3590_s2 + $0x198] sm:$0xff]  ;;  %v2976_v25 = vpack.c.bf16 %v342_v13, %v338_v12  ;;  %v2979_v28 = vpack.c.bf16 %v351_v17, %v347_v14  ;;  %v346_v29 = vld [vmem:[%s3590_s2 + $0x1c0] sm:$0xff]  ;;  %v2991_v33 = vpack.c.bf16 %v336_v21, %v332_v20 }
  0x30   : > { %v345_v24 = vld [vmem:[%s3590_s2 + $0x1b8] sm:$0xff]  ;;  %v350_v30 = vld [vmem:[%s3590_s2 + $0x1e0] sm:$0xff]  ;;  %v355_v32 = vld [vmem:[%s3591_s3 + $0x8] sm:$0xff] }
  0x31   : > { %2038 = vmatpush1.bf16.msra.mxu0 %v2898_v56  ;;  %3657 = vst [vmem:[#allocation16_spill] sm:$0xff] %v2976_v25  ;;  %3658 = vst [vmem:[#allocation17_spill] sm:$0xff] %v2979_v28  ;;  %v359_v35 = vld [vmem:[%s3591_s3 + $0x28] sm:$0xff]  ;;  %v2997_v36 = vpack.c.bf16 %v345_v24, %v341_v22  ;;  %v340_v37 = vld [vmem:[%s3590_s2 + $0x190] sm:$0xff]  ;;  %v3012_v42 = vpack.c.bf16 %v350_v30, %v346_v29 }
  0x32   : > { %2040 = vmatprep.subr.bf16.mxu0 %v2907_v59  ;;  %2070 = vmatpush1.bf16.msra.mxu1 %v2955_v16  ;;  %3659 = vst [vmem:[#allocation18_spill] sm:$0xff] %v2991_v33  ;;  %v344_v39 = vld [vmem:[%s3590_s2 + $0x1b0] sm:$0xff]  ;;  %v349_v40 = vld [vmem:[%s3590_s2 + $0x1d8] sm:$0xff]  ;;  %v3015_v44 = vpack.c.bf16 %v359_v35, %v355_v32  ;;  %v354_v45 = vld [vmem:[%s3591_s3] sm:$0xff] }
  0x33   : > { %2072 = vmatprep.subr.bf16.mxu1 %v2961_v19  ;;  %3660 = vst [vmem:[#allocation19_spill] sm:$0xff] %v2997_v36  ;;  %v353_v41 = vld [vmem:[%s3590_s2 + $0x1f8] sm:$0xff]  ;;  %3661 = vst [vmem:[#allocation20_spill] sm:$0xff] %v3012_v42  ;;  %v358_v48 = vld [vmem:[%s3591_s3 + $0x20] sm:$0xff]  ;;  %v3027_v51 = vpack.c.bf16 %v344_v39, %v340_v37 }
  0x34   : > { %3662 = vst [vmem:[#allocation21_spill] sm:$0xff] %v3015_v44  ;;  %v363_v50 = vld [vmem:[%s3591_s3 + $0x48] sm:$0xff]  ;;  %v3033_v54 = vpack.c.bf16 %v353_v41, %v349_v40  ;;  %v348_v55 = vld [vmem:[%s3590_s2 + $0x1d0] sm:$0xff]  ;;  %v357_v58 = vld [vmem:[%s3591_s3 + $0x18] sm:$0xff]  ;;  %v3048_v62 = vpack.c.bf16 %v358_v48, %v354_v45 }
  0x35   : > { %2042 = vmatpush1.bf16.msra.mxu0 %v2940_v7  ;;  %3663 = vst [vmem:[#allocation22_spill] sm:$0xff] %v3027_v51  ;;  %v367_v52 = vld [vmem:[%s3591_s3 + $0x68] sm:$0xff]  ;;  %v352_v57 = vld [vmem:[%s3590_s2 + $0x1f0] sm:$0xff]  ;;  %v361_v60 = vld [vmem:[%s3591_s3 + $0x38] sm:$0xff] }
  0x36   : > { %2044 = vmatprep.subr.bf16.mxu0 %v2943_v11  ;;  %2074 = vmatpush1.bf16.msra.mxu1 %v2991_v33  ;;  %3664 = vst [vmem:[#allocation23_spill] sm:$0xff] %v3033_v54  ;;  %v418_v61 = vld [vmem:[#allocation2] sm:$0xff]  ;;  %v3051_v0 = vpack.c.bf16 %v367_v52, %v363_v50  ;;  %v371_v5 = vld [vmem:[%s3591_s3 + $0x88] sm:$0xff]  ;;  %v3063_v6 = vpack.c.bf16 %v352_v57, %v348_v55  ;;  %v356_v14 = vld [vmem:[%s3591_s3 + $0x10] sm:$0xff] }
  0x37   : > { %2076 = vmatprep.subr.bf16.mxu1 %v2997_v36  ;;  %v362_v2 = vld [vmem:[%s3591_s3 + $0x40] sm:$0xff]  ;;  %v375_v12 = vld [vmem:[%s3591_s3 + $0xa8] sm:$0xff]  ;;  %v3069_v13 = vpack.c.bf16 %v361_v60, %v357_v58  ;;  %v360_v17 = vld [vmem:[%s3591_s3 + $0x30] sm:$0xff] }
  0x38   : > { %v366_v3 = vld [vmem:[%s3591_s3 + $0x60] sm:$0xff]  ;;  %3665 = vst [vmem:[#allocation24_spill] sm:$0xff] %v3063_v6  ;;  %v365_v20 = vld [vmem:[%s3591_s3 + $0x58] sm:$0xff]  ;;  %v3088_v24 = vpack.c.bf16 %v375_v12, %v371_v5  ;;  %v379_v32 = vld [vmem:[%s3591_s3 + $0xc8] sm:$0xff]  ;;  %v3100_v35 = vpack.c.bf16 %v360_v17, %v356_v14 }
  0x39   : > { %2046 = vmatpush1.bf16.msra.mxu0 %v2976_v25  ;;  %3666 = vst [vmem:[#allocation25_spill] sm:$0xff] %v3069_v13  ;;  %v369_v21 = vld [vmem:[%s3591_s3 + $0x78] sm:$0xff]  ;;  %v3084_v22 = vpack.c.bf16 %v366_v3, %v362_v2  ;;  %v370_v29 = vld [vmem:[%s3591_s3 + $0x80] sm:$0xff]  ;;  %v383_v37 = vld [vmem:[%s3591_s3 + $0xe8] sm:$0xff] }
  0x3a   : > { %2048 = vmatprep.subr.bf16.mxu0 %v2979_v28  ;;  %2078 = vmatpush1.bf16.msra.mxu1 %v3027_v51  ;;  %v374_v30 = vld [vmem:[%s3591_s3 + $0xa0] sm:$0xff]  ;;  %v3106_v39 = vpack.c.bf16 %v369_v21, %v365_v20  ;;  %v364_v40 = vld [vmem:[%s3591_s3 + $0x50] sm:$0xff]  ;;  %v373_v45 = vld [vmem:[%s3591_s3 + $0x98] sm:$0xff]  ;;  %v3124_v52 = vpack.c.bf16 %v383_v37, %v379_v32 }
  0x3b   : > { %2080 = vmatprep.subr.bf16.mxu1 %v3033_v54  ;;  %v368_v41 = vld [vmem:[%s3591_s3 + $0x70] sm:$0xff]  ;;  %v377_v48 = vld [vmem:[%s3591_s3 + $0xb8] sm:$0xff]  ;;  %v3121_v50 = vpack.c.bf16 %v374_v30, %v370_v29  ;;  %v378_v55 = vld [vmem:[%s3591_s3 + $0xc0] sm:$0xff] }
  0x3c   : > { %v382_v57 = vld [vmem:[%s3591_s3 + $0xe0] sm:$0xff]  ;;  %v387_v58 = vld [vmem:[%s3591_s3 + $0x108] sm:$0xff]  ;;  %v3136_v60 = vpack.c.bf16 %v368_v41, %v364_v40  ;;  %v3142_v2 = vpack.c.bf16 %v377_v48, %v373_v45  ;;  %v372_v3 = vld [vmem:[%s3591_s3 + $0x90] sm:$0xff] }
  0x3d   : > { %2050 = vmatpush1.bf16.msra.mxu0 %v3012_v42  ;;  %v376_v5 = vld [vmem:[%s3591_s3 + $0xb0] sm:$0xff]  ;;  %v381_v12 = vld [vmem:[%s3591_s3 + $0xd8] sm:$0xff]  ;;  %v3158_v17 = vpack.c.bf16 %v382_v57, %v378_v55  ;;  %v386_v21 = vld [vmem:[%s3591_s3 + $0x100] sm:$0xff] }
  0x3e   : > { %2084 = vmatprep.subr.bf16.mxu0 %v3015_v44  ;;  %2082 = vmatpush1.bf16.msra.mxu1 %v3063_v6  ;;  %v385_v14 = vld [vmem:[%s3591_s3 + $0xf8] sm:$0xff]  ;;  %v390_v29 = vld [vmem:[%s3591_s3 + $0x120] sm:$0xff]  ;;  %v395_v30 = vld [vmem:[%s3591_s3 + $0x148] sm:$0xff]  ;;  %v3173_v32 = vpack.c.bf16 %v376_v5, %v372_v3 }
  0x3f   : > { %2116 = vmatprep.subr.bf16.mxu1 %v3069_v13  ;;  %v399_v37 = vld [vmem:[%s3591_s3 + $0x168] sm:$0xff]  ;;  %v3179_v40 = vpack.c.bf16 %v385_v14, %v381_v12  ;;  %v380_v41 = vld [vmem:[%s3591_s3 + $0xd0] sm:$0xff]  ;;  %v389_v48 = vld [vmem:[%s3591_s3 + $0x118] sm:$0xff]  ;;  %v3194_v57 = vpack.c.bf16 %v390_v29, %v386_v21 }
  0x40   : > { %493 = vmatmul.mubr.f32.vlgmr.msra.gmra.mrb[0].mxu0 %v418_v61  ;;  %v384_v45 = vld [vmem:[%s3591_s3 + $0xf0] sm:$0xff]  ;;  %v393_v55 = vld [vmem:[%s3591_s3 + $0x138] sm:$0xff]  ;;  %v398_v3 = vld [vmem:[%s3591_s3 + $0x160] sm:$0xff] }
  0x41   : > { %2086 = vmatpush1.bf16.msra.mxu0 %v3048_v62  ;;  %667 = vmatprep.mubr.f32.mxu0 %v3594_v8  ;;  %3668 = vst [vmem:[#allocation27_spill] sm:$0xff] %v3194_v57  ;;  %v403_v5 = vld [vmem:[%s3591_s3 + $0x188] sm:$0xff]  ;;  %v3209_v12 = vpack.c.bf16 %v384_v45, %v380_v41  ;;  %v3215_v21 = vpack.c.bf16 %v393_v55, %v389_v48  ;;  %v388_v29 = vld [vmem:[%s3591_s3 + $0x110] sm:$0xff]  ;;  %v401_v41 = vld [vmem:[%s3591_s3 + $0x178] sm:$0xff] }
  0x42   : > { %2088 = vmatprep.subr.bf16.mxu0 %v3051_v0  ;;  %564 = vmatmul.mubr.f32.vlgmr.msra.gmra.mrb[0].mxu1 %v418_v61  ;;  %v391_v61 = vld [vmem:[%s3591_s3 + $0x128] sm:$0xff]  ;;  %v402_v55 = vld [vmem:[%s3591_s3 + $0x180] sm:$0xff] }
  0x43   : > { %2118 = vmatpush1.bf16.msra.mxu1 %v3100_v35  ;;  %738 = vmatprep.mubr.f32.mxu1 %v3594_v8  ;;  %v3161_v20 = vpack.c.bf16 %v391_v61, %v387_v58  ;;  %v3197_v58 = vpack.c.bf16 %v399_v37, %v395_v30  ;;  %v394_v61 = vld [vmem:[%s3591_s3 + $0x140] sm:$0xff]  ;;  %3670 = vst [vmem:[#allocation29_spill] sm:$0xff] %v3209_v12  ;;  %v407_v14 = vld [vmem:[%s3591_s3 + $0x1a8] sm:$0xff]  ;;  %3671 = vst [vmem:[#allocation30_spill] sm:$0xff] %v3215_v21 }
  0x44   : > { %2120 = vmatprep.subr.bf16.mxu1 %v3106_v39  ;;  %v392_v30 = vld [vmem:[%s3591_s3 + $0x130] sm:$0xff]  ;;  %v397_v37 = vld [vmem:[%s3591_s3 + $0x158] sm:$0xff]  ;;  %v3230_v45 = vpack.c.bf16 %v398_v3, %v394_v61  ;;  %v3233_v48 = vpack.c.bf16 %v407_v14, %v403_v5  ;;  %v406_v8 = vld [vmem:[%s3591_s3 + $0x1a0] sm:$0xff] }
  0x45   : > { %2090 = vmatpush1.bf16.msra.mxu0 %v3084_v22  ;;  %3667 = vst [vmem:[#allocation26_spill] sm:$0xff] %v3161_v20  ;;  %3669 = vst [vmem:[#allocation28_spill] sm:$0xff] %v3197_v58  ;;  %v3245_v61 = vpack.c.bf16 %v392_v30, %v388_v29  ;;  %v415_v3 = vld [vmem:[%s3591_s3 + $0x1e8] sm:$0xff]  ;;  %v3251_v5 = vpack.c.bf16 %v401_v41, %v397_v37  ;;  %v396_v14 = vld [vmem:[%s3591_s3 + $0x150] sm:$0xff]  ;;  %v3266_v37 = vpack.c.bf16 %v406_v8, %v402_v55 }
  0x46   : > { %2092 = vmatprep.subr.bf16.mxu0 %v3088_v24  ;;  %3672 = vst [vmem:[#allocation31_spill] sm:$0xff] %v3233_v48  ;;  %v405_v29 = vld [vmem:[%s3591_s3 + $0x198] sm:$0xff]  ;;  %v408_v55 = vld [vmem:[%s3591_s3 + $0x1b0] sm:$0xff] }
  0x47   : > { %2122 = vmatpush1.bf16.msra.mxu1 %v3136_v60  ;;  %v409_v30 = vld [vmem:[%s3591_s3 + $0x1b8] sm:$0xff]  ;;  %3673 = vst [vmem:[#allocation32_spill] sm:$0xff] %v3266_v37 }
  0x48   : > { %2124 = vmatprep.subr.bf16.mxu1 %v3142_v2  ;;  %v3281_v8 = vpack.c.bf16 %v409_v30, %v405_v29 }
  0x49   : > { %2094 = vmatpush1.bf16.msra.mxu0 %v3121_v50 }
  0x4a   : > { %2096 = vmatprep.subr.bf16.mxu0 %v3124_v52 }
  0x4b   : > { %2126 = vmatpush1.bf16.msra.mxu1 %v3173_v32 }
  0x4c   : > { %2128 = vmatprep.subr.bf16.mxu1 %v3179_v40 }
  0x4d   : > { %2098 = vmatpush1.bf16.msra.mxu0 %v3158_v17 }
  0x4e   : > { %2100 = vmatprep.subr.bf16.mxu0 %v3161_v20  ;;  %v414_v20 = vld [vmem:[%s3591_s3 + $0x1e0] sm:$0xff] }
  0x4f   : > { %2130 = vmatpush1.bf16.msra.mxu1 %v3209_v12 }
  0x50   : > { %2132 = vmatprep.subr.bf16.mxu1 %v3215_v21  ;;  %v410_v21 = vld [vmem:[%s3591_s3 + $0x1c0] sm:$0xff] }
  0x51   : > { %2102 = vmatpush1.bf16.msra.mxu0 %v3194_v57  ;;  %v411_v57 = vld [vmem:[%s3591_s3 + $0x1c8] sm:$0xff] }
  0x52   : > { %2104 = vmatprep.subr.bf16.mxu0 %v3197_v58  ;;  %v400_v58 = vld [vmem:[%s3591_s3 + $0x170] sm:$0xff]  ;;  %v3269_v41 = vpack.c.bf16 %v415_v3, %v411_v57  ;;  %v413_v3 = vld [vmem:[%s3591_s3 + $0x1d8] sm:$0xff] }
  0x53   : > { %2134 = vmatpush1.bf16.msra.mxu1 %v3245_v61  ;;  %v3278_v12 = vpack.c.bf16 %v400_v58, %v396_v14  ;;  %v404_v57 = vld [vmem:[%s3591_s3 + $0x190] sm:$0xff]  ;;  %v417_v58 = vld [vmem:[%s3591_s3 + $0x1f8] sm:$0xff]  ;;  %v3296_v14 = vpack.c.bf16 %v414_v20, %v410_v21  ;;  %v421_v20 = vld [vmem:[#allocation2 + $0x8] sm:$0xff] }
  0x54   : > { %2136 = vmatprep.subr.bf16.mxu1 %v3251_v5  ;;  %v3300_v29 = vpack.c.bf16 %v408_v55, %v404_v57  ;;  %v3303_v30 = vpack.c.bf16 %v417_v58, %v413_v3  ;;  %v3674_v57 = vmov 0.0  }
  0x55   : > { %2106 = vmatpush1.bf16.msra.mxu0 %v3230_v45 }
  0x56   : > { %2108 = vmatprep.subr.bf16.mxu0 %v3233_v48  ;;  %v412_v48 = vld [vmem:[%s3591_s3 + $0x1d0] sm:$0xff] }
  0x57   : > { %2138 = vmatpush1.bf16.msra.mxu1 %v3278_v12 }
  0x58   : > { %2140 = vmatprep.subr.bf16.mxu1 %v3281_v8 }
  0x59   : > { %2110 = vmatpush1.bf16.msra.mxu0 %v3266_v37  ;;  %v416_v37 = vld [vmem:[%s3591_s3 + $0x1f0] sm:$0xff] }
  0x5a   : > { %2112 = vmatprep.subr.bf16.mxu0 %v3269_v41  ;;  %v3313_v21 = vpack.c.bf16 %v416_v37, %v412_v48  ;;  %v424_v48 = vld [vmem:[%s2720_s27] sm:$0xff]  ;;  %v425_v37 = vld [vmem:[%s2720_s27 + $0x8] sm:$0xff] }
  0x5b   : > { %2142 = vmatpush1.bf16.msra.mxu1 %v3300_v29 }
  0x5c   : > { %2144 = vmatprep.subr.bf16.mxu1 %v3303_v30 }
  0x5d   : > { %2114 = vmatpush1.bf16.msra.mxu0 %v3296_v14 }
  0x5e   : > { %2148 = vmatprep.subr.bf16.mxu0 %v2746_v4 }
  0x5f   : > { %2146 = vmatpush1.bf16.msra.mxu1 %v3313_v21 }
  0x60   : > { %668 = vmatmul.mubr.f32.vlgmr.msra.gmra.mrb[2].mxu0 %v421_v20  ;;  %2180 = vmatprep.subr.bf16.mxu1 %v2800_v23 }
  0x61   : > { %2150 = vmatpush1.bf16.msra.mxu0 %v2759_v9  ;;  %845 = vmatprep.mubr.f32.mxu0 %v3674_v57 }
  0x62   : > { %2152 = vmatprep.subr.bf16.mxu0 %v2761_v10  ;;  %739 = vmatmul.mubr.f32.vlgmr.msra.gmra.mrb[2].mxu1 %v421_v20 }
  0x63   : > { %2182 = vmatpush1.bf16.msra.mxu1 %v2808_v26  ;;  %916 = vmatprep.mubr.f32.mxu1 %v3674_v57 }
  0x64   : > { %2184 = vmatprep.subr.bf16.mxu1 %v2833_v34 }
  0x65   : > { %2154 = vmatpush1.bf16.msra.mxu0 %v2777_v15 }
  0x66   : > { %2156 = vmatprep.subr.bf16.mxu0 %v2786_v18 }
  0x67   : > { %2186 = vmatpush1.bf16.msra.mxu1 %v2844_v38 }
  0x68   : > { %2188 = vmatprep.subr.bf16.mxu1 %v2868_v46 }
  0x69   : > { %2158 = vmatpush1.bf16.msra.mxu0 %v2811_v27 }
  0x6a   : > { %2160 = vmatprep.subr.bf16.mxu0 %v2824_v31 }
  0x6b   : > { %2190 = vmatpush1.bf16.msra.mxu1 %v2877_v49 }
  0x6c   : > { %2192 = vmatprep.subr.bf16.mxu1 %v2889_v53 }
  0x6d   : > { %2162 = vmatpush1.bf16.msra.mxu0 %v2860_v43 }
  0x6e   : > { %2164 = vmatprep.subr.bf16.mxu0 %v2871_v47 }
  0x6f   : > { %2194 = vmatpush1.bf16.msra.mxu1 %v2919_v63 }
  0x70   : > { %2196 = vmatprep.subr.bf16.mxu1 %v2925_v1 }
  0x71   : > { %2166 = vmatpush1.bf16.msra.mxu0 %v2898_v56 }
  0x72   : > { %2168 = vmatprep.subr.bf16.mxu0 %v2907_v59 }
  0x73   : > { %2198 = vmatpush1.bf16.msra.mxu1 %v2955_v16 }
  0x74   : > { %2200 = vmatprep.subr.bf16.mxu1 %v2961_v19 }
  0x75   : > { %2170 = vmatpush1.bf16.msra.mxu0 %v2940_v7 }
  0x76   : > { %2172 = vmatprep.subr.bf16.mxu0 %v2943_v11 }
  0x77   : > { %2202 = vmatpush1.bf16.msra.mxu1 %v2991_v33 }
  0x78   : > { %2204 = vmatprep.subr.bf16.mxu1 %v2997_v36 }
  0x79   : > { %2174 = vmatpush1.bf16.msra.mxu0 %v2976_v25 }
  0x7a   : > { %2176 = vmatprep.subr.bf16.mxu0 %v2979_v28 }
  0x7b   : > { %2206 = vmatpush1.bf16.msra.mxu1 %v3027_v51 }
  0x7c   : > { %2208 = vmatprep.subr.bf16.mxu1 %v3033_v54  ;;  %v426_v54 = vld [vmem:[%s2720_s27 + $0x10] sm:$0xff] }
  0x7d   : > { %2178 = vmatpush1.bf16.msra.mxu0 %v3012_v42  ;;  %v427_v42 = vld [vmem:[%s2720_s27 + $0x18] sm:$0xff] }
  0x7e   : > { %2212 = vmatprep.subr.bf16.mxu0 %v3015_v44 }
  0x7f   : > { %2210 = vmatpush1.bf16.msra.mxu1 %v3063_v6 }
  0x80   : > { %2244 = vmatprep.subr.bf16.mxu1 %v3069_v13 }
 0x113   : > { %v494_v55 = vpop.f32.mrb[0].mxu0 }
 0x114   : > { %v570_v3 = vadd.f32 %v494_v55, %v424_v48  ;;  %v496_v58 = vpop.f32.mrb[1].mxu0 }
 0x115   : > { %v571_v20 = vadd.f32 %v496_v58, %v425_v37  ;;  %v565_v51 = vpop.f32.mrb[0].mxu1 }
 0x116   : > { %v1961_v28 = vmul.f32 -1.442695, %v570_v3  ;;  %v567_v44 = vpop.f32.mrb[1].mxu1  ;;  %v572_v6 = vadd.f32 %v565_v51, %v426_v54  ;;  %v1964_v51 = vld [vmem:[%s2725_s6 + $0x60] sm:$0xff]  ;;  %v1965_v54 = vld [vmem:[%s2725_s6 + $0x68] sm:$0xff] }
 0x117   : > { %v1962_v25 = vmul.f32 -1.442695, %v571_v20  ;;  %v573_v36 = vadd.f32 %v567_v44, %v427_v42 }
 0x118   : > { %2541 = vpow2.f32 %v1961_v28  ;;  %v419_v28 = vld [vmem:[#allocation3] sm:$0xff] }
 0x119   : > { %2543 = vpow2.f32 %v1962_v25  ;;  %v1963_v11 = vmul.f32 -1.442695, %v573_v36 }
 0x11b   : > { %2545 = vpow2.f32 %v1963_v11 }
 0x11c   : > { %2547 = vtanh.f32 %v572_v6 }
 0x122   : > { %v2542_v33 = vpop.eup %2541 }
 0x123   : > { %v2544_v13 = vpop.eup %2543  ;;  %v577_v7 = vadd.f32 1.0, %v2542_v33 }
 0x124   : > { %v583_v48 = vadd.f32 1.0, %v2544_v13 }
 0x125   : > { %2549 = vrcp.f32 %v577_v7  ;;  %v2546_v37 = vpop.eup %2545 }
 0x126   : > { %2551 = vrcp.f32 %v583_v48  ;;  %v2548_v55 = vpop.eup %2547  ;;  %v590_v25 = vadd.f32 1.0, %v2546_v37  ;;  %v1967_v48 = vld [vmem:[%s2725_s6 + $0x78] sm:$0xff] }
 0x128   : > { %2553 = vrcp.f32 %v590_v25 }
 0x12f   : > { %v2550_v3 = vpop.eup %2549 }
 0x130   : > { %v2552_v42 = vpop.eup %2551  ;;  %v594_v44 = vmul.f32 %v2550_v3, %v2548_v55  ;;  %v1966_v3 = vld [vmem:[%s2725_s6 + $0x70] sm:$0xff] }
 0x131   : > { %v593_v36 = vmul.f32 %v2552_v42, %v419_v28 }
 0x132   : > { %v2554_v42 = vpop.eup %2553 }
 0x133   : > { %v3359_v11 = vadd.f32 %v594_v44, %v593_v36  ;;  %v669_v33 = vpop.f32.mrb[2].mxu0 }
 0x134   : > { %v745_v6 = vadd.f32 %v1964_v51, %v669_v33  ;;  %v671_v13 = vpop.f32.mrb[3].mxu0 }
 0x135   : > { %2555 = vtanh.f32 %v3359_v11  ;;  %v746_v7 = vadd.f32 %v1965_v54, %v671_v13  ;;  %v740_v37 = vpop.f32.mrb[2].mxu1 }
 0x136   : > { %v1968_v58 = vmul.f32 -1.442695, %v745_v6  ;;  %v742_v55 = vpop.f32.mrb[3].mxu1  ;;  %v747_v25 = vadd.f32 %v1966_v3, %v740_v37  ;;  %v3677_v3 = vld [vmem:[#allocation30_spill] sm:$0xff] }
 0x137   : > { %v1969_v20 = vmul.f32 -1.442695, %v746_v7  ;;  %v748_v28 = vadd.f32 %v1967_v48, %v742_v55  ;;  %v423_v7 = vld [vmem:[#allocation3 + $0x8] sm:$0xff]  ;;  %v3675_v48 = vld [vmem:[#allocation29_spill] sm:$0xff] }
 0x138   : > { %2557 = vpow2.f32 %v1968_v58 }
 0x139   : > { %2559 = vpow2.f32 %v1969_v20  ;;  %v1970_v44 = vmul.f32 -1.442695, %v748_v28  ;;  %v3676_v28 = vld [vmem:[#allocation26_spill] sm:$0xff] }
 0x13b   : > { %2561 = vpow2.f32 %v1970_v44 }
 0x13c   : > { %2563 = vtanh.f32 %v747_v25  ;;  %v3679_v25 = vld [vmem:[#allocation28_spill] sm:$0xff] }
 0x13f   : > { %v2556_v36 = vpop.eup %2555 }
 0x140   : > { %v597_v19 = vmul.f32 %v2556_v36, %v2554_v42  ;;  %v3678_v36 = vld [vmem:[#allocation27_spill] sm:$0xff] }
 0x142   : > { %v2558_v51 = vpop.eup %2557  ;;  %773 = vst [vmem:[%s2730_s9] sm:$0xff] %v597_v19  ;;  %846 = vmatmul.mubr.f32.vlgmr.msra.gmra.mrb[4].mxu0 %v597_v19  ;;  %917 = vmatmul.mubr.f32.vlgmr.msra.gmra.mrb[4].mxu1 %v597_v19 }
 0x143   : > { %v2560_v54 = vpop.eup %2559  ;;  %v752_v33 = vadd.f32 1.0, %v2558_v51  ;;  %2214 = vmatpush1.bf16.msra.mxu0 %v3048_v62  ;;  %2246 = vmatpush1.bf16.msra.mxu1 %v3100_v35  ;;  %v3680_v51 = vld [vmem:[#allocation31_spill] sm:$0xff] }
 0x144   : > { %v758_v6 = vadd.f32 1.0, %v2560_v54  ;;  %2216 = vmatprep.subr.bf16.mxu0 %v3051_v0  ;;  %2248 = vmatprep.subr.bf16.mxu1 %v3106_v39  ;;  %v3681_v54 = vld [vmem:[#allocation32_spill] sm:$0xff] }
 0x145   : > { %2565 = vrcp.f32 %v752_v33  ;;  %1020 = vmatprep.mubr.f32.mxu0 %v3674_v57  ;;  %1091 = vmatprep.mubr.f32.mxu1 %v3674_v57  ;;  %v2562_v19 = vpop.eup %2561 }
 0x146   : > { %2567 = vrcp.f32 %v758_v6  ;;  %v2564_v13 = vpop.eup %2563  ;;  %v765_v20 = vadd.f32 1.0, %v2562_v19 }
 0x147   : > { %2218 = vmatpush1.bf16.msra.mxu0 %v3084_v22  ;;  %2250 = vmatpush1.bf16.msra.mxu1 %v3136_v60 }
 0x148   : > { %2220 = vmatprep.subr.bf16.mxu0 %v3088_v24  ;;  %2252 = vmatprep.subr.bf16.mxu1 %v3142_v2  ;;  %2569 = vrcp.f32 %v765_v20  ;;  %v3685_v20 = vld [vmem:[#allocation13_spill] sm:$0xff] }
 0x14b   : > { %2222 = vmatpush1.bf16.msra.mxu0 %v3121_v50  ;;  %2254 = vmatpush1.bf16.msra.mxu1 %v3173_v32 }
 0x14c   : > { %2224 = vmatprep.subr.bf16.mxu0 %v3124_v52  ;;  %2256 = vmatprep.subr.bf16.mxu1 %v3179_v40 }
 0x14f   : > { %v2566_v58 = vpop.eup %2565  ;;  %2226 = vmatpush1.bf16.msra.mxu0 %v3158_v17  ;;  %2258 = vmatpush1.bf16.msra.mxu1 %v3675_v48 }
 0x150   : > { %v2568_v37 = vpop.eup %2567  ;;  %v769_v55 = vmul.f32 %v2566_v58, %v2564_v13  ;;  %2228 = vmatprep.subr.bf16.mxu0 %v3676_v28  ;;  %2260 = vmatprep.subr.bf16.mxu1 %v3677_v3  ;;  %v3682_v13 = vld [vmem:[#allocation15_spill] sm:$0xff]  ;;  %v3684_v58 = vld [vmem:[#allocation18_spill] sm:$0xff] }
 0x151   : > { %v768_v42 = vmul.f32 %v2568_v37, %v423_v7  ;;  %v3683_v7 = vld [vmem:[#allocation12_spill] sm:$0xff]  ;;  %v3686_v37 = vld [vmem:[#allocation19_spill] sm:$0xff] }
 0x152   : > { %v2570_v33 = vpop.eup %2569 }
 0x153   : > { %v3383_v44 = vadd.f32 %v769_v55, %v768_v42  ;;  %2230 = vmatpush1.bf16.msra.mxu0 %v3678_v36  ;;  %2262 = vmatpush1.bf16.msra.mxu1 %v3245_v61  ;;  %v3687_v55 = vld [vmem:[#allocation16_spill] sm:$0xff]  ;;  %v3688_v42 = vld [vmem:[#allocation22_spill] sm:$0xff] }
 0x154   : > { %2232 = vmatprep.subr.bf16.mxu0 %v3679_v25  ;;  %2264 = vmatprep.subr.bf16.mxu1 %v3251_v5 }
 0x155   : > { %2571 = vtanh.f32 %v3383_v44 }
 0x157   : > { %2234 = vmatpush1.bf16.msra.mxu0 %v3230_v45  ;;  %2266 = vmatpush1.bf16.msra.mxu1 %v3278_v12 }
 0x158   : > { %2236 = vmatprep.subr.bf16.mxu0 %v3680_v51  ;;  %2268 = vmatprep.subr.bf16.mxu1 %v3281_v8 }
 0x15b   : > { %2238 = vmatpush1.bf16.msra.mxu0 %v3681_v54  ;;  %2270 = vmatpush1.bf16.msra.mxu1 %v3300_v29 }
 0x15c   : > { %2240 = vmatprep.subr.bf16.mxu0 %v3269_v41  ;;  %2272 = vmatprep.subr.bf16.mxu1 %v3303_v30 }
 0x15f   : > { %v2572_v6 = vpop.eup %2571  ;;  %2242 = vmatpush1.bf16.msra.mxu0 %v3296_v14  ;;  %2274 = vmatpush1.bf16.msra.mxu1 %v3313_v21 }
 0x160   : > { %v772_v19 = vmul.f32 %v2572_v6, %v2570_v33  ;;  %2276 = vmatprep.subr.bf16.mxu0 %v2746_v4  ;;  %2308 = vmatprep.subr.bf16.mxu1 %v2800_v23  ;;  %v3689_v33 = vld [vmem:[#allocation17_spill] sm:$0xff]  ;;  %v3690_v6 = vld [vmem:[#allocation23_spill] sm:$0xff] }
 0x162   : > { %1971 = vst [vmem:[%s2735_s13 + $0x18] sm:$0xff] %v772_v19  ;;  %1021 = vmatmul.mubr.f32.vlgmr.msra.gmra.mrb[6].mxu0 %v772_v19  ;;  %1092 = vmatmul.mubr.f32.vlgmr.msra.gmra.mrb[6].mxu1 %v772_v19  ;;  %v3691_v19 = vld [vmem:[#allocation20_spill] sm:$0xff] }
 0x163   : > { %2278 = vmatpush1.bf16.msra.mxu0 %v2759_v9  ;;  %2310 = vmatpush1.bf16.msra.mxu1 %v2808_v26 }
 0x164   : > { %2280 = vmatprep.subr.bf16.mxu0 %v2761_v10  ;;  %2312 = vmatprep.subr.bf16.mxu1 %v2833_v34 }
 0x165   : > { %1199 = vmatprep.mubr.f32.mxu0 %v3674_v57  ;;  %1270 = vmatprep.mubr.f32.mxu1 %v3674_v57 }
 0x167   : > { %2282 = vmatpush1.bf16.msra.mxu0 %v2777_v15  ;;  %2314 = vmatpush1.bf16.msra.mxu1 %v2844_v38 }
 0x168   : > { %2284 = vmatprep.subr.bf16.mxu0 %v2786_v18  ;;  %2316 = vmatprep.subr.bf16.mxu1 %v2868_v46 }
 0x16b   : > { %2286 = vmatpush1.bf16.msra.mxu0 %v2811_v27  ;;  %2318 = vmatpush1.bf16.msra.mxu1 %v2877_v49 }
 0x16c   : > { %2288 = vmatprep.subr.bf16.mxu0 %v2824_v31  ;;  %2320 = vmatprep.subr.bf16.mxu1 %v2889_v53 }
 0x16f   : > { %2290 = vmatpush1.bf16.msra.mxu0 %v2860_v43  ;;  %2322 = vmatpush1.bf16.msra.mxu1 %v2919_v63 }
 0x170   : > { %2292 = vmatprep.subr.bf16.mxu0 %v2871_v47  ;;  %2324 = vmatprep.subr.bf16.mxu1 %v2925_v1  ;;  %v1975_v47 = vld [vmem:[%s2720_s27 + $0x38] sm:$0xff] }
 0x173   : > { %2294 = vmatpush1.bf16.msra.mxu0 %v2898_v56  ;;  %2326 = vmatpush1.bf16.msra.mxu1 %v2955_v16 }
 0x174   : > { %2296 = vmatprep.subr.bf16.mxu0 %v2907_v59  ;;  %2328 = vmatprep.subr.bf16.mxu1 %v3682_v13  ;;  %v3692_v13 = vld [vmem:[#allocation24_spill] sm:$0xff] }
 0x177   : > { %2298 = vmatpush1.bf16.msra.mxu0 %v3683_v7  ;;  %2330 = vmatpush1.bf16.msra.mxu1 %v3684_v58  ;;  %v3693_v7 = vld [vmem:[#allocation21_spill] sm:$0xff] }
 0x178   : > { %2300 = vmatprep.subr.bf16.mxu0 %v3685_v20  ;;  %2332 = vmatprep.subr.bf16.mxu1 %v3686_v37  ;;  %v3694_v58 = vld [vmem:[#allocation25_spill] sm:$0xff]  ;;  %v1972_v20 = vld [vmem:[%s2720_s27 + $0x20] sm:$0xff] }
 0x179   : > { %v1973_v37 = vld [vmem:[%s2720_s27 + $0x28] sm:$0xff] }
 0x17b   : > { %2302 = vmatpush1.bf16.msra.mxu0 %v3687_v55  ;;  %2334 = vmatpush1.bf16.msra.mxu1 %v3688_v42 }
 0x17c   : > { %2304 = vmatprep.subr.bf16.mxu0 %v3689_v33  ;;  %2336 = vmatprep.subr.bf16.mxu1 %v3690_v6 }
 0x17f   : > { %2306 = vmatpush1.bf16.msra.mxu0 %v3691_v19  ;;  %2338 = vmatpush1.bf16.msra.mxu1 %v3692_v13  ;;  %v1974_v13 = vld [vmem:[%s2720_s27 + $0x30] sm:$0xff] }
 0x180   : > { %2340 = vmatprep.subr.bf16.mxu0 %v3693_v7  ;;  %2372 = vmatprep.subr.bf16.mxu1 %v3694_v58 }
 0x215   : > { %v847_v59 = vpop.f32.mrb[4].mxu0  ;;  %v918_v55 = vpop.f32.mrb[4].mxu1 }
 0x216   : > { %v923_v16 = vadd.f32 %v1972_v20, %v847_v59  ;;  %v849_v42 = vpop.f32.mrb[5].mxu0  ;;  %v920_v56 = vpop.f32.mrb[5].mxu1  ;;  %v925_v7 = vadd.f32 %v1974_v13, %v918_v55  ;;  %v1980_v13 = vld [vmem:[%s2725_s6 + $0x48] sm:$0xff] }
 0x217   : > { %v924_v33 = vadd.f32 %v1973_v37, %v849_v42  ;;  %v926_v19 = vadd.f32 %v1975_v47, %v920_v56  ;;  %v1979_v56 = vld [vmem:[%s2725_s6 + $0x40] sm:$0xff] }
 0x218   : > { %v1976_v1 = vmul.f32 -1.442695, %v923_v16 }
 0x219   : > { %v1977_v6 = vmul.f32 -1.442695, %v924_v33  ;;  %v1978_v63 = vmul.f32 -1.442695, %v926_v19 }
 0x21a   : > { %2573 = vpow2.f32 %v1976_v1 }
 0x21b   : > { %2575 = vpow2.f32 %v1977_v6 }
 0x21c   : > { %2577 = vpow2.f32 %v1978_v63 }
 0x21d   : > { %2579 = vtanh.f32 %v925_v7 }
 0x224   : > { %v2574_v43 = vpop.eup %2573 }
 0x225   : > { %v2576_v58 = vpop.eup %2575  ;;  %v930_v53 = vadd.f32 1.0, %v2574_v43 }
 0x226   : > { %v936_v59 = vadd.f32 1.0, %v2576_v58  ;;  %v2578_v20 = vpop.eup %2577 }
 0x227   : > { %2581 = vrcp.f32 %v930_v53  ;;  %v2580_v16 = vpop.eup %2579  ;;  %v943_v33 = vadd.f32 1.0, %v2578_v20  ;;  %v1982_v20 = vld [vmem:[%s2725_s6 + $0x58] sm:$0xff] }
 0x228   : > { %2583 = vrcp.f32 %v936_v59 }
 0x229   : > { %2585 = vrcp.f32 %v943_v33 }
 0x231   : > { %v2582_v37 = vpop.eup %2581 }
 0x232   : > { %v2584_v1 = vpop.eup %2583  ;;  %v947_v42 = vmul.f32 %v2582_v37, %v2580_v16  ;;  %v1981_v16 = vld [vmem:[%s2725_s6 + $0x50] sm:$0xff] }
 0x233   : > { %v946_v47 = vmul.f32 %v2584_v1, %v3359_v11  ;;  %v2586_v37 = vpop.eup %2585 }
 0x235   : > { %v3444_v55 = vadd.f32 %v947_v42, %v946_v47  ;;  %v1022_v43 = vpop.f32.mrb[6].mxu0  ;;  %v1093_v63 = vpop.f32.mrb[6].mxu1 }
 0x236   : > { %v1098_v7 = vadd.f32 %v1979_v56, %v1022_v43  ;;  %v1024_v53 = vpop.f32.mrb[7].mxu0  ;;  %v1095_v58 = vpop.f32.mrb[7].mxu1  ;;  %v1100_v47 = vadd.f32 %v1981_v16, %v1093_v63  ;;  %v3707_v16 = vld [vmem:[#allocation13_spill] sm:$0xff] }
 0x237   : > { %v1099_v6 = vadd.f32 %v1980_v13, %v1024_v53  ;;  %2587 = vtanh.f32 %v3444_v55  ;;  %v1101_v11 = vadd.f32 %v1982_v20, %v1095_v58 }
 0x238   : > { %v1983_v19 = vmul.f32 -1.442695, %v1098_v7 }
 0x239   : > { %v1984_v59 = vmul.f32 -1.442695, %v1099_v6  ;;  %v1985_v42 = vmul.f32 -1.442695, %v1101_v11 }
 0x23a   : > { %2589 = vpow2.f32 %v1983_v19 }
 0x23b   : > { %2591 = vpow2.f32 %v1984_v59 }
 0x23c   : > { %2593 = vpow2.f32 %v1985_v42  ;;  %v3710_v42 = vld [vmem:[#allocation22_spill] sm:$0xff] }
 0x23d   : > { %2595 = vtanh.f32 %v1100_v47  ;;  %v3711_v47 = vld [vmem:[#allocation17_spill] sm:$0xff] }
 0x241   : > { %v2588_v1 = vpop.eup %2587 }
 0x242   : > { %v950_v31 = vmul.f32 %v2588_v1, %v2586_v37  ;;  %v3708_v37 = vld [vmem:[#allocation19_spill] sm:$0xff]  ;;  %v3709_v1 = vld [vmem:[#allocation16_spill] sm:$0xff] }
 0x244   : > { %v2590_v33 = vpop.eup %2589  ;;  %1986 = vst [vmem:[%s2730_s9 + $0x8] sm:$0xff] %v950_v31  ;;  %1200 = vmatmul.mubr.f32.vlgmr.msra.gmra.mrb[8].mxu0 %v950_v31  ;;  %1271 = vmatmul.mubr.f32.vlgmr.msra.gmra.mrb[8].mxu1 %v950_v31 }
 0x245   : > { %v2592_v56 = vpop.eup %2591  ;;  %v1105_v13 = vadd.f32 1.0, %v2590_v33  ;;  %2342 = vmatpush1.bf16.msra.mxu0 %v3048_v62  ;;  %2374 = vmatpush1.bf16.msra.mxu1 %v3100_v35  ;;  %v3712_v33 = vld [vmem:[#allocation23_spill] sm:$0xff] }
 0x246   : > { %v1111_v43 = vadd.f32 1.0, %v2592_v56  ;;  %2344 = vmatprep.subr.bf16.mxu0 %v3051_v0  ;;  %2376 = vmatprep.subr.bf16.mxu1 %v3106_v39  ;;  %v2594_v31 = vpop.eup %2593  ;;  %v3713_v56 = vld [vmem:[#allocation20_spill] sm:$0xff] }
 0x247   : > { %2597 = vrcp.f32 %v1105_v13  ;;  %1374 = vmatprep.mubr.f32.mxu0 %v3674_v57  ;;  %1445 = vmatprep.mubr.f32.mxu1 %v3674_v57  ;;  %v2596_v63 = vpop.eup %2595  ;;  %v1118_v6 = vadd.f32 1.0, %v2594_v31  ;;  %v3714_v13 = vld [vmem:[#allocation24_spill] sm:$0xff]  ;;  %v3716_v31 = vld [vmem:[#allocation25_spill] sm:$0xff] }
 0x248   : > { %2599 = vrcp.f32 %v1111_v43  ;;  %v3715_v43 = vld [vmem:[#allocation21_spill] sm:$0xff] }
 0x249   : > { %2346 = vmatpush1.bf16.msra.mxu0 %v3084_v22  ;;  %2378 = vmatpush1.bf16.msra.mxu1 %v3136_v60  ;;  %2601 = vrcp.f32 %v1118_v6 }
 0x24a   : > { %2348 = vmatprep.subr.bf16.mxu0 %v3088_v24  ;;  %2380 = vmatprep.subr.bf16.mxu1 %v3142_v2 }
 0x24d   : > { %2350 = vmatpush1.bf16.msra.mxu0 %v3121_v50  ;;  %2382 = vmatpush1.bf16.msra.mxu1 %v3173_v32 }
 0x24e   : > { %2352 = vmatprep.subr.bf16.mxu0 %v3124_v52  ;;  %2384 = vmatprep.subr.bf16.mxu1 %v3179_v40 }
 0x251   : > { %v2598_v7 = vpop.eup %2597  ;;  %2354 = vmatpush1.bf16.msra.mxu0 %v3158_v17  ;;  %2386 = vmatpush1.bf16.msra.mxu1 %v3675_v48 }
 0x252   : > { %v2600_v53 = vpop.eup %2599  ;;  %v1122_v58 = vmul.f32 %v2598_v7, %v2596_v63  ;;  %2356 = vmatprep.subr.bf16.mxu0 %v3676_v28  ;;  %2388 = vmatprep.subr.bf16.mxu1 %v3677_v3  ;;  %v1988_v63 = vld [vmem:[%s2720_s27 + $0x40] sm:$0xff]  ;;  %v1989_v7 = vld [vmem:[%s2720_s27 + $0x48] sm:$0xff] }
 0x253   : > { %v1121_v19 = vmul.f32 %v2600_v53, %v3383_v44  ;;  %v2602_v44 = vpop.eup %2601 }
 0x255   : > { %v3469_v59 = vadd.f32 %v1122_v58, %v1121_v19  ;;  %2358 = vmatpush1.bf16.msra.mxu0 %v3678_v36  ;;  %2390 = vmatpush1.bf16.msra.mxu1 %v3245_v61 }
 0x256   : > { %2360 = vmatprep.subr.bf16.mxu0 %v3679_v25  ;;  %2392 = vmatprep.subr.bf16.mxu1 %v3251_v5 }
 0x257   : > { %2603 = vtanh.f32 %v3469_v59 }
 0x259   : > { %2362 = vmatpush1.bf16.msra.mxu0 %v3230_v45  ;;  %2394 = vmatpush1.bf16.msra.mxu1 %v3278_v12 }
 0x25a   : > { %2364 = vmatprep.subr.bf16.mxu0 %v3680_v51  ;;  %2396 = vmatprep.subr.bf16.mxu1 %v3281_v8 }
 0x25d   : > { %2366 = vmatpush1.bf16.msra.mxu0 %v3681_v54  ;;  %2398 = vmatpush1.bf16.msra.mxu1 %v3300_v29 }
 0x25e   : > { %2368 = vmatprep.subr.bf16.mxu0 %v3269_v41  ;;  %2400 = vmatprep.subr.bf16.mxu1 %v3303_v30 }
 0x261   : > { %v2604_v20 = vpop.eup %2603  ;;  %2370 = vmatpush1.bf16.msra.mxu0 %v3296_v14  ;;  %2402 = vmatpush1.bf16.msra.mxu1 %v3313_v21 }
 0x262   : > { %v1125_v11 = vmul.f32 %v2604_v20, %v2602_v44  ;;  %2404 = vmatprep.subr.bf16.mxu0 %v2746_v4  ;;  %2436 = vmatprep.subr.bf16.mxu1 %v2800_v23  ;;  %v3695_v4 = vld [vmem:[#allocation4_spill] sm:$0xff]  ;;  %v3698_v23 = vld [vmem:[#allocation10_spill] sm:$0xff] }
 0x264   : > { %1987 = vst [vmem:[%s2735_s13 + $0x10] sm:$0xff] %v1125_v11  ;;  %1375 = vmatmul.mubr.f32.vlgmr.msra.gmra.mrb[10].mxu0 %v1125_v11  ;;  %1446 = vmatmul.mubr.f32.vlgmr.msra.gmra.mrb[10].mxu1 %v1125_v11 }
 0x265   : > { %2406 = vmatpush1.bf16.msra.mxu0 %v2759_v9  ;;  %2438 = vmatpush1.bf16.msra.mxu1 %v2808_v26  ;;  %v3696_v9 = vld [vmem:[#allocation7_spill] sm:$0xff]  ;;  %v3699_v26 = vld [vmem:[#allocation6_spill] sm:$0xff] }
 0x266   : > { %2408 = vmatprep.subr.bf16.mxu0 %v2761_v10  ;;  %2440 = vmatprep.subr.bf16.mxu1 %v2833_v34  ;;  %v3697_v10 = vld [vmem:[#allocation5_spill] sm:$0xff]  ;;  %v3701_v34 = vld [vmem:[#allocation8_spill] sm:$0xff] }
 0x267   : > { %1553 = vmatprep.mubr.f32.mxu0 %v3674_v57  ;;  %1624 = vmatprep.mubr.f32.mxu1 %v3674_v57 }
 0x269   : > { %2410 = vmatpush1.bf16.msra.mxu0 %v2777_v15  ;;  %2442 = vmatpush1.bf16.msra.mxu1 %v2844_v38  ;;  %v3700_v15 = vld [vmem:[#allocation11_spill] sm:$0xff] }
 0x26a   : > { %2412 = vmatprep.subr.bf16.mxu0 %v2786_v18  ;;  %2444 = vmatprep.subr.bf16.mxu1 %v2868_v46  ;;  %v3702_v18 = vld [vmem:[#allocation14_spill] sm:$0xff]  ;;  %v3704_v38 = vld [vmem:[#allocation15_spill] sm:$0xff]  ;;  %v3705_v46 = vld [vmem:[#allocation12_spill] sm:$0xff] }
 0x26d   : > { %2414 = vmatpush1.bf16.msra.mxu0 %v2811_v27  ;;  %2446 = vmatpush1.bf16.msra.mxu1 %v2877_v49  ;;  %v3703_v27 = vld [vmem:[#allocation9_spill] sm:$0xff]  ;;  %v3706_v49 = vld [vmem:[#allocation18_spill] sm:$0xff] }
 0x26e   : > { %2416 = vmatprep.subr.bf16.mxu0 %v3695_v4  ;;  %2448 = vmatprep.subr.bf16.mxu1 %v3696_v9  ;;  %v1991_v9 = vld [vmem:[%s2720_s27 + $0x58] sm:$0xff] }
 0x271   : > { %2418 = vmatpush1.bf16.msra.mxu0 %v3697_v10  ;;  %2450 = vmatpush1.bf16.msra.mxu1 %v3698_v23  ;;  %v1990_v23 = vld [vmem:[%s2720_s27 + $0x50] sm:$0xff] }
 0x272   : > { %2420 = vmatprep.subr.bf16.mxu0 %v3699_v26  ;;  %2452 = vmatprep.subr.bf16.mxu1 %v3700_v15 }
 0x275   : > { %2422 = vmatpush1.bf16.msra.mxu0 %v3701_v34  ;;  %2454 = vmatpush1.bf16.msra.mxu1 %v3702_v18 }
 0x276   : > { %2424 = vmatprep.subr.bf16.mxu0 %v3703_v27  ;;  %2456 = vmatprep.subr.bf16.mxu1 %v3704_v38 }
 0x279   : > { %2426 = vmatpush1.bf16.msra.mxu0 %v3705_v46  ;;  %2458 = vmatpush1.bf16.msra.mxu1 %v3706_v49 }
 0x27a   : > { %2428 = vmatprep.subr.bf16.mxu0 %v3707_v16  ;;  %2460 = vmatprep.subr.bf16.mxu1 %v3708_v37 }
 0x27d   : > { %2430 = vmatpush1.bf16.msra.mxu0 %v3709_v1  ;;  %2462 = vmatpush1.bf16.msra.mxu1 %v3710_v42 }
 0x27e   : > { %2432 = vmatprep.subr.bf16.mxu0 %v3711_v47  ;;  %2464 = vmatprep.subr.bf16.mxu1 %v3712_v33  ;;  %v1995_v33 = vld [vmem:[%s2725_s6 + $0x20] sm:$0xff] }
 0x281   : > { %2434 = vmatpush1.bf16.msra.mxu0 %v3713_v56  ;;  %2466 = vmatpush1.bf16.msra.mxu1 %v3714_v13  ;;  %v1996_v56 = vld [vmem:[%s2725_s6 + $0x28] sm:$0xff] }
 0x282   : > { %2468 = vmatprep.subr.bf16.mxu0 %v3715_v43  ;;  %2500 = vmatprep.subr.bf16.mxu1 %v3716_v31 }
 0x317   : > { %v1201_v53 = vpop.f32.mrb[8].mxu0  ;;  %v1272_v58 = vpop.f32.mrb[8].mxu1 }
 0x318   : > { %v1277_v6 = vadd.f32 %v1988_v63, %v1201_v53  ;;  %v1203_v19 = vpop.f32.mrb[9].mxu0  ;;  %v1274_v44 = vpop.f32.mrb[9].mxu1  ;;  %v1279_v15 = vadd.f32 %v1990_v23, %v1272_v58 }
 0x319   : > { %v1278_v20 = vadd.f32 %v1989_v7, %v1203_v19  ;;  %v1280_v10 = vadd.f32 %v1991_v9, %v1274_v44  ;;  %v1998_v44 = vld [vmem:[%s2725_s6 + $0x38] sm:$0xff] }
 0x31a   : > { %v1992_v11 = vmul.f32 -1.442695, %v1277_v6 }
 0x31b   : > { %v1993_v4 = vmul.f32 -1.442695, %v1278_v20  ;;  %v1994_v26 = vmul.f32 -1.442695, %v1280_v10  ;;  %v1997_v20 = vld [vmem:[%s2725_s6 + $0x30] sm:$0xff] }
 0x31c   : > { %2605 = vpow2.f32 %v1992_v11 }
 0x31d   : > { %2607 = vpow2.f32 %v1993_v4 }
 0x31e   : > { %2609 = vpow2.f32 %v1994_v26 }
 0x31f   : > { %2611 = vtanh.f32 %v1279_v15 }
 0x326   : > { %v2606_v34 = vpop.eup %2605 }
 0x327   : > { %v2608_v18 = vpop.eup %2607  ;;  %v1284_v27 = vadd.f32 1.0, %v2606_v34 }
 0x328   : > { %v1290_v38 = vadd.f32 1.0, %v2608_v18  ;;  %v2610_v46 = vpop.eup %2609 }
 0x329   : > { %2613 = vrcp.f32 %v1284_v27  ;;  %v2612_v49 = vpop.eup %2611  ;;  %v1297_v42 = vadd.f32 1.0, %v2610_v46 }
 0x32a   : > { %2615 = vrcp.f32 %v1290_v38 }
 0x32b   : > { %2617 = vrcp.f32 %v1297_v42 }
 0x333   : > { %v2614_v16 = vpop.eup %2613 }
 0x334   : > { %v2616_v37 = vpop.eup %2615  ;;  %v1301_v1 = vmul.f32 %v2614_v16, %v2612_v49 }
 0x335   : > { %v1300_v47 = vmul.f32 %v2616_v37, %v3444_v55  ;;  %v2618_v11 = vpop.eup %2617  ;;  %v1659_v37 = vld [vmem:[%s2725_s6] sm:$0xff] }
 0x337   : > { %v3530_v13 = vadd.f32 %v1301_v1, %v1300_v47  ;;  %v1376_v43 = vpop.f32.mrb[10].mxu0  ;;  %v1447_v31 = vpop.f32.mrb[10].mxu1  ;;  %v1660_v1 = vld [vmem:[%s2725_s6 + $0x8] sm:$0xff] }
 0x338   : > { %v1452_v63 = vadd.f32 %v1995_v33, %v1376_v43  ;;  %v1378_v7 = vpop.f32.mrb[11].mxu0  ;;  %v1449_v53 = vpop.f32.mrb[11].mxu1  ;;  %v1454_v10 = vadd.f32 %v1997_v20, %v1447_v31 }
 0x339   : > { %v1453_v58 = vadd.f32 %v1996_v56, %v1378_v7  ;;  %2619 = vtanh.f32 %v3530_v13  ;;  %v1455_v55 = vadd.f32 %v1998_v44, %v1449_v53 }
 0x33a   : > { %v1999_v6 = vmul.f32 -1.442695, %v1452_v63 }
 0x33b   : > { %v2000_v19 = vmul.f32 -1.442695, %v1453_v58  ;;  %v2001_v9 = vmul.f32 -1.442695, %v1455_v55  ;;  %v1662_v58 = vld [vmem:[%s2725_s6 + $0x18] sm:$0xff] }
 0x33c   : > { %2621 = vpow2.f32 %v1999_v6  ;;  %v1661_v6 = vld [vmem:[%s2725_s6 + $0x10] sm:$0xff] }
 0x33d   : > { %2623 = vpow2.f32 %v2000_v19 }
 0x33e   : > { %2625 = vpow2.f32 %v2001_v9 }
 0x33f   : > { %2627 = vtanh.f32 %v1454_v10 }
 0x343   : > { %v2620_v4 = vpop.eup %2619 }
 0x344   : > { %v1304_v23 = vmul.f32 %v2620_v4, %v2618_v11 }
 0x346   : > { %v2622_v26 = vpop.eup %2621  ;;  %2002 = vst [vmem:[%s2730_s9 + $0x10] sm:$0xff] %v1304_v23  ;;  %1554 = vmatmul.mubr.f32.vlgmr.msra.gmra.mrb[12].mxu0 %v1304_v23  ;;  %1625 = vmatmul.mubr.f32.vlgmr.msra.gmra.mrb[12].mxu1 %v1304_v23 }
 0x347   : > { %v2624_v15 = vpop.eup %2623  ;;  %v1459_v34 = vadd.f32 1.0, %v2622_v26  ;;  %2470 = vmatpush1.bf16.msra.mxu0 %v3048_v62  ;;  %2502 = vmatpush1.bf16.msra.mxu1 %v3100_v35 }
 0x348   : > { %v1465_v18 = vadd.f32 1.0, %v2624_v15  ;;  %2472 = vmatprep.subr.bf16.mxu0 %v3051_v0  ;;  %2504 = vmatprep.subr.bf16.mxu1 %v3106_v39  ;;  %v2626_v62 = vpop.eup %2625 }
 0x349   : > { %2629 = vrcp.f32 %v1459_v34  ;;  %1727 = vmatprep.mubr.f32.mxu0 %v3674_v57  ;;  %1798 = vmatprep.mubr.f32.mxu1 %v3674_v57  ;;  %v2628_v0 = vpop.eup %2627  ;;  %v2006_v57 = vld [vmem:[%s2720_s27 + $0x70] sm:$0xff] }
 0x34a   : > { %2631 = vrcp.f32 %v1465_v18 }
 0x34b   : > { %2474 = vmatpush1.bf16.msra.mxu0 %v3084_v22  ;;  %2506 = vmatpush1.bf16.msra.mxu1 %v3136_v60 }
 0x34c   : > { %2476 = vmatprep.subr.bf16.mxu0 %v3088_v24  ;;  %2508 = vmatprep.subr.bf16.mxu1 %v3142_v2  ;;  %v1472_v24 = vadd.f32 1.0, %v2626_v62 }
 0x34e   : > { %2633 = vrcp.f32 %v1472_v24 }
 0x34f   : > { %2478 = vmatpush1.bf16.msra.mxu0 %v3121_v50  ;;  %2510 = vmatpush1.bf16.msra.mxu1 %v3173_v32  ;;  %v2004_v32 = vld [vmem:[%s2720_s27 + $0x60] sm:$0xff] }
 0x350   : > { %2480 = vmatprep.subr.bf16.mxu0 %v3124_v52  ;;  %2512 = vmatprep.subr.bf16.mxu1 %v3179_v40  ;;  %v2005_v40 = vld [vmem:[%s2720_s27 + $0x68] sm:$0xff] }
 0x353   : > { %v2630_v35 = vpop.eup %2629  ;;  %2482 = vmatpush1.bf16.msra.mxu0 %v3158_v17  ;;  %2514 = vmatpush1.bf16.msra.mxu1 %v3675_v48 }
 0x354   : > { %v2632_v22 = vpop.eup %2631  ;;  %v1476_v39 = vmul.f32 %v2630_v35, %v2628_v0  ;;  %2484 = vmatprep.subr.bf16.mxu0 %v3676_v28  ;;  %2516 = vmatprep.subr.bf16.mxu1 %v3677_v3 }
 0x355   : > { %v1475_v50 = vmul.f32 %v2632_v22, %v3469_v59 }
 0x357   : > { %v3555_v60 = vadd.f32 %v1476_v39, %v1475_v50  ;;  %2486 = vmatpush1.bf16.msra.mxu0 %v3678_v36  ;;  %2518 = vmatpush1.bf16.msra.mxu1 %v3245_v61 }
 0x358   : > { %2488 = vmatprep.subr.bf16.mxu0 %v3679_v25  ;;  %2520 = vmatprep.subr.bf16.mxu1 %v3251_v5  ;;  %v2634_v52 = vpop.eup %2633 }
 0x359   : > { %2635 = vtanh.f32 %v3555_v60 }
 0x35b   : > { %2490 = vmatpush1.bf16.msra.mxu0 %v3230_v45  ;;  %2522 = vmatpush1.bf16.msra.mxu1 %v3278_v12 }
 0x35c   : > { %2492 = vmatprep.subr.bf16.mxu0 %v3680_v51  ;;  %2524 = vmatprep.subr.bf16.mxu1 %v3281_v8 }
 0x35f   : > { %2494 = vmatpush1.bf16.msra.mxu0 %v3681_v54  ;;  %2526 = vmatpush1.bf16.msra.mxu1 %v3300_v29 }
 0x360   : > { %2496 = vmatprep.subr.bf16.mxu0 %v3269_v41  ;;  %2528 = vmatprep.subr.bf16.mxu1 %v3303_v30 }
 0x363   : > { %v2636_v2 = vpop.eup %2635  ;;  %2498 = vmatpush1.bf16.msra.mxu0 %v3296_v14  ;;  %2530 = vmatpush1.bf16.msra.mxu1 %v3313_v21  ;;  %v2007_v14 = vld [vmem:[%s2720_s27 + $0x78] sm:$0xff] }
 0x364   : > { %v1479_v17 = vmul.f32 %v2636_v2, %v2634_v52 }
 0x366   : > { %2003 = vst [vmem:[%s2735_s13 + $0x8] sm:$0xff] %v1479_v17  ;;  %1728 = vmatmul.mubr.f32.vlgmr.msra.gmra.mrb[14].mxu0 %v1479_v17  ;;  %1799 = vmatmul.mubr.f32.vlgmr.msra.gmra.mrb[14].mxu1 %v1479_v17 }
 0x419   : > { %v1555_v12 = vpop.f32.mrb[12].mxu0  ;;  %v1626_v45 = vpop.f32.mrb[12].mxu1 }
 0x41a   : > { %v1631_v61 = vadd.f32 %v2004_v32, %v1555_v12  ;;  %v1557_v5 = vpop.f32.mrb[13].mxu0  ;;  %v1628_v41 = vpop.f32.mrb[13].mxu1  ;;  %v1633_v28 = vadd.f32 %v2006_v57, %v1626_v45 }
 0x41b   : > { %v1632_v8 = vadd.f32 %v2005_v40, %v1557_v5  ;;  %v1634_v21 = vadd.f32 %v2007_v14, %v1628_v41 }
 0x41c   : > { %v2008_v29 = vmul.f32 -1.442695, %v1631_v61 }
 0x41d   : > { %v2009_v30 = vmul.f32 -1.442695, %v1632_v8  ;;  %v2010_v48 = vmul.f32 -1.442695, %v1634_v21 }
 0x41e   : > { %2637 = vpow2.f32 %v2008_v29 }
 0x41f   : > { %2639 = vpow2.f32 %v2009_v30 }
 0x420   : > { %2641 = vpow2.f32 %v2010_v48 }
 0x421   : > { %2643 = vtanh.f32 %v1633_v28 }
 0x428   : > { %v2638_v3 = vpop.eup %2637 }
 0x429   : > { %v2640_v36 = vpop.eup %2639  ;;  %v1638_v25 = vadd.f32 1.0, %v2638_v3 }
 0x42a   : > { %v1644_v51 = vadd.f32 1.0, %v2640_v36  ;;  %v2642_v54 = vpop.eup %2641 }
 0x42b   : > { %2645 = vrcp.f32 %v1638_v25  ;;  %v2644_v59 = vpop.eup %2643  ;;  %v1651_v49 = vadd.f32 1.0, %v2642_v54 }
 0x42c   : > { %2647 = vrcp.f32 %v1644_v51 }
 0x42d   : > { %2649 = vrcp.f32 %v1651_v49 }
 0x435   : > { %v2646_v27 = vpop.eup %2645 }
 0x436   : > { %v2648_v38 = vpop.eup %2647  ;;  %v1655_v46 = vmul.f32 %v2646_v27, %v2644_v59 }
 0x437   : > { %v1654_v16 = vmul.f32 %v2648_v38, %v3530_v13  ;;  %v2650_v19 = vpop.eup %2649 }
 0x439   : > { %v1656_v42 = vadd.f32 %v1655_v46, %v1654_v16  ;;  %v1729_v47 = vpop.f32.mrb[14].mxu0  ;;  %v1800_v33 = vpop.f32.mrb[14].mxu1 }
 0x43a   : > { %v1805_v56 = vadd.f32 %v1729_v47, %v1659_v37  ;;  %v1731_v43 = vpop.f32.mrb[15].mxu0  ;;  %v1802_v31 = vpop.f32.mrb[15].mxu1  ;;  %v1807_v11 = vadd.f32 %v1800_v33, %v1661_v6 }
 0x43b   : > { %2651 = vtanh.f32 %v1656_v42  ;;  %1837 = vst [vmem:[#allocation3] sm:$0xff] %v1656_v42  ;;  %v1806_v63 = vadd.f32 %v1731_v43, %v1660_v1  ;;  %v1808_v13 = vadd.f32 %v1802_v31, %v1662_v58 }
 0x43c   : > { %v2011_v7 = vmul.f32 -1.442695, %v1805_v56 }
 0x43d   : > { %v2012_v53 = vmul.f32 -1.442695, %v1806_v63  ;;  %v2013_v55 = vmul.f32 -1.442695, %v1808_v13 }
 0x43e   : > { %2653 = vpow2.f32 %v2011_v7 }
 0x43f   : > { %2655 = vpow2.f32 %v2012_v53 }
 0x440   : > { %2657 = vpow2.f32 %v2013_v55 }
 0x441   : > { %2659 = vtanh.f32 %v1807_v11 }
 0x445   : > { %v2652_v44 = vpop.eup %2651 }
 0x446   : > { %v1658_v20 = vmul.f32 %v2652_v44, %v2650_v19 }
 0x448   : > { %v2654_v4 = vpop.eup %2653  ;;  %2014 = vst [vmem:[%s2730_s9 + $0x18] sm:$0xff] %v1658_v20  ;;  %1836 = vst [vmem:[#allocation2] sm:$0xff] %v1658_v20 }
 0x449   : > { %v2656_v9 = vpop.eup %2655  ;;  %v1812_v10 = vadd.f32 1.0, %v2654_v4 }
 0x44a   : > { %v1818_v23 = vadd.f32 1.0, %v2656_v9  ;;  %v2658_v26 = vpop.eup %2657 }
 0x44b   : > { %2661 = vrcp.f32 %v1812_v10  ;;  %v2660_v15 = vpop.eup %2659  ;;  %v1825_v0 = vadd.f32 1.0, %v2658_v26 }
 0x44c   : > { %2663 = vrcp.f32 %v1818_v23 }
 0x44d   : > { %2665 = vrcp.f32 %v1825_v0 }
 0x455   : > { %v2662_v34 = vpop.eup %2661 }
 0x456   : > { %v2664_v18 = vpop.eup %2663  ;;  %v1829_v62 = vmul.f32 %v2662_v34, %v2660_v15 }
 0x457   : > { %v1828_v35 = vmul.f32 %v2664_v18, %v3555_v60  ;;  %v2666_v39 = vpop.eup %2665 }
 0x459   : > { %v1830_v22 = vadd.f32 %v1829_v62, %v1828_v35 }
 0x45b   : > { %2667 = vtanh.f32 %v1830_v22  ;;  %1839 = vst [vmem:[#allocation3 + $0x8] sm:$0xff] %v1830_v22 }
 0x465   : > { %v2668_v24 = vpop.eup %2667 }
 0x466   : > { %v1832_v50 = vmul.f32 %v2668_v24, %v2666_v39 }
 0x468   : > { %1835 = vst [vmem:[%s2735_s13] sm:$0xff] %v1832_v50  ;;  %1838 = vst [vmem:[#allocation2 + $0x8] sm:$0xff] %v1832_v50 }
 0x469 PF: > { %s16_s18 = sadd.s32 1, %s2675_s18  }
 0x46a   : > { %p13_p6 = scmp.ge.s32.totalorder %s16_s18, 4  }
 0x46c   :  { %15 = sbr.rel (!%p13_p6) target bundleno = 1 (0x1), region = 99 }

// kernel: _lambda_.7
= control target key start
LH: loop header
LB: loop body
LE: loop exit
PB: predicated region body
PF: predicated region fallthrough
CT: control target
= control target key end

     0   :  { %12 = vsyncpa [#allocation6], 0  ;;  %s3059_s24 = smov 0   ;;  %s4077_s0 = inlined_call_operand.vmem [shape: f32[8,8,512], index: 0, kind: input, shape index: {}]   ;;  %s4078_s1 = inlined_call_operand.vmem [shape: f32[8,8,512], index: 1, kind: input, shape index: {}]   ;;  %s4079_s2 = inlined_call_operand.vmem [shape: f32[128,512], index: 2, kind: input, shape index: {}]   ;;  %s4080_s3 = inlined_call_operand.vmem [shape: f32[128,512], index: 3, kind: input, shape index: {}]   ;;  %s4081_s4 = inlined_call_operand.vmem [shape: f32[128,128], index: 4, kind: input, shape index: {}]   ;;  %s4082_s5 = inlined_call_operand.vmem [shape: f32[128,128], index: 5, kind: input, shape index: {}]   ;;  %s4083_s6 = inlined_call_operand.vmem [shape: f32[1,128], index: 6, kind: input, shape index: {}]   ;;  %s4084_s7 = inlined_call_operand.hbm [shape: f32[8,128], index: 7, kind: output, shape index: {}]  }
   0x1 LB: > { %s3065_s25 = sadd.s32 4294967295, %s3011_s24   ;;  %p2098_p0 = scmp.ge.s32.totalorder %s3011_s24, 1  ;;  %s3011_s24 = sphi %s3059_s24, %s18_s24  }
   0x2   : > { %p251_p1 = scmp.lt.s32.totalorder %s3011_s24, 3 }
   0x4   : > { %p252_p2 = pnand %p2098_p0, %p251_p1 }
   0x6   : > { %255 = sbr.rel (%p252_p2) target bundleno = 1452 (0x5ac), region = 48 }
   0xd   : > { %s2099_s26 = sshll.u32 %s3065_s25, 2  ;;  %s293_s27 = ssub.s32 1, %s3065_s25 }
   0xe   : > { %p287_p3 = scmp.lt.s32.totalorder %s2099_s26, 7  ;;  %s2102_s28 = sshll.u32 %s293_s27, 2 }
   0xf   : > { %p295_p4 = scmp.lt.s32.totalorder %s2102_s28, 7  ;;  %p2105_p5 = scmp.ne.s32.totalorder %s3065_s25, 0 }
  0x10   : > { %s4232_s26 = smov (!%p287_p3, %s2099_s26), 7  ;;  %v3013_v0 = vmov (!%p2105_p5), 0.0  }
  0x11   : > { %s4234_s28 = smov (!%p295_p4, %s2102_s28), 7  ;;  %s2161_s29 = sshll.u32 %s4232_s26, 5  ;;  %306 = vst [vmem:[#allocation2] sm:$0xff] (!%p2105_p5), %v3013_v0  ;;  %307 = vst [vmem:[#allocation2 + $0x8] sm:$0xff] (!%p2105_p5), %v3013_v0 }
  0x12   : > { %s3074_s9 = scalar_lea.vmem %s4077_s0, %s2161_s29  ;;  %s2162_s10 = sshll.u32 %s4234_s28, 5  ;;  %308 = vst [vmem:[#allocation3] sm:$0xff] (!%p2105_p5), %v3013_v0  ;;  %309 = vst [vmem:[#allocation3 + $0x8] sm:$0xff] (!%p2105_p5), %v3013_v0 }
  0x13   : > { %s3079_s13 = scalar_lea.vmem %s4078_s1, %s2162_s10  ;;  %305 = sbr.rel (%p2105_p5) target bundleno = 26 (0x1a), region = 52 }
  0x1a PF: > { %v311_v1 = vld [vmem:[%s4079_s2 + $0x8] sm:$0xff]  ;;  %v310_v3 = vld [vmem:[%s4079_s2] sm:$0xff]  ;;  %v4085_v8 = vmov 0.0   ;;  %v313_v20 = vld [vmem:[%s4079_s2 + $0x18] sm:$0xff] }
  0x1b   : > { %v315_v2 = vld [vmem:[%s4079_s2 + $0x28] sm:$0xff]  ;;  %v314_v5 = vld [vmem:[%s4079_s2 + $0x20] sm:$0xff]  ;;  %512 = vmatprep.mubr.f32.mxu0 %v4085_v8  ;;  %583 = vmatprep.mubr.f32.mxu1 %v4085_v8  ;;  %v317_v21 = vld [vmem:[%s4079_s2 + $0x38] sm:$0xff] }
  0x1c   : > { %v3093_v4 = vpack.c.bf16 %v315_v2, %v311_v1  ;;  %v319_v6 = vld [vmem:[%s4079_s2 + $0x48] sm:$0xff]  ;;  %v3106_v9 = vpack.c.bf16 %v314_v5, %v310_v3  ;;  %v318_v11 = vld [vmem:[%s4079_s2 + $0x40] sm:$0xff]  ;;  %v3147_v23 = vpack.c.bf16 %v317_v21, %v313_v20  ;;  %v312_v24 = vld [vmem:[%s4079_s2 + $0x10] sm:$0xff] }
  0x1d   : > { %v323_v7 = vld [vmem:[%s4079_s2 + $0x68] sm:$0xff]  ;;  %v322_v12 = vld [vmem:[%s4079_s2 + $0x60] sm:$0xff]  ;;  %v316_v25 = vld [vmem:[%s4079_s2 + $0x30] sm:$0xff] }
  0x1e   : > { %v3108_v10 = vpack.c.bf16 %v323_v7, %v319_v6  ;;  %v327_v13 = vld [vmem:[%s4079_s2 + $0x88] sm:$0xff]  ;;  %2268 = vmatprep.subr.bf16.mxu0 %v3093_v4  ;;  %v3124_v15 = vpack.c.bf16 %v322_v12, %v318_v11  ;;  %v326_v16 = vld [vmem:[%s4079_s2 + $0x80] sm:$0xff]  ;;  %v3155_v26 = vpack.c.bf16 %v316_v25, %v312_v24  ;;  %2300 = vmatprep.subr.bf16.mxu1 %v3147_v23  ;;  %v321_v28 = vld [vmem:[%s4079_s2 + $0x58] sm:$0xff] }
  0x1f   : > { %v331_v14 = vld [vmem:[%s4079_s2 + $0xa8] sm:$0xff]  ;;  %2270 = vmatpush1.bf16.msra.mxu0 %v3106_v9  ;;  %v330_v17 = vld [vmem:[%s4079_s2 + $0xa0] sm:$0xff]  ;;  %v325_v29 = vld [vmem:[%s4079_s2 + $0x78] sm:$0xff] }
  0x20   : > { %2272 = vmatprep.subr.bf16.mxu0 %v3108_v10  ;;  %v3133_v18 = vpack.c.bf16 %v331_v14, %v327_v13  ;;  %v335_v19 = vld [vmem:[%s4079_s2 + $0xc8] sm:$0xff]  ;;  %v3158_v27 = vpack.c.bf16 %v330_v17, %v326_v16  ;;  %v320_v30 = vld [vmem:[%s4079_s2 + $0x50] sm:$0xff]  ;;  %v334_v32 = vld [vmem:[%s4079_s2 + $0xc0] sm:$0xff]  ;;  %2302 = vmatpush1.bf16.msra.mxu1 %v3155_v26  ;;  %v3180_v34 = vpack.c.bf16 %v325_v29, %v321_v28 }
  0x21   : > { %v339_v22 = vld [vmem:[%s4079_s2 + $0xe8] sm:$0xff]  ;;  %v338_v33 = vld [vmem:[%s4079_s2 + $0xe0] sm:$0xff]  ;;  %v324_v35 = vld [vmem:[%s4079_s2 + $0x70] sm:$0xff] }
  0x22   : > { %v3171_v31 = vpack.c.bf16 %v339_v22, %v335_v19  ;;  %v343_v36 = vld [vmem:[%s4079_s2 + $0x108] sm:$0xff]  ;;  %v3191_v38 = vpack.c.bf16 %v324_v35, %v320_v30  ;;  %v329_v39 = vld [vmem:[%s4079_s2 + $0x98] sm:$0xff]  ;;  %2304 = vmatprep.subr.bf16.mxu1 %v3180_v34  ;;  %v328_v41 = vld [vmem:[%s4079_s2 + $0x90] sm:$0xff]  ;;  %v3207_v43 = vpack.c.bf16 %v338_v33, %v334_v32 }
  0x23   : > { %2274 = vmatpush1.bf16.msra.mxu0 %v3124_v15  ;;  %v347_v37 = vld [vmem:[%s4079_s2 + $0x128] sm:$0xff]  ;;  %v333_v40 = vld [vmem:[%s4079_s2 + $0xb8] sm:$0xff]  ;;  %v332_v42 = vld [vmem:[%s4079_s2 + $0xb0] sm:$0xff] }
  0x24   : > { %2276 = vmatprep.subr.bf16.mxu0 %v3133_v18  ;;  %v342_v44 = vld [vmem:[%s4079_s2 + $0x100] sm:$0xff]  ;;  %v3215_v46 = vpack.c.bf16 %v333_v40, %v329_v39  ;;  %v3218_v47 = vpack.c.bf16 %v347_v37, %v343_v36  ;;  %2306 = vmatpush1.bf16.msra.mxu1 %v3191_v38  ;;  %v351_v48 = vld [vmem:[%s4079_s2 + $0x148] sm:$0xff]  ;;  %v3224_v49 = vpack.c.bf16 %v332_v42, %v328_v41  ;;  %v337_v50 = vld [vmem:[%s4079_s2 + $0xd8] sm:$0xff] }
  0x25   : > { %v346_v45 = vld [vmem:[%s4079_s2 + $0x120] sm:$0xff]  ;;  %v341_v51 = vld [vmem:[%s4079_s2 + $0xf8] sm:$0xff]  ;;  %v355_v52 = vld [vmem:[%s4079_s2 + $0x168] sm:$0xff] }
  0x26   : > { %4147 = vst [vmem:[#allocation8_spill] sm:$0xff] %v3218_v47  ;;  %2308 = vmatprep.subr.bf16.mxu1 %v3215_v46  ;;  %v3236_v53 = vpack.c.bf16 %v341_v51, %v337_v50  ;;  %v336_v54 = vld [vmem:[%s4079_s2 + $0xd0] sm:$0xff]  ;;  %v3245_v56 = vpack.c.bf16 %v346_v45, %v342_v44  ;;  %v345_v57 = vld [vmem:[%s4079_s2 + $0x118] sm:$0xff]  ;;  %v3254_v59 = vpack.c.bf16 %v355_v52, %v351_v48  ;;  %v350_v60 = vld [vmem:[%s4079_s2 + $0x140] sm:$0xff] }
  0x27   : > { %2278 = vmatpush1.bf16.msra.mxu0 %v3158_v27  ;;  %v340_v55 = vld [vmem:[%s4079_s2 + $0xf0] sm:$0xff]  ;;  %v349_v58 = vld [vmem:[%s4079_s2 + $0x138] sm:$0xff]  ;;  %v354_v61 = vld [vmem:[%s4079_s2 + $0x160] sm:$0xff] }
  0x28   : > { %2280 = vmatprep.subr.bf16.mxu0 %v3171_v31  ;;  %4148 = vst [vmem:[#allocation9_spill] sm:$0xff] %v3245_v56  ;;  %4149 = vst [vmem:[#allocation10_spill] sm:$0xff] %v3254_v59  ;;  %2310 = vmatpush1.bf16.msra.mxu1 %v3224_v49  ;;  %v359_v62 = vld [vmem:[%s4079_s2 + $0x188] sm:$0xff]  ;;  %v3266_v63 = vpack.c.bf16 %v340_v55, %v336_v54  ;;  %v3272_v1 = vpack.c.bf16 %v349_v58, %v345_v57  ;;  %v344_v2 = vld [vmem:[%s4079_s2 + $0x110] sm:$0xff] }
  0x29   : > { %v363_v0 = vld [vmem:[%s4079_s2 + $0x1a8] sm:$0xff]  ;;  %2312 = vmatprep.subr.bf16.mxu1 %v3236_v53  ;;  %v348_v3 = vld [vmem:[%s4079_s2 + $0x130] sm:$0xff]  ;;  %v353_v5 = vld [vmem:[%s4079_s2 + $0x158] sm:$0xff]  ;;  %v3287_v7 = vpack.c.bf16 %v354_v61, %v350_v60 }
  0x2a   : > { %4150 = vst [vmem:[#allocation11_spill] sm:$0xff] %v3266_v63  ;;  %4151 = vst [vmem:[#allocation12_spill] sm:$0xff] %v3272_v1  ;;  %v357_v6 = vld [vmem:[%s4079_s2 + $0x178] sm:$0xff]  ;;  %v3290_v11 = vpack.c.bf16 %v363_v0, %v359_v62  ;;  %v358_v12 = vld [vmem:[%s4079_s2 + $0x180] sm:$0xff]  ;;  %v3302_v16 = vpack.c.bf16 %v348_v3, %v344_v2 }
  0x2b   : > { %2282 = vmatpush1.bf16.msra.mxu0 %v3207_v43  ;;  %4152 = vst [vmem:[#allocation13_spill] sm:$0xff] %v3287_v7  ;;  %v362_v13 = vld [vmem:[%s4079_s2 + $0x1a0] sm:$0xff]  ;;  %v367_v14 = vld [vmem:[%s4079_s2 + $0x1c8] sm:$0xff]  ;;  %v3308_v19 = vpack.c.bf16 %v357_v6, %v353_v5  ;;  %v352_v20 = vld [vmem:[%s4079_s2 + $0x150] sm:$0xff] }
  0x2c   : > { %2284 = vmatprep.subr.bf16.mxu0 %v3218_v47  ;;  %4153 = vst [vmem:[#allocation14_spill] sm:$0xff] %v3290_v11  ;;  %2314 = vmatpush1.bf16.msra.mxu1 %v3266_v63  ;;  %4154 = vst [vmem:[#allocation15_spill] sm:$0xff] %v3302_v16  ;;  %v371_v17 = vld [vmem:[%s4079_s2 + $0x1e8] sm:$0xff]  ;;  %v356_v21 = vld [vmem:[%s4079_s2 + $0x170] sm:$0xff]  ;;  %v3323_v25 = vpack.c.bf16 %v362_v13, %v358_v12 }
  0x2d   : > { %2316 = vmatprep.subr.bf16.mxu1 %v3272_v1  ;;  %4155 = vst [vmem:[#allocation16_spill] sm:$0xff] %v3308_v19  ;;  %v361_v22 = vld [vmem:[%s4079_s2 + $0x198] sm:$0xff]  ;;  %v3326_v28 = vpack.c.bf16 %v371_v17, %v367_v14  ;;  %v366_v29 = vld [vmem:[%s4079_s2 + $0x1c0] sm:$0xff]  ;;  %v375_v32 = vld [vmem:[%s4080_s3 + $0x8] sm:$0xff]  ;;  %v3338_v33 = vpack.c.bf16 %v356_v21, %v352_v20 }
  0x2e   : > { %v365_v24 = vld [vmem:[%s4079_s2 + $0x1b8] sm:$0xff]  ;;  %4156 = vst [vmem:[#allocation17_spill] sm:$0xff] %v3323_v25  ;;  %v370_v30 = vld [vmem:[%s4079_s2 + $0x1e0] sm:$0xff]  ;;  %v379_v35 = vld [vmem:[%s4080_s3 + $0x28] sm:$0xff] }
  0x2f   : > { %2286 = vmatpush1.bf16.msra.mxu0 %v3245_v56  ;;  %4157 = vst [vmem:[#allocation18_spill] sm:$0xff] %v3326_v28  ;;  %4158 = vst [vmem:[#allocation19_spill] sm:$0xff] %v3338_v33  ;;  %v3344_v36 = vpack.c.bf16 %v365_v24, %v361_v22  ;;  %v360_v37 = vld [vmem:[%s4079_s2 + $0x190] sm:$0xff]  ;;  %v369_v40 = vld [vmem:[%s4079_s2 + $0x1d8] sm:$0xff]  ;;  %v3359_v42 = vpack.c.bf16 %v370_v30, %v366_v29  ;;  %v3362_v44 = vpack.c.bf16 %v379_v35, %v375_v32 }
  0x30   : > { %2288 = vmatprep.subr.bf16.mxu0 %v3254_v59  ;;  %2318 = vmatpush1.bf16.msra.mxu1 %v3302_v16  ;;  %v364_v39 = vld [vmem:[%s4079_s2 + $0x1b0] sm:$0xff]  ;;  %v373_v41 = vld [vmem:[%s4079_s2 + $0x1f8] sm:$0xff]  ;;  %v374_v45 = vld [vmem:[%s4080_s3] sm:$0xff] }
  0x31   : > { %2320 = vmatprep.subr.bf16.mxu1 %v3308_v19  ;;  %4159 = vst [vmem:[#allocation20_spill] sm:$0xff] %v3344_v36  ;;  %4160 = vst [vmem:[#allocation21_spill] sm:$0xff] %v3359_v42  ;;  %v378_v48 = vld [vmem:[%s4080_s3 + $0x20] sm:$0xff]  ;;  %v383_v50 = vld [vmem:[%s4080_s3 + $0x48] sm:$0xff]  ;;  %v3374_v51 = vpack.c.bf16 %v364_v39, %v360_v37  ;;  %v3380_v54 = vpack.c.bf16 %v373_v41, %v369_v40 }
  0x32   : > { %4161 = vst [vmem:[#allocation22_spill] sm:$0xff] %v3362_v44  ;;  %v387_v52 = vld [vmem:[%s4080_s3 + $0x68] sm:$0xff]  ;;  %v368_v55 = vld [vmem:[%s4079_s2 + $0x1d0] sm:$0xff]  ;;  %v377_v58 = vld [vmem:[%s4080_s3 + $0x18] sm:$0xff]  ;;  %v3395_v62 = vpack.c.bf16 %v378_v48, %v374_v45 }
  0x33   : > { %2290 = vmatpush1.bf16.msra.mxu0 %v3287_v7  ;;  %4162 = vst [vmem:[#allocation23_spill] sm:$0xff] %v3374_v51  ;;  %4163 = vst [vmem:[#allocation24_spill] sm:$0xff] %v3380_v54  ;;  %v372_v57 = vld [vmem:[%s4079_s2 + $0x1f0] sm:$0xff]  ;;  %v381_v60 = vld [vmem:[%s4080_s3 + $0x38] sm:$0xff]  ;;  %v3398_v0 = vpack.c.bf16 %v387_v52, %v383_v50 }
  0x34   : > { %2292 = vmatprep.subr.bf16.mxu0 %v3290_v11  ;;  %2322 = vmatpush1.bf16.msra.mxu1 %v3338_v33  ;;  %v438_v61 = vld [vmem:[#allocation2] sm:$0xff]  ;;  %v391_v5 = vld [vmem:[%s4080_s3 + $0x88] sm:$0xff]  ;;  %v3410_v6 = vpack.c.bf16 %v372_v57, %v368_v55  ;;  %v3416_v13 = vpack.c.bf16 %v381_v60, %v377_v58  ;;  %v376_v14 = vld [vmem:[%s4080_s3 + $0x10] sm:$0xff] }
  0x35   : > { %2324 = vmatprep.subr.bf16.mxu1 %v3344_v36  ;;  %v382_v2 = vld [vmem:[%s4080_s3 + $0x40] sm:$0xff]  ;;  %v395_v12 = vld [vmem:[%s4080_s3 + $0xa8] sm:$0xff]  ;;  %v380_v17 = vld [vmem:[%s4080_s3 + $0x30] sm:$0xff] }
  0x36   : > { %v386_v3 = vld [vmem:[%s4080_s3 + $0x60] sm:$0xff]  ;;  %4164 = vst [vmem:[#allocation25_spill] sm:$0xff] %v3410_v6  ;;  %4165 = vst [vmem:[#allocation26_spill] sm:$0xff] %v3416_v13  ;;  %v385_v20 = vld [vmem:[%s4080_s3 + $0x58] sm:$0xff]  ;;  %v3435_v24 = vpack.c.bf16 %v395_v12, %v391_v5  ;;  %v3447_v35 = vpack.c.bf16 %v380_v17, %v376_v14 }
  0x37   : > { %2294 = vmatpush1.bf16.msra.mxu0 %v3323_v25  ;;  %v389_v21 = vld [vmem:[%s4080_s3 + $0x78] sm:$0xff]  ;;  %v3431_v22 = vpack.c.bf16 %v386_v3, %v382_v2  ;;  %v390_v29 = vld [vmem:[%s4080_s3 + $0x80] sm:$0xff]  ;;  %v399_v32 = vld [vmem:[%s4080_s3 + $0xc8] sm:$0xff] }
  0x38   : > { %2296 = vmatprep.subr.bf16.mxu0 %v3326_v28  ;;  %2326 = vmatpush1.bf16.msra.mxu1 %v3374_v51  ;;  %v394_v30 = vld [vmem:[%s4080_s3 + $0xa0] sm:$0xff]  ;;  %v403_v37 = vld [vmem:[%s4080_s3 + $0xe8] sm:$0xff]  ;;  %v3453_v39 = vpack.c.bf16 %v389_v21, %v385_v20  ;;  %v384_v40 = vld [vmem:[%s4080_s3 + $0x50] sm:$0xff] }
  0x39   : > { %2328 = vmatprep.subr.bf16.mxu1 %v3380_v54  ;;  %v388_v41 = vld [vmem:[%s4080_s3 + $0x70] sm:$0xff]  ;;  %v393_v45 = vld [vmem:[%s4080_s3 + $0x98] sm:$0xff]  ;;  %v3468_v50 = vpack.c.bf16 %v394_v30, %v390_v29  ;;  %v3471_v52 = vpack.c.bf16 %v403_v37, %v399_v32  ;;  %v398_v55 = vld [vmem:[%s4080_s3 + $0xc0] sm:$0xff] }
  0x3a   : > { %v397_v48 = vld [vmem:[%s4080_s3 + $0xb8] sm:$0xff]  ;;  %v402_v57 = vld [vmem:[%s4080_s3 + $0xe0] sm:$0xff]  ;;  %v407_v58 = vld [vmem:[%s4080_s3 + $0x108] sm:$0xff]  ;;  %v3483_v60 = vpack.c.bf16 %v388_v41, %v384_v40 }
  0x3b   : > { %2298 = vmatpush1.bf16.msra.mxu0 %v3359_v42  ;;  %4166 = vst [vmem:[#allocation27_spill] sm:$0xff] %v3471_v52  ;;  %v3489_v2 = vpack.c.bf16 %v397_v48, %v393_v45  ;;  %v392_v3 = vld [vmem:[%s4080_s3 + $0x90] sm:$0xff]  ;;  %v401_v12 = vld [vmem:[%s4080_s3 + $0xd8] sm:$0xff]  ;;  %v3505_v17 = vpack.c.bf16 %v402_v57, %v398_v55  ;;  %v406_v21 = vld [vmem:[%s4080_s3 + $0x100] sm:$0xff] }
  0x3c   : > { %2332 = vmatprep.subr.bf16.mxu0 %v3362_v44  ;;  %2330 = vmatpush1.bf16.msra.mxu1 %v3410_v6  ;;  %v396_v5 = vld [vmem:[%s4080_s3 + $0xb0] sm:$0xff]  ;;  %v405_v14 = vld [vmem:[%s4080_s3 + $0xf8] sm:$0xff]  ;;  %v410_v29 = vld [vmem:[%s4080_s3 + $0x120] sm:$0xff] }
  0x3d   : > { %2364 = vmatprep.subr.bf16.mxu1 %v3416_v13  ;;  %4167 = vst [vmem:[#allocation28_spill] sm:$0xff] %v3505_v17  ;;  %v415_v30 = vld [vmem:[%s4080_s3 + $0x148] sm:$0xff]  ;;  %v3520_v32 = vpack.c.bf16 %v396_v5, %v392_v3  ;;  %v3526_v40 = vpack.c.bf16 %v405_v14, %v401_v12  ;;  %v400_v41 = vld [vmem:[%s4080_s3 + $0xd0] sm:$0xff]  ;;  %v409_v48 = vld [vmem:[%s4080_s3 + $0x118] sm:$0xff]  ;;  %v3541_v57 = vpack.c.bf16 %v410_v29, %v406_v21 }
  0x3e   : > { %513 = vmatmul.mubr.f32.vlgmr.msra.gmra.mrb[0].mxu0 %v438_v61  ;;  %v419_v37 = vld [vmem:[%s4080_s3 + $0x168] sm:$0xff]  ;;  %v404_v45 = vld [vmem:[%s4080_s3 + $0xf0] sm:$0xff]  ;;  %v413_v55 = vld [vmem:[%s4080_s3 + $0x138] sm:$0xff] }
  0x3f   : > { %2334 = vmatpush1.bf16.msra.mxu0 %v3395_v62  ;;  %687 = vmatprep.mubr.f32.mxu0 %v4085_v8  ;;  %4169 = vst [vmem:[#allocation30_spill] sm:$0xff] %v3526_v40  ;;  %4170 = vst [vmem:[#allocation31_spill] sm:$0xff] %v3541_v57  ;;  %v418_v3 = vld [vmem:[%s4080_s3 + $0x160] sm:$0xff]  ;;  %v423_v5 = vld [vmem:[%s4080_s3 + $0x188] sm:$0xff]  ;;  %v3556_v12 = vpack.c.bf16 %v404_v45, %v400_v41  ;;  %v3562_v21 = vpack.c.bf16 %v413_v55, %v409_v48 }
  0x40   : > { %2336 = vmatprep.subr.bf16.mxu0 %v3398_v0  ;;  %584 = vmatmul.mubr.f32.vlgmr.msra.gmra.mrb[0].mxu1 %v438_v61  ;;  %v411_v61 = vld [vmem:[%s4080_s3 + $0x128] sm:$0xff]  ;;  %v408_v29 = vld [vmem:[%s4080_s3 + $0x110] sm:$0xff]  ;;  %v421_v41 = vld [vmem:[%s4080_s3 + $0x178] sm:$0xff] }
  0x41   : > { %2366 = vmatpush1.bf16.msra.mxu1 %v3447_v35  ;;  %758 = vmatprep.mubr.f32.mxu1 %v4085_v8  ;;  %v3508_v20 = vpack.c.bf16 %v411_v61, %v407_v58  ;;  %v3544_v58 = vpack.c.bf16 %v419_v37, %v415_v30  ;;  %v414_v61 = vld [vmem:[%s4080_s3 + $0x140] sm:$0xff]  ;;  %4172 = vst [vmem:[#allocation33_spill] sm:$0xff] %v3556_v12  ;;  %v427_v14 = vld [vmem:[%s4080_s3 + $0x1a8] sm:$0xff]  ;;  %4173 = vst [vmem:[#allocation34_spill] sm:$0xff] %v3562_v21 }
  0x42   : > { %2368 = vmatprep.subr.bf16.mxu1 %v3453_v39  ;;  %v412_v30 = vld [vmem:[%s4080_s3 + $0x130] sm:$0xff]  ;;  %v417_v37 = vld [vmem:[%s4080_s3 + $0x158] sm:$0xff]  ;;  %v3577_v45 = vpack.c.bf16 %v418_v3, %v414_v61  ;;  %v3580_v48 = vpack.c.bf16 %v427_v14, %v423_v5  ;;  %v422_v55 = vld [vmem:[%s4080_s3 + $0x180] sm:$0xff] }
  0x43   : > { %2338 = vmatpush1.bf16.msra.mxu0 %v3431_v22  ;;  %4168 = vst [vmem:[#allocation29_spill] sm:$0xff] %v3508_v20  ;;  %4171 = vst [vmem:[#allocation32_spill] sm:$0xff] %v3544_v58  ;;  %v426_v8 = vld [vmem:[%s4080_s3 + $0x1a0] sm:$0xff]  ;;  %v3592_v61 = vpack.c.bf16 %v412_v30, %v408_v29  ;;  %v435_v3 = vld [vmem:[%s4080_s3 + $0x1e8] sm:$0xff]  ;;  %v3598_v5 = vpack.c.bf16 %v421_v41, %v417_v37 }
  0x44   : > { %2340 = vmatprep.subr.bf16.mxu0 %v3435_v24  ;;  %4174 = vst [vmem:[#allocation35_spill] sm:$0xff] %v3577_v45  ;;  %4175 = vst [vmem:[#allocation36_spill] sm:$0xff] %v3580_v48  ;;  %v416_v14 = vld [vmem:[%s4080_s3 + $0x150] sm:$0xff]  ;;  %v425_v29 = vld [vmem:[%s4080_s3 + $0x198] sm:$0xff]  ;;  %v3613_v37 = vpack.c.bf16 %v426_v8, %v422_v55 }
  0x45   : > { %2370 = vmatpush1.bf16.msra.mxu1 %v3483_v60  ;;  %4176 = vst [vmem:[#allocation37_spill] sm:$0xff] %v3592_v61  ;;  %4177 = vst [vmem:[#allocation38_spill] sm:$0xff] %v3598_v5  ;;  %v429_v30 = vld [vmem:[%s4080_s3 + $0x1b8] sm:$0xff]  ;;  %v428_v55 = vld [vmem:[%s4080_s3 + $0x1b0] sm:$0xff] }
  0x46   : > { %2372 = vmatprep.subr.bf16.mxu1 %v3489_v2  ;;  %4178 = vst [vmem:[#allocation39_spill] sm:$0xff] %v3613_v37  ;;  %v3628_v8 = vpack.c.bf16 %v429_v30, %v425_v29 }
  0x47   : > { %2342 = vmatpush1.bf16.msra.mxu0 %v3468_v50 }
  0x48   : > { %2344 = vmatprep.subr.bf16.mxu0 %v3471_v52  ;;  %4181 = vst [vmem:[#allocation42_spill] sm:$0xff] %v3628_v8 }
  0x49   : > { %2374 = vmatpush1.bf16.msra.mxu1 %v3520_v32 }
  0x4a   : > { %2376 = vmatprep.subr.bf16.mxu1 %v3526_v40 }
  0x4b   : > { %2346 = vmatpush1.bf16.msra.mxu0 %v3505_v17 }
  0x4c   : > { %2348 = vmatprep.subr.bf16.mxu0 %v3508_v20  ;;  %v434_v20 = vld [vmem:[%s4080_s3 + $0x1e0] sm:$0xff] }
  0x4d   : > { %2378 = vmatpush1.bf16.msra.mxu1 %v3556_v12 }
  0x4e   : > { %2380 = vmatprep.subr.bf16.mxu1 %v3562_v21  ;;  %v430_v21 = vld [vmem:[%s4080_s3 + $0x1c0] sm:$0xff] }
  0x4f   : > { %2350 = vmatpush1.bf16.msra.mxu0 %v3541_v57  ;;  %v431_v57 = vld [vmem:[%s4080_s3 + $0x1c8] sm:$0xff] }
  0x50   : > { %2352 = vmatprep.subr.bf16.mxu0 %v3544_v58  ;;  %v420_v58 = vld [vmem:[%s4080_s3 + $0x170] sm:$0xff]  ;;  %v3616_v41 = vpack.c.bf16 %v435_v3, %v431_v57  ;;  %v433_v3 = vld [vmem:[%s4080_s3 + $0x1d8] sm:$0xff] }
  0x51   : > { %2382 = vmatpush1.bf16.msra.mxu1 %v3592_v61  ;;  %v3625_v12 = vpack.c.bf16 %v420_v58, %v416_v14  ;;  %v424_v57 = vld [vmem:[%s4080_s3 + $0x190] sm:$0xff]  ;;  %v437_v58 = vld [vmem:[%s4080_s3 + $0x1f8] sm:$0xff]  ;;  %v3643_v14 = vpack.c.bf16 %v434_v20, %v430_v21  ;;  %v441_v21 = vld [vmem:[#allocation2 + $0x8] sm:$0xff] }
  0x52   : > { %4179 = vst [vmem:[#allocation40_spill] sm:$0xff] %v3616_v41  ;;  %2384 = vmatprep.subr.bf16.mxu1 %v3598_v5  ;;  %v3647_v29 = vpack.c.bf16 %v428_v55, %v424_v57  ;;  %v3650_v30 = vpack.c.bf16 %v437_v58, %v433_v3  ;;  %v436_v20 = vld [vmem:[%s4080_s3 + $0x1f0] sm:$0xff]  ;;  %v444_v55 = vld [vmem:[%s3074_s9] sm:$0xff]  ;;  %v445_v3 = vld [vmem:[%s3074_s9 + $0x8] sm:$0xff] }
  0x53   : > { %2354 = vmatpush1.bf16.msra.mxu0 %v3577_v45  ;;  %4180 = vst [vmem:[#allocation41_spill] sm:$0xff] %v3625_v12  ;;  %4182 = vst [vmem:[#allocation43_spill] sm:$0xff] %v3643_v14  ;;  %v447_v45 = vld [vmem:[%s3074_s9 + $0x18] sm:$0xff] }
  0x54   : > { %2356 = vmatprep.subr.bf16.mxu0 %v3580_v48  ;;  %4183 = vst [vmem:[#allocation44_spill] sm:$0xff] %v3647_v29  ;;  %4184 = vst [vmem:[#allocation45_spill] sm:$0xff] %v3650_v30  ;;  %v432_v48 = vld [vmem:[%s4080_s3 + $0x1d0] sm:$0xff] }
  0x55   : > { %2386 = vmatpush1.bf16.msra.mxu1 %v3625_v12  ;;  %v3660_v57 = vpack.c.bf16 %v436_v20, %v432_v48 }
  0x56   : > { %2388 = vmatprep.subr.bf16.mxu1 %v3628_v8 }
  0x57   : > { %2358 = vmatpush1.bf16.msra.mxu0 %v3613_v37  ;;  %4185 = vst [vmem:[#allocation46_spill] sm:$0xff] %v3660_v57 }
  0x58   : > { %2360 = vmatprep.subr.bf16.mxu0 %v3616_v41 }
  0x59   : > { %2390 = vmatpush1.bf16.msra.mxu1 %v3647_v29 }
  0x5a   : > { %2392 = vmatprep.subr.bf16.mxu1 %v3650_v30  ;;  %v446_v30 = vld [vmem:[%s3074_s9 + $0x10] sm:$0xff] }
  0x5b   : > { %2362 = vmatpush1.bf16.msra.mxu0 %v3643_v14 }
  0x5d   : > { %2394 = vmatpush1.bf16.msra.mxu1 %v3660_v57 }
  0x5e   : > { %688 = vmatmul.mubr.f32.vlgmr.msra.gmra.mrb[2].mxu0 %v441_v21 }
  0x60   : > { %759 = vmatmul.mubr.f32.vlgmr.msra.gmra.mrb[2].mxu1 %v441_v21 }
 0x111   : > { %v514_v58 = vpop.f32.mrb[0].mxu0 }
 0x112   : > { %v590_v41 = vadd.f32 %v514_v58, %v444_v55  ;;  %v516_v37 = vpop.f32.mrb[1].mxu0 }
 0x113   : > { %v591_v8 = vadd.f32 %v516_v37, %v445_v3  ;;  %v585_v29 = vpop.f32.mrb[0].mxu1 }
 0x114   : > { %v2106_v14 = vmul.f32 -1.442695, %v590_v41  ;;  %v587_v48 = vpop.f32.mrb[1].mxu1  ;;  %v592_v61 = vadd.f32 %v585_v29, %v446_v30  ;;  %v2109_v29 = vld [vmem:[%s3079_s13 + $0x60] sm:$0xff]  ;;  %v2110_v30 = vld [vmem:[%s3079_s13 + $0x68] sm:$0xff] }
 0x115   : > { %v2107_v12 = vmul.f32 -1.442695, %v591_v8  ;;  %v593_v20 = vadd.f32 %v587_v48, %v447_v45  ;;  %v439_v8 = vld [vmem:[#allocation3] sm:$0xff] }
 0x116   : > { %2847 = vpow2.f32 %v2106_v14 }
 0x117   : > { %2849 = vpow2.f32 %v2107_v12  ;;  %v2108_v5 = vmul.f32 -1.442695, %v593_v20 }
 0x119   : > { %2851 = vpow2.f32 %v2108_v5 }
 0x11a   : > { %2853 = vtanh.f32 %v592_v61 }
 0x120   : > { %v2848_v57 = vpop.eup %2847 }
 0x121   : > { %v2850_v21 = vpop.eup %2849  ;;  %v597_v17 = vadd.f32 1.0, %v2848_v57 }
 0x122   : > { %v603_v55 = vadd.f32 1.0, %v2850_v21 }
 0x123   : > { %2855 = vrcp.f32 %v597_v17  ;;  %v2852_v37 = vpop.eup %2851 }
 0x124   : > { %2857 = vrcp.f32 %v603_v55  ;;  %v2854_v41 = vpop.eup %2853  ;;  %v610_v12 = vadd.f32 1.0, %v2852_v37  ;;  %v2112_v55 = vld [vmem:[%s3079_s13 + $0x78] sm:$0xff] }
 0x126   : > { %2859 = vrcp.f32 %v610_v12 }
 0x12d   : > { %v2856_v14 = vpop.eup %2855 }
 0x12e   : > { %v2858_v45 = vpop.eup %2857  ;;  %v614_v3 = vmul.f32 %v2856_v14, %v2854_v41  ;;  %v2111_v14 = vld [vmem:[%s3079_s13 + $0x70] sm:$0xff] }
 0x12f   : > { %v613_v58 = vmul.f32 %v2858_v45, %v439_v8 }
 0x130   : > { %v2860_v45 = vpop.eup %2859 }
 0x131   : > { %v3670_v5 = vadd.f32 %v614_v3, %v613_v58  ;;  %v689_v57 = vpop.f32.mrb[2].mxu0 }
 0x132   : > { %v765_v61 = vadd.f32 %v2109_v29, %v689_v57  ;;  %v691_v48 = vpop.f32.mrb[3].mxu0 }
 0x133   : > { %4186 = vst [vmem:[#allocation47_spill] sm:$0xff] %v3670_v5  ;;  %2861 = vtanh.f32 %v3670_v5  ;;  %v766_v17 = vadd.f32 %v2110_v30, %v691_v48  ;;  %v760_v37 = vpop.f32.mrb[2].mxu1 }
 0x134   : > { %v2113_v20 = vmul.f32 -1.442695, %v765_v61  ;;  %v762_v41 = vpop.f32.mrb[3].mxu1  ;;  %v767_v58 = vadd.f32 %v2111_v14, %v760_v37 }
 0x135   : > { %v2114_v21 = vmul.f32 -1.442695, %v766_v17  ;;  %v768_v8 = vadd.f32 %v2112_v55, %v762_v41  ;;  %v443_v17 = vld [vmem:[#allocation3 + $0x8] sm:$0xff] }
 0x136   : > { %2863 = vpow2.f32 %v2113_v20 }
 0x137   : > { %2865 = vpow2.f32 %v2114_v21  ;;  %v2115_v40 = vmul.f32 -1.442695, %v768_v8 }
 0x139   : > { %2867 = vpow2.f32 %v2115_v40 }
 0x13a   : > { %2869 = vtanh.f32 %v767_v58 }
 0x13d   : > { %v2862_v3 = vpop.eup %2861 }
 0x13e   : > { %v617_v12 = vmul.f32 %v2862_v3, %v2860_v45 }
 0x140   : > { %v2864_v52 = vpop.eup %2863 }
 0x141   : > { %v2866_v29 = vpop.eup %2865  ;;  %v772_v57 = vadd.f32 1.0, %v2864_v52 }
 0x142   : > { %v778_v30 = vadd.f32 1.0, %v2866_v29 }
 0x143   : > { %2871 = vrcp.f32 %v772_v57  ;;  %v2868_v61 = vpop.eup %2867 }
 0x144   : > { %2873 = vrcp.f32 %v778_v30  ;;  %v2870_v48 = vpop.eup %2869  ;;  %v785_v21 = vadd.f32 1.0, %v2868_v61 }
 0x146   : > { %2875 = vrcp.f32 %v785_v21 }
 0x14d   : > { %v2872_v20 = vpop.eup %2871 }
 0x14e   : > { %v2874_v55 = vpop.eup %2873  ;;  %v789_v41 = vmul.f32 %v2872_v20, %v2870_v48 }
 0x14f   : > { %v788_v5 = vmul.f32 %v2874_v55, %v443_v17 }
 0x150   : > { %v2876_v40 = vpop.eup %2875 }
 0x151   : > { %v3675_v8 = vadd.f32 %v789_v41, %v788_v5 }
 0x153   : > { %2877 = vtanh.f32 %v3675_v8 }
 0x158   : > { %795 = sbr.rel (%p2105_p5) target bundleno = 353 (0x161), region = 56 }
 0x15d   : > { %v2878_v37 = vpop.eup %2877 }
 0x15e   : > { %v3678_v52 = vmul.f32 %v2878_v37, %v2876_v40 }
 0x160   : > { %796 = vst [vmem:[#allocation4] sm:$0xff] %v3678_v52 }
 0x161 PF: > { %2396 = vmatprep.subr.bf16.mxu0 %v3093_v4  ;;  %2428 = vmatprep.subr.bf16.mxu1 %v3147_v23  ;;  %v4187_v5 = vmov 0.0   ;;  %v4188_v14 = vld [vmem:[#allocation27_spill] sm:$0xff]  ;;  %v4189_v45 = vld [vmem:[#allocation30_spill] sm:$0xff]  ;;  %v4190_v3 = vld [vmem:[#allocation28_spill] sm:$0xff]  ;;  %p2155_p6 = scmp.ne.s32.totalorder %s3065_s25, 1 }
 0x162   : > { %2398 = vmatpush1.bf16.msra.mxu0 %v3106_v9  ;;  %2430 = vmatpush1.bf16.msra.mxu1 %v3155_v26  ;;  %v4191_v58 = vld [vmem:[#allocation33_spill] sm:$0xff]  ;;  %v4193_v29 = vld [vmem:[#allocation34_spill] sm:$0xff]  ;;  %v4194_v57 = vld [vmem:[#allocation31_spill] sm:$0xff]  ;;  %vm3016_vm0 = vmmov (!%p2155_p6), 0  }
 0x163   : > { %2400 = vmatprep.subr.bf16.mxu0 %v3108_v10  ;;  %2432 = vmatprep.subr.bf16.mxu1 %v3180_v34  ;;  %v4195_v30 = vld [vmem:[#allocation37_spill] sm:$0xff]  ;;  %v4196_v61 = vld [vmem:[#allocation32_spill] sm:$0xff]  ;;  %v4197_v48 = vld [vmem:[#allocation38_spill] sm:$0xff] }
 0x164   : > { %866 = vmatprep.mubr.f32.mxu0 %v4187_v5  ;;  %937 = vmatprep.mubr.f32.mxu1 %v4187_v5  ;;  %v4198_v17 = vld [vmem:[#allocation35_spill] sm:$0xff]  ;;  %v4199_v20 = vld [vmem:[#allocation41_spill] sm:$0xff]  ;;  %v4200_v21 = vld [vmem:[#allocation36_spill] sm:$0xff] }
 0x165   : > { %v4201_v55 = vld [vmem:[#allocation42_spill] sm:$0xff]  ;;  %v4202_v41 = vld [vmem:[#allocation39_spill] sm:$0xff]  ;;  %v4203_v40 = vld [vmem:[#allocation44_spill] sm:$0xff] }
 0x166   : > { %2402 = vmatpush1.bf16.msra.mxu0 %v3124_v15  ;;  %2434 = vmatpush1.bf16.msra.mxu1 %v3191_v38  ;;  %v4204_v37 = vld [vmem:[#allocation40_spill] sm:$0xff] }
 0x167   : > { %2404 = vmatprep.subr.bf16.mxu0 %v3133_v18  ;;  %2436 = vmatprep.subr.bf16.mxu1 %v3215_v46 }
 0x16a   : > { %2406 = vmatpush1.bf16.msra.mxu0 %v3158_v27  ;;  %2438 = vmatpush1.bf16.msra.mxu1 %v3224_v49 }
 0x16b   : > { %2408 = vmatprep.subr.bf16.mxu0 %v3171_v31  ;;  %2440 = vmatprep.subr.bf16.mxu1 %v3236_v53 }
 0x16e   : > { %2410 = vmatpush1.bf16.msra.mxu0 %v3207_v43  ;;  %2442 = vmatpush1.bf16.msra.mxu1 %v3266_v63 }
 0x16f   : > { %2412 = vmatprep.subr.bf16.mxu0 %v3218_v47  ;;  %2444 = vmatprep.subr.bf16.mxu1 %v3272_v1 }
 0x172   : > { %2414 = vmatpush1.bf16.msra.mxu0 %v3245_v56  ;;  %2446 = vmatpush1.bf16.msra.mxu1 %v3302_v16 }
 0x173   : > { %2416 = vmatprep.subr.bf16.mxu0 %v3254_v59  ;;  %2448 = vmatprep.subr.bf16.mxu1 %v3308_v19 }
 0x176   : > { %2418 = vmatpush1.bf16.msra.mxu0 %v3287_v7  ;;  %2450 = vmatpush1.bf16.msra.mxu1 %v3338_v33 }
 0x177   : > { %2420 = vmatprep.subr.bf16.mxu0 %v3290_v11  ;;  %2452 = vmatprep.subr.bf16.mxu1 %v3344_v36 }
 0x17a   : > { %2422 = vmatpush1.bf16.msra.mxu0 %v3323_v25  ;;  %2454 = vmatpush1.bf16.msra.mxu1 %v3374_v51 }
 0x17b   : > { %2424 = vmatprep.subr.bf16.mxu0 %v3326_v28  ;;  %2456 = vmatprep.subr.bf16.mxu1 %v3380_v54 }
 0x17e   : > { %2426 = vmatpush1.bf16.msra.mxu0 %v3359_v42  ;;  %2458 = vmatpush1.bf16.msra.mxu1 %v3410_v6 }
 0x17f   : > { %2460 = vmatprep.subr.bf16.mxu0 %v3362_v44  ;;  %2492 = vmatprep.subr.bf16.mxu1 %v3416_v13 }
 0x181   : > { %867 = vmatmul.mubr.f32.vlgmr.msra.gmra.mrb[4].mxu0 %v617_v12  ;;  %938 = vmatmul.mubr.f32.vlgmr.msra.gmra.mrb[4].mxu1 %v617_v12  ;;  %v4192_v12 = vld [vmem:[#allocation29_spill] sm:$0xff] }
 0x182   : > { %2462 = vmatpush1.bf16.msra.mxu0 %v3395_v62  ;;  %2494 = vmatpush1.bf16.msra.mxu1 %v3447_v35 }
 0x183   : > { %2464 = vmatprep.subr.bf16.mxu0 %v3398_v0  ;;  %2496 = vmatprep.subr.bf16.mxu1 %v3453_v39 }
 0x184   : > { %1041 = vmatprep.mubr.f32.mxu0 %v4187_v5  ;;  %1112 = vmatprep.mubr.f32.mxu1 %v4187_v5 }
 0x186   : > { %2466 = vmatpush1.bf16.msra.mxu0 %v3431_v22  ;;  %2498 = vmatpush1.bf16.msra.mxu1 %v3483_v60 }
 0x187   : > { %2468 = vmatprep.subr.bf16.mxu0 %v3435_v24  ;;  %2500 = vmatprep.subr.bf16.mxu1 %v3489_v2 }
 0x18a   : > { %2470 = vmatpush1.bf16.msra.mxu0 %v3468_v50  ;;  %2502 = vmatpush1.bf16.msra.mxu1 %v3520_v32 }
 0x18b   : > { %2472 = vmatprep.subr.bf16.mxu0 %v4188_v14  ;;  %2504 = vmatprep.subr.bf16.mxu1 %v4189_v45 }
 0x18e   : > { %2474 = vmatpush1.bf16.msra.mxu0 %v4190_v3  ;;  %2506 = vmatpush1.bf16.msra.mxu1 %v4191_v58 }
 0x18f   : > { %2476 = vmatprep.subr.bf16.mxu0 %v4192_v12  ;;  %2508 = vmatprep.subr.bf16.mxu1 %v4193_v29 }
 0x192   : > { %2478 = vmatpush1.bf16.msra.mxu0 %v4194_v57  ;;  %2510 = vmatpush1.bf16.msra.mxu1 %v4195_v30  ;;  %v4205_v57 = vld [vmem:[#allocation45_spill] sm:$0xff]  ;;  %v4206_v30 = vld [vmem:[#allocation43_spill] sm:$0xff] }
 0x193   : > { %2480 = vmatprep.subr.bf16.mxu0 %v4196_v61  ;;  %2512 = vmatprep.subr.bf16.mxu1 %v4197_v48  ;;  %v4207_v61 = vld [vmem:[#allocation46_spill] sm:$0xff] }
 0x196   : > { %2482 = vmatpush1.bf16.msra.mxu0 %v4198_v17  ;;  %2514 = vmatpush1.bf16.msra.mxu1 %v4199_v20 }
 0x197   : > { %2484 = vmatprep.subr.bf16.mxu0 %v4200_v21  ;;  %2516 = vmatprep.subr.bf16.mxu1 %v4201_v55 }
 0x19a   : > { %2486 = vmatpush1.bf16.msra.mxu0 %v4202_v41  ;;  %2518 = vmatpush1.bf16.msra.mxu1 %v4203_v40 }
 0x19b   : > { %2488 = vmatprep.subr.bf16.mxu0 %v4204_v37  ;;  %2520 = vmatprep.subr.bf16.mxu1 %v4205_v57 }
 0x19e   : > { %2490 = vmatpush1.bf16.msra.mxu0 %v4206_v30  ;;  %2522 = vmatpush1.bf16.msra.mxu1 %v4207_v61 }
 0x19f   : > { %2524 = vmatprep.subr.bf16.mxu0 %v3093_v4  ;;  %2556 = vmatprep.subr.bf16.mxu1 %v3147_v23 }
 0x1a1   : > { %1042 = vmatmul.mubr.f32.vlgmr.msra.gmra.mrb[6].mxu0 %v3678_v52  ;;  %1113 = vmatmul.mubr.f32.vlgmr.msra.gmra.mrb[6].mxu1 %v3678_v52  ;;  %v2117_v52 = vld [vmem:[%s3074_s9 + $0x20] sm:$0xff] }
 0x1a2   : > { %2526 = vmatpush1.bf16.msra.mxu0 %v3106_v9  ;;  %2558 = vmatpush1.bf16.msra.mxu1 %v3155_v26 }
 0x1a3   : > { %2528 = vmatprep.subr.bf16.mxu0 %v3108_v10  ;;  %2560 = vmatprep.subr.bf16.mxu1 %v3180_v34 }
 0x1a4   : > { %1216 = vmatprep.mubr.f32.mxu0 %v4187_v5  ;;  %1287 = vmatprep.mubr.f32.mxu1 %v4187_v5 }
 0x1a6   : > { %2530 = vmatpush1.bf16.msra.mxu0 %v3124_v15  ;;  %2562 = vmatpush1.bf16.msra.mxu1 %v3191_v38 }
 0x1a7   : > { %2532 = vmatprep.subr.bf16.mxu0 %v3133_v18  ;;  %2564 = vmatprep.subr.bf16.mxu1 %v3215_v46 }
 0x1aa   : > { %2534 = vmatpush1.bf16.msra.mxu0 %v3158_v27  ;;  %2566 = vmatpush1.bf16.msra.mxu1 %v3224_v49 }
 0x1ab   : > { %2536 = vmatprep.subr.bf16.mxu0 %v3171_v31  ;;  %2568 = vmatprep.subr.bf16.mxu1 %v3236_v53 }
 0x1ae   : > { %2538 = vmatpush1.bf16.msra.mxu0 %v3207_v43  ;;  %2570 = vmatpush1.bf16.msra.mxu1 %v3266_v63 }
 0x1af   : > { %2540 = vmatprep.subr.bf16.mxu0 %v3218_v47  ;;  %2572 = vmatprep.subr.bf16.mxu1 %v3272_v1  ;;  %v2127_v47 = vld [vmem:[%s3079_s13 + $0x58] sm:$0xff] }
 0x1b2   : > { %2542 = vmatpush1.bf16.msra.mxu0 %v3245_v56  ;;  %2574 = vmatpush1.bf16.msra.mxu1 %v3302_v16 }
 0x1b3   : > { %2544 = vmatprep.subr.bf16.mxu0 %v3254_v59  ;;  %2576 = vmatprep.subr.bf16.mxu1 %v3308_v19 }
 0x1b6   : > { %2546 = vmatpush1.bf16.msra.mxu0 %v3287_v7  ;;  %2578 = vmatpush1.bf16.msra.mxu1 %v3338_v33 }
 0x1b7   : > { %2548 = vmatprep.subr.bf16.mxu0 %v3290_v11  ;;  %2580 = vmatprep.subr.bf16.mxu1 %v3344_v36  ;;  %v2118_v36 = vld [vmem:[%s3074_s9 + $0x28] sm:$0xff] }
 0x1ba   : > { %2550 = vmatpush1.bf16.msra.mxu0 %v3323_v25  ;;  %2582 = vmatpush1.bf16.msra.mxu1 %v3374_v51 }
 0x1bb   : > { %2552 = vmatprep.subr.bf16.mxu0 %v3326_v28  ;;  %2584 = vmatprep.subr.bf16.mxu1 %v3380_v54  ;;  %v2120_v54 = vld [vmem:[%s3074_s9 + $0x38] sm:$0xff] }
 0x1be   : > { %2554 = vmatpush1.bf16.msra.mxu0 %v3359_v42  ;;  %2586 = vmatpush1.bf16.msra.mxu1 %v3410_v6  ;;  %v2119_v6 = vld [vmem:[%s3074_s9 + $0x30] sm:$0xff] }
 0x1bf   : > { %2588 = vmatprep.subr.bf16.mxu0 %v3362_v44  ;;  %2620 = vmatprep.subr.bf16.mxu1 %v3416_v13 }
 0x254   : > { %v868_v11 = vpop.f32.mrb[4].mxu0  ;;  %v939_v25 = vpop.f32.mrb[4].mxu1 }
 0x255   : > { %v944_v33 = vadd.f32 %v2117_v52, %v868_v11  ;;  %v870_v51 = vpop.f32.mrb[5].mxu0  ;;  %v941_v7 = vpop.f32.mrb[5].mxu1  ;;  %v946_v44 = vadd.f32 %v2119_v6, %v939_v25  ;;  %v2124_v25 = vld [vmem:[%s3079_s13 + $0x40] sm:$0xff] }
 0x256   : > { %v945_v28 = vadd.f32 %v2118_v36, %v870_v51  ;;  %v947_v42 = vadd.f32 %v2120_v54, %v941_v7  ;;  %v4208_v7 = vld [vmem:[#allocation47_spill] sm:$0xff] }
 0x257   : > { %v2121_v19 = vmul.f32 -1.442695, %v944_v33  ;;  %v2125_v54 = vld [vmem:[%s3079_s13 + $0x48] sm:$0xff] }
 0x258   : > { %v2122_v59 = vmul.f32 -1.442695, %v945_v28  ;;  %v2123_v16 = vmul.f32 -1.442695, %v947_v42 }
 0x259   : > { %2879 = vpow2.f32 %v2121_v19 }
 0x25a   : > { %2881 = vpow2.f32 %v2122_v59 }
 0x25b   : > { %2883 = vpow2.f32 %v2123_v16 }
 0x25c   : > { %2885 = vtanh.f32 %v946_v44 }
 0x263   : > { %v2880_v56 = vpop.eup %2879 }
 0x264   : > { %v2882_v13 = vpop.eup %2881  ;;  %v951_v1 = vadd.f32 1.0, %v2880_v56 }
 0x265   : > { %v957_v11 = vadd.f32 1.0, %v2882_v13  ;;  %v2884_v36 = vpop.eup %2883 }
 0x266   : > { %2887 = vrcp.f32 %v951_v1  ;;  %v2886_v33 = vpop.eup %2885  ;;  %v964_v51 = vadd.f32 1.0, %v2884_v36 }
 0x267   : > { %2889 = vrcp.f32 %v957_v11 }
 0x268   : > { %2891 = vrcp.f32 %v964_v51 }
 0x270   : > { %v2888_v28 = vpop.eup %2887 }
 0x271   : > { %v2890_v19 = vpop.eup %2889  ;;  %v968_v59 = vmul.f32 %v2888_v28, %v2886_v33  ;;  %v2126_v28 = vld [vmem:[%s3079_s13 + $0x50] sm:$0xff] }
 0x272   : > { %v967_v42 = vmul.f32 %v2890_v19, %v4208_v7  ;;  %v2892_v19 = vpop.eup %2891 }
 0x274   : > { %v3796_v6 = vadd.f32 %v968_v59, %v967_v42  ;;  %v1043_v56 = vpop.f32.mrb[6].mxu0  ;;  %v1114_v16 = vpop.f32.mrb[6].mxu1 }
 0x275   : > { %v1119_v44 = vadd.f32 %v2124_v25, %v1043_v56  ;;  %v1045_v1 = vpop.f32.mrb[7].mxu0  ;;  %v1116_v13 = vpop.f32.mrb[7].mxu1  ;;  %v1121_v42 = vadd.f32 %v2126_v28, %v1114_v16  ;;  %v4211_v28 = vld [vmem:[#allocation32_spill] sm:$0xff] }
 0x276   : > { %2893 = vtanh.f32 %v3796_v6  ;;  %v1120_v52 = vadd.f32 %v2125_v54, %v1045_v1  ;;  %v1122_v33 = vadd.f32 %v2127_v47, %v1116_v13 }
 0x277   : > { %v2128_v11 = vmul.f32 -1.442695, %v1119_v44 }
 0x278   : > { %v2129_v36 = vmul.f32 -1.442695, %v1120_v52  ;;  %v2130_v7 = vmul.f32 -1.442695, %v1122_v33  ;;  %v4210_v33 = vld [vmem:[#allocation37_spill] sm:$0xff] }
 0x279   : > { %2895 = vpow2.f32 %v2128_v11 }
 0x27a   : > { %2897 = vpow2.f32 %v2129_v36  ;;  %v4209_v36 = vld [vmem:[#allocation31_spill] sm:$0xff] }
 0x27b   : > { %2899 = vpow2.f32 %v2130_v7 }
 0x27c   : > { %2901 = vtanh.f32 %v1121_v42  ;;  %v4228_v42 = vld [vmem:[#allocation25_spill] sm:$0xff] }
 0x280   : > { %v2894_v59 = vpop.eup %2893 }
 0x281   : > { %v971_v51 = vmul.f32 %v2894_v59, %v2892_v19  ;;  %v4227_v59 = vld [vmem:[#allocation21_spill] sm:$0xff] }
 0x283   : > { %v2896_v63 = vpop.eup %2895  ;;  %1217 = vmatmul.mubr.f32.vlgmr.msra.gmra.mrb[8].mxu0 %v971_v51  ;;  %1288 = vmatmul.mubr.f32.vlgmr.msra.gmra.mrb[8].mxu1 %v971_v51  ;;  %v4229_v51 = vld [vmem:[#allocation22_spill] sm:$0xff] }
 0x284   : > { %v2898_v25 = vpop.eup %2897  ;;  %v1126_v56 = vadd.f32 1.0, %v2896_v63  ;;  %2590 = vmatpush1.bf16.msra.mxu0 %v3395_v62  ;;  %2622 = vmatpush1.bf16.msra.mxu1 %v3447_v35 }
 0x285   : > { %v1132_v54 = vadd.f32 1.0, %v2898_v25  ;;  %2592 = vmatprep.subr.bf16.mxu0 %v3398_v0  ;;  %2624 = vmatprep.subr.bf16.mxu1 %v3453_v39  ;;  %v2900_v47 = vpop.eup %2899  ;;  %v4230_v25 = vld [vmem:[#allocation26_spill] sm:$0xff] }
 0x286   : > { %2903 = vrcp.f32 %v1126_v56  ;;  %1391 = vmatprep.mubr.f32.mxu0 %v4187_v5  ;;  %1462 = vmatprep.mubr.f32.mxu1 %v4187_v5  ;;  %v2902_v63 = vpop.eup %2901  ;;  %v1139_v44 = vadd.f32 1.0, %v2900_v47  ;;  %v2131_v56 = vld [vmem:[%s3074_s9 + $0x40] sm:$0xff] }
 0x287   : > { %2905 = vrcp.f32 %v1132_v54  ;;  %v2132_v54 = vld [vmem:[%s3074_s9 + $0x48] sm:$0xff] }
 0x288   : > { %2594 = vmatpush1.bf16.msra.mxu0 %v3431_v22  ;;  %2626 = vmatpush1.bf16.msra.mxu1 %v3483_v60  ;;  %2907 = vrcp.f32 %v1139_v44 }
 0x289   : > { %2596 = vmatprep.subr.bf16.mxu0 %v3435_v24  ;;  %2628 = vmatprep.subr.bf16.mxu1 %v3489_v2 }
 0x28c   : > { %2598 = vmatpush1.bf16.msra.mxu0 %v3468_v50  ;;  %2630 = vmatpush1.bf16.msra.mxu1 %v3520_v32 }
 0x28d   : > { %2600 = vmatprep.subr.bf16.mxu0 %v4188_v14  ;;  %2632 = vmatprep.subr.bf16.mxu1 %v4189_v45 }
 0x290   : > { %v2904_v16 = vpop.eup %2903  ;;  %2602 = vmatpush1.bf16.msra.mxu0 %v4190_v3  ;;  %2634 = vmatpush1.bf16.msra.mxu1 %v4191_v58 }
 0x291   : > { %v2906_v1 = vpop.eup %2905  ;;  %v1143_v13 = vmul.f32 %v2904_v16, %v2902_v63  ;;  %2604 = vmatprep.subr.bf16.mxu0 %v4192_v12  ;;  %2636 = vmatprep.subr.bf16.mxu1 %v4193_v29 }
 0x292   : > { %v1142_v52 = vmul.f32 %v2906_v1, %v3675_v8  ;;  %v2908_v8 = vpop.eup %2907 }
 0x294   : > { %v3820_v11 = vadd.f32 %v1143_v13, %v1142_v52  ;;  %2606 = vmatpush1.bf16.msra.mxu0 %v4209_v36  ;;  %2638 = vmatpush1.bf16.msra.mxu1 %v4210_v33 }
 0x295   : > { %2608 = vmatprep.subr.bf16.mxu0 %v4211_v28  ;;  %2640 = vmatprep.subr.bf16.mxu1 %v4197_v48 }
 0x296   : > { %2909 = vtanh.f32 %v3820_v11 }
 0x298   : > { %2610 = vmatpush1.bf16.msra.mxu0 %v4198_v17  ;;  %2642 = vmatpush1.bf16.msra.mxu1 %v4199_v20 }
 0x299   : > { %2612 = vmatprep.subr.bf16.mxu0 %v4200_v21  ;;  %2644 = vmatprep.subr.bf16.mxu1 %v4201_v55 }
 0x29c   : > { %2614 = vmatpush1.bf16.msra.mxu0 %v4202_v41  ;;  %2646 = vmatpush1.bf16.msra.mxu1 %v4203_v40 }
 0x29d   : > { %2616 = vmatprep.subr.bf16.mxu0 %v4204_v37  ;;  %2648 = vmatprep.subr.bf16.mxu1 %v4205_v57 }
 0x2a0   : > { %v2910_v19 = vpop.eup %2909  ;;  %2618 = vmatpush1.bf16.msra.mxu0 %v4206_v30  ;;  %2650 = vmatpush1.bf16.msra.mxu1 %v4207_v61 }
 0x2a1   : > { %v1146_v7 = vmul.f32 %v2910_v19, %v2908_v8  ;;  %2652 = vmatprep.subr.bf16.mxu0 %v3093_v4  ;;  %2684 = vmatprep.subr.bf16.mxu1 %v3147_v23  ;;  %v4212_v4 = vld [vmem:[#allocation11_spill] sm:$0xff]  ;;  %v4217_v23 = vld [vmem:[#allocation10_spill] sm:$0xff]  ;;  %v2134_v19 = vld [vmem:[%s3074_s9 + $0x58] sm:$0xff] }
 0x2a3   : > { %1392 = vmatmul.mubr.f32.vlgmr.msra.gmra.mrb[10].mxu0 %v1146_v7  ;;  %1463 = vmatmul.mubr.f32.vlgmr.msra.gmra.mrb[10].mxu1 %v1146_v7 }
 0x2a4   : > { %2654 = vmatpush1.bf16.msra.mxu0 %v3106_v9  ;;  %2686 = vmatpush1.bf16.msra.mxu1 %v3155_v26  ;;  %v4213_v9 = vld [vmem:[#allocation8_spill] sm:$0xff] }
 0x2a5   : > { %2656 = vmatprep.subr.bf16.mxu0 %v3108_v10  ;;  %2688 = vmatprep.subr.bf16.mxu1 %v3180_v34  ;;  %v4214_v10 = vld [vmem:[#allocation12_spill] sm:$0xff]  ;;  %v4221_v34 = vld [vmem:[#allocation14_spill] sm:$0xff] }
 0x2a6   : > { %1566 = vmatprep.mubr.f32.mxu0 %v4187_v5  ;;  %1637 = vmatprep.mubr.f32.mxu1 %v4187_v5  ;;  %v4218_v26 = vld [vmem:[#allocation16_spill] sm:$0xff] }
 0x2a8   : > { %2658 = vmatpush1.bf16.msra.mxu0 %v3124_v15  ;;  %2690 = vmatpush1.bf16.msra.mxu1 %v3191_v38  ;;  %v4215_v15 = vld [vmem:[#allocation9_spill] sm:$0xff]  ;;  %v4222_v38 = vld [vmem:[#allocation20_spill] sm:$0xff] }
 0x2a9   : > { %2660 = vmatprep.subr.bf16.mxu0 %v3133_v18  ;;  %2692 = vmatprep.subr.bf16.mxu1 %v3215_v46  ;;  %v4216_v18 = vld [vmem:[#allocation15_spill] sm:$0xff] }
 0x2aa   : > { %v4224_v46 = vld [vmem:[#allocation23_spill] sm:$0xff] }
 0x2ac   : > { %2662 = vmatpush1.bf16.msra.mxu0 %v3158_v27  ;;  %2694 = vmatpush1.bf16.msra.mxu1 %v3224_v49  ;;  %v4219_v27 = vld [vmem:[#allocation13_spill] sm:$0xff]  ;;  %v4225_v49 = vld [vmem:[#allocation18_spill] sm:$0xff] }
 0x2ad   : > { %2664 = vmatprep.subr.bf16.mxu0 %v3171_v31  ;;  %2696 = vmatprep.subr.bf16.mxu1 %v3236_v53  ;;  %v4220_v31 = vld [vmem:[#allocation19_spill] sm:$0xff]  ;;  %v4226_v53 = vld [vmem:[#allocation24_spill] sm:$0xff] }
 0x2b0   : > { %2666 = vmatpush1.bf16.msra.mxu0 %v3207_v43  ;;  %2698 = vmatpush1.bf16.msra.mxu1 %v4212_v4  ;;  %v4223_v43 = vld [vmem:[#allocation17_spill] sm:$0xff]  ;;  %v2133_v4 = vld [vmem:[%s3074_s9 + $0x50] sm:$0xff] }
 0x2b1   : > { %2668 = vmatprep.subr.bf16.mxu0 %v4213_v9  ;;  %2700 = vmatprep.subr.bf16.mxu1 %v4214_v10 }
 0x2b4   : > { %2670 = vmatpush1.bf16.msra.mxu0 %v4215_v15  ;;  %2702 = vmatpush1.bf16.msra.mxu1 %v4216_v18 }
 0x2b5   : > { %2672 = vmatprep.subr.bf16.mxu0 %v4217_v23  ;;  %2704 = vmatprep.subr.bf16.mxu1 %v4218_v26 }
 0x2b8   : > { %2674 = vmatpush1.bf16.msra.mxu0 %v4219_v27  ;;  %2706 = vmatpush1.bf16.msra.mxu1 %v4220_v31 }
 0x2b9   : > { %2676 = vmatprep.subr.bf16.mxu0 %v4221_v34  ;;  %2708 = vmatprep.subr.bf16.mxu1 %v4222_v38 }
 0x2bc   : > { %2678 = vmatpush1.bf16.msra.mxu0 %v4223_v43  ;;  %2710 = vmatpush1.bf16.msra.mxu1 %v4224_v46 }
 0x2bd   : > { %2680 = vmatprep.subr.bf16.mxu0 %v4225_v49  ;;  %2712 = vmatprep.subr.bf16.mxu1 %v4226_v53  ;;  %v2138_v53 = vld [vmem:[%s3079_s13 + $0x20] sm:$0xff] }
 0x2c0   : > { %2682 = vmatpush1.bf16.msra.mxu0 %v4227_v59  ;;  %2714 = vmatpush1.bf16.msra.mxu1 %v4228_v42  ;;  %v2139_v59 = vld [vmem:[%s3079_s13 + $0x28] sm:$0xff] }
 0x2c1   : > { %2716 = vmatprep.subr.bf16.mxu0 %v4229_v51  ;;  %2748 = vmatprep.subr.bf16.mxu1 %v4230_v25 }
 0x356   : > { %v1218_v47 = vpop.f32.mrb[8].mxu0  ;;  %v1289_v63 = vpop.f32.mrb[8].mxu1 }
 0x357   : > { %v1294_v16 = vadd.f32 %v2131_v56, %v1218_v47  ;;  %v1220_v44 = vpop.f32.mrb[9].mxu0  ;;  %v1291_v1 = vpop.f32.mrb[9].mxu1  ;;  %v1296_v10 = vadd.f32 %v2133_v4, %v1289_v63 }
 0x358   : > { %v1295_v13 = vadd.f32 %v2132_v54, %v1220_v44  ;;  %v1297_v7 = vadd.f32 %v2134_v19, %v1291_v1  ;;  %v2141_v1 = vld [vmem:[%s3079_s13 + $0x38] sm:$0xff] }
 0x359   : > { %v2135_v52 = vmul.f32 -1.442695, %v1294_v16 }
 0x35a   : > { %v2136_v8 = vmul.f32 -1.442695, %v1295_v13  ;;  %v2137_v9 = vmul.f32 -1.442695, %v1297_v7  ;;  %v2140_v13 = vld [vmem:[%s3079_s13 + $0x30] sm:$0xff] }
 0x35b   : > { %2911 = vpow2.f32 %v2135_v52 }
 0x35c   : > { %2913 = vpow2.f32 %v2136_v8 }
 0x35d   : > { %2915 = vpow2.f32 %v2137_v9 }
 0x35e   : > { %2917 = vtanh.f32 %v1296_v10 }
 0x365   : > { %v2912_v15 = vpop.eup %2911 }
 0x366   : > { %v2914_v18 = vpop.eup %2913  ;;  %v1301_v23 = vadd.f32 1.0, %v2912_v15 }
 0x367   : > { %v1307_v26 = vadd.f32 1.0, %v2914_v18  ;;  %v2916_v27 = vpop.eup %2915 }
 0x368   : > { %2919 = vrcp.f32 %v1301_v23  ;;  %v2918_v31 = vpop.eup %2917  ;;  %v1314_v46 = vadd.f32 1.0, %v2916_v27 }
 0x369   : > { %2921 = vrcp.f32 %v1307_v26 }
 0x36a   : > { %2923 = vrcp.f32 %v1314_v46 }
 0x372   : > { %v2920_v34 = vpop.eup %2919 }
 0x373   : > { %v2922_v38 = vpop.eup %2921  ;;  %v1318_v43 = vmul.f32 %v2920_v34, %v2918_v31 }
 0x374   : > { %v1317_v49 = vmul.f32 %v2922_v38, %v3796_v6  ;;  %v2924_v52 = vpop.eup %2923  ;;  %v1672_v38 = vld [vmem:[%s3079_s13] sm:$0xff] }
 0x376   : > { %v3880_v42 = vadd.f32 %v1318_v43, %v1317_v49  ;;  %v1393_v51 = vpop.f32.mrb[10].mxu0  ;;  %v1464_v25 = vpop.f32.mrb[10].mxu1  ;;  %v1673_v43 = vld [vmem:[%s3079_s13 + $0x8] sm:$0xff] }
 0x377   : > { %v1469_v56 = vadd.f32 %v2138_v53, %v1393_v51  ;;  %v1395_v54 = vpop.f32.mrb[11].mxu0  ;;  %v1466_v47 = vpop.f32.mrb[11].mxu1  ;;  %v1471_v7 = vadd.f32 %v2140_v13, %v1464_v25 }
 0x378   : > { %v1470_v63 = vadd.f32 %v2139_v59, %v1395_v54  ;;  %2925 = vtanh.f32 %v3880_v42  ;;  %v1472_v6 = vadd.f32 %v2141_v1, %v1466_v47 }
 0x379   : > { %v2142_v16 = vmul.f32 -1.442695, %v1469_v56 }
 0x37a   : > { %v2143_v44 = vmul.f32 -1.442695, %v1470_v63  ;;  %v2144_v19 = vmul.f32 -1.442695, %v1472_v6  ;;  %v1675_v63 = vld [vmem:[%s3079_s13 + $0x18] sm:$0xff] }
 0x37b   : > { %2927 = vpow2.f32 %v2142_v16  ;;  %v1674_v16 = vld [vmem:[%s3079_s13 + $0x10] sm:$0xff] }
 0x37c   : > { %2929 = vpow2.f32 %v2143_v44 }
 0x37d   : > { %2931 = vpow2.f32 %v2144_v19 }
 0x37e   : > { %2933 = vtanh.f32 %v1471_v7 }
 0x382   : > { %v2926_v8 = vpop.eup %2925 }
 0x383   : > { %v1321_v4 = vmul.f32 %v2926_v8, %v2924_v52 }
 0x385   : > { %v2928_v9 = vpop.eup %2927  ;;  %1567 = vmatmul.mubr.f32.vlgmr.msra.gmra.mrb[12].mxu0 %v1321_v4  ;;  %1638 = vmatmul.mubr.f32.vlgmr.msra.gmra.mrb[12].mxu1 %v1321_v4 }
 0x386   : > { %v2930_v10 = vpop.eup %2929  ;;  %v1476_v15 = vadd.f32 1.0, %v2928_v9  ;;  %2718 = vmatpush1.bf16.msra.mxu0 %v3395_v62  ;;  %2750 = vmatpush1.bf16.msra.mxu1 %v3447_v35 }
 0x387   : > { %v1482_v18 = vadd.f32 1.0, %v2930_v10  ;;  %2720 = vmatprep.subr.bf16.mxu0 %v3398_v0  ;;  %2752 = vmatprep.subr.bf16.mxu1 %v3453_v39  ;;  %v2932_v62 = vpop.eup %2931 }
 0x388   : > { %2935 = vrcp.f32 %v1476_v15  ;;  %1740 = vmatprep.mubr.f32.mxu0 %v4187_v5  ;;  %1811 = vmatprep.mubr.f32.mxu1 %v4187_v5  ;;  %v2934_v0 = vpop.eup %2933 }
 0x389   : > { %2937 = vrcp.f32 %v1482_v18 }
 0x38a   : > { %2722 = vmatpush1.bf16.msra.mxu0 %v3431_v22  ;;  %2754 = vmatpush1.bf16.msra.mxu1 %v3483_v60 }
 0x38b   : > { %2724 = vmatprep.subr.bf16.mxu0 %v3435_v24  ;;  %2756 = vmatprep.subr.bf16.mxu1 %v3489_v2  ;;  %v1489_v24 = vadd.f32 1.0, %v2932_v62 }
 0x38d   : > { %2939 = vrcp.f32 %v1489_v24 }
 0x38e   : > { %2726 = vmatpush1.bf16.msra.mxu0 %v3468_v50  ;;  %2758 = vmatpush1.bf16.msra.mxu1 %v3520_v32 }
 0x38f   : > { %2728 = vmatprep.subr.bf16.mxu0 %v4188_v14  ;;  %2760 = vmatprep.subr.bf16.mxu1 %v4189_v45  ;;  %v2145_v14 = vld [vmem:[%s3074_s9 + $0x60] sm:$0xff]  ;;  %v2146_v45 = vld [vmem:[%s3074_s9 + $0x68] sm:$0xff] }
 0x392   : > { %v2936_v35 = vpop.eup %2935  ;;  %2730 = vmatpush1.bf16.msra.mxu0 %v4190_v3  ;;  %2762 = vmatpush1.bf16.msra.mxu1 %v4191_v58 }
 0x393   : > { %v2938_v22 = vpop.eup %2937  ;;  %v1493_v39 = vmul.f32 %v2936_v35, %v2934_v0  ;;  %2732 = vmatprep.subr.bf16.mxu0 %v4192_v12  ;;  %2764 = vmatprep.subr.bf16.mxu1 %v4193_v29 }
 0x394   : > { %v1492_v50 = vmul.f32 %v2938_v22, %v3820_v11 }
 0x396   : > { %v3904_v60 = vadd.f32 %v1493_v39, %v1492_v50  ;;  %2734 = vmatpush1.bf16.msra.mxu0 %v4209_v36  ;;  %2766 = vmatpush1.bf16.msra.mxu1 %v4210_v33 }
 0x397   : > { %2736 = vmatprep.subr.bf16.mxu0 %v4211_v28  ;;  %2768 = vmatprep.subr.bf16.mxu1 %v4197_v48  ;;  %v2940_v2 = vpop.eup %2939 }
 0x398   : > { %2941 = vtanh.f32 %v3904_v60 }
 0x39a   : > { %2738 = vmatpush1.bf16.msra.mxu0 %v4198_v17  ;;  %2770 = vmatpush1.bf16.msra.mxu1 %v4199_v20 }
 0x39b   : > { %2740 = vmatprep.subr.bf16.mxu0 %v4200_v21  ;;  %2772 = vmatprep.subr.bf16.mxu1 %v4201_v55  ;;  %v2148_v21 = vld [vmem:[%s3074_s9 + $0x78] sm:$0xff]  ;;  %v2147_v55 = vld [vmem:[%s3074_s9 + $0x70] sm:$0xff] }
 0x39e   : > { %2742 = vmatpush1.bf16.msra.mxu0 %v4202_v41  ;;  %2774 = vmatpush1.bf16.msra.mxu1 %v4203_v40 }
 0x39f   : > { %2744 = vmatprep.subr.bf16.mxu0 %v4204_v37  ;;  %2776 = vmatprep.subr.bf16.mxu1 %v4205_v57 }
 0x3a2   : > { %v2942_v32 = vpop.eup %2941  ;;  %2746 = vmatpush1.bf16.msra.mxu0 %v4206_v30  ;;  %2778 = vmatpush1.bf16.msra.mxu1 %v4207_v61 }
 0x3a3   : > { %v1496_v5 = vmul.f32 %v2942_v32, %v2940_v2  ;;  %v1871_v2 = vld [vmem:[%s4082_s5] sm:$0xff] (!%p2155_p6)  ;;  %v1872_v32 = vld [vmem:[%s4082_s5 + $0x8] sm:$0xff] (!%p2155_p6) }
 0x3a5   : > { %1741 = vmatmul.mubr.f32.vlgmr.msra.gmra.mrb[14].mxu0 %v1496_v5  ;;  %1812 = vmatmul.mubr.f32.vlgmr.msra.gmra.mrb[14].mxu1 %v1496_v5  ;;  %v3015_v5 = vmov (!%p2155_p6), 0.0|0.0  }
 0x3a6   : > { %2779 = vmatprep.subr.bf16.mxu0 (!%p2155_p6), %v3015_v5  ;;  %2803 = vmatprep.subr.bf16.mxu1 (!%p2155_p6), %v3015_v5 }
 0x458   : > { %v1568_v3 = vpop.f32.mrb[12].mxu0  ;;  %v1639_v58 = vpop.f32.mrb[12].mxu1 }
 0x459   : > { %v1644_v12 = vadd.f32 %v2145_v14, %v1568_v3  ;;  %v1570_v29 = vpop.f32.mrb[13].mxu0  ;;  %v1641_v48 = vpop.f32.mrb[13].mxu1  ;;  %v1646_v41 = vadd.f32 %v2147_v55, %v1639_v58  ;;  %v2780_v14 = vpack.c.bf16 (!%p2155_p6), %v1872_v32, %v1871_v2  ;;  %v1873_v3 = vld [vmem:[%s4082_s5 + $0x10] sm:$0xff] (!%p2155_p6)  ;;  %v1874_v58 = vld [vmem:[%s4082_s5 + $0x18] sm:$0xff] (!%p2155_p6)  ;;  %v1858_v55 = vld [vmem:[%s4081_s4 + $0x20] sm:$0xff] (!%p2155_p6) }
 0x45a   : > { %v1645_v17 = vadd.f32 %v2146_v45, %v1570_v29  ;;  %v1647_v30 = vadd.f32 %v2148_v21, %v1641_v48  ;;  %v1855_v45 = vld [vmem:[%s4081_s4 + $0x8] sm:$0xff] (!%p2155_p6)  ;;  %v1856_v29 = vld [vmem:[%s4081_s4 + $0x10] sm:$0xff] (!%p2155_p6)  ;;  %v1857_v48 = vld [vmem:[%s4081_s4 + $0x18] sm:$0xff] (!%p2155_p6) }
 0x45b   : > { %v2149_v57 = vmul.f32 -1.442695, %v1644_v12  ;;  %2781 = vmatpush3.bf16.msra.mxu0 (!%p2155_p6), %v2780_v14  ;;  %v1875_v21 = vld [vmem:[%s4082_s5 + $0x20] sm:$0xff] (!%p2155_p6) }
 0x45c   : > { %v2150_v20 = vmul.f32 -1.442695, %v1645_v17  ;;  %v2151_v61 = vmul.f32 -1.442695, %v1647_v30  ;;  %v3017_v17 = vmov (!%p2155_p6), 0.0   ;;  %2782 = vmatprep.subr.bf16.mxu0 (!%p2155_p6), %v3015_v5  ;;  %v1876_v30 = vld [vmem:[%s4082_s5 + $0x28] sm:$0xff] (!%p2155_p6) }
 0x45d   : > { %2943 = vpow2.f32 %v2149_v57  ;;  %2229 = vmatprep.mubr.msk.f32.mxu0 (!%p2155_p6), %vm3016_vm0, %v3017_v17  ;;  %2264 = vmatprep.mubr.msk.f32.mxu1 (!%p2155_p6), %vm3016_vm0, %v3017_v17  ;;  %v2783_v57 = vpack.c.bf16 (!%p2155_p6), %v1874_v58, %v1873_v3 }
 0x45e   : > { %2945 = vpow2.f32 %v2150_v20  ;;  %v2807_v20 = vpack.c.bf16 (!%p2155_p6), %v1857_v48, %v1856_v29 }
 0x45f   : > { %2947 = vpow2.f32 %v2151_v61  ;;  %v1859_v61 = vld [vmem:[%s4081_s4 + $0x28] sm:$0xff] (!%p2155_p6)  ;;  %2784 = vmatpush3.bf16.msra.mxu0 (!%p2155_p6), %v2783_v57 }
 0x460   : > { %2949 = vtanh.f32 %v1646_v41  ;;  %v2786_v41 = vpack.c.bf16 (!%p2155_p6), %v1876_v30, %v1875_v21  ;;  %2785 = vmatprep.subr.bf16.mxu0 (!%p2155_p6), %v3015_v5 }
 0x463   : > { %2787 = vmatpush3.bf16.msra.mxu0 (!%p2155_p6), %v2786_v41 }
 0x464   : > { %2788 = vmatprep.subr.bf16.mxu0 (!%p2155_p6), %v3015_v5 }
 0x467   : > { %v2944_v40 = vpop.eup %2943 }
 0x468   : > { %v2946_v37 = vpop.eup %2945  ;;  %v1651_v11 = vadd.f32 1.0, %v2944_v40  ;;  %v2810_v40 = vpack.c.bf16 (!%p2155_p6), %v1859_v61, %v1858_v55 }
 0x469   : > { %v1657_v36 = vadd.f32 1.0, %v2946_v37  ;;  %v2948_v33 = vpop.eup %2947  ;;  %v1877_v37 = vld [vmem:[%s4082_s5 + $0x30] sm:$0xff] (!%p2155_p6) }
 0x46a   : > { %2951 = vrcp.f32 %v1651_v11  ;;  %v2950_v28 = vpop.eup %2949  ;;  %v1664_v31 = vadd.f32 1.0, %v2948_v33  ;;  %v1878_v11 = vld [vmem:[%s4082_s5 + $0x38] sm:$0xff] (!%p2155_p6) }
 0x46b   : > { %2953 = vrcp.f32 %v1657_v36  ;;  %v1860_v36 = vld [vmem:[%s4081_s4 + $0x30] sm:$0xff] (!%p2155_p6)  ;;  %v1861_v33 = vld [vmem:[%s4081_s4 + $0x38] sm:$0xff] (!%p2155_p6) }
 0x46c   : > { %2955 = vrcp.f32 %v1664_v31  ;;  %v1862_v31 = vld [vmem:[%s4081_s4 + $0x40] sm:$0xff] (!%p2155_p6) }
 0x474   : > { %v2952_v23 = vpop.eup %2951 }
 0x475   : > { %v2954_v26 = vpop.eup %2953  ;;  %v1668_v27 = vmul.f32 %v2952_v23, %v2950_v28  ;;  %v2789_v28 = vpack.c.bf16 (!%p2155_p6), %v1878_v11, %v1877_v37  ;;  %v2813_v23 = vpack.c.bf16 (!%p2155_p6), %v1861_v33, %v1860_v36 }
 0x476   : > { %v1667_v34 = vmul.f32 %v2954_v26, %v3880_v42  ;;  %v2956_v44 = vpop.eup %2955  ;;  %v1879_v26 = vld [vmem:[%s4082_s5 + $0x40] sm:$0xff] (!%p2155_p6) }
 0x477   : > { %2790 = vmatpush3.bf16.msra.mxu0 (!%p2155_p6), %v2789_v28 }
 0x478   : > { %v1669_v46 = vadd.f32 %v1668_v27, %v1667_v34  ;;  %v1742_v49 = vpop.f32.mrb[14].mxu0  ;;  %v1813_v53 = vpop.f32.mrb[14].mxu1  ;;  %v1880_v27 = vld [vmem:[%s4082_s5 + $0x48] sm:$0xff] (!%p2155_p6)  ;;  %2791 = vmatprep.subr.bf16.mxu0 (!%p2155_p6), %v3015_v5 }
 0x479   : > { %v1818_v59 = vadd.f32 %v1742_v49, %v1672_v38  ;;  %v1744_v51 = vpop.f32.mrb[15].mxu0  ;;  %v1815_v25 = vpop.f32.mrb[15].mxu1  ;;  %v1820_v52 = vadd.f32 %v1813_v53, %v1674_v16  ;;  %v1863_v34 = vld [vmem:[%s4081_s4 + $0x48] sm:$0xff] (!%p2155_p6)  ;;  %v2792_v38 = vpack.c.bf16 (!%p2155_p6), %v1880_v27, %v1879_v26  ;;  %v1882_v49 = vld [vmem:[%s4082_s5 + $0x58] sm:$0xff] (!%p2155_p6)  ;;  %v1864_v53 = vld [vmem:[%s4081_s4 + $0x50] sm:$0xff] (!%p2155_p6) }
 0x47a   : > { %2957 = vtanh.f32 %v1669_v46  ;;  %1847 = vst [vmem:[#allocation3] sm:$0xff] %v1669_v46  ;;  %v1819_v56 = vadd.f32 %v1744_v51, %v1673_v43  ;;  %v1821_v42 = vadd.f32 %v1815_v25, %v1675_v63  ;;  %v2816_v43 = vpack.c.bf16 (!%p2155_p6), %v1863_v34, %v1862_v31  ;;  %v1881_v46 = vld [vmem:[%s4082_s5 + $0x50] sm:$0xff] (!%p2155_p6)  ;;  %v1867_v63 = vld [vmem:[%s4081_s4 + $0x68] sm:$0xff] (!%p2155_p6) }
 0x47b   : > { %v2152_v54 = vmul.f32 -1.442695, %v1818_v59  ;;  %v1865_v59 = vld [vmem:[%s4081_s4 + $0x58] sm:$0xff] (!%p2155_p6)  ;;  %2793 = vmatpush3.bf16.msra.mxu0 (!%p2155_p6), %v2792_v38  ;;  %v2795_v51 = vpack.c.bf16 (!%p2155_p6), %v1882_v49, %v1881_v46 }
 0x47c   : > { %v2153_v47 = vmul.f32 -1.442695, %v1819_v56  ;;  %v2154_v6 = vmul.f32 -1.442695, %v1821_v42  ;;  %2794 = vmatprep.subr.bf16.mxu0 (!%p2155_p6), %v3015_v5  ;;  %v2819_v25 = vpack.c.bf16 (!%p2155_p6), %v1865_v59, %v1864_v53  ;;  %v1883_v56 = vld [vmem:[%s4082_s5 + $0x60] sm:$0xff] (!%p2155_p6) }
 0x47d   : > { %2959 = vpow2.f32 %v2152_v54  ;;  %v1884_v54 = vld [vmem:[%s4082_s5 + $0x68] sm:$0xff] (!%p2155_p6) }
 0x47e   : > { %2961 = vpow2.f32 %v2153_v47  ;;  %v1866_v47 = vld [vmem:[%s4081_s4 + $0x60] sm:$0xff] (!%p2155_p6)  ;;  %v2798_v42 = vpack.c.bf16 (!%p2155_p6), %v1884_v54, %v1883_v56 }
 0x47f   : > { %2963 = vpow2.f32 %v2154_v6  ;;  %2796 = vmatpush3.bf16.msra.mxu0 (!%p2155_p6), %v2795_v51  ;;  %v2822_v16 = vpack.c.bf16 (!%p2155_p6), %v1867_v63, %v1866_v47  ;;  %v1868_v6 = vld [vmem:[%s4081_s4 + $0x70] sm:$0xff] (!%p2155_p6) }
 0x480   : > { %2965 = vtanh.f32 %v1820_v52  ;;  %2797 = vmatprep.subr.bf16.mxu0 (!%p2155_p6), %v3015_v5  ;;  %v1869_v52 = vld [vmem:[%s4081_s4 + $0x78] sm:$0xff] (!%p2155_p6) }
 0x483   : > { %2799 = vmatpush3.bf16.msra.mxu0 (!%p2155_p6), %v2798_v42 }
 0x484   : > { %v2958_v1 = vpop.eup %2957  ;;  %2800 = vmatprep.subr.bf16.mxu0 (!%p2155_p6), %v3015_v5 }
 0x485   : > { %v3930_v13 = vmul.f32 %v2958_v1, %v2956_v44  ;;  %v1885_v44 = vld [vmem:[%s4082_s5 + $0x70] sm:$0xff] (!%p2155_p6)  ;;  %v1886_v1 = vld [vmem:[%s4082_s5 + $0x78] sm:$0xff] (!%p2155_p6) }
 0x487   : > { %v2960_v8 = vpop.eup %2959  ;;  %1846 = vst [vmem:[#allocation2] sm:$0xff] %v3930_v13 }
 0x488   : > { %v2962_v19 = vpop.eup %2961  ;;  %v1825_v7 = vadd.f32 1.0, %v2960_v8  ;;  %v2801_v8 = vpack.c.bf16 (!%p2155_p6), %v1886_v1, %v1885_v44 }
 0x489   : > { %v1831_v4 = vadd.f32 1.0, %v2962_v19  ;;  %v2964_v9 = vpop.eup %2963  ;;  %v2825_v19 = vpack.c.bf16 (!%p2155_p6), %v1869_v52, %v1868_v6 }
 0x48a   : > { %2967 = vrcp.f32 %v1825_v7  ;;  %v2966_v10 = vpop.eup %2965  ;;  %v1838_v0 = vadd.f32 1.0, %v2964_v9  ;;  %2802 = vmatpush3.bf16.msra.mxu0 (!%p2155_p6), %v2801_v8  ;;  %v1870_v7 = vld [vmem:[#allocation4] sm:$0xff] (!%p2155_p6) }
 0x48b   : > { %2969 = vrcp.f32 %v1831_v4 }
 0x48c   : > { %2971 = vrcp.f32 %v1838_v0 }
 0x48d   : > { %2230 = vmatmul.mubr.f32.vlgmr.msra.gmra.mrb[0].mxu0 (!%p2155_p6), %v1870_v7 }
 0x494   : > { %v2968_v15 = vpop.eup %2967 }
 0x495   : > { %v2970_v18 = vpop.eup %2969  ;;  %v1842_v62 = vmul.f32 %v2968_v15, %v2966_v10  ;;  %v2156_v10 = vld [vmem:[%s4083_s6] ss:$0 sm:$0xff] (!%p2155_p6) }
 0x496   : > { %v1841_v35 = vmul.f32 %v2970_v18, %v3904_v60  ;;  %v2972_v39 = vpop.eup %2971  ;;  %v1854_v60 = vld [vmem:[%s4081_s4] sm:$0xff] (!%p2155_p6) }
 0x497   : > { %v2804_v12 = vpack.c.bf16 (!%p2155_p6), %v1855_v45, %v1854_v60 }
 0x498   : > { %v1843_v22 = vadd.f32 %v1842_v62, %v1841_v35 }
 0x499   : > { %2805 = vmatpush3.bf16.msra.mxu1 (!%p2155_p6), %v2804_v12 }
 0x49a   : > { %2973 = vtanh.f32 %v1843_v22  ;;  %1849 = vst [vmem:[#allocation3 + $0x8] sm:$0xff] %v1843_v22  ;;  %2806 = vmatprep.subr.bf16.mxu1 (!%p2155_p6), %v3015_v5 }
 0x49d   : > { %2808 = vmatpush3.bf16.msra.mxu1 (!%p2155_p6), %v2807_v20 }
 0x49e   : > { %2809 = vmatprep.subr.bf16.mxu1 (!%p2155_p6), %v3015_v5 }
 0x4a1   : > { %1853 = sbr.rel (%p2155_p6) target bundleno = 1427 (0x593), region = 60  ;;  %2811 = vmatpush3.bf16.msra.mxu1 (!%p2155_p6), %v2810_v40 }
 0x4a2   : > { %2812 = vmatprep.subr.bf16.mxu1 (!%p2155_p6), %v3015_v5 }
 0x4a4   : > { %v2974_v24 = vpop.eup %2973 }
 0x4a5   : > { %v1845_v50 = vmul.f32 %v2974_v24, %v2972_v39  ;;  %2814 = vmatpush3.bf16.msra.mxu1 (!%p2155_p6), %v2813_v23 }
 0x4a6   : > { %2815 = vmatprep.subr.bf16.mxu1 (!%p2155_p6), %v3015_v5 }
 0x4a7   : > { %1848 = vst [vmem:[#allocation2 + $0x8] sm:$0xff] %v1845_v50 }
 0x4a9   : > { %2817 = vmatpush3.bf16.msra.mxu1 %v2816_v43 }
 0x4aa   : > { %2818 = vmatprep.subr.bf16.mxu1 %v3015_v5 }
 0x4ad   : > { %2820 = vmatpush3.bf16.msra.mxu1 %v2819_v25 }
 0x4ae   : > { %2821 = vmatprep.subr.bf16.mxu1 %v3015_v5 }
 0x4b1   : > { %2823 = vmatpush3.bf16.msra.mxu1 %v2822_v16 }
 0x4b2   : > { %2824 = vmatprep.subr.bf16.mxu1 %v3015_v5 }
 0x4b5   : > { %2826 = vmatpush3.bf16.msra.mxu1 %v2825_v19 }
 0x4b8   : > { %2265 = vmatmul.mubr.f32.vlgmr.msra.gmra.mrb[0].mxu1 %v3930_v13 }
 0x560   : > { %v1953_v4 = vpop.f32.mrb[0].mxu0 }
 0x561   : > { %v2231_v15 = vpop.f32.mrb[1].mxu0 }
 0x58b   : > { %v2023_v9 = vpop.f32.mrb[0].mxu1 }
 0x58c   : > { %v2024_v18 = vadd.f32 %v2023_v9, %v1953_v4  ;;  %v2266_v62 = vpop.f32.mrb[1].mxu1 }
 0x58e   : > { %v2034_v0 = vadd.f32 %v2156_v10, %v2024_v18 }
 0x590   : > { %v2035_v35 = vmax.f32 %v2034_v0, 0.0 }
 0x592   : > { %2036 = vst [vmem:[#allocation5] sm:$0xff] %v2035_v35 }
 0x593 PF: > { %p2831_p7 = scmp.eq.s32.totalorder %s3065_s25, 1  ;;  %s3018_s26 = smov [#allocation5]  }
 0x594   : > { %s2044_s27 = sshll.u32 %s3018_s26, 4  ;;  %s2045_s27 = int_to_ptr.vmem [resolvable:$true] %s2044_s27 }
 0x595   : > { %s2975_s28 = scalar_lea.vmem %s2045_s27, 128  ;;  %p2982_p11 = scmp.lt.s32.totalorder %s2045_s27, %s2045_s27 }
 0x596   : > { %p2976_p8 = scmp.ne.s32.totalorder %s2045_s27, %s2975_s28  ;;  %p2983_p12 = scmp.lt.s32.totalorder %s2975_s28, %s2975_s28 }
 0x598   : > { %p2977_p9 = pnand %p2976_p8, %p2831_p7  ;;  %p2984_p13 = por %p2983_p12, %p2982_p11 }
 0x59a   : > { %p2978_p10 = pneg %p2977_p9 }
 0x59c   : > { %p2985_p0 = pnand %p2984_p13, %p2978_p10 }
 0x59e   : > { %2988 = shalt.err (!%p2985_p0)
}
 0x59f   : > { %s2989_s8 = scalar_lea.hbm %s4084_s7, 128 }
 0x5a0   : > { %p2990_p1 = scmp.ne.s32.totalorder %s4084_s7, %s2989_s8  ;;  %p2995_p4 = scmp.lt.u32.totalorder %s2989_s8, %s4084_s7 }
 0x5a2   : > { %p2991_p2 = pnand %p2990_p1, %p2831_p7 }
 0x5a4   : > { %p2992_p3 = pneg %p2991_p2 }
 0x5a6   : > { %p2997_p5 = pnand %p2995_p4, %p2992_p3 }
 0x5a8   : > { %3000 = shalt.err (!%p2997_p5)
}
 0x5a9   : > { %2828 = dma.vmem_to_hbm [thread:$0]  (%p2831_p7), %s2045_s27, 128, %s4084_s7, [#allocation6]  }
 0x5aa   : > { %3006 = dma.done.wait (%p2831_p7), [#allocation6], 128  }
 0x5ab   : > { %3008 = vsyncadd (%p2831_p7), [#allocation6], 4294967168 }
 0x5ac PF: > { %s18_s24 = sadd.s32 1, %s3011_s24  }
 0x5ad   : > { %p15_p6 = scmp.ge.s32.totalorder %s18_s24, 4  }
 0x5af   :  { %17 = sbr.rel (!%p15_p6) target bundleno = 1 (0x1), region = 98 }
 0x5b6   :  { %2057 = vsyncpa [#allocation6], 1 }
 0x5b7   :  { %2059 = vsyncpa [#allocation6 + $0x1], 1 }

</bundles_post_ra>
